<compile_context>
chip_gen: v7x
topology: tpu7x:2x2x1
jax: 0.10.0
libtpu: 0.0.40
codegen_flags: <defaults>
</compile_context>

<pallas_src>
import math
from functools import partial

import numpy as np
import jax
import jax.numpy as jnp
from jax import lax
from jax.experimental import pallas as pl
from jax.experimental.pallas import tpu as pltpu

_EPS = 1e-5      # nn.InstanceNorm2d default eps (affine=False, no running stats)
_CPAD = 128      # lane-dense output / weight channel padding


def _round_up(v, m):
    return (v + m - 1) // m * m


# --------------------------------------------------------------------------
# Pallas kernel: shifted-matmul conv + bias + InstanceNorm + activation
# --------------------------------------------------------------------------
def _conv_kernel(offs_ref, x_ref, w_ref, b_ref, mask_ref, o_ref, *,
                 gps, n_taps, m_rows, n_samples, rows_ps, inv_count, norm, act):
    """One grid step processes `gps` independent output groups.

    Every tap of a group is a contiguous row window (offset scalar-prefetched
    into SMEM) of the flattened input block; taps accumulate as bf16 matmuls
    into an f32 accumulator.  Bias + (optional) single-pass InstanceNorm +
    activation are applied before the lane-dense store.
    """
    step = pl.program_id(0)
    cpad = o_ref.shape[-1]

    ys = []
    for lg in range(gps):
        acc = jnp.zeros((m_rows, cpad), jnp.float32)
        for t in range(n_taps):
            off = offs_ref[step * gps + lg, t]
            xs = x_ref[pl.ds(off, m_rows), :].astype(jnp.bfloat16)
            acc = acc + jnp.dot(xs, w_ref[lg, t],
                                preferred_element_type=jnp.float32)
        ys.append(acc + b_ref[...])

    if norm:
        # InstanceNorm2d over the union of all groups in this step, per sample /
        # per channel, single pass (sum + sum-of-squares), rsqrt on the EUP.
        msk = mask_ref[...]                                   # (rows_ps, 1)
        stats = []
        for s in range(n_samples):
            s1 = jnp.zeros((1, cpad), jnp.float32)
            s2 = jnp.zeros((1, cpad), jnp.float32)
            for y in ys:
                ysl = y[s * rows_ps:(s + 1) * rows_ps, :]
                ym = ysl * msk
                s1 = s1 + jnp.sum(ym, axis=0, keepdims=True)
                s2 = s2 + jnp.sum(ym * ysl, axis=0, keepdims=True)
            mean = s1 * inv_count
            var = s2 * inv_count - mean * mean
            stats.append((mean, lax.rsqrt(var + _EPS)))
        new_ys = []
        for y in ys:
            parts = []
            for s in range(n_samples):
                mean, scale = stats[s]
                ysl = y[s * rows_ps:(s + 1) * rows_ps, :]
                parts.append((ysl - mean) * scale)
            new_ys.append(jnp.concatenate(parts, axis=0))
        ys = new_ys

    for lg in range(gps):
        y = ys[lg]
        if act == "leaky_relu":
            y = jnp.where(y >= 0.0, y, 0.2 * y)
        elif act == "relu":
            y = jnp.maximum(y, 0.0)
        elif act == "sigmoid":
            y = jax.nn.sigmoid(y)
        o_ref[lg] = y.astype(o_ref.dtype)


def _fused_conv_call(x_flat, groups, bias_vec, cout, n, grid_h, grid_w,
                     valid_h, valid_w, norm, act):
    """Run one fused conv layer.

    x_flat : (R, cin_p) f32 flattened (phase-stacked) padded input.
    groups : list (G) of lists of (row_offset:int, w_tap:(cin_p, cout)).
             Output row r of group g is sum_t x_flat[r + off_t] @ w_t.
    Returns (G, n*grid_h*grid_w, _CPAD) f32 (overcomputed rows, padded lanes).
    """
    g_cnt = len(groups)
    n_taps = max(len(g) for g in groups)
    cin_p = x_flat.shape[-1]
    rows_ps = grid_h * grid_w
    m_rows = n * rows_ps

    offs_np = np.zeros((g_cnt, n_taps), np.int32)
    w_stack = []
    for gi, taps in enumerate(groups):
        tap_ws = []
        for ti in range(n_taps):
            if ti < len(taps):
                offs_np[gi, ti] = taps[ti][0]
                tap_ws.append(taps[ti][1])
            else:                       # pad ragged groups with zero taps
                tap_ws.append(jnp.zeros((cin_p, cout), jnp.float32))
        w_stack.append(jnp.stack(tap_ws, axis=0))
    w_all = jnp.stack(w_stack, axis=0)                        # (G, T, cin_p, cout)
    w_all = jnp.pad(w_all, ((0, 0), (0, 0), (0, 0), (0, _CPAD - cout)))
    w_all = w_all.astype(jnp.bfloat16)

    bias_p = jnp.pad(bias_vec.astype(jnp.float32),
                     ((0, _CPAD - cout),)).reshape(1, _CPAD)

    # Pad the flat input so every tap window stays in bounds (garbage rows only).
    r_need = _round_up(int(offs_np.max()) + m_rows, 8)
    x_flat = jnp.pad(x_flat, ((0, r_need - x_flat.shape[0]), (0, 0)))

    valid = np.zeros((grid_h, grid_w), np.float32)
    valid[:valid_h, :valid_w] = 1.0
    mask = jnp.asarray(valid.reshape(rows_ps, 1))

    # InstanceNorm couples all output groups (phases) of a layer -> single step;
    # otherwise the groups are independent -> parallel grid axis.
    num_steps = 1 if (norm or g_cnt == 1) else g_cnt
    gps = g_cnt // num_steps
    inv_count = 1.0 / float(gps * valid_h * valid_w)

    kern = partial(_conv_kernel, gps=gps, n_taps=n_taps, m_rows=m_rows,
                   n_samples=n, rows_ps=rows_ps, inv_count=inv_count,
                   norm=norm, act=act)
    return pl.pallas_call(
        kern,
        out_shape=jax.ShapeDtypeStruct((g_cnt, m_rows, _CPAD), jnp.float32),
        grid_spec=pltpu.PrefetchScalarGridSpec(
            num_scalar_prefetch=1,
            grid=(num_steps,),
            in_specs=[
                pl.BlockSpec((r_need, cin_p), lambda i, offs: (0, 0)),
                pl.BlockSpec((gps, n_taps, cin_p, _CPAD),
                             lambda i, offs: (i, 0, 0, 0)),
                pl.BlockSpec((1, _CPAD), lambda i, offs: (0, 0)),
                pl.BlockSpec((rows_ps, 1), lambda i, offs: (0, 0)),
            ],
            out_specs=pl.BlockSpec((gps, m_rows, _CPAD),
                                   lambda i, offs: (i, 0, 0)),
        ),
        compiler_params=pltpu.CompilerParams(
            dimension_semantics=("parallel",)),
    )(jnp.asarray(offs_np), x_flat, w_all, bias_p, mask)


# --------------------------------------------------------------------------
# Layer wrappers (JAX glue: padding, phase split, flatten; all fused under jit)
# --------------------------------------------------------------------------
def conv2d_layer(x, w_hwio, bias, *, stride, padding, norm, act):
    """Conv2d + optional InstanceNorm + activation.  x: NHWC, w: HWIO."""
    n, h, w_, cin = x.shape
    k, cout = w_hwio.shape[0], w_hwio.shape[3]
    s = stride
    ho = (h + 2 * padding - k) // s + 1
    wo = (w_ + 2 * padding - k) // s + 1
    cin_p = _round_up(max(cin, 8), 8)
    x_pad = jnp.pad(x, ((0, 0), (padding, padding), (padding, padding),
                        (0, cin_p - cin)))
    hp, wp = h + 2 * padding, w_ + 2 * padding
    gh, gw = -(-hp // s), -(-wp // s)          # common phase grid (overcompute)
    m_rows = n * gh * gw

    phase_blocks, taps = [], []
    for ay in range(s):
        for ax in range(s):
            ph = x_pad[:, ay::s, ax::s, :]
            ph = jnp.pad(ph, ((0, 0), (0, gh - ph.shape[1]),
                              (0, gw - ph.shape[2]), (0, 0)))
            base = len(phase_blocks) * m_rows
            phase_blocks.append(ph.reshape(m_rows, cin_p))
            for ty in range(-(-(k - ay) // s)):
                for tx in range(-(-(k - ax) // s)):
                    wt = jnp.pad(w_hwio[ay + s * ty, ax + s * tx],
                                 ((0, cin_p - cin), (0, 0)))
                    taps.append((base + ty * gw + tx, wt))
    x_flat = jnp.concatenate(phase_blocks, axis=0)

    b = bias if bias is not None else jnp.zeros((cout,), jnp.float32)
    out = _fused_conv_call(x_flat, [taps], b, cout, n, gh, gw, ho, wo, norm, act)
    return out.reshape(n, gh, gw, _CPAD)[:, :ho, :wo, :cout]


def conv_transpose2d_layer(x, w_pt, bias, *, stride, padding, norm, act):
    """ConvTranspose2d (PyTorch weight layout (Cin,Cout,K,K)) via sub-pixel
    phase decomposition + optional InstanceNorm + activation.  x: NHWC."""
    n, h, w_, cin = x.shape
    cout, k = w_pt.shape[1], w_pt.shape[2]
    s, p = stride, padding
    ho = (h - 1) * s - 2 * p + k
    wo = (w_ - 1) * s - 2 * p + k
    # TODO(synk): assumes ho % s == 0 / wo % s == 0 (true for every GoodNetwork
    #             configuration built by init_good_network).
    assert ho % s == 0 and wo % s == 0
    qh, qw = ho // s, wo // s

    def phase_pairs(r):   # (input offset from q, kernel index) for output phase r
        return [((r + p - c) // s, c) for c in range(k) if c % s == (r + p) % s]

    all_m = [m for r in range(s) for m, _ in phase_pairs(r)]
    mins, maxs = min(all_m), max(all_m)
    pad_t = max(0, -mins)
    pad_b = max(0, qh - 1 + maxs - (h - 1))
    pad_l = max(0, -mins)
    pad_r = max(0, qw - 1 + maxs - (w_ - 1))
    cin_p = _round_up(max(cin, 8), 8)
    x_pad = jnp.pad(x, ((0, 0), (pad_t, pad_b), (pad_l, pad_r),
                        (0, cin_p - cin)))
    gh, gw = h + pad_t + pad_b, w_ + pad_l + pad_r
    x_flat = x_pad.reshape(n * gh * gw, cin_p)

    groups = []
    for ry in range(s):
        for rx in range(s):
            g = []
            for my, ky in phase_pairs(ry):
                for mx, kx in phase_pairs(rx):
                    off = (my + pad_t) * gw + (mx + pad_l)
                    wt = jnp.pad(w_pt[:, :, ky, kx], ((0, cin_p - cin), (0, 0)))
                    g.append((off, wt))
            groups.append(g)

    b = bias if bias is not None else jnp.zeros((cout,), jnp.float32)
    out = _fused_conv_call(x_flat, groups, b, cout, n, gh, gw, qh, qw, norm, act)
    out = out.reshape(s, s, n, gh, gw, _CPAD)[:, :, :, :qh, :qw, :cout]
    # interleave output phases: out[:, qy*s+ry, qx*s+rx] = phase(ry, rx)[qy, qx]
    return out.transpose(2, 3, 0, 4, 1, 5).reshape(n, ho, wo, cout)


# --------------------------------------------------------------------------
# Parameter construction (mirrors GoodEncoder / GoodDecoder __init__)
# --------------------------------------------------------------------------
def init_good_network(key, in_channels=1, out_channels=1, in_dim=16, out_dim=16,
                      lowest_dim=4, filters=16):
    keys = iter(jax.random.split(key, 64))

    def conv_w(k_, cin, cout):   # stored directly in HWIO
        return 0.1 * jax.random.normal(next(keys), (k_, k_, cin, cout), jnp.float32)

    def convT_w(cin, cout, k_):  # PyTorch ConvTranspose2d layout (Cin, Cout, K, K)
        return 0.1 * jax.random.normal(next(keys), (cin, cout, k_, k_), jnp.float32)

    params = {"downs": [], "ups": [], "final": {}}
    cfg = {"downs": []}

    # ---- encoder ----
    assert in_dim > 8
    resize_factor = int(math.floor(math.log2(in_dim / lowest_dim)))
    low_log2 = int(math.log2(lowest_dim))
    target_dim = 2 ** (resize_factor + low_log2 - 1)
    k0 = in_dim - 2 * (target_dim - 1) + 2
    f = filters
    params["downs"].append(conv_w(k0, in_channels, f))
    cfg["downs"].append(dict(stride=2, padding=1, norm=True))
    cur_dim = target_dim
    for _ in range(resize_factor - 2):
        params["downs"].append(conv_w(4, f, 2 * f))
        cfg["downs"].append(dict(stride=2, padding=1, norm=False))
        f = 2 * f
        cur_dim //= 2
    params["downs"].append(conv_w(4, f, f))
    cfg["downs"].append(dict(stride=2, padding=1, norm=False))
    assert cur_dim // 2 == lowest_dim

    # ---- decoder ----
    rf_d = int(math.floor(math.log2(out_dim / lowest_dim)))
    fd = int(filters * 2 ** (rf_d - 2))
    params["ups"].append(convT_w(fd, fd, 4))          # UNetUp(fd, fd, dropout=0.5)
    for _ in reversed(range(rf_d)):
        params["ups"].append(convT_w(2 * fd, fd // 2, 4))
        fd //= 2
    fd = 8 * fd
    cur_dim = lowest_dim * 2 ** (rf_d + 1) // 4
    kfin = out_dim - (cur_dim - 1) * 2 + 2
    # TODO(synk): the multi-layer stride-1 "final" branch (kernel_size >= 10) is not built.
    assert kfin < 10
    params["final"]["w"] = convT_w(fd, out_channels, kfin)
    params["final"]["b"] = 0.1 * jax.random.normal(next(keys), (out_channels,),
                                                   jnp.float32)
    return params, cfg


# --------------------------------------------------------------------------
# Forward pass (GoodNetwork.forward semantics)
# --------------------------------------------------------------------------
def good_network_forward(cfg, params, x_nchw):
    x = jnp.transpose(x_nchw, (0, 2, 3, 1))                   # NCHW -> NHWC
    downs = []
    for w, c in zip(params["downs"], cfg["downs"]):
        x = conv2d_layer(x, w, None, stride=c["stride"], padding=c["padding"],
                         norm=c["norm"], act="leaky_relu")
        downs.append(x)
    rev = downs[::-1]
    u = rev[0]
    for idx in range(len(rev) - 1):
        up = conv_transpose2d_layer(u, params["ups"][idx], None, stride=2,
                                    padding=1, norm=True, act="relu")
        # TODO(synk): nn.Dropout(0.5) in ups[0] treated as identity (eval mode).
        u = jnp.concatenate([up, rev[idx + 1]], axis=-1)       # torch.cat(dim=1)
    out = conv_transpose2d_layer(u, params["final"]["w"], params["final"]["b"],
                                 stride=2, padding=1, norm=False, act="sigmoid")
    return jnp.transpose(out, (0, 3, 1, 2))                    # NHWC -> NCHW


# --------------------------------------------------------------------------
# Precision-matched pure-JAX reference (lax.conv with bf16 operands, f32 accum)
# --------------------------------------------------------------------------
def _ref_forward(cfg, params, x_nchw):
    def conv(x, w_hwio, stride, padding):
        w_oihw = jnp.transpose(w_hwio, (3, 2, 0, 1))
        return lax.conv_general_dilated(
            x.astype(jnp.bfloat16), w_oihw.astype(jnp.bfloat16),
            (stride, stride), ((padding, padding), (padding, padding)),
            dimension_numbers=("NCHW", "OIHW", "NCHW"),
            preferred_element_type=jnp.float32)

    def convT(x, w_pt, stride, padding):
        k = w_pt.shape[2]
        w_oihw = jnp.transpose(jnp.flip(w_pt, (2, 3)), (1, 0, 2, 3))
        pad = k - 1 - padding
        return lax.conv_general_dilated(
            x.astype(jnp.bfloat16), w_oihw.astype(jnp.bfloat16),
            (1, 1), ((pad, pad), (pad, pad)), lhs_dilation=(stride, stride),
            dimension_numbers=("NCHW", "OIHW", "NCHW"),
            preferred_element_type=jnp.float32)

    def inorm(x):
        m = jnp.mean(x, axis=(2, 3), keepdims=True)
        v = jnp.mean(jnp.square(x - m), axis=(2, 3), keepdims=True)
        return (x - m) / jnp.sqrt(v + _EPS)

    x = x_nchw
    downs = []
    for w, c in zip(params["downs"], cfg["downs"]):
        x = conv(x, w, c["stride"], c["padding"])
        if c["norm"]:
            x = inorm(x)
        x = jnp.where(x >= 0, x, 0.2 * x)
        downs.append(x)
    rev = downs[::-1]
    u = rev[0]
    for idx in range(len(rev) - 1):
        up = jnp.maximum(inorm(convT(u, params["ups"][idx], 2, 1)), 0.0)
        u = jnp.concatenate([up, rev[idx + 1]], axis=1)
    out = convT(u, params["final"]["w"], 2, 1) + params["final"]["b"].reshape(1, -1, 1, 1)
    return jax.nn.sigmoid(out)


if __name__ == "__main__":
    key = jax.random.PRNGKey(0)
    pkey, xkey = jax.random.split(key)
    B, C, H, W = 2, 1, 16, 16                  # in_dim=out_dim=16, lowest_dim=4
    params, cfg = init_good_network(pkey, in_channels=C, out_channels=1,
                                    in_dim=H, out_dim=H, lowest_dim=4, filters=16)
    x = jax.random.normal(xkey, (B, C, H, W), jnp.float32)

    fwd = jax.jit(partial(good_network_forward, cfg))
    out = jax.block_until_ready(fwd(params, x))
    assert out.shape == (B, 1, H, W), out.shape
    assert bool(jnp.all(jnp.isfinite(out)))

    # Reference is precision-matched (bf16 conv operands, f32 accumulation), so
    # the expected discrepancy is ~1e-3; any structural bug shows up as O(0.1+).
    ref = jax.block_until_ready(jax.jit(partial(_ref_forward, cfg))(params, x))
    err = float(jnp.max(jnp.abs(out - ref)))
    assert err < 1e-2, f"max abs err vs reference = {err}"

    print("KERNEL_OK")
</pallas_src>

<mosaic_0001>
module attributes {stable_mosaic.version = 11 : i64} {
  func.func @_conv_kernel(%arg0: i32, %arg1: memref<1x16xi32, #tpu.memory_space<smem>>, %arg2: memref<664x8xf32, #tpu.memory_space<vmem>>, %arg3: memref<1x16x8x128xbf16, #tpu.memory_space<vmem>>, %arg4: memref<1x128xf32, #tpu.memory_space<vmem>>, %arg5: memref<81x1xf32, #tpu.memory_space<vmem>>, %arg6: memref<1x162x128xf32, #tpu.memory_space<vmem>>) attributes {dimension_semantics = [#tpu.dimension_semantics<parallel>], iteration_bounds = array<i64: 1>, scalar_prefetch = 1 : i64, scratch_operands = 0 : i64, tpu.core_type = #tpu.core_type<tc>, window_params = [{pipeline_mode = #tpu.pipeline_mode<synchronous>, transform_indices = @transform_0, window_bounds = array<i64: 664, 8>}, {transform_indices = @transform_1, window_bounds = array<i64: 1, 16, 8, 128>}, {pipeline_mode = #tpu.pipeline_mode<synchronous>, transform_indices = @transform_2, window_bounds = array<i64: 1, 128>}, {pipeline_mode = #tpu.pipeline_mode<synchronous>, transform_indices = @transform_3, window_bounds = array<i64: 81, 1>}, {transform_indices = @transform_4, window_bounds = array<i64: 1, 162, 128>}]} {
    %cst = arith.constant 0.000000e+00 : f32
    %0 = vector.broadcast %cst : f32 to vector<162x128xf32>
    %c1_i32 = arith.constant 1 : i32
    %1 = arith.muli %arg0, %c1_i32 : i32
    %c0_i32 = arith.constant 0 : i32
    %2 = arith.addi %1, %c0_i32 : i32
    %3 = arith.index_cast %2 : i32 to index
    %c0 = arith.constant 0 : index
    %4 = memref.load %arg1[%3, %c0] : memref<1x16xi32, #tpu.memory_space<smem>>
    %5 = arith.index_cast %4 : i32 to index
    %c0_0 = arith.constant 0 : index
    %6 = vector.load %arg2[%5, %c0_0] : memref<664x8xf32, #tpu.memory_space<vmem>>, vector<162x8xf32>
    %7 = arith.truncf %6 : vector<162x8xf32> to vector<162x8xbf16>
    %c0_1 = arith.constant 0 : index
    %c0_2 = arith.constant 0 : index
    %c0_3 = arith.constant 0 : index
    %c0_4 = arith.constant 0 : index
    %8 = vector.load %arg3[%c0_1, %c0_2, %c0_3, %c0_4] : memref<1x16x8x128xbf16, #tpu.memory_space<vmem>>, vector<1x1x8x128xbf16>
    %9 = vector.shape_cast %8 : vector<1x1x8x128xbf16> to vector<8x128xbf16>
    %cst_5 = arith.constant dense<0.000000e+00> : vector<162x128xf32>
    %10 = tpu.matmul %7, %9, %cst_5 {dimension_numbers = #tpu.dot_dimension_numbers<[1], [0], [0], [1], [0, 0, 1, 1], [], []>} : vector<162x8xbf16>, vector<8x128xbf16>, vector<162x128xf32> -> vector<162x128xf32>
    %11 = arith.addf %0, %10 : vector<162x128xf32>
    %c1_i32_6 = arith.constant 1 : i32
    %12 = arith.muli %arg0, %c1_i32_6 : i32
    %c0_i32_7 = arith.constant 0 : i32
    %13 = arith.addi %12, %c0_i32_7 : i32
    %14 = arith.index_cast %13 : i32 to index
    %c1 = arith.constant 1 : index
    %15 = memref.load %arg1[%14, %c1] : memref<1x16xi32, #tpu.memory_space<smem>>
    %16 = arith.index_cast %15 : i32 to index
    %c0_8 = arith.constant 0 : index
    %17 = vector.load %arg2[%16, %c0_8] : memref<664x8xf32, #tpu.memory_space<vmem>>, vector<162x8xf32>
    %18 = arith.truncf %17 : vector<162x8xf32> to vector<162x8xbf16>
    %c0_9 = arith.constant 0 : index
    %c1_10 = arith.constant 1 : index
    %c0_11 = arith.constant 0 : index
    %c0_12 = arith.constant 0 : index
    %19 = vector.load %arg3[%c0_9, %c1_10, %c0_11, %c0_12] : memref<1x16x8x128xbf16, #tpu.memory_space<vmem>>, vector<1x1x8x128xbf16>
    %20 = vector.shape_cast %19 : vector<1x1x8x128xbf16> to vector<8x128xbf16>
    %cst_13 = arith.constant dense<0.000000e+00> : vector<162x128xf32>
    %21 = tpu.matmul %18, %20, %cst_13 {dimension_numbers = #tpu.dot_dimension_numbers<[1], [0], [0], [1], [0, 0, 1, 1], [], []>} : vector<162x8xbf16>, vector<8x128xbf16>, vector<162x128xf32> -> vector<162x128xf32>
    %22 = arith.addf %11, %21 : vector<162x128xf32>
    %c1_i32_14 = arith.constant 1 : i32
    %23 = arith.muli %arg0, %c1_i32_14 : i32
    %c0_i32_15 = arith.constant 0 : i32
    %24 = arith.addi %23, %c0_i32_15 : i32
    %25 = arith.index_cast %24 : i32 to index
    %c2 = arith.constant 2 : index
    %26 = memref.load %arg1[%25, %c2] : memref<1x16xi32, #tpu.memory_space<smem>>
    %27 = arith.index_cast %26 : i32 to index
    %c0_16 = arith.constant 0 : index
    %28 = vector.load %arg2[%27, %c0_16] : memref<664x8xf32, #tpu.memory_space<vmem>>, vector<162x8xf32>
    %29 = arith.truncf %28 : vector<162x8xf32> to vector<162x8xbf16>
    %c0_17 = arith.constant 0 : index
    %c2_18 = arith.constant 2 : index
    %c0_19 = arith.constant 0 : index
    %c0_20 = arith.constant 0 : index
    %30 = vector.load %arg3[%c0_17, %c2_18, %c0_19, %c0_20] : memref<1x16x8x128xbf16, #tpu.memory_space<vmem>>, vector<1x1x8x128xbf16>
    %31 = vector.shape_cast %30 : vector<1x1x8x128xbf16> to vector<8x128xbf16>
    %cst_21 = arith.constant dense<0.000000e+00> : vector<162x128xf32>
    %32 = tpu.matmul %29, %31, %cst_21 {dimension_numbers = #tpu.dot_dimension_numbers<[1], [0], [0], [1], [0, 0, 1, 1], [], []>} : vector<162x8xbf16>, vector<8x128xbf16>, vector<162x128xf32> -> vector<162x128xf32>
    %33 = arith.addf %22, %32 : vector<162x128xf32>
    %c1_i32_22 = arith.constant 1 : i32
    %34 = arith.muli %arg0, %c1_i32_22 : i32
    %c0_i32_23 = arith.constant 0 : i32
    %35 = arith.addi %34, %c0_i32_23 : i32
    %36 = arith.index_cast %35 : i32 to index
    %c3 = arith.constant 3 : index
    %37 = memref.load %arg1[%36, %c3] : memref<1x16xi32, #tpu.memory_space<smem>>
    %38 = arith.index_cast %37 : i32 to index
    %c0_24 = arith.constant 0 : index
    %39 = vector.load %arg2[%38, %c0_24] : memref<664x8xf32, #tpu.memory_space<vmem>>, vector<162x8xf32>
    %40 = arith.truncf %39 : vector<162x8xf32> to vector<162x8xbf16>
    %c0_25 = arith.constant 0 : index
    %c3_26 = arith.constant 3 : index
    %c0_27 = arith.constant 0 : index
    %c0_28 = arith.constant 0 : index
    %41 = vector.load %arg3[%c0_25, %c3_26, %c0_27, %c0_28] : memref<1x16x8x128xbf16, #tpu.memory_space<vmem>>, vector<1x1x8x128xbf16>
    %42 = vector.shape_cast %41 : vector<1x1x8x128xbf16> to vector<8x128xbf16>
    %cst_29 = arith.constant dense<0.000000e+00> : vector<162x128xf32>
    %43 = tpu.matmul %40, %42, %cst_29 {dimension_numbers = #tpu.dot_dimension_numbers<[1], [0], [0], [1], [0, 0, 1, 1], [], []>} : vector<162x8xbf16>, vector<8x128xbf16>, vector<162x128xf32> -> vector<162x128xf32>
    %44 = arith.addf %33, %43 : vector<162x128xf32>
    %c1_i32_30 = arith.constant 1 : i32
    %45 = arith.muli %arg0, %c1_i32_30 : i32
    %c0_i32_31 = arith.constant 0 : i32
    %46 = arith.addi %45, %c0_i32_31 : i32
    %47 = arith.index_cast %46 : i32 to index
    %c4 = arith.constant 4 : index
    %48 = memref.load %arg1[%47, %c4] : memref<1x16xi32, #tpu.memory_space<smem>>
    %49 = arith.index_cast %48 : i32 to index
    %c0_32 = arith.constant 0 : index
    %50 = vector.load %arg2[%49, %c0_32] : memref<664x8xf32, #tpu.memory_space<vmem>>, vector<162x8xf32>
    %51 = arith.truncf %50 : vector<162x8xf32> to vector<162x8xbf16>
    %c0_33 = arith.constant 0 : index
    %c4_34 = arith.constant 4 : index
    %c0_35 = arith.constant 0 : index
    %c0_36 = arith.constant 0 : index
    %52 = vector.load %arg3[%c0_33, %c4_34, %c0_35, %c0_36] : memref<1x16x8x128xbf16, #tpu.memory_space<vmem>>, vector<1x1x8x128xbf16>
    %53 = vector.shape_cast %52 : vector<1x1x8x128xbf16> to vector<8x128xbf16>
    %cst_37 = arith.constant dense<0.000000e+00> : vector<162x128xf32>
    %54 = tpu.matmul %51, %53, %cst_37 {dimension_numbers = #tpu.dot_dimension_numbers<[1], [0], [0], [1], [0, 0, 1, 1], [], []>} : vector<162x8xbf16>, vector<8x128xbf16>, vector<162x128xf32> -> vector<162x128xf32>
    %55 = arith.addf %44, %54 : vector<162x128xf32>
    %c1_i32_38 = arith.constant 1 : i32
    %56 = arith.muli %arg0, %c1_i32_38 : i32
    %c0_i32_39 = arith.constant 0 : i32
    %57 = arith.addi %56, %c0_i32_39 : i32
    %58 = arith.index_cast %57 : i32 to index
    %c5 = arith.constant 5 : index
    %59 = memref.load %arg1[%58, %c5] : memref<1x16xi32, #tpu.memory_space<smem>>
    %60 = arith.index_cast %59 : i32 to index
    %c0_40 = arith.constant 0 : index
    %61 = vector.load %arg2[%60, %c0_40] : memref<664x8xf32, #tpu.memory_space<vmem>>, vector<162x8xf32>
    %62 = arith.truncf %61 : vector<162x8xf32> to vector<162x8xbf16>
    %c0_41 = arith.constant 0 : index
    %c5_42 = arith.constant 5 : index
    %c0_43 = arith.constant 0 : index
    %c0_44 = arith.constant 0 : index
    %63 = vector.load %arg3[%c0_41, %c5_42, %c0_43, %c0_44] : memref<1x16x8x128xbf16, #tpu.memory_space<vmem>>, vector<1x1x8x128xbf16>
    %64 = vector.shape_cast %63 : vector<1x1x8x128xbf16> to vector<8x128xbf16>
    %cst_45 = arith.constant dense<0.000000e+00> : vector<162x128xf32>
    %65 = tpu.matmul %62, %64, %cst_45 {dimension_numbers = #tpu.dot_dimension_numbers<[1], [0], [0], [1], [0, 0, 1, 1], [], []>} : vector<162x8xbf16>, vector<8x128xbf16>, vector<162x128xf32> -> vector<162x128xf32>
    %66 = arith.addf %55, %65 : vector<162x128xf32>
    %c1_i32_46 = arith.constant 1 : i32
    %67 = arith.muli %arg0, %c1_i32_46 : i32
    %c0_i32_47 = arith.constant 0 : i32
    %68 = arith.addi %67, %c0_i32_47 : i32
    %69 = arith.index_cast %68 : i32 to index
    %c6 = arith.constant 6 : index
    %70 = memref.load %arg1[%69, %c6] : memref<1x16xi32, #tpu.memory_space<smem>>
    %71 = arith.index_cast %70 : i32 to index
    %c0_48 = arith.constant 0 : index
    %72 = vector.load %arg2[%71, %c0_48] : memref<664x8xf32, #tpu.memory_space<vmem>>, vector<162x8xf32>
    %73 = arith.truncf %72 : vector<162x8xf32> to vector<162x8xbf16>
    %c0_49 = arith.constant 0 : index
    %c6_50 = arith.constant 6 : index
    %c0_51 = arith.constant 0 : index
    %c0_52 = arith.constant 0 : index
    %74 = vector.load %arg3[%c0_49, %c6_50, %c0_51, %c0_52] : memref<1x16x8x128xbf16, #tpu.memory_space<vmem>>, vector<1x1x8x128xbf16>
    %75 = vector.shape_cast %74 : vector<1x1x8x128xbf16> to vector<8x128xbf16>
    %cst_53 = arith.constant dense<0.000000e+00> : vector<162x128xf32>
    %76 = tpu.matmul %73, %75, %cst_53 {dimension_numbers = #tpu.dot_dimension_numbers<[1], [0], [0], [1], [0, 0, 1, 1], [], []>} : vector<162x8xbf16>, vector<8x128xbf16>, vector<162x128xf32> -> vector<162x128xf32>
    %77 = arith.addf %66, %76 : vector<162x128xf32>
    %c1_i32_54 = arith.constant 1 : i32
    %78 = arith.muli %arg0, %c1_i32_54 : i32
    %c0_i32_55 = arith.constant 0 : i32
    %79 = arith.addi %78, %c0_i32_55 : i32
    %80 = arith.index_cast %79 : i32 to index
    %c7 = arith.constant 7 : index
    %81 = memref.load %arg1[%80, %c7] : memref<1x16xi32, #tpu.memory_space<smem>>
    %82 = arith.index_cast %81 : i32 to index
    %c0_56 = arith.constant 0 : index
    %83 = vector.load %arg2[%82, %c0_56] : memref<664x8xf32, #tpu.memory_space<vmem>>, vector<162x8xf32>
    %84 = arith.truncf %83 : vector<162x8xf32> to vector<162x8xbf16>
    %c0_57 = arith.constant 0 : index
    %c7_58 = arith.constant 7 : index
    %c0_59 = arith.constant 0 : index
    %c0_60 = arith.constant 0 : index
    %85 = vector.load %arg3[%c0_57, %c7_58, %c0_59, %c0_60] : memref<1x16x8x128xbf16, #tpu.memory_space<vmem>>, vector<1x1x8x128xbf16>
    %86 = vector.shape_cast %85 : vector<1x1x8x128xbf16> to vector<8x128xbf16>
    %cst_61 = arith.constant dense<0.000000e+00> : vector<162x128xf32>
    %87 = tpu.matmul %84, %86, %cst_61 {dimension_numbers = #tpu.dot_dimension_numbers<[1], [0], [0], [1], [0, 0, 1, 1], [], []>} : vector<162x8xbf16>, vector<8x128xbf16>, vector<162x128xf32> -> vector<162x128xf32>
    %88 = arith.addf %77, %87 : vector<162x128xf32>
    %c1_i32_62 = arith.constant 1 : i32
    %89 = arith.muli %arg0, %c1_i32_62 : i32
    %c0_i32_63 = arith.constant 0 : i32
    %90 = arith.addi %89, %c0_i32_63 : i32
    %91 = arith.index_cast %90 : i32 to index
    %c8 = arith.constant 8 : index
    %92 = memref.load %arg1[%91, %c8] : memref<1x16xi32, #tpu.memory_space<smem>>
    %93 = arith.index_cast %92 : i32 to index
    %c0_64 = arith.constant 0 : index
    %94 = vector.load %arg2[%93, %c0_64] : memref<664x8xf32, #tpu.memory_space<vmem>>, vector<162x8xf32>
    %95 = arith.truncf %94 : vector<162x8xf32> to vector<162x8xbf16>
    %c0_65 = arith.constant 0 : index
    %c8_66 = arith.constant 8 : index
    %c0_67 = arith.constant 0 : index
    %c0_68 = arith.constant 0 : index
    %96 = vector.load %arg3[%c0_65, %c8_66, %c0_67, %c0_68] : memref<1x16x8x128xbf16, #tpu.memory_space<vmem>>, vector<1x1x8x128xbf16>
    %97 = vector.shape_cast %96 : vector<1x1x8x128xbf16> to vector<8x128xbf16>
    %cst_69 = arith.constant dense<0.000000e+00> : vector<162x128xf32>
    %98 = tpu.matmul %95, %97, %cst_69 {dimension_numbers = #tpu.dot_dimension_numbers<[1], [0], [0], [1], [0, 0, 1, 1], [], []>} : vector<162x8xbf16>, vector<8x128xbf16>, vector<162x128xf32> -> vector<162x128xf32>
    %99 = arith.addf %88, %98 : vector<162x128xf32>
    %c1_i32_70 = arith.constant 1 : i32
    %100 = arith.muli %arg0, %c1_i32_70 : i32
    %c0_i32_71 = arith.constant 0 : i32
    %101 = arith.addi %100, %c0_i32_71 : i32
    %102 = arith.index_cast %101 : i32 to index
    %c9 = arith.constant 9 : index
    %103 = memref.load %arg1[%102, %c9] : memref<1x16xi32, #tpu.memory_space<smem>>
    %104 = arith.index_cast %103 : i32 to index
    %c0_72 = arith.constant 0 : index
    %105 = vector.load %arg2[%104, %c0_72] : memref<664x8xf32, #tpu.memory_space<vmem>>, vector<162x8xf32>
    %106 = arith.truncf %105 : vector<162x8xf32> to vector<162x8xbf16>
    %c0_73 = arith.constant 0 : index
    %c9_74 = arith.constant 9 : index
    %c0_75 = arith.constant 0 : index
    %c0_76 = arith.constant 0 : index
    %107 = vector.load %arg3[%c0_73, %c9_74, %c0_75, %c0_76] : memref<1x16x8x128xbf16, #tpu.memory_space<vmem>>, vector<1x1x8x128xbf16>
    %108 = vector.shape_cast %107 : vector<1x1x8x128xbf16> to vector<8x128xbf16>
    %cst_77 = arith.constant dense<0.000000e+00> : vector<162x128xf32>
    %109 = tpu.matmul %106, %108, %cst_77 {dimension_numbers = #tpu.dot_dimension_numbers<[1], [0], [0], [1], [0, 0, 1, 1], [], []>} : vector<162x8xbf16>, vector<8x128xbf16>, vector<162x128xf32> -> vector<162x128xf32>
    %110 = arith.addf %99, %109 : vector<162x128xf32>
    %c1_i32_78 = arith.constant 1 : i32
    %111 = arith.muli %arg0, %c1_i32_78 : i32
    %c0_i32_79 = arith.constant 0 : i32
    %112 = arith.addi %111, %c0_i32_79 : i32
    %113 = arith.index_cast %112 : i32 to index
    %c10 = arith.constant 10 : index
    %114 = memref.load %arg1[%113, %c10] : memref<1x16xi32, #tpu.memory_space<smem>>
    %115 = arith.index_cast %114 : i32 to index
    %c0_80 = arith.constant 0 : index
    %116 = vector.load %arg2[%115, %c0_80] : memref<664x8xf32, #tpu.memory_space<vmem>>, vector<162x8xf32>
    %117 = arith.truncf %116 : vector<162x8xf32> to vector<162x8xbf16>
    %c0_81 = arith.constant 0 : index
    %c10_82 = arith.constant 10 : index
    %c0_83 = arith.constant 0 : index
    %c0_84 = arith.constant 0 : index
    %118 = vector.load %arg3[%c0_81, %c10_82, %c0_83, %c0_84] : memref<1x16x8x128xbf16, #tpu.memory_space<vmem>>, vector<1x1x8x128xbf16>
    %119 = vector.shape_cast %118 : vector<1x1x8x128xbf16> to vector<8x128xbf16>
    %cst_85 = arith.constant dense<0.000000e+00> : vector<162x128xf32>
    %120 = tpu.matmul %117, %119, %cst_85 {dimension_numbers = #tpu.dot_dimension_numbers<[1], [0], [0], [1], [0, 0, 1, 1], [], []>} : vector<162x8xbf16>, vector<8x128xbf16>, vector<162x128xf32> -> vector<162x128xf32>
    %121 = arith.addf %110, %120 : vector<162x128xf32>
    %c1_i32_86 = arith.constant 1 : i32
    %122 = arith.muli %arg0, %c1_i32_86 : i32
    %c0_i32_87 = arith.constant 0 : i32
    %123 = arith.addi %122, %c0_i32_87 : i32
    %124 = arith.index_cast %123 : i32 to index
    %c11 = arith.constant 11 : index
    %125 = memref.load %arg1[%124, %c11] : memref<1x16xi32, #tpu.memory_space<smem>>
    %126 = arith.index_cast %125 : i32 to index
    %c0_88 = arith.constant 0 : index
    %127 = vector.load %arg2[%126, %c0_88] : memref<664x8xf32, #tpu.memory_space<vmem>>, vector<162x8xf32>
    %128 = arith.truncf %127 : vector<162x8xf32> to vector<162x8xbf16>
    %c0_89 = arith.constant 0 : index
    %c11_90 = arith.constant 11 : index
    %c0_91 = arith.constant 0 : index
    %c0_92 = arith.constant 0 : index
    %129 = vector.load %arg3[%c0_89, %c11_90, %c0_91, %c0_92] : memref<1x16x8x128xbf16, #tpu.memory_space<vmem>>, vector<1x1x8x128xbf16>
    %130 = vector.shape_cast %129 : vector<1x1x8x128xbf16> to vector<8x128xbf16>
    %cst_93 = arith.constant dense<0.000000e+00> : vector<162x128xf32>
    %131 = tpu.matmul %128, %130, %cst_93 {dimension_numbers = #tpu.dot_dimension_numbers<[1], [0], [0], [1], [0, 0, 1, 1], [], []>} : vector<162x8xbf16>, vector<8x128xbf16>, vector<162x128xf32> -> vector<162x128xf32>
    %132 = arith.addf %121, %131 : vector<162x128xf32>
    %c1_i32_94 = arith.constant 1 : i32
    %133 = arith.muli %arg0, %c1_i32_94 : i32
    %c0_i32_95 = arith.constant 0 : i32
    %134 = arith.addi %133, %c0_i32_95 : i32
    %135 = arith.index_cast %134 : i32 to index
    %c12 = arith.constant 12 : index
    %136 = memref.load %arg1[%135, %c12] : memref<1x16xi32, #tpu.memory_space<smem>>
    %137 = arith.index_cast %136 : i32 to index
    %c0_96 = arith.constant 0 : index
    %138 = vector.load %arg2[%137, %c0_96] : memref<664x8xf32, #tpu.memory_space<vmem>>, vector<162x8xf32>
    %139 = arith.truncf %138 : vector<162x8xf32> to vector<162x8xbf16>
    %c0_97 = arith.constant 0 : index
    %c12_98 = arith.constant 12 : index
    %c0_99 = arith.constant 0 : index
    %c0_100 = arith.constant 0 : index
    %140 = vector.load %arg3[%c0_97, %c12_98, %c0_99, %c0_100] : memref<1x16x8x128xbf16, #tpu.memory_space<vmem>>, vector<1x1x8x128xbf16>
    %141 = vector.shape_cast %140 : vector<1x1x8x128xbf16> to vector<8x128xbf16>
    %cst_101 = arith.constant dense<0.000000e+00> : vector<162x128xf32>
    %142 = tpu.matmul %139, %141, %cst_101 {dimension_numbers = #tpu.dot_dimension_numbers<[1], [0], [0], [1], [0, 0, 1, 1], [], []>} : vector<162x8xbf16>, vector<8x128xbf16>, vector<162x128xf32> -> vector<162x128xf32>
    %143 = arith.addf %132, %142 : vector<162x128xf32>
    %c1_i32_102 = arith.constant 1 : i32
    %144 = arith.muli %arg0, %c1_i32_102 : i32
    %c0_i32_103 = arith.constant 0 : i32
    %145 = arith.addi %144, %c0_i32_103 : i32
    %146 = arith.index_cast %145 : i32 to index
    %c13 = arith.constant 13 : index
    %147 = memref.load %arg1[%146, %c13] : memref<1x16xi32, #tpu.memory_space<smem>>
    %148 = arith.index_cast %147 : i32 to index
    %c0_104 = arith.constant 0 : index
    %149 = vector.load %arg2[%148, %c0_104] : memref<664x8xf32, #tpu.memory_space<vmem>>, vector<162x8xf32>
    %150 = arith.truncf %149 : vector<162x8xf32> to vector<162x8xbf16>
    %c0_105 = arith.constant 0 : index
    %c13_106 = arith.constant 13 : index
    %c0_107 = arith.constant 0 : index
    %c0_108 = arith.constant 0 : index
    %151 = vector.load %arg3[%c0_105, %c13_106, %c0_107, %c0_108] : memref<1x16x8x128xbf16, #tpu.memory_space<vmem>>, vector<1x1x8x128xbf16>
    %152 = vector.shape_cast %151 : vector<1x1x8x128xbf16> to vector<8x128xbf16>
    %cst_109 = arith.constant dense<0.000000e+00> : vector<162x128xf32>
    %153 = tpu.matmul %150, %152, %cst_109 {dimension_numbers = #tpu.dot_dimension_numbers<[1], [0], [0], [1], [0, 0, 1, 1], [], []>} : vector<162x8xbf16>, vector<8x128xbf16>, vector<162x128xf32> -> vector<162x128xf32>
    %154 = arith.addf %143, %153 : vector<162x128xf32>
    %c1_i32_110 = arith.constant 1 : i32
    %155 = arith.muli %arg0, %c1_i32_110 : i32
    %c0_i32_111 = arith.constant 0 : i32
    %156 = arith.addi %155, %c0_i32_111 : i32
    %157 = arith.index_cast %156 : i32 to index
    %c14 = arith.constant 14 : index
    %158 = memref.load %arg1[%157, %c14] : memref<1x16xi32, #tpu.memory_space<smem>>
    %159 = arith.index_cast %158 : i32 to index
    %c0_112 = arith.constant 0 : index
    %160 = vector.load %arg2[%159, %c0_112] : memref<664x8xf32, #tpu.memory_space<vmem>>, vector<162x8xf32>
    %161 = arith.truncf %160 : vector<162x8xf32> to vector<162x8xbf16>
    %c0_113 = arith.constant 0 : index
    %c14_114 = arith.constant 14 : index
    %c0_115 = arith.constant 0 : index
    %c0_116 = arith.constant 0 : index
    %162 = vector.load %arg3[%c0_113, %c14_114, %c0_115, %c0_116] : memref<1x16x8x128xbf16, #tpu.memory_space<vmem>>, vector<1x1x8x128xbf16>
    %163 = vector.shape_cast %162 : vector<1x1x8x128xbf16> to vector<8x128xbf16>
    %cst_117 = arith.constant dense<0.000000e+00> : vector<162x128xf32>
    %164 = tpu.matmul %161, %163, %cst_117 {dimension_numbers = #tpu.dot_dimension_numbers<[1], [0], [0], [1], [0, 0, 1, 1], [], []>} : vector<162x8xbf16>, vector<8x128xbf16>, vector<162x128xf32> -> vector<162x128xf32>
    %165 = arith.addf %154, %164 : vector<162x128xf32>
    %c1_i32_118 = arith.constant 1 : i32
    %166 = arith.muli %arg0, %c1_i32_118 : i32
    %c0_i32_119 = arith.constant 0 : i32
    %167 = arith.addi %166, %c0_i32_119 : i32
    %168 = arith.index_cast %167 : i32 to index
    %c15 = arith.constant 15 : index
    %169 = memref.load %arg1[%168, %c15] : memref<1x16xi32, #tpu.memory_space<smem>>
    %170 = arith.index_cast %169 : i32 to index
    %c0_120 = arith.constant 0 : index
    %171 = vector.load %arg2[%170, %c0_120] : memref<664x8xf32, #tpu.memory_space<vmem>>, vector<162x8xf32>
    %172 = arith.truncf %171 : vector<162x8xf32> to vector<162x8xbf16>
    %c0_121 = arith.constant 0 : index
    %c15_122 = arith.constant 15 : index
    %c0_123 = arith.constant 0 : index
    %c0_124 = arith.constant 0 : index
    %173 = vector.load %arg3[%c0_121, %c15_122, %c0_123, %c0_124] : memref<1x16x8x128xbf16, #tpu.memory_space<vmem>>, vector<1x1x8x128xbf16>
    %174 = vector.shape_cast %173 : vector<1x1x8x128xbf16> to vector<8x128xbf16>
    %cst_125 = arith.constant dense<0.000000e+00> : vector<162x128xf32>
    %175 = tpu.matmul %172, %174, %cst_125 {dimension_numbers = #tpu.dot_dimension_numbers<[1], [0], [0], [1], [0, 0, 1, 1], [], []>} : vector<162x8xbf16>, vector<8x128xbf16>, vector<162x128xf32> -> vector<162x128xf32>
    %176 = arith.addf %165, %175 : vector<162x128xf32>
    %c0_126 = arith.constant 0 : index
    %c0_127 = arith.constant 0 : index
    %177 = vector.load %arg4[%c0_126, %c0_127] : memref<1x128xf32, #tpu.memory_space<vmem>>, vector<1x128xf32>
    %178 = vector.broadcast %177 : vector<1x128xf32> to vector<162x128xf32>
    %179 = arith.addf %176, %178 : vector<162x128xf32>
    %c0_128 = arith.constant 0 : index
    %c0_129 = arith.constant 0 : index
    %180 = vector.load %arg5[%c0_128, %c0_129] : memref<81x1xf32, #tpu.memory_space<vmem>>, vector<81x1xf32>
    %cst_130 = arith.constant 0.000000e+00 : f32
    %181 = vector.broadcast %cst_130 : f32 to vector<1x128xf32>
    %cst_131 = arith.constant 0.000000e+00 : f32
    %182 = vector.broadcast %cst_131 : f32 to vector<1x128xf32>
    %183 = vector.extract_strided_slice %179 {offsets = [0, 0], sizes = [81, 128], strides = [1, 1]} : vector<162x128xf32> to vector<81x128xf32>
    %184 = vector.broadcast %180 : vector<81x1xf32> to vector<81x128xf32>
    %185 = arith.mulf %183, %184 : vector<81x128xf32>
    %cst_132 = arith.constant dense<0.000000e+00> : vector<128xf32>
    %186 = vector.multi_reduction <add>, %185, %cst_132 [0] : vector<81x128xf32> to vector<128xf32>
    %187 = vector.shape_cast %186 : vector<128xf32> to vector<1x128xf32>
    %188 = arith.addf %181, %187 : vector<1x128xf32>
    %189 = arith.mulf %185, %183 : vector<81x128xf32>
    %cst_133 = arith.constant dense<0.000000e+00> : vector<128xf32>
    %190 = vector.multi_reduction <add>, %189, %cst_133 [0] : vector<81x128xf32> to vector<128xf32>
    %191 = vector.shape_cast %190 : vector<128xf32> to vector<1x128xf32>
    %192 = arith.addf %182, %191 : vector<1x128xf32>
    %cst_134 = arith.constant 1.562500e-02 : f32
    %193 = vector.broadcast %cst_134 : f32 to vector<1x128xf32>
    %194 = arith.mulf %188, %193 : vector<1x128xf32>
    %cst_135 = arith.constant 1.562500e-02 : f32
    %195 = vector.broadcast %cst_135 : f32 to vector<1x128xf32>
    %196 = arith.mulf %192, %195 : vector<1x128xf32>
    %197 = arith.mulf %194, %194 : vector<1x128xf32>
    %198 = arith.subf %196, %197 : vector<1x128xf32>
    %cst_136 = arith.constant 9.99999974E-6 : f32
    %199 = vector.broadcast %cst_136 : f32 to vector<1x128xf32>
    %200 = arith.addf %198, %199 : vector<1x128xf32>
    %201 = math.rsqrt %200 : vector<1x128xf32>
    %cst_137 = arith.constant 0.000000e+00 : f32
    %202 = vector.broadcast %cst_137 : f32 to vector<1x128xf32>
    %cst_138 = arith.constant 0.000000e+00 : f32
    %203 = vector.broadcast %cst_138 : f32 to vector<1x128xf32>
    %204 = vector.extract_strided_slice %179 {offsets = [81, 0], sizes = [81, 128], strides = [1, 1]} : vector<162x128xf32> to vector<81x128xf32>
    %205 = vector.broadcast %180 : vector<81x1xf32> to vector<81x128xf32>
    %206 = arith.mulf %204, %205 : vector<81x128xf32>
    %cst_139 = arith.constant dense<0.000000e+00> : vector<128xf32>
    %207 = vector.multi_reduction <add>, %206, %cst_139 [0] : vector<81x128xf32> to vector<128xf32>
    %208 = vector.shape_cast %207 : vector<128xf32> to vector<1x128xf32>
    %209 = arith.addf %202, %208 : vector<1x128xf32>
    %210 = arith.mulf %206, %204 : vector<81x128xf32>
    %cst_140 = arith.constant dense<0.000000e+00> : vector<128xf32>
    %211 = vector.multi_reduction <add>, %210, %cst_140 [0] : vector<81x128xf32> to vector<128xf32>
    %212 = vector.shape_cast %211 : vector<128xf32> to vector<1x128xf32>
    %213 = arith.addf %203, %212 : vector<1x128xf32>
    %cst_141 = arith.constant 1.562500e-02 : f32
    %214 = vector.broadcast %cst_141 : f32 to vector<1x128xf32>
    %215 = arith.mulf %209, %214 : vector<1x128xf32>
    %cst_142 = arith.constant 1.562500e-02 : f32
    %216 = vector.broadcast %cst_142 : f32 to vector<1x128xf32>
    %217 = arith.mulf %213, %216 : vector<1x128xf32>
    %218 = arith.mulf %215, %215 : vector<1x128xf32>
    %219 = arith.subf %217, %218 : vector<1x128xf32>
    %cst_143 = arith.constant 9.99999974E-6 : f32
    %220 = vector.broadcast %cst_143 : f32 to vector<1x128xf32>
    %221 = arith.addf %219, %220 : vector<1x128xf32>
    %222 = math.rsqrt %221 : vector<1x128xf32>
    %223 = vector.extract_strided_slice %179 {offsets = [0, 0], sizes = [81, 128], strides = [1, 1]} : vector<162x128xf32> to vector<81x128xf32>
    %224 = vector.broadcast %194 : vector<1x128xf32> to vector<81x128xf32>
    %225 = arith.subf %223, %224 : vector<81x128xf32>
    %226 = vector.broadcast %201 : vector<1x128xf32> to vector<81x128xf32>
    %227 = arith.mulf %225, %226 : vector<81x128xf32>
    %228 = vector.extract_strided_slice %179 {offsets = [81, 0], sizes = [81, 128], strides = [1, 1]} : vector<162x128xf32> to vector<81x128xf32>
    %229 = vector.broadcast %215 : vector<1x128xf32> to vector<81x128xf32>
    %230 = arith.subf %228, %229 : vector<81x128xf32>
    %231 = vector.broadcast %222 : vector<1x128xf32> to vector<81x128xf32>
    %232 = arith.mulf %230, %231 : vector<81x128xf32>
    %233 = tpu.concatenate %227, %232 in 0 : vector<81x128xf32>, vector<81x128xf32> -> vector<162x128xf32>
    %cst_144 = arith.constant 0.000000e+00 : f32
    %234 = vector.broadcast %cst_144 : f32 to vector<162x128xf32>
    %235 = arith.cmpf oge, %233, %234 : vector<162x128xf32>
    %cst_145 = arith.constant 2.000000e-01 : f32
    %236 = vector.broadcast %cst_145 : f32 to vector<162x128xf32>
    %237 = arith.mulf %236, %233 : vector<162x128xf32>
    %238 = arith.select %235, %233, %237 : vector<162x128xi1>, vector<162x128xf32>
    %c0_146 = arith.constant 0 : index
    %c0_147 = arith.constant 0 : index
    %c0_148 = arith.constant 0 : index
    %239 = vector.load %arg6[%c0_146, %c0_147, %c0_148] : memref<1x162x128xf32, #tpu.memory_space<vmem>>, vector<1x162x128xf32>
    %240 = vector.shape_cast %239 : vector<1x162x128xf32> to vector<162x128xf32>
    %241 = vector.shape_cast %238 : vector<162x128xf32> to vector<1x162x128xf32>
    tpu.vector_store %arg6[%c0_146, %c0_147, %c0_148], %241 {strides = array<i32>} : memref<1x162x128xf32, #tpu.memory_space<vmem>>, vector<1x162x128xf32>,
    return
  }
  func.func @transform_0(%arg0: i32, %arg1: memref<1x16xi32, #tpu.memory_space<smem>>) -> (i32, i32) {
    %c0_i32 = arith.constant 0 : i32
    %c0_i32_0 = arith.constant 0 : i32
    %c0_i32_1 = arith.constant 0 : i32
    return %c0_i32, %c0_i32_0 : i32, i32
  }
  func.func @transform_1(%arg0: i32, %arg1: memref<1x16xi32, #tpu.memory_space<smem>>) -> (i32, i32, i32, i32) {
    %c0_i32 = arith.constant 0 : i32
    %c0_i32_0 = arith.constant 0 : i32
    %c0_i32_1 = arith.constant 0 : i32
    %c0_i32_2 = arith.constant 0 : i32
    return %arg0, %c0_i32, %c0_i32_0, %c0_i32_1 : i32, i32, i32, i32
  }
  func.func @transform_2(%arg0: i32, %arg1: memref<1x16xi32, #tpu.memory_space<smem>>) -> (i32, i32) {
    %c0_i32 = arith.constant 0 : i32
    %c0_i32_0 = arith.constant 0 : i32
    %c0_i32_1 = arith.constant 0 : i32
    return %c0_i32, %c0_i32_0 : i32, i32
  }
  func.func @transform_3(%arg0: i32, %arg1: memref<1x16xi32, #tpu.memory_space<smem>>) -> (i32, i32) {
    %c0_i32 = arith.constant 0 : i32
    %c0_i32_0 = arith.constant 0 : i32
    %c0_i32_1 = arith.constant 0 : i32
    return %c0_i32, %c0_i32_0 : i32, i32
  }
  func.func @transform_4(%arg0: i32, %arg1: memref<1x16xi32, #tpu.memory_space<smem>>) -> (i32, i32, i32) {
    %c0_i32 = arith.constant 0 : i32
    %c0_i32_0 = arith.constant 0 : i32
    %c0_i32_1 = arith.constant 0 : i32
    return %arg0, %c0_i32, %c0_i32_0 : i32, i32, i32
  }
}

module attributes {stable_mosaic.version = 11 : i64} {
  func.func @_conv_kernel(%arg0: i32, %arg1: memref<1x16xi32, #tpu.memory_space<smem>>, %arg2: memref<208x16xf32, #tpu.memory_space<vmem>>, %arg3: memref<1x16x16x128xbf16, #tpu.memory_space<vmem>>, %arg4: memref<1x128xf32, #tpu.memory_space<vmem>>, %arg5: memref<25x1xf32, #tpu.memory_space<vmem>>, %arg6: memref<1x50x128xf32, #tpu.memory_space<vmem>>) attributes {dimension_semantics = [#tpu.dimension_semantics<parallel>], iteration_bounds = array<i64: 1>, scalar_prefetch = 1 : i64, scratch_operands = 0 : i64, tpu.core_type = #tpu.core_type<tc>, window_params = [{pipeline_mode = #tpu.pipeline_mode<synchronous>, transform_indices = @transform_0, window_bounds = array<i64: 208, 16>}, {transform_indices = @transform_1, window_bounds = array<i64: 1, 16, 16, 128>}, {pipeline_mode = #tpu.pipeline_mode<synchronous>, transform_indices = @transform_2, window_bounds = array<i64: 1, 128>}, {pipeline_mode = #tpu.pipeline_mode<synchronous>, transform_indices = @transform_3, window_bounds = array<i64: 25, 1>}, {transform_indices = @transform_4, window_bounds = array<i64: 1, 50, 128>}]} {
    %cst = arith.constant 0.000000e+00 : f32
    %0 = vector.broadcast %cst : f32 to vector<50x128xf32>
    %c1_i32 = arith.constant 1 : i32
    %1 = arith.muli %arg0, %c1_i32 : i32
    %c0_i32 = arith.constant 0 : i32
    %2 = arith.addi %1, %c0_i32 : i32
    %3 = arith.index_cast %2 : i32 to index
    %c0 = arith.constant 0 : index
    %4 = memref.load %arg1[%3, %c0] : memref<1x16xi32, #tpu.memory_space<smem>>
    %5 = arith.index_cast %4 : i32 to index
    %c0_0 = arith.constant 0 : index
    %6 = vector.load %arg2[%5, %c0_0] : memref<208x16xf32, #tpu.memory_space<vmem>>, vector<50x16xf32>
    %7 = arith.truncf %6 : vector<50x16xf32> to vector<50x16xbf16>
    %c0_1 = arith.constant 0 : index
    %c0_2 = arith.constant 0 : index
    %c0_3 = arith.constant 0 : index
    %c0_4 = arith.constant 0 : index
    %8 = vector.load %arg3[%c0_1, %c0_2, %c0_3, %c0_4] : memref<1x16x16x128xbf16, #tpu.memory_space<vmem>>, vector<1x1x16x128xbf16>
    %9 = vector.shape_cast %8 : vector<1x1x16x128xbf16> to vector<16x128xbf16>
    %cst_5 = arith.constant dense<0.000000e+00> : vector<50x128xf32>
    %10 = tpu.matmul %7, %9, %cst_5 {dimension_numbers = #tpu.dot_dimension_numbers<[1], [0], [0], [1], [0, 0, 1, 1], [], []>} : vector<50x16xbf16>, vector<16x128xbf16>, vector<50x128xf32> -> vector<50x128xf32>
    %11 = arith.addf %0, %10 : vector<50x128xf32>
    %c1_i32_6 = arith.constant 1 : i32
    %12 = arith.muli %arg0, %c1_i32_6 : i32
    %c0_i32_7 = arith.constant 0 : i32
    %13 = arith.addi %12, %c0_i32_7 : i32
    %14 = arith.index_cast %13 : i32 to index
    %c1 = arith.constant 1 : index
    %15 = memref.load %arg1[%14, %c1] : memref<1x16xi32, #tpu.memory_space<smem>>
    %16 = arith.index_cast %15 : i32 to index
    %c0_8 = arith.constant 0 : index
    %17 = vector.load %arg2[%16, %c0_8] : memref<208x16xf32, #tpu.memory_space<vmem>>, vector<50x16xf32>
    %18 = arith.truncf %17 : vector<50x16xf32> to vector<50x16xbf16>
    %c0_9 = arith.constant 0 : index
    %c1_10 = arith.constant 1 : index
    %c0_11 = arith.constant 0 : index
    %c0_12 = arith.constant 0 : index
    %19 = vector.load %arg3[%c0_9, %c1_10, %c0_11, %c0_12] : memref<1x16x16x128xbf16, #tpu.memory_space<vmem>>, vector<1x1x16x128xbf16>
    %20 = vector.shape_cast %19 : vector<1x1x16x128xbf16> to vector<16x128xbf16>
    %cst_13 = arith.constant dense<0.000000e+00> : vector<50x128xf32>
    %21 = tpu.matmul %18, %20, %cst_13 {dimension_numbers = #tpu.dot_dimension_numbers<[1], [0], [0], [1], [0, 0, 1, 1], [], []>} : vector<50x16xbf16>, vector<16x128xbf16>, vector<50x128xf32> -> vector<50x128xf32>
    %22 = arith.addf %11, %21 : vector<50x128xf32>
    %c1_i32_14 = arith.constant 1 : i32
    %23 = arith.muli %arg0, %c1_i32_14 : i32
    %c0_i32_15 = arith.constant 0 : i32
    %24 = arith.addi %23, %c0_i32_15 : i32
    %25 = arith.index_cast %24 : i32 to index
    %c2 = arith.constant 2 : index
    %26 = memref.load %arg1[%25, %c2] : memref<1x16xi32, #tpu.memory_space<smem>>
    %27 = arith.index_cast %26 : i32 to index
    %c0_16 = arith.constant 0 : index
    %28 = vector.load %arg2[%27, %c0_16] : memref<208x16xf32, #tpu.memory_space<vmem>>, vector<50x16xf32>
    %29 = arith.truncf %28 : vector<50x16xf32> to vector<50x16xbf16>
    %c0_17 = arith.constant 0 : index
    %c2_18 = arith.constant 2 : index
    %c0_19 = arith.constant 0 : index
    %c0_20 = arith.constant 0 : index
    %30 = vector.load %arg3[%c0_17, %c2_18, %c0_19, %c0_20] : memref<1x16x16x128xbf16, #tpu.memory_space<vmem>>, vector<1x1x16x128xbf16>
    %31 = vector.shape_cast %30 : vector<1x1x16x128xbf16> to vector<16x128xbf16>
    %cst_21 = arith.constant dense<0.000000e+00> : vector<50x128xf32>
    %32 = tpu.matmul %29, %31, %cst_21 {dimension_numbers = #tpu.dot_dimension_numbers<[1], [0], [0], [1], [0, 0, 1, 1], [], []>} : vector<50x16xbf16>, vector<16x128xbf16>, vector<50x128xf32> -> vector<50x128xf32>
    %33 = arith.addf %22, %32 : vector<50x128xf32>
    %c1_i32_22 = arith.constant 1 : i32
    %34 = arith.muli %arg0, %c1_i32_22 : i32
    %c0_i32_23 = arith.constant 0 : i32
    %35 = arith.addi %34, %c0_i32_23 : i32
    %36 = arith.index_cast %35 : i32 to index
    %c3 = arith.constant 3 : index
    %37 = memref.load %arg1[%36, %c3] : memref<1x16xi32, #tpu.memory_space<smem>>
    %38 = arith.index_cast %37 : i32 to index
    %c0_24 = arith.constant 0 : index
    %39 = vector.load %arg2[%38, %c0_24] : memref<208x16xf32, #tpu.memory_space<vmem>>, vector<50x16xf32>
    %40 = arith.truncf %39 : vector<50x16xf32> to vector<50x16xbf16>
    %c0_25 = arith.constant 0 : index
    %c3_26 = arith.constant 3 : index
    %c0_27 = arith.constant 0 : index
    %c0_28 = arith.constant 0 : index
    %41 = vector.load %arg3[%c0_25, %c3_26, %c0_27, %c0_28] : memref<1x16x16x128xbf16, #tpu.memory_space<vmem>>, vector<1x1x16x128xbf16>
    %42 = vector.shape_cast %41 : vector<1x1x16x128xbf16> to vector<16x128xbf16>
    %cst_29 = arith.constant dense<0.000000e+00> : vector<50x128xf32>
    %43 = tpu.matmul %40, %42, %cst_29 {dimension_numbers = #tpu.dot_dimension_numbers<[1], [0], [0], [1], [0, 0, 1, 1], [], []>} : vector<50x16xbf16>, vector<16x128xbf16>, vector<50x128xf32> -> vector<50x128xf32>
    %44 = arith.addf %33, %43 : vector<50x128xf32>
    %c1_i32_30 = arith.constant 1 : i32
    %45 = arith.muli %arg0, %c1_i32_30 : i32
    %c0_i32_31 = arith.constant 0 : i32
    %46 = arith.addi %45, %c0_i32_31 : i32
    %47 = arith.index_cast %46 : i32 to index
    %c4 = arith.constant 4 : index
    %48 = memref.load %arg1[%47, %c4] : memref<1x16xi32, #tpu.memory_space<smem>>
    %49 = arith.index_cast %48 : i32 to index
    %c0_32 = arith.constant 0 : index
    %50 = vector.load %arg2[%49, %c0_32] : memref<208x16xf32, #tpu.memory_space<vmem>>, vector<50x16xf32>
    %51 = arith.truncf %50 : vector<50x16xf32> to vector<50x16xbf16>
    %c0_33 = arith.constant 0 : index
    %c4_34 = arith.constant 4 : index
    %c0_35 = arith.constant 0 : index
    %c0_36 = arith.constant 0 : index
    %52 = vector.load %arg3[%c0_33, %c4_34, %c0_35, %c0_36] : memref<1x16x16x128xbf16, #tpu.memory_space<vmem>>, vector<1x1x16x128xbf16>
    %53 = vector.shape_cast %52 : vector<1x1x16x128xbf16> to vector<16x128xbf16>
    %cst_37 = arith.constant dense<0.000000e+00> : vector<50x128xf32>
    %54 = tpu.matmul %51, %53, %cst_37 {dimension_numbers = #tpu.dot_dimension_numbers<[1], [0], [0], [1], [0, 0, 1, 1], [], []>} : vector<50x16xbf16>, vector<16x128xbf16>, vector<50x128xf32> -> vector<50x128xf32>
    %55 = arith.addf %44, %54 : vector<50x128xf32>
    %c1_i32_38 = arith.constant 1 : i32
    %56 = arith.muli %arg0, %c1_i32_38 : i32
    %c0_i32_39 = arith.constant 0 : i32
    %57 = arith.addi %56, %c0_i32_39 : i32
    %58 = arith.index_cast %57 : i32 to index
    %c5 = arith.constant 5 : index
    %59 = memref.load %arg1[%58, %c5] : memref<1x16xi32, #tpu.memory_space<smem>>
    %60 = arith.index_cast %59 : i32 to index
    %c0_40 = arith.constant 0 : index
    %61 = vector.load %arg2[%60, %c0_40] : memref<208x16xf32, #tpu.memory_space<vmem>>, vector<50x16xf32>
    %62 = arith.truncf %61 : vector<50x16xf32> to vector<50x16xbf16>
    %c0_41 = arith.constant 0 : index
    %c5_42 = arith.constant 5 : index
    %c0_43 = arith.constant 0 : index
    %c0_44 = arith.constant 0 : index
    %63 = vector.load %arg3[%c0_41, %c5_42, %c0_43, %c0_44] : memref<1x16x16x128xbf16, #tpu.memory_space<vmem>>, vector<1x1x16x128xbf16>
    %64 = vector.shape_cast %63 : vector<1x1x16x128xbf16> to vector<16x128xbf16>
    %cst_45 = arith.constant dense<0.000000e+00> : vector<50x128xf32>
    %65 = tpu.matmul %62, %64, %cst_45 {dimension_numbers = #tpu.dot_dimension_numbers<[1], [0], [0], [1], [0, 0, 1, 1], [], []>} : vector<50x16xbf16>, vector<16x128xbf16>, vector<50x128xf32> -> vector<50x128xf32>
    %66 = arith.addf %55, %65 : vector<50x128xf32>
    %c1_i32_46 = arith.constant 1 : i32
    %67 = arith.muli %arg0, %c1_i32_46 : i32
    %c0_i32_47 = arith.constant 0 : i32
    %68 = arith.addi %67, %c0_i32_47 : i32
    %69 = arith.index_cast %68 : i32 to index
    %c6 = arith.constant 6 : index
    %70 = memref.load %arg1[%69, %c6] : memref<1x16xi32, #tpu.memory_space<smem>>
    %71 = arith.index_cast %70 : i32 to index
    %c0_48 = arith.constant 0 : index
    %72 = vector.load %arg2[%71, %c0_48] : memref<208x16xf32, #tpu.memory_space<vmem>>, vector<50x16xf32>
    %73 = arith.truncf %72 : vector<50x16xf32> to vector<50x16xbf16>
    %c0_49 = arith.constant 0 : index
    %c6_50 = arith.constant 6 : index
    %c0_51 = arith.constant 0 : index
    %c0_52 = arith.constant 0 : index
    %74 = vector.load %arg3[%c0_49, %c6_50, %c0_51, %c0_52] : memref<1x16x16x128xbf16, #tpu.memory_space<vmem>>, vector<1x1x16x128xbf16>
    %75 = vector.shape_cast %74 : vector<1x1x16x128xbf16> to vector<16x128xbf16>
    %cst_53 = arith.constant dense<0.000000e+00> : vector<50x128xf32>
    %76 = tpu.matmul %73, %75, %cst_53 {dimension_numbers = #tpu.dot_dimension_numbers<[1], [0], [0], [1], [0, 0, 1, 1], [], []>} : vector<50x16xbf16>, vector<16x128xbf16>, vector<50x128xf32> -> vector<50x128xf32>
    %77 = arith.addf %66, %76 : vector<50x128xf32>
    %c1_i32_54 = arith.constant 1 : i32
    %78 = arith.muli %arg0, %c1_i32_54 : i32
    %c0_i32_55 = arith.constant 0 : i32
    %79 = arith.addi %78, %c0_i32_55 : i32
    %80 = arith.index_cast %79 : i32 to index
    %c7 = arith.constant 7 : index
    %81 = memref.load %arg1[%80, %c7] : memref<1x16xi32, #tpu.memory_space<smem>>
    %82 = arith.index_cast %81 : i32 to index
    %c0_56 = arith.constant 0 : index
    %83 = vector.load %arg2[%82, %c0_56] : memref<208x16xf32, #tpu.memory_space<vmem>>, vector<50x16xf32>
    %84 = arith.truncf %83 : vector<50x16xf32> to vector<50x16xbf16>
    %c0_57 = arith.constant 0 : index
    %c7_58 = arith.constant 7 : index
    %c0_59 = arith.constant 0 : index
    %c0_60 = arith.constant 0 : index
    %85 = vector.load %arg3[%c0_57, %c7_58, %c0_59, %c0_60] : memref<1x16x16x128xbf16, #tpu.memory_space<vmem>>, vector<1x1x16x128xbf16>
    %86 = vector.shape_cast %85 : vector<1x1x16x128xbf16> to vector<16x128xbf16>
    %cst_61 = arith.constant dense<0.000000e+00> : vector<50x128xf32>
    %87 = tpu.matmul %84, %86, %cst_61 {dimension_numbers = #tpu.dot_dimension_numbers<[1], [0], [0], [1], [0, 0, 1, 1], [], []>} : vector<50x16xbf16>, vector<16x128xbf16>, vector<50x128xf32> -> vector<50x128xf32>
    %88 = arith.addf %77, %87 : vector<50x128xf32>
    %c1_i32_62 = arith.constant 1 : i32
    %89 = arith.muli %arg0, %c1_i32_62 : i32
    %c0_i32_63 = arith.constant 0 : i32
    %90 = arith.addi %89, %c0_i32_63 : i32
    %91 = arith.index_cast %90 : i32 to index
    %c8 = arith.constant 8 : index
    %92 = memref.load %arg1[%91, %c8] : memref<1x16xi32, #tpu.memory_space<smem>>
    %93 = arith.index_cast %92 : i32 to index
    %c0_64 = arith.constant 0 : index
    %94 = vector.load %arg2[%93, %c0_64] : memref<208x16xf32, #tpu.memory_space<vmem>>, vector<50x16xf32>
    %95 = arith.truncf %94 : vector<50x16xf32> to vector<50x16xbf16>
    %c0_65 = arith.constant 0 : index
    %c8_66 = arith.constant 8 : index
    %c0_67 = arith.constant 0 : index
    %c0_68 = arith.constant 0 : index
    %96 = vector.load %arg3[%c0_65, %c8_66, %c0_67, %c0_68] : memref<1x16x16x128xbf16, #tpu.memory_space<vmem>>, vector<1x1x16x128xbf16>
    %97 = vector.shape_cast %96 : vector<1x1x16x128xbf16> to vector<16x128xbf16>
    %cst_69 = arith.constant dense<0.000000e+00> : vector<50x128xf32>
    %98 = tpu.matmul %95, %97, %cst_69 {dimension_numbers = #tpu.dot_dimension_numbers<[1], [0], [0], [1], [0, 0, 1, 1], [], []>} : vector<50x16xbf16>, vector<16x128xbf16>, vector<50x128xf32> -> vector<50x128xf32>
    %99 = arith.addf %88, %98 : vector<50x128xf32>
    %c1_i32_70 = arith.constant 1 : i32
    %100 = arith.muli %arg0, %c1_i32_70 : i32
    %c0_i32_71 = arith.constant 0 : i32
    %101 = arith.addi %100, %c0_i32_71 : i32
    %102 = arith.index_cast %101 : i32 to index
    %c9 = arith.constant 9 : index
    %103 = memref.load %arg1[%102, %c9] : memref<1x16xi32, #tpu.memory_space<smem>>
    %104 = arith.index_cast %103 : i32 to index
    %c0_72 = arith.constant 0 : index
    %105 = vector.load %arg2[%104, %c0_72] : memref<208x16xf32, #tpu.memory_space<vmem>>, vector<50x16xf32>
    %106 = arith.truncf %105 : vector<50x16xf32> to vector<50x16xbf16>
    %c0_73 = arith.constant 0 : index
    %c9_74 = arith.constant 9 : index
    %c0_75 = arith.constant 0 : index
    %c0_76 = arith.constant 0 : index
    %107 = vector.load %arg3[%c0_73, %c9_74, %c0_75, %c0_76] : memref<1x16x16x128xbf16, #tpu.memory_space<vmem>>, vector<1x1x16x128xbf16>
    %108 = vector.shape_cast %107 : vector<1x1x16x128xbf16> to vector<16x128xbf16>
    %cst_77 = arith.constant dense<0.000000e+00> : vector<50x128xf32>
    %109 = tpu.matmul %106, %108, %cst_77 {dimension_numbers = #tpu.dot_dimension_numbers<[1], [0], [0], [1], [0, 0, 1, 1], [], []>} : vector<50x16xbf16>, vector<16x128xbf16>, vector<50x128xf32> -> vector<50x128xf32>
    %110 = arith.addf %99, %109 : vector<50x128xf32>
    %c1_i32_78 = arith.constant 1 : i32
    %111 = arith.muli %arg0, %c1_i32_78 : i32
    %c0_i32_79 = arith.constant 0 : i32
    %112 = arith.addi %111, %c0_i32_79 : i32
    %113 = arith.index_cast %112 : i32 to index
    %c10 = arith.constant 10 : index
    %114 = memref.load %arg1[%113, %c10] : memref<1x16xi32, #tpu.memory_space<smem>>
    %115 = arith.index_cast %114 : i32 to index
    %c0_80 = arith.constant 0 : index
    %116 = vector.load %arg2[%115, %c0_80] : memref<208x16xf32, #tpu.memory_space<vmem>>, vector<50x16xf32>
    %117 = arith.truncf %116 : vector<50x16xf32> to vector<50x16xbf16>
    %c0_81 = arith.constant 0 : index
    %c10_82 = arith.constant 10 : index
    %c0_83 = arith.constant 0 : index
    %c0_84 = arith.constant 0 : index
    %118 = vector.load %arg3[%c0_81, %c10_82, %c0_83, %c0_84] : memref<1x16x16x128xbf16, #tpu.memory_space<vmem>>, vector<1x1x16x128xbf16>
    %119 = vector.shape_cast %118 : vector<1x1x16x128xbf16> to vector<16x128xbf16>
    %cst_85 = arith.constant dense<0.000000e+00> : vector<50x128xf32>
    %120 = tpu.matmul %117, %119, %cst_85 {dimension_numbers = #tpu.dot_dimension_numbers<[1], [0], [0], [1], [0, 0, 1, 1], [], []>} : vector<50x16xbf16>, vector<16x128xbf16>, vector<50x128xf32> -> vector<50x128xf32>
    %121 = arith.addf %110, %120 : vector<50x128xf32>
    %c1_i32_86 = arith.constant 1 : i32
    %122 = arith.muli %arg0, %c1_i32_86 : i32
    %c0_i32_87 = arith.constant 0 : i32
    %123 = arith.addi %122, %c0_i32_87 : i32
    %124 = arith.index_cast %123 : i32 to index
    %c11 = arith.constant 11 : index
    %125 = memref.load %arg1[%124, %c11] : memref<1x16xi32, #tpu.memory_space<smem>>
    %126 = arith.index_cast %125 : i32 to index
    %c0_88 = arith.constant 0 : index
    %127 = vector.load %arg2[%126, %c0_88] : memref<208x16xf32, #tpu.memory_space<vmem>>, vector<50x16xf32>
    %128 = arith.truncf %127 : vector<50x16xf32> to vector<50x16xbf16>
    %c0_89 = arith.constant 0 : index
    %c11_90 = arith.constant 11 : index
    %c0_91 = arith.constant 0 : index
    %c0_92 = arith.constant 0 : index
    %129 = vector.load %arg3[%c0_89, %c11_90, %c0_91, %c0_92] : memref<1x16x16x128xbf16, #tpu.memory_space<vmem>>, vector<1x1x16x128xbf16>
    %130 = vector.shape_cast %129 : vector<1x1x16x128xbf16> to vector<16x128xbf16>
    %cst_93 = arith.constant dense<0.000000e+00> : vector<50x128xf32>
    %131 = tpu.matmul %128, %130, %cst_93 {dimension_numbers = #tpu.dot_dimension_numbers<[1], [0], [0], [1], [0, 0, 1, 1], [], []>} : vector<50x16xbf16>, vector<16x128xbf16>, vector<50x128xf32> -> vector<50x128xf32>
    %132 = arith.addf %121, %131 : vector<50x128xf32>
    %c1_i32_94 = arith.constant 1 : i32
    %133 = arith.muli %arg0, %c1_i32_94 : i32
    %c0_i32_95 = arith.constant 0 : i32
    %134 = arith.addi %133, %c0_i32_95 : i32
    %135 = arith.index_cast %134 : i32 to index
    %c12 = arith.constant 12 : index
    %136 = memref.load %arg1[%135, %c12] : memref<1x16xi32, #tpu.memory_space<smem>>
    %137 = arith.index_cast %136 : i32 to index
    %c0_96 = arith.constant 0 : index
    %138 = vector.load %arg2[%137, %c0_96] : memref<208x16xf32, #tpu.memory_space<vmem>>, vector<50x16xf32>
    %139 = arith.truncf %138 : vector<50x16xf32> to vector<50x16xbf16>
    %c0_97 = arith.constant 0 : index
    %c12_98 = arith.constant 12 : index
    %c0_99 = arith.constant 0 : index
    %c0_100 = arith.constant 0 : index
    %140 = vector.load %arg3[%c0_97, %c12_98, %c0_99, %c0_100] : memref<1x16x16x128xbf16, #tpu.memory_space<vmem>>, vector<1x1x16x128xbf16>
    %141 = vector.shape_cast %140 : vector<1x1x16x128xbf16> to vector<16x128xbf16>
    %cst_101 = arith.constant dense<0.000000e+00> : vector<50x128xf32>
    %142 = tpu.matmul %139, %141, %cst_101 {dimension_numbers = #tpu.dot_dimension_numbers<[1], [0], [0], [1], [0, 0, 1, 1], [], []>} : vector<50x16xbf16>, vector<16x128xbf16>, vector<50x128xf32> -> vector<50x128xf32>
    %143 = arith.addf %132, %142 : vector<50x128xf32>
    %c1_i32_102 = arith.constant 1 : i32
    %144 = arith.muli %arg0, %c1_i32_102 : i32
    %c0_i32_103 = arith.constant 0 : i32
    %145 = arith.addi %144, %c0_i32_103 : i32
    %146 = arith.index_cast %145 : i32 to index
    %c13 = arith.constant 13 : index
    %147 = memref.load %arg1[%146, %c13] : memref<1x16xi32, #tpu.memory_space<smem>>
    %148 = arith.index_cast %147 : i32 to index
    %c0_104 = arith.constant 0 : index
    %149 = vector.load %arg2[%148, %c0_104] : memref<208x16xf32, #tpu.memory_space<vmem>>, vector<50x16xf32>
    %150 = arith.truncf %149 : vector<50x16xf32> to vector<50x16xbf16>
    %c0_105 = arith.constant 0 : index
    %c13_106 = arith.constant 13 : index
    %c0_107 = arith.constant 0 : index
    %c0_108 = arith.constant 0 : index
    %151 = vector.load %arg3[%c0_105, %c13_106, %c0_107, %c0_108] : memref<1x16x16x128xbf16, #tpu.memory_space<vmem>>, vector<1x1x16x128xbf16>
    %152 = vector.shape_cast %151 : vector<1x1x16x128xbf16> to vector<16x128xbf16>
    %cst_109 = arith.constant dense<0.000000e+00> : vector<50x128xf32>
    %153 = tpu.matmul %150, %152, %cst_109 {dimension_numbers = #tpu.dot_dimension_numbers<[1], [0], [0], [1], [0, 0, 1, 1], [], []>} : vector<50x16xbf16>, vector<16x128xbf16>, vector<50x128xf32> -> vector<50x128xf32>
    %154 = arith.addf %143, %153 : vector<50x128xf32>
    %c1_i32_110 = arith.constant 1 : i32
    %155 = arith.muli %arg0, %c1_i32_110 : i32
    %c0_i32_111 = arith.constant 0 : i32
    %156 = arith.addi %155, %c0_i32_111 : i32
    %157 = arith.index_cast %156 : i32 to index
    %c14 = arith.constant 14 : index
    %158 = memref.load %arg1[%157, %c14] : memref<1x16xi32, #tpu.memory_space<smem>>
    %159 = arith.index_cast %158 : i32 to index
    %c0_112 = arith.constant 0 : index
    %160 = vector.load %arg2[%159, %c0_112] : memref<208x16xf32, #tpu.memory_space<vmem>>, vector<50x16xf32>
    %161 = arith.truncf %160 : vector<50x16xf32> to vector<50x16xbf16>
    %c0_113 = arith.constant 0 : index
    %c14_114 = arith.constant 14 : index
    %c0_115 = arith.constant 0 : index
    %c0_116 = arith.constant 0 : index
    %162 = vector.load %arg3[%c0_113, %c14_114, %c0_115, %c0_116] : memref<1x16x16x128xbf16, #tpu.memory_space<vmem>>, vector<1x1x16x128xbf16>
    %163 = vector.shape_cast %162 : vector<1x1x16x128xbf16> to vector<16x128xbf16>
    %cst_117 = arith.constant dense<0.000000e+00> : vector<50x128xf32>
    %164 = tpu.matmul %161, %163, %cst_117 {dimension_numbers = #tpu.dot_dimension_numbers<[1], [0], [0], [1], [0, 0, 1, 1], [], []>} : vector<50x16xbf16>, vector<16x128xbf16>, vector<50x128xf32> -> vector<50x128xf32>
    %165 = arith.addf %154, %164 : vector<50x128xf32>
    %c1_i32_118 = arith.constant 1 : i32
    %166 = arith.muli %arg0, %c1_i32_118 : i32
    %c0_i32_119 = arith.constant 0 : i32
    %167 = arith.addi %166, %c0_i32_119 : i32
    %168 = arith.index_cast %167 : i32 to index
    %c15 = arith.constant 15 : index
    %169 = memref.load %arg1[%168, %c15] : memref<1x16xi32, #tpu.memory_space<smem>>
    %170 = arith.index_cast %169 : i32 to index
    %c0_120 = arith.constant 0 : index
    %171 = vector.load %arg2[%170, %c0_120] : memref<208x16xf32, #tpu.memory_space<vmem>>, vector<50x16xf32>
    %172 = arith.truncf %171 : vector<50x16xf32> to vector<50x16xbf16>
    %c0_121 = arith.constant 0 : index
    %c15_122 = arith.constant 15 : index
    %c0_123 = arith.constant 0 : index
    %c0_124 = arith.constant 0 : index
    %173 = vector.load %arg3[%c0_121, %c15_122, %c0_123, %c0_124] : memref<1x16x16x128xbf16, #tpu.memory_space<vmem>>, vector<1x1x16x128xbf16>
    %174 = vector.shape_cast %173 : vector<1x1x16x128xbf16> to vector<16x128xbf16>
    %cst_125 = arith.constant dense<0.000000e+00> : vector<50x128xf32>
    %175 = tpu.matmul %172, %174, %cst_125 {dimension_numbers = #tpu.dot_dimension_numbers<[1], [0], [0], [1], [0, 0, 1, 1], [], []>} : vector<50x16xbf16>, vector<16x128xbf16>, vector<50x128xf32> -> vector<50x128xf32>
    %176 = arith.addf %165, %175 : vector<50x128xf32>
    %c0_126 = arith.constant 0 : index
    %c0_127 = arith.constant 0 : index
    %177 = vector.load %arg4[%c0_126, %c0_127] : memref<1x128xf32, #tpu.memory_space<vmem>>, vector<1x128xf32>
    %178 = vector.broadcast %177 : vector<1x128xf32> to vector<50x128xf32>
    %179 = arith.addf %176, %178 : vector<50x128xf32>
    %cst_128 = arith.constant 0.000000e+00 : f32
    %180 = vector.broadcast %cst_128 : f32 to vector<50x128xf32>
    %181 = arith.cmpf oge, %179, %180 : vector<50x128xf32>
    %cst_129 = arith.constant 2.000000e-01 : f32
    %182 = vector.broadcast %cst_129 : f32 to vector<50x128xf32>
    %183 = arith.mulf %182, %179 : vector<50x128xf32>
    %184 = arith.select %181, %179, %183 : vector<50x128xi1>, vector<50x128xf32>
    %c0_130 = arith.constant 0 : index
    %c0_131 = arith.constant 0 : index
    %c0_132 = arith.constant 0 : index
    %185 = vector.load %arg6[%c0_130, %c0_131, %c0_132] : memref<1x50x128xf32, #tpu.memory_space<vmem>>, vector<1x50x128xf32>
    %186 = vector.shape_cast %185 : vector<1x50x128xf32> to vector<50x128xf32>
    %187 = vector.shape_cast %184 : vector<50x128xf32> to vector<1x50x128xf32>
    tpu.vector_store %arg6[%c0_130, %c0_131, %c0_132], %187 {strides = array<i32>} : memref<1x50x128xf32, #tpu.memory_space<vmem>>, vector<1x50x128xf32>,
    return
  }
  func.func @transform_0(%arg0: i32, %arg1: memref<1x16xi32, #tpu.memory_space<smem>>) -> (i32, i32) {
    %c0_i32 = arith.constant 0 : i32
    %c0_i32_0 = arith.constant 0 : i32
    %c0_i32_1 = arith.constant 0 : i32
    return %c0_i32, %c0_i32_0 : i32, i32
  }
  func.func @transform_1(%arg0: i32, %arg1: memref<1x16xi32, #tpu.memory_space<smem>>) -> (i32, i32, i32, i32) {
    %c0_i32 = arith.constant 0 : i32
    %c0_i32_0 = arith.constant 0 : i32
    %c0_i32_1 = arith.constant 0 : i32
    %c0_i32_2 = arith.constant 0 : i32
    return %arg0, %c0_i32, %c0_i32_0, %c0_i32_1 : i32, i32, i32, i32
  }
  func.func @transform_2(%arg0: i32, %arg1: memref<1x16xi32, #tpu.memory_space<smem>>) -> (i32, i32) {
    %c0_i32 = arith.constant 0 : i32
    %c0_i32_0 = arith.constant 0 : i32
    %c0_i32_1 = arith.constant 0 : i32
    return %c0_i32, %c0_i32_0 : i32, i32
  }
  func.func @transform_3(%arg0: i32, %arg1: memref<1x16xi32, #tpu.memory_space<smem>>) -> (i32, i32) {
    %c0_i32 = arith.constant 0 : i32
    %c0_i32_0 = arith.constant 0 : i32
    %c0_i32_1 = arith.constant 0 : i32
    return %c0_i32, %c0_i32_0 : i32, i32
  }
  func.func @transform_4(%arg0: i32, %arg1: memref<1x16xi32, #tpu.memory_space<smem>>) -> (i32, i32, i32) {
    %c0_i32 = arith.constant 0 : i32
    %c0_i32_0 = arith.constant 0 : i32
    %c0_i32_1 = arith.constant 0 : i32
    return %arg0, %c0_i32, %c0_i32_0 : i32, i32, i32
  }
}

module attributes {stable_mosaic.version = 11 : i64} {
  func.func @_conv_kernel(%arg0: i32, %arg1: memref<4x4xi32, #tpu.memory_space<smem>>, %arg2: memref<88x16xf32, #tpu.memory_space<vmem>>, %arg3: memref<4x4x16x128xbf16, #tpu.memory_space<vmem>>, %arg4: memref<1x128xf32, #tpu.memory_space<vmem>>, %arg5: memref<36x1xf32, #tpu.memory_space<vmem>>, %arg6: memref<4x72x128xf32, #tpu.memory_space<vmem>>) attributes {dimension_semantics = [#tpu.dimension_semantics<parallel>], iteration_bounds = array<i64: 1>, scalar_prefetch = 1 : i64, scratch_operands = 0 : i64, tpu.core_type = #tpu.core_type<tc>, window_params = [{pipeline_mode = #tpu.pipeline_mode<synchronous>, transform_indices = @transform_0, window_bounds = array<i64: 88, 16>}, {transform_indices = @transform_1, window_bounds = array<i64: 4, 4, 16, 128>}, {pipeline_mode = #tpu.pipeline_mode<synchronous>, transform_indices = @transform_2, window_bounds = array<i64: 1, 128>}, {pipeline_mode = #tpu.pipeline_mode<synchronous>, transform_indices = @transform_3, window_bounds = array<i64: 36, 1>}, {transform_indices = @transform_4, window_bounds = array<i64: 4, 72, 128>}]} {
    %cst = arith.constant 0.000000e+00 : f32
    %0 = vector.broadcast %cst : f32 to vector<72x128xf32>
    %c4_i32 = arith.constant 4 : i32
    %1 = arith.muli %arg0, %c4_i32 : i32
    %c0_i32 = arith.constant 0 : i32
    %2 = arith.addi %1, %c0_i32 : i32
    %3 = arith.index_cast %2 : i32 to index
    %c0 = arith.constant 0 : index
    %4 = memref.load %arg1[%3, %c0] : memref<4x4xi32, #tpu.memory_space<smem>>
    %5 = arith.index_cast %4 : i32 to index
    %c0_0 = arith.constant 0 : index
    %6 = vector.load %arg2[%5, %c0_0] : memref<88x16xf32, #tpu.memory_space<vmem>>, vector<72x16xf32>
    %7 = arith.truncf %6 : vector<72x16xf32> to vector<72x16xbf16>
    %c0_1 = arith.constant 0 : index
    %c0_2 = arith.constant 0 : index
    %c0_3 = arith.constant 0 : index
    %c0_4 = arith.constant 0 : index
    %8 = vector.load %arg3[%c0_1, %c0_2, %c0_3, %c0_4] : memref<4x4x16x128xbf16, #tpu.memory_space<vmem>>, vector<1x1x16x128xbf16>
    %9 = vector.shape_cast %8 : vector<1x1x16x128xbf16> to vector<16x128xbf16>
    %cst_5 = arith.constant dense<0.000000e+00> : vector<72x128xf32>
    %10 = tpu.matmul %7, %9, %cst_5 {dimension_numbers = #tpu.dot_dimension_numbers<[1], [0], [0], [1], [0, 0, 1, 1], [], []>} : vector<72x16xbf16>, vector<16x128xbf16>, vector<72x128xf32> -> vector<72x128xf32>
    %11 = arith.addf %0, %10 : vector<72x128xf32>
    %c4_i32_6 = arith.constant 4 : i32
    %12 = arith.muli %arg0, %c4_i32_6 : i32
    %c0_i32_7 = arith.constant 0 : i32
    %13 = arith.addi %12, %c0_i32_7 : i32
    %14 = arith.index_cast %13 : i32 to index
    %c1 = arith.constant 1 : index
    %15 = memref.load %arg1[%14, %c1] : memref<4x4xi32, #tpu.memory_space<smem>>
    %16 = arith.index_cast %15 : i32 to index
    %c0_8 = arith.constant 0 : index
    %17 = vector.load %arg2[%16, %c0_8] : memref<88x16xf32, #tpu.memory_space<vmem>>, vector<72x16xf32>
    %18 = arith.truncf %17 : vector<72x16xf32> to vector<72x16xbf16>
    %c0_9 = arith.constant 0 : index
    %c1_10 = arith.constant 1 : index
    %c0_11 = arith.constant 0 : index
    %c0_12 = arith.constant 0 : index
    %19 = vector.load %arg3[%c0_9, %c1_10, %c0_11, %c0_12] : memref<4x4x16x128xbf16, #tpu.memory_space<vmem>>, vector<1x1x16x128xbf16>
    %20 = vector.shape_cast %19 : vector<1x1x16x128xbf16> to vector<16x128xbf16>
    %cst_13 = arith.constant dense<0.000000e+00> : vector<72x128xf32>
    %21 = tpu.matmul %18, %20, %cst_13 {dimension_numbers = #tpu.dot_dimension_numbers<[1], [0], [0], [1], [0, 0, 1, 1], [], []>} : vector<72x16xbf16>, vector<16x128xbf16>, vector<72x128xf32> -> vector<72x128xf32>
    %22 = arith.addf %11, %21 : vector<72x128xf32>
    %c4_i32_14 = arith.constant 4 : i32
    %23 = arith.muli %arg0, %c4_i32_14 : i32
    %c0_i32_15 = arith.constant 0 : i32
    %24 = arith.addi %23, %c0_i32_15 : i32
    %25 = arith.index_cast %24 : i32 to index
    %c2 = arith.constant 2 : index
    %26 = memref.load %arg1[%25, %c2] : memref<4x4xi32, #tpu.memory_space<smem>>
    %27 = arith.index_cast %26 : i32 to index
    %c0_16 = arith.constant 0 : index
    %28 = vector.load %arg2[%27, %c0_16] : memref<88x16xf32, #tpu.memory_space<vmem>>, vector<72x16xf32>
    %29 = arith.truncf %28 : vector<72x16xf32> to vector<72x16xbf16>
    %c0_17 = arith.constant 0 : index
    %c2_18 = arith.constant 2 : index
    %c0_19 = arith.constant 0 : index
    %c0_20 = arith.constant 0 : index
    %30 = vector.load %arg3[%c0_17, %c2_18, %c0_19, %c0_20] : memref<4x4x16x128xbf16, #tpu.memory_space<vmem>>, vector<1x1x16x128xbf16>
    %31 = vector.shape_cast %30 : vector<1x1x16x128xbf16> to vector<16x128xbf16>
    %cst_21 = arith.constant dense<0.000000e+00> : vector<72x128xf32>
    %32 = tpu.matmul %29, %31, %cst_21 {dimension_numbers = #tpu.dot_dimension_numbers<[1], [0], [0], [1], [0, 0, 1, 1], [], []>} : vector<72x16xbf16>, vector<16x128xbf16>, vector<72x128xf32> -> vector<72x128xf32>
    %33 = arith.addf %22, %32 : vector<72x128xf32>
    %c4_i32_22 = arith.constant 4 : i32
    %34 = arith.muli %arg0, %c4_i32_22 : i32
    %c0_i32_23 = arith.constant 0 : i32
    %35 = arith.addi %34, %c0_i32_23 : i32
    %36 = arith.index_cast %35 : i32 to index
    %c3 = arith.constant 3 : index
    %37 = memref.load %arg1[%36, %c3] : memref<4x4xi32, #tpu.memory_space<smem>>
    %38 = arith.index_cast %37 : i32 to index
    %c0_24 = arith.constant 0 : index
    %39 = vector.load %arg2[%38, %c0_24] : memref<88x16xf32, #tpu.memory_space<vmem>>, vector<72x16xf32>
    %40 = arith.truncf %39 : vector<72x16xf32> to vector<72x16xbf16>
    %c0_25 = arith.constant 0 : index
    %c3_26 = arith.constant 3 : index
    %c0_27 = arith.constant 0 : index
    %c0_28 = arith.constant 0 : index
    %41 = vector.load %arg3[%c0_25, %c3_26, %c0_27, %c0_28] : memref<4x4x16x128xbf16, #tpu.memory_space<vmem>>, vector<1x1x16x128xbf16>
    %42 = vector.shape_cast %41 : vector<1x1x16x128xbf16> to vector<16x128xbf16>
    %cst_29 = arith.constant dense<0.000000e+00> : vector<72x128xf32>
    %43 = tpu.matmul %40, %42, %cst_29 {dimension_numbers = #tpu.dot_dimension_numbers<[1], [0], [0], [1], [0, 0, 1, 1], [], []>} : vector<72x16xbf16>, vector<16x128xbf16>, vector<72x128xf32> -> vector<72x128xf32>
    %44 = arith.addf %33, %43 : vector<72x128xf32>
    %c0_30 = arith.constant 0 : index
    %c0_31 = arith.constant 0 : index
    %45 = vector.load %arg4[%c0_30, %c0_31] : memref<1x128xf32, #tpu.memory_space<vmem>>, vector<1x128xf32>
    %46 = vector.broadcast %45 : vector<1x128xf32> to vector<72x128xf32>
    %47 = arith.addf %44, %46 : vector<72x128xf32>
    %cst_32 = arith.constant 0.000000e+00 : f32
    %48 = vector.broadcast %cst_32 : f32 to vector<72x128xf32>
    %c4_i32_33 = arith.constant 4 : i32
    %49 = arith.muli %arg0, %c4_i32_33 : i32
    %c1_i32 = arith.constant 1 : i32
    %50 = arith.addi %49, %c1_i32 : i32
    %51 = arith.index_cast %50 : i32 to index
    %c0_34 = arith.constant 0 : index
    %52 = memref.load %arg1[%51, %c0_34] : memref<4x4xi32, #tpu.memory_space<smem>>
    %53 = arith.index_cast %52 : i32 to index
    %c0_35 = arith.constant 0 : index
    %54 = vector.load %arg2[%53, %c0_35] : memref<88x16xf32, #tpu.memory_space<vmem>>, vector<72x16xf32>
    %55 = arith.truncf %54 : vector<72x16xf32> to vector<72x16xbf16>
    %c1_36 = arith.constant 1 : index
    %c0_37 = arith.constant 0 : index
    %c0_38 = arith.constant 0 : index
    %c0_39 = arith.constant 0 : index
    %56 = vector.load %arg3[%c1_36, %c0_37, %c0_38, %c0_39] : memref<4x4x16x128xbf16, #tpu.memory_space<vmem>>, vector<1x1x16x128xbf16>
    %57 = vector.shape_cast %56 : vector<1x1x16x128xbf16> to vector<16x128xbf16>
    %cst_40 = arith.constant dense<0.000000e+00> : vector<72x128xf32>
    %58 = tpu.matmul %55, %57, %cst_40 {dimension_numbers = #tpu.dot_dimension_numbers<[1], [0], [0], [1], [0, 0, 1, 1], [], []>} : vector<72x16xbf16>, vector<16x128xbf16>, vector<72x128xf32> -> vector<72x128xf32>
    %59 = arith.addf %48, %58 : vector<72x128xf32>
    %c4_i32_41 = arith.constant 4 : i32
    %60 = arith.muli %arg0, %c4_i32_41 : i32
    %c1_i32_42 = arith.constant 1 : i32
    %61 = arith.addi %60, %c1_i32_42 : i32
    %62 = arith.index_cast %61 : i32 to index
    %c1_43 = arith.constant 1 : index
    %63 = memref.load %arg1[%62, %c1_43] : memref<4x4xi32, #tpu.memory_space<smem>>
    %64 = arith.index_cast %63 : i32 to index
    %c0_44 = arith.constant 0 : index
    %65 = vector.load %arg2[%64, %c0_44] : memref<88x16xf32, #tpu.memory_space<vmem>>, vector<72x16xf32>
    %66 = arith.truncf %65 : vector<72x16xf32> to vector<72x16xbf16>
    %c1_45 = arith.constant 1 : index
    %c1_46 = arith.constant 1 : index
    %c0_47 = arith.constant 0 : index
    %c0_48 = arith.constant 0 : index
    %67 = vector.load %arg3[%c1_45, %c1_46, %c0_47, %c0_48] : memref<4x4x16x128xbf16, #tpu.memory_space<vmem>>, vector<1x1x16x128xbf16>
    %68 = vector.shape_cast %67 : vector<1x1x16x128xbf16> to vector<16x128xbf16>
    %cst_49 = arith.constant dense<0.000000e+00> : vector<72x128xf32>
    %69 = tpu.matmul %66, %68, %cst_49 {dimension_numbers = #tpu.dot_dimension_numbers<[1], [0], [0], [1], [0, 0, 1, 1], [], []>} : vector<72x16xbf16>, vector<16x128xbf16>, vector<72x128xf32> -> vector<72x128xf32>
    %70 = arith.addf %59, %69 : vector<72x128xf32>
    %c4_i32_50 = arith.constant 4 : i32
    %71 = arith.muli %arg0, %c4_i32_50 : i32
    %c1_i32_51 = arith.constant 1 : i32
    %72 = arith.addi %71, %c1_i32_51 : i32
    %73 = arith.index_cast %72 : i32 to index
    %c2_52 = arith.constant 2 : index
    %74 = memref.load %arg1[%73, %c2_52] : memref<4x4xi32, #tpu.memory_space<smem>>
    %75 = arith.index_cast %74 : i32 to index
    %c0_53 = arith.constant 0 : index
    %76 = vector.load %arg2[%75, %c0_53] : memref<88x16xf32, #tpu.memory_space<vmem>>, vector<72x16xf32>
    %77 = arith.truncf %76 : vector<72x16xf32> to vector<72x16xbf16>
    %c1_54 = arith.constant 1 : index
    %c2_55 = arith.constant 2 : index
    %c0_56 = arith.constant 0 : index
    %c0_57 = arith.constant 0 : index
    %78 = vector.load %arg3[%c1_54, %c2_55, %c0_56, %c0_57] : memref<4x4x16x128xbf16, #tpu.memory_space<vmem>>, vector<1x1x16x128xbf16>
    %79 = vector.shape_cast %78 : vector<1x1x16x128xbf16> to vector<16x128xbf16>
    %cst_58 = arith.constant dense<0.000000e+00> : vector<72x128xf32>
    %80 = tpu.matmul %77, %79, %cst_58 {dimension_numbers = #tpu.dot_dimension_numbers<[1], [0], [0], [1], [0, 0, 1, 1], [], []>} : vector<72x16xbf16>, vector<16x128xbf16>, vector<72x128xf32> -> vector<72x128xf32>
    %81 = arith.addf %70, %80 : vector<72x128xf32>
    %c4_i32_59 = arith.constant 4 : i32
    %82 = arith.muli %arg0, %c4_i32_59 : i32
    %c1_i32_60 = arith.constant 1 : i32
    %83 = arith.addi %82, %c1_i32_60 : i32
    %84 = arith.index_cast %83 : i32 to index
    %c3_61 = arith.constant 3 : index
    %85 = memref.load %arg1[%84, %c3_61] : memref<4x4xi32, #tpu.memory_space<smem>>
    %86 = arith.index_cast %85 : i32 to index
    %c0_62 = arith.constant 0 : index
    %87 = vector.load %arg2[%86, %c0_62] : memref<88x16xf32, #tpu.memory_space<vmem>>, vector<72x16xf32>
    %88 = arith.truncf %87 : vector<72x16xf32> to vector<72x16xbf16>
    %c1_63 = arith.constant 1 : index
    %c3_64 = arith.constant 3 : index
    %c0_65 = arith.constant 0 : index
    %c0_66 = arith.constant 0 : index
    %89 = vector.load %arg3[%c1_63, %c3_64, %c0_65, %c0_66] : memref<4x4x16x128xbf16, #tpu.memory_space<vmem>>, vector<1x1x16x128xbf16>
    %90 = vector.shape_cast %89 : vector<1x1x16x128xbf16> to vector<16x128xbf16>
    %cst_67 = arith.constant dense<0.000000e+00> : vector<72x128xf32>
    %91 = tpu.matmul %88, %90, %cst_67 {dimension_numbers = #tpu.dot_dimension_numbers<[1], [0], [0], [1], [0, 0, 1, 1], [], []>} : vector<72x16xbf16>, vector<16x128xbf16>, vector<72x128xf32> -> vector<72x128xf32>
    %92 = arith.addf %81, %91 : vector<72x128xf32>
    %c0_68 = arith.constant 0 : index
    %c0_69 = arith.constant 0 : index
    %93 = vector.load %arg4[%c0_68, %c0_69] : memref<1x128xf32, #tpu.memory_space<vmem>>, vector<1x128xf32>
    %94 = vector.broadcast %93 : vector<1x128xf32> to vector<72x128xf32>
    %95 = arith.addf %92, %94 : vector<72x128xf32>
    %cst_70 = arith.constant 0.000000e+00 : f32
    %96 = vector.broadcast %cst_70 : f32 to vector<72x128xf32>
    %c4_i32_71 = arith.constant 4 : i32
    %97 = arith.muli %arg0, %c4_i32_71 : i32
    %c2_i32 = arith.constant 2 : i32
    %98 = arith.addi %97, %c2_i32 : i32
    %99 = arith.index_cast %98 : i32 to index
    %c0_72 = arith.constant 0 : index
    %100 = memref.load %arg1[%99, %c0_72] : memref<4x4xi32, #tpu.memory_space<smem>>
    %101 = arith.index_cast %100 : i32 to index
    %c0_73 = arith.constant 0 : index
    %102 = vector.load %arg2[%101, %c0_73] : memref<88x16xf32, #tpu.memory_space<vmem>>, vector<72x16xf32>
    %103 = arith.truncf %102 : vector<72x16xf32> to vector<72x16xbf16>
    %c2_74 = arith.constant 2 : index
    %c0_75 = arith.constant 0 : index
    %c0_76 = arith.constant 0 : index
    %c0_77 = arith.constant 0 : index
    %104 = vector.load %arg3[%c2_74, %c0_75, %c0_76, %c0_77] : memref<4x4x16x128xbf16, #tpu.memory_space<vmem>>, vector<1x1x16x128xbf16>
    %105 = vector.shape_cast %104 : vector<1x1x16x128xbf16> to vector<16x128xbf16>
    %cst_78 = arith.constant dense<0.000000e+00> : vector<72x128xf32>
    %106 = tpu.matmul %103, %105, %cst_78 {dimension_numbers = #tpu.dot_dimension_numbers<[1], [0], [0], [1], [0, 0, 1, 1], [], []>} : vector<72x16xbf16>, vector<16x128xbf16>, vector<72x128xf32> -> vector<72x128xf32>
    %107 = arith.addf %96, %106 : vector<72x128xf32>
    %c4_i32_79 = arith.constant 4 : i32
    %108 = arith.muli %arg0, %c4_i32_79 : i32
    %c2_i32_80 = arith.constant 2 : i32
    %109 = arith.addi %108, %c2_i32_80 : i32
    %110 = arith.index_cast %109 : i32 to index
    %c1_81 = arith.constant 1 : index
    %111 = memref.load %arg1[%110, %c1_81] : memref<4x4xi32, #tpu.memory_space<smem>>
    %112 = arith.index_cast %111 : i32 to index
    %c0_82 = arith.constant 0 : index
    %113 = vector.load %arg2[%112, %c0_82] : memref<88x16xf32, #tpu.memory_space<vmem>>, vector<72x16xf32>
    %114 = arith.truncf %113 : vector<72x16xf32> to vector<72x16xbf16>
    %c2_83 = arith.constant 2 : index
    %c1_84 = arith.constant 1 : index
    %c0_85 = arith.constant 0 : index
    %c0_86 = arith.constant 0 : index
    %115 = vector.load %arg3[%c2_83, %c1_84, %c0_85, %c0_86] : memref<4x4x16x128xbf16, #tpu.memory_space<vmem>>, vector<1x1x16x128xbf16>
    %116 = vector.shape_cast %115 : vector<1x1x16x128xbf16> to vector<16x128xbf16>
    %cst_87 = arith.constant dense<0.000000e+00> : vector<72x128xf32>
    %117 = tpu.matmul %114, %116, %cst_87 {dimension_numbers = #tpu.dot_dimension_numbers<[1], [0], [0], [1], [0, 0, 1, 1], [], []>} : vector<72x16xbf16>, vector<16x128xbf16>, vector<72x128xf32> -> vector<72x128xf32>
    %118 = arith.addf %107, %117 : vector<72x128xf32>
    %c4_i32_88 = arith.constant 4 : i32
    %119 = arith.muli %arg0, %c4_i32_88 : i32
    %c2_i32_89 = arith.constant 2 : i32
    %120 = arith.addi %119, %c2_i32_89 : i32
    %121 = arith.index_cast %120 : i32 to index
    %c2_90 = arith.constant 2 : index
    %122 = memref.load %arg1[%121, %c2_90] : memref<4x4xi32, #tpu.memory_space<smem>>
    %123 = arith.index_cast %122 : i32 to index
    %c0_91 = arith.constant 0 : index
    %124 = vector.load %arg2[%123, %c0_91] : memref<88x16xf32, #tpu.memory_space<vmem>>, vector<72x16xf32>
    %125 = arith.truncf %124 : vector<72x16xf32> to vector<72x16xbf16>
    %c2_92 = arith.constant 2 : index
    %c2_93 = arith.constant 2 : index
    %c0_94 = arith.constant 0 : index
    %c0_95 = arith.constant 0 : index
    %126 = vector.load %arg3[%c2_92, %c2_93, %c0_94, %c0_95] : memref<4x4x16x128xbf16, #tpu.memory_space<vmem>>, vector<1x1x16x128xbf16>
    %127 = vector.shape_cast %126 : vector<1x1x16x128xbf16> to vector<16x128xbf16>
    %cst_96 = arith.constant dense<0.000000e+00> : vector<72x128xf32>
    %128 = tpu.matmul %125, %127, %cst_96 {dimension_numbers = #tpu.dot_dimension_numbers<[1], [0], [0], [1], [0, 0, 1, 1], [], []>} : vector<72x16xbf16>, vector<16x128xbf16>, vector<72x128xf32> -> vector<72x128xf32>
    %129 = arith.addf %118, %128 : vector<72x128xf32>
    %c4_i32_97 = arith.constant 4 : i32
    %130 = arith.muli %arg0, %c4_i32_97 : i32
    %c2_i32_98 = arith.constant 2 : i32
    %131 = arith.addi %130, %c2_i32_98 : i32
    %132 = arith.index_cast %131 : i32 to index
    %c3_99 = arith.constant 3 : index
    %133 = memref.load %arg1[%132, %c3_99] : memref<4x4xi32, #tpu.memory_space<smem>>
    %134 = arith.index_cast %133 : i32 to index
    %c0_100 = arith.constant 0 : index
    %135 = vector.load %arg2[%134, %c0_100] : memref<88x16xf32, #tpu.memory_space<vmem>>, vector<72x16xf32>
    %136 = arith.truncf %135 : vector<72x16xf32> to vector<72x16xbf16>
    %c2_101 = arith.constant 2 : index
    %c3_102 = arith.constant 3 : index
    %c0_103 = arith.constant 0 : index
    %c0_104 = arith.constant 0 : index
    %137 = vector.load %arg3[%c2_101, %c3_102, %c0_103, %c0_104] : memref<4x4x16x128xbf16, #tpu.memory_space<vmem>>, vector<1x1x16x128xbf16>
    %138 = vector.shape_cast %137 : vector<1x1x16x128xbf16> to vector<16x128xbf16>
    %cst_105 = arith.constant dense<0.000000e+00> : vector<72x128xf32>
    %139 = tpu.matmul %136, %138, %cst_105 {dimension_numbers = #tpu.dot_dimension_numbers<[1], [0], [0], [1], [0, 0, 1, 1], [], []>} : vector<72x16xbf16>, vector<16x128xbf16>, vector<72x128xf32> -> vector<72x128xf32>
    %140 = arith.addf %129, %139 : vector<72x128xf32>
    %c0_106 = arith.constant 0 : index
    %c0_107 = arith.constant 0 : index
    %141 = vector.load %arg4[%c0_106, %c0_107] : memref<1x128xf32, #tpu.memory_space<vmem>>, vector<1x128xf32>
    %142 = vector.broadcast %141 : vector<1x128xf32> to vector<72x128xf32>
    %143 = arith.addf %140, %142 : vector<72x128xf32>
    %cst_108 = arith.constant 0.000000e+00 : f32
    %144 = vector.broadcast %cst_108 : f32 to vector<72x128xf32>
    %c4_i32_109 = arith.constant 4 : i32
    %145 = arith.muli %arg0, %c4_i32_109 : i32
    %c3_i32 = arith.constant 3 : i32
    %146 = arith.addi %145, %c3_i32 : i32
    %147 = arith.index_cast %146 : i32 to index
    %c0_110 = arith.constant 0 : index
    %148 = memref.load %arg1[%147, %c0_110] : memref<4x4xi32, #tpu.memory_space<smem>>
    %149 = arith.index_cast %148 : i32 to index
    %c0_111 = arith.constant 0 : index
    %150 = vector.load %arg2[%149, %c0_111] : memref<88x16xf32, #tpu.memory_space<vmem>>, vector<72x16xf32>
    %151 = arith.truncf %150 : vector<72x16xf32> to vector<72x16xbf16>
    %c3_112 = arith.constant 3 : index
    %c0_113 = arith.constant 0 : index
    %c0_114 = arith.constant 0 : index
    %c0_115 = arith.constant 0 : index
    %152 = vector.load %arg3[%c3_112, %c0_113, %c0_114, %c0_115] : memref<4x4x16x128xbf16, #tpu.memory_space<vmem>>, vector<1x1x16x128xbf16>
    %153 = vector.shape_cast %152 : vector<1x1x16x128xbf16> to vector<16x128xbf16>
    %cst_116 = arith.constant dense<0.000000e+00> : vector<72x128xf32>
    %154 = tpu.matmul %151, %153, %cst_116 {dimension_numbers = #tpu.dot_dimension_numbers<[1], [0], [0], [1], [0, 0, 1, 1], [], []>} : vector<72x16xbf16>, vector<16x128xbf16>, vector<72x128xf32> -> vector<72x128xf32>
    %155 = arith.addf %144, %154 : vector<72x128xf32>
    %c4_i32_117 = arith.constant 4 : i32
    %156 = arith.muli %arg0, %c4_i32_117 : i32
    %c3_i32_118 = arith.constant 3 : i32
    %157 = arith.addi %156, %c3_i32_118 : i32
    %158 = arith.index_cast %157 : i32 to index
    %c1_119 = arith.constant 1 : index
    %159 = memref.load %arg1[%158, %c1_119] : memref<4x4xi32, #tpu.memory_space<smem>>
    %160 = arith.index_cast %159 : i32 to index
    %c0_120 = arith.constant 0 : index
    %161 = vector.load %arg2[%160, %c0_120] : memref<88x16xf32, #tpu.memory_space<vmem>>, vector<72x16xf32>
    %162 = arith.truncf %161 : vector<72x16xf32> to vector<72x16xbf16>
    %c3_121 = arith.constant 3 : index
    %c1_122 = arith.constant 1 : index
    %c0_123 = arith.constant 0 : index
    %c0_124 = arith.constant 0 : index
    %163 = vector.load %arg3[%c3_121, %c1_122, %c0_123, %c0_124] : memref<4x4x16x128xbf16, #tpu.memory_space<vmem>>, vector<1x1x16x128xbf16>
    %164 = vector.shape_cast %163 : vector<1x1x16x128xbf16> to vector<16x128xbf16>
    %cst_125 = arith.constant dense<0.000000e+00> : vector<72x128xf32>
    %165 = tpu.matmul %162, %164, %cst_125 {dimension_numbers = #tpu.dot_dimension_numbers<[1], [0], [0], [1], [0, 0, 1, 1], [], []>} : vector<72x16xbf16>, vector<16x128xbf16>, vector<72x128xf32> -> vector<72x128xf32>
    %166 = arith.addf %155, %165 : vector<72x128xf32>
    %c4_i32_126 = arith.constant 4 : i32
    %167 = arith.muli %arg0, %c4_i32_126 : i32
    %c3_i32_127 = arith.constant 3 : i32
    %168 = arith.addi %167, %c3_i32_127 : i32
    %169 = arith.index_cast %168 : i32 to index
    %c2_128 = arith.constant 2 : index
    %170 = memref.load %arg1[%169, %c2_128] : memref<4x4xi32, #tpu.memory_space<smem>>
    %171 = arith.index_cast %170 : i32 to index
    %c0_129 = arith.constant 0 : index
    %172 = vector.load %arg2[%171, %c0_129] : memref<88x16xf32, #tpu.memory_space<vmem>>, vector<72x16xf32>
    %173 = arith.truncf %172 : vector<72x16xf32> to vector<72x16xbf16>
    %c3_130 = arith.constant 3 : index
    %c2_131 = arith.constant 2 : index
    %c0_132 = arith.constant 0 : index
    %c0_133 = arith.constant 0 : index
    %174 = vector.load %arg3[%c3_130, %c2_131, %c0_132, %c0_133] : memref<4x4x16x128xbf16, #tpu.memory_space<vmem>>, vector<1x1x16x128xbf16>
    %175 = vector.shape_cast %174 : vector<1x1x16x128xbf16> to vector<16x128xbf16>
    %cst_134 = arith.constant dense<0.000000e+00> : vector<72x128xf32>
    %176 = tpu.matmul %173, %175, %cst_134 {dimension_numbers = #tpu.dot_dimension_numbers<[1], [0], [0], [1], [0, 0, 1, 1], [], []>} : vector<72x16xbf16>, vector<16x128xbf16>, vector<72x128xf32> -> vector<72x128xf32>
    %177 = arith.addf %166, %176 : vector<72x128xf32>
    %c4_i32_135 = arith.constant 4 : i32
    %178 = arith.muli %arg0, %c4_i32_135 : i32
    %c3_i32_136 = arith.constant 3 : i32
    %179 = arith.addi %178, %c3_i32_136 : i32
    %180 = arith.index_cast %179 : i32 to index
    %c3_137 = arith.constant 3 : index
    %181 = memref.load %arg1[%180, %c3_137] : memref<4x4xi32, #tpu.memory_space<smem>>
    %182 = arith.index_cast %181 : i32 to index
    %c0_138 = arith.constant 0 : index
    %183 = vector.load %arg2[%182, %c0_138] : memref<88x16xf32, #tpu.memory_space<vmem>>, vector<72x16xf32>
    %184 = arith.truncf %183 : vector<72x16xf32> to vector<72x16xbf16>
    %c3_139 = arith.constant 3 : index
    %c3_140 = arith.constant 3 : index
    %c0_141 = arith.constant 0 : index
    %c0_142 = arith.constant 0 : index
    %185 = vector.load %arg3[%c3_139, %c3_140, %c0_141, %c0_142] : memref<4x4x16x128xbf16, #tpu.memory_space<vmem>>, vector<1x1x16x128xbf16>
    %186 = vector.shape_cast %185 : vector<1x1x16x128xbf16> to vector<16x128xbf16>
    %cst_143 = arith.constant dense<0.000000e+00> : vector<72x128xf32>
    %187 = tpu.matmul %184, %186, %cst_143 {dimension_numbers = #tpu.dot_dimension_numbers<[1], [0], [0], [1], [0, 0, 1, 1], [], []>} : vector<72x16xbf16>, vector<16x128xbf16>, vector<72x128xf32> -> vector<72x128xf32>
    %188 = arith.addf %177, %187 : vector<72x128xf32>
    %c0_144 = arith.constant 0 : index
    %c0_145 = arith.constant 0 : index
    %189 = vector.load %arg4[%c0_144, %c0_145] : memref<1x128xf32, #tpu.memory_space<vmem>>, vector<1x128xf32>
    %190 = vector.broadcast %189 : vector<1x128xf32> to vector<72x128xf32>
    %191 = arith.addf %188, %190 : vector<72x128xf32>
    %c0_146 = arith.constant 0 : index
    %c0_147 = arith.constant 0 : index
    %192 = vector.load %arg5[%c0_146, %c0_147] : memref<36x1xf32, #tpu.memory_space<vmem>>, vector<36x1xf32>
    %cst_148 = arith.constant 0.000000e+00 : f32
    %193 = vector.broadcast %cst_148 : f32 to vector<1x128xf32>
    %cst_149 = arith.constant 0.000000e+00 : f32
    %194 = vector.broadcast %cst_149 : f32 to vector<1x128xf32>
    %195 = vector.extract_strided_slice %47 {offsets = [0, 0], sizes = [36, 128], strides = [1, 1]} : vector<72x128xf32> to vector<36x128xf32>
    %196 = vector.broadcast %192 : vector<36x1xf32> to vector<36x128xf32>
    %197 = arith.mulf %195, %196 : vector<36x128xf32>
    %cst_150 = arith.constant dense<0.000000e+00> : vector<128xf32>
    %198 = vector.multi_reduction <add>, %197, %cst_150 [0] : vector<36x128xf32> to vector<128xf32>
    %199 = vector.shape_cast %198 : vector<128xf32> to vector<1x128xf32>
    %200 = arith.addf %193, %199 : vector<1x128xf32>
    %201 = arith.mulf %197, %195 : vector<36x128xf32>
    %cst_151 = arith.constant dense<0.000000e+00> : vector<128xf32>
    %202 = vector.multi_reduction <add>, %201, %cst_151 [0] : vector<36x128xf32> to vector<128xf32>
    %203 = vector.shape_cast %202 : vector<128xf32> to vector<1x128xf32>
    %204 = arith.addf %194, %203 : vector<1x128xf32>
    %205 = vector.extract_strided_slice %95 {offsets = [0, 0], sizes = [36, 128], strides = [1, 1]} : vector<72x128xf32> to vector<36x128xf32>
    %206 = vector.broadcast %192 : vector<36x1xf32> to vector<36x128xf32>
    %207 = arith.mulf %205, %206 : vector<36x128xf32>
    %cst_152 = arith.constant dense<0.000000e+00> : vector<128xf32>
    %208 = vector.multi_reduction <add>, %207, %cst_152 [0] : vector<36x128xf32> to vector<128xf32>
    %209 = vector.shape_cast %208 : vector<128xf32> to vector<1x128xf32>
    %210 = arith.addf %200, %209 : vector<1x128xf32>
    %211 = arith.mulf %207, %205 : vector<36x128xf32>
    %cst_153 = arith.constant dense<0.000000e+00> : vector<128xf32>
    %212 = vector.multi_reduction <add>, %211, %cst_153 [0] : vector<36x128xf32> to vector<128xf32>
    %213 = vector.shape_cast %212 : vector<128xf32> to vector<1x128xf32>
    %214 = arith.addf %204, %213 : vector<1x128xf32>
    %215 = vector.extract_strided_slice %143 {offsets = [0, 0], sizes = [36, 128], strides = [1, 1]} : vector<72x128xf32> to vector<36x128xf32>
    %216 = vector.broadcast %192 : vector<36x1xf32> to vector<36x128xf32>
    %217 = arith.mulf %215, %216 : vector<36x128xf32>
    %cst_154 = arith.constant dense<0.000000e+00> : vector<128xf32>
    %218 = vector.multi_reduction <add>, %217, %cst_154 [0] : vector<36x128xf32> to vector<128xf32>
    %219 = vector.shape_cast %218 : vector<128xf32> to vector<1x128xf32>
    %220 = arith.addf %210, %219 : vector<1x128xf32>
    %221 = arith.mulf %217, %215 : vector<36x128xf32>
    %cst_155 = arith.constant dense<0.000000e+00> : vector<128xf32>
    %222 = vector.multi_reduction <add>, %221, %cst_155 [0] : vector<36x128xf32> to vector<128xf32>
    %223 = vector.shape_cast %222 : vector<128xf32> to vector<1x128xf32>
    %224 = arith.addf %214, %223 : vector<1x128xf32>
    %225 = vector.extract_strided_slice %191 {offsets = [0, 0], sizes = [36, 128], strides = [1, 1]} : vector<72x128xf32> to vector<36x128xf32>
    %226 = vector.broadcast %192 : vector<36x1xf32> to vector<36x128xf32>
    %227 = arith.mulf %225, %226 : vector<36x128xf32>
    %cst_156 = arith.constant dense<0.000000e+00> : vector<128xf32>
    %228 = vector.multi_reduction <add>, %227, %cst_156 [0] : vector<36x128xf32> to vector<128xf32>
    %229 = vector.shape_cast %228 : vector<128xf32> to vector<1x128xf32>
    %230 = arith.addf %220, %229 : vector<1x128xf32>
    %231 = arith.mulf %227, %225 : vector<36x128xf32>
    %cst_157 = arith.constant dense<0.000000e+00> : vector<128xf32>
    %232 = vector.multi_reduction <add>, %231, %cst_157 [0] : vector<36x128xf32> to vector<128xf32>
    %233 = vector.shape_cast %232 : vector<128xf32> to vector<1x128xf32>
    %234 = arith.addf %224, %233 : vector<1x128xf32>
    %cst_158 = arith.constant 1.562500e-02 : f32
    %235 = vector.broadcast %cst_158 : f32 to vector<1x128xf32>
    %236 = arith.mulf %230, %235 : vector<1x128xf32>
    %cst_159 = arith.constant 1.562500e-02 : f32
    %237 = vector.broadcast %cst_159 : f32 to vector<1x128xf32>
    %238 = arith.mulf %234, %237 : vector<1x128xf32>
    %239 = arith.mulf %236, %236 : vector<1x128xf32>
    %240 = arith.subf %238, %239 : vector<1x128xf32>
    %cst_160 = arith.constant 9.99999974E-6 : f32
    %241 = vector.broadcast %cst_160 : f32 to vector<1x128xf32>
    %242 = arith.addf %240, %241 : vector<1x128xf32>
    %243 = math.rsqrt %242 : vector<1x128xf32>
    %cst_161 = arith.constant 0.000000e+00 : f32
    %244 = vector.broadcast %cst_161 : f32 to vector<1x128xf32>
    %cst_162 = arith.constant 0.000000e+00 : f32
    %245 = vector.broadcast %cst_162 : f32 to vector<1x128xf32>
    %246 = vector.extract_strided_slice %47 {offsets = [36, 0], sizes = [36, 128], strides = [1, 1]} : vector<72x128xf32> to vector<36x128xf32>
    %247 = vector.broadcast %192 : vector<36x1xf32> to vector<36x128xf32>
    %248 = arith.mulf %246, %247 : vector<36x128xf32>
    %cst_163 = arith.constant dense<0.000000e+00> : vector<128xf32>
    %249 = vector.multi_reduction <add>, %248, %cst_163 [0] : vector<36x128xf32> to vector<128xf32>
    %250 = vector.shape_cast %249 : vector<128xf32> to vector<1x128xf32>
    %251 = arith.addf %244, %250 : vector<1x128xf32>
    %252 = arith.mulf %248, %246 : vector<36x128xf32>
    %cst_164 = arith.constant dense<0.000000e+00> : vector<128xf32>
    %253 = vector.multi_reduction <add>, %252, %cst_164 [0] : vector<36x128xf32> to vector<128xf32>
    %254 = vector.shape_cast %253 : vector<128xf32> to vector<1x128xf32>
    %255 = arith.addf %245, %254 : vector<1x128xf32>
    %256 = vector.extract_strided_slice %95 {offsets = [36, 0], sizes = [36, 128], strides = [1, 1]} : vector<72x128xf32> to vector<36x128xf32>
    %257 = vector.broadcast %192 : vector<36x1xf32> to vector<36x128xf32>
    %258 = arith.mulf %256, %257 : vector<36x128xf32>
    %cst_165 = arith.constant dense<0.000000e+00> : vector<128xf32>
    %259 = vector.multi_reduction <add>, %258, %cst_165 [0] : vector<36x128xf32> to vector<128xf32>
    %260 = vector.shape_cast %259 : vector<128xf32> to vector<1x128xf32>
    %261 = arith.addf %251, %260 : vector<1x128xf32>
    %262 = arith.mulf %258, %256 : vector<36x128xf32>
    %cst_166 = arith.constant dense<0.000000e+00> : vector<128xf32>
    %263 = vector.multi_reduction <add>, %262, %cst_166 [0] : vector<36x128xf32> to vector<128xf32>
    %264 = vector.shape_cast %263 : vector<128xf32> to vector<1x128xf32>
    %265 = arith.addf %255, %264 : vector<1x128xf32>
    %266 = vector.extract_strided_slice %143 {offsets = [36, 0], sizes = [36, 128], strides = [1, 1]} : vector<72x128xf32> to vector<36x128xf32>
    %267 = vector.broadcast %192 : vector<36x1xf32> to vector<36x128xf32>
    %268 = arith.mulf %266, %267 : vector<36x128xf32>
    %cst_167 = arith.constant dense<0.000000e+00> : vector<128xf32>
    %269 = vector.multi_reduction <add>, %268, %cst_167 [0] : vector<36x128xf32> to vector<128xf32>
    %270 = vector.shape_cast %269 : vector<128xf32> to vector<1x128xf32>
    %271 = arith.addf %261, %270 : vector<1x128xf32>
    %272 = arith.mulf %268, %266 : vector<36x128xf32>
    %cst_168 = arith.constant dense<0.000000e+00> : vector<128xf32>
    %273 = vector.multi_reduction <add>, %272, %cst_168 [0] : vector<36x128xf32> to vector<128xf32>
    %274 = vector.shape_cast %273 : vector<128xf32> to vector<1x128xf32>
    %275 = arith.addf %265, %274 : vector<1x128xf32>
    %276 = vector.extract_strided_slice %191 {offsets = [36, 0], sizes = [36, 128], strides = [1, 1]} : vector<72x128xf32> to vector<36x128xf32>
    %277 = vector.broadcast %192 : vector<36x1xf32> to vector<36x128xf32>
    %278 = arith.mulf %276, %277 : vector<36x128xf32>
    %cst_169 = arith.constant dense<0.000000e+00> : vector<128xf32>
    %279 = vector.multi_reduction <add>, %278, %cst_169 [0] : vector<36x128xf32> to vector<128xf32>
    %280 = vector.shape_cast %279 : vector<128xf32> to vector<1x128xf32>
    %281 = arith.addf %271, %280 : vector<1x128xf32>
    %282 = arith.mulf %278, %276 : vector<36x128xf32>
    %cst_170 = arith.constant dense<0.000000e+00> : vector<128xf32>
    %283 = vector.multi_reduction <add>, %282, %cst_170 [0] : vector<36x128xf32> to vector<128xf32>
    %284 = vector.shape_cast %283 : vector<128xf32> to vector<1x128xf32>
    %285 = arith.addf %275, %284 : vector<1x128xf32>
    %cst_171 = arith.constant 1.562500e-02 : f32
    %286 = vector.broadcast %cst_171 : f32 to vector<1x128xf32>
    %287 = arith.mulf %281, %286 : vector<1x128xf32>
    %cst_172 = arith.constant 1.562500e-02 : f32
    %288 = vector.broadcast %cst_172 : f32 to vector<1x128xf32>
    %289 = arith.mulf %285, %288 : vector<1x128xf32>
    %290 = arith.mulf %287, %287 : vector<1x128xf32>
    %291 = arith.subf %289, %290 : vector<1x128xf32>
    %cst_173 = arith.constant 9.99999974E-6 : f32
    %292 = vector.broadcast %cst_173 : f32 to vector<1x128xf32>
    %293 = arith.addf %291, %292 : vector<1x128xf32>
    %294 = math.rsqrt %293 : vector<1x128xf32>
    %295 = vector.extract_strided_slice %47 {offsets = [0, 0], sizes = [36, 128], strides = [1, 1]} : vector<72x128xf32> to vector<36x128xf32>
    %296 = vector.broadcast %236 : vector<1x128xf32> to vector<36x128xf32>
    %297 = arith.subf %295, %296 : vector<36x128xf32>
    %298 = vector.broadcast %243 : vector<1x128xf32> to vector<36x128xf32>
    %299 = arith.mulf %297, %298 : vector<36x128xf32>
    %300 = vector.extract_strided_slice %47 {offsets = [36, 0], sizes = [36, 128], strides = [1, 1]} : vector<72x128xf32> to vector<36x128xf32>
    %301 = vector.broadcast %287 : vector<1x128xf32> to vector<36x128xf32>
    %302 = arith.subf %300, %301 : vector<36x128xf32>
    %303 = vector.broadcast %294 : vector<1x128xf32> to vector<36x128xf32>
    %304 = arith.mulf %302, %303 : vector<36x128xf32>
    %305 = tpu.concatenate %299, %304 in 0 : vector<36x128xf32>, vector<36x128xf32> -> vector<72x128xf32>
    %306 = vector.extract_strided_slice %95 {offsets = [0, 0], sizes = [36, 128], strides = [1, 1]} : vector<72x128xf32> to vector<36x128xf32>
    %307 = vector.broadcast %236 : vector<1x128xf32> to vector<36x128xf32>
    %308 = arith.subf %306, %307 : vector<36x128xf32>
    %309 = vector.broadcast %243 : vector<1x128xf32> to vector<36x128xf32>
    %310 = arith.mulf %308, %309 : vector<36x128xf32>
    %311 = vector.extract_strided_slice %95 {offsets = [36, 0], sizes = [36, 128], strides = [1, 1]} : vector<72x128xf32> to vector<36x128xf32>
    %312 = vector.broadcast %287 : vector<1x128xf32> to vector<36x128xf32>
    %313 = arith.subf %311, %312 : vector<36x128xf32>
    %314 = vector.broadcast %294 : vector<1x128xf32> to vector<36x128xf32>
    %315 = arith.mulf %313, %314 : vector<36x128xf32>
    %316 = tpu.concatenate %310, %315 in 0 : vector<36x128xf32>, vector<36x128xf32> -> vector<72x128xf32>
    %317 = vector.extract_strided_slice %143 {offsets = [0, 0], sizes = [36, 128], strides = [1, 1]} : vector<72x128xf32> to vector<36x128xf32>
    %318 = vector.broadcast %236 : vector<1x128xf32> to vector<36x128xf32>
    %319 = arith.subf %317, %318 : vector<36x128xf32>
    %320 = vector.broadcast %243 : vector<1x128xf32> to vector<36x128xf32>
    %321 = arith.mulf %319, %320 : vector<36x128xf32>
    %322 = vector.extract_strided_slice %143 {offsets = [36, 0], sizes = [36, 128], strides = [1, 1]} : vector<72x128xf32> to vector<36x128xf32>
    %323 = vector.broadcast %287 : vector<1x128xf32> to vector<36x128xf32>
    %324 = arith.subf %322, %323 : vector<36x128xf32>
    %325 = vector.broadcast %294 : vector<1x128xf32> to vector<36x128xf32>
    %326 = arith.mulf %324, %325 : vector<36x128xf32>
    %327 = tpu.concatenate %321, %326 in 0 : vector<36x128xf32>, vector<36x128xf32> -> vector<72x128xf32>
    %328 = vector.extract_strided_slice %191 {offsets = [0, 0], sizes = [36, 128], strides = [1, 1]} : vector<72x128xf32> to vector<36x128xf32>
    %329 = vector.broadcast %236 : vector<1x128xf32> to vector<36x128xf32>
    %330 = arith.subf %328, %329 : vector<36x128xf32>
    %331 = vector.broadcast %243 : vector<1x128xf32> to vector<36x128xf32>
    %332 = arith.mulf %330, %331 : vector<36x128xf32>
    %333 = vector.extract_strided_slice %191 {offsets = [36, 0], sizes = [36, 128], strides = [1, 1]} : vector<72x128xf32> to vector<36x128xf32>
    %334 = vector.broadcast %287 : vector<1x128xf32> to vector<36x128xf32>
    %335 = arith.subf %333, %334 : vector<36x128xf32>
    %336 = vector.broadcast %294 : vector<1x128xf32> to vector<36x128xf32>
    %337 = arith.mulf %335, %336 : vector<36x128xf32>
    %338 = tpu.concatenate %332, %337 in 0 : vector<36x128xf32>, vector<36x128xf32> -> vector<72x128xf32>
    %cst_174 = arith.constant 0.000000e+00 : f32
    %339 = vector.broadcast %cst_174 : f32 to vector<72x128xf32>
    %340 = arith.maximumf %305, %339 : vector<72x128xf32>
    %c0_175 = arith.constant 0 : index
    %c0_176 = arith.constant 0 : index
    %c0_177 = arith.constant 0 : index
    %341 = vector.load %arg6[%c0_175, %c0_176, %c0_177] : memref<4x72x128xf32, #tpu.memory_space<vmem>>, vector<1x72x128xf32>
    %342 = vector.shape_cast %341 : vector<1x72x128xf32> to vector<72x128xf32>
    %343 = vector.shape_cast %340 : vector<72x128xf32> to vector<1x72x128xf32>
    tpu.vector_store %arg6[%c0_175, %c0_176, %c0_177], %343 {strides = array<i32>} : memref<4x72x128xf32, #tpu.memory_space<vmem>>, vector<1x72x128xf32>,
    %cst_178 = arith.constant 0.000000e+00 : f32
    %344 = vector.broadcast %cst_178 : f32 to vector<72x128xf32>
    %345 = arith.maximumf %316, %344 : vector<72x128xf32>
    %c1_179 = arith.constant 1 : index
    %c0_180 = arith.constant 0 : index
    %c0_181 = arith.constant 0 : index
    %346 = vector.load %arg6[%c1_179, %c0_180, %c0_181] : memref<4x72x128xf32, #tpu.memory_space<vmem>>, vector<1x72x128xf32>
    %347 = vector.shape_cast %346 : vector<1x72x128xf32> to vector<72x128xf32>
    %348 = vector.shape_cast %345 : vector<72x128xf32> to vector<1x72x128xf32>
    tpu.vector_store %arg6[%c1_179, %c0_180, %c0_181], %348 {strides = array<i32>} : memref<4x72x128xf32, #tpu.memory_space<vmem>>, vector<1x72x128xf32>,
    %cst_182 = arith.constant 0.000000e+00 : f32
    %349 = vector.broadcast %cst_182 : f32 to vector<72x128xf32>
    %350 = arith.maximumf %327, %349 : vector<72x128xf32>
    %c2_183 = arith.constant 2 : index
    %c0_184 = arith.constant 0 : index
    %c0_185 = arith.constant 0 : index
    %351 = vector.load %arg6[%c2_183, %c0_184, %c0_185] : memref<4x72x128xf32, #tpu.memory_space<vmem>>, vector<1x72x128xf32>
    %352 = vector.shape_cast %351 : vector<1x72x128xf32> to vector<72x128xf32>
    %353 = vector.shape_cast %350 : vector<72x128xf32> to vector<1x72x128xf32>
    tpu.vector_store %arg6[%c2_183, %c0_184, %c0_185], %353 {strides = array<i32>} : memref<4x72x128xf32, #tpu.memory_space<vmem>>, vector<1x72x128xf32>,
    %cst_186 = arith.constant 0.000000e+00 : f32
    %354 = vector.broadcast %cst_186 : f32 to vector<72x128xf32>
    %355 = arith.maximumf %338, %354 : vector<72x128xf32>
    %c3_187 = arith.constant 3 : index
    %c0_188 = arith.constant 0 : index
    %c0_189 = arith.constant 0 : index
    %356 = vector.load %arg6[%c3_187, %c0_188, %c0_189] : memref<4x72x128xf32, #tpu.memory_space<vmem>>, vector<1x72x128xf32>
    %357 = vector.shape_cast %356 : vector<1x72x128xf32> to vector<72x128xf32>
    %358 = vector.shape_cast %355 : vector<72x128xf32> to vector<1x72x128xf32>
    tpu.vector_store %arg6[%c3_187, %c0_188, %c0_189], %358 {strides = array<i32>} : memref<4x72x128xf32, #tpu.memory_space<vmem>>, vector<1x72x128xf32>,
    return
  }
  func.func @transform_0(%arg0: i32, %arg1: memref<4x4xi32, #tpu.memory_space<smem>>) -> (i32, i32) {
    %c0_i32 = arith.constant 0 : i32
    %c0_i32_0 = arith.constant 0 : i32
    %c0_i32_1 = arith.constant 0 : i32
    return %c0_i32, %c0_i32_0 : i32, i32
  }
  func.func @transform_1(%arg0: i32, %arg1: memref<4x4xi32, #tpu.memory_space<smem>>) -> (i32, i32, i32, i32) {
    %c0_i32 = arith.constant 0 : i32
    %c0_i32_0 = arith.constant 0 : i32
    %c0_i32_1 = arith.constant 0 : i32
    %c0_i32_2 = arith.constant 0 : i32
    return %arg0, %c0_i32, %c0_i32_0, %c0_i32_1 : i32, i32, i32, i32
  }
  func.func @transform_2(%arg0: i32, %arg1: memref<4x4xi32, #tpu.memory_space<smem>>) -> (i32, i32) {
    %c0_i32 = arith.constant 0 : i32
    %c0_i32_0 = arith.constant 0 : i32
    %c0_i32_1 = arith.constant 0 : i32
    return %c0_i32, %c0_i32_0 : i32, i32
  }
  func.func @transform_3(%arg0: i32, %arg1: memref<4x4xi32, #tpu.memory_space<smem>>) -> (i32, i32) {
    %c0_i32 = arith.constant 0 : i32
    %c0_i32_0 = arith.constant 0 : i32
    %c0_i32_1 = arith.constant 0 : i32
    return %c0_i32, %c0_i32_0 : i32, i32
  }
  func.func @transform_4(%arg0: i32, %arg1: memref<4x4xi32, #tpu.memory_space<smem>>) -> (i32, i32, i32) {
    %c0_i32 = arith.constant 0 : i32
    %c0_i32_0 = arith.constant 0 : i32
    %c0_i32_1 = arith.constant 0 : i32
    return %arg0, %c0_i32, %c0_i32_0 : i32, i32, i32
  }
}

module attributes {stable_mosaic.version = 11 : i64} {
  func.func @_conv_kernel(%arg0: i32, %arg1: memref<4x4xi32, #tpu.memory_space<smem>>, %arg2: memref<224x32xf32, #tpu.memory_space<vmem>>, %arg3: memref<1x4x32x128xbf16, #tpu.memory_space<vmem>>, %arg4: memref<1x128xf32, #tpu.memory_space<vmem>>, %arg5: memref<100x1xf32, #tpu.memory_space<vmem>>, %arg6: memref<1x200x128xf32, #tpu.memory_space<vmem>>) attributes {dimension_semantics = [#tpu.dimension_semantics<parallel>], iteration_bounds = array<i64: 4>, scalar_prefetch = 1 : i64, scratch_operands = 0 : i64, tpu.core_type = #tpu.core_type<tc>, window_params = [{pipeline_mode = #tpu.pipeline_mode<synchronous>, transform_indices = @transform_0, window_bounds = array<i64: 224, 32>}, {transform_indices = @transform_1, window_bounds = array<i64: 1, 4, 32, 128>}, {pipeline_mode = #tpu.pipeline_mode<synchronous>, transform_indices = @transform_2, window_bounds = array<i64: 1, 128>}, {pipeline_mode = #tpu.pipeline_mode<synchronous>, transform_indices = @transform_3, window_bounds = array<i64: 100, 1>}, {transform_indices = @transform_4, window_bounds = array<i64: 1, 200, 128>}]} {
    %cst = arith.constant 0.000000e+00 : f32
    %0 = vector.broadcast %cst : f32 to vector<200x128xf32>
    %c1_i32 = arith.constant 1 : i32
    %1 = arith.muli %arg0, %c1_i32 : i32
    %c0_i32 = arith.constant 0 : i32
    %2 = arith.addi %1, %c0_i32 : i32
    %3 = arith.index_cast %2 : i32 to index
    %c0 = arith.constant 0 : index
    %4 = memref.load %arg1[%3, %c0] : memref<4x4xi32, #tpu.memory_space<smem>>
    %5 = arith.index_cast %4 : i32 to index
    %c0_0 = arith.constant 0 : index
    %6 = vector.load %arg2[%5, %c0_0] : memref<224x32xf32, #tpu.memory_space<vmem>>, vector<200x32xf32>
    %7 = arith.truncf %6 : vector<200x32xf32> to vector<200x32xbf16>
    %c0_1 = arith.constant 0 : index
    %c0_2 = arith.constant 0 : index
    %c0_3 = arith.constant 0 : index
    %c0_4 = arith.constant 0 : index
    %8 = vector.load %arg3[%c0_1, %c0_2, %c0_3, %c0_4] : memref<1x4x32x128xbf16, #tpu.memory_space<vmem>>, vector<1x1x32x128xbf16>
    %9 = vector.shape_cast %8 : vector<1x1x32x128xbf16> to vector<32x128xbf16>
    %cst_5 = arith.constant dense<0.000000e+00> : vector<200x128xf32>
    %10 = tpu.matmul %7, %9, %cst_5 {dimension_numbers = #tpu.dot_dimension_numbers<[1], [0], [0], [1], [0, 0, 1, 1], [], []>} : vector<200x32xbf16>, vector<32x128xbf16>, vector<200x128xf32> -> vector<200x128xf32>
    %11 = arith.addf %0, %10 : vector<200x128xf32>
    %c1_i32_6 = arith.constant 1 : i32
    %12 = arith.muli %arg0, %c1_i32_6 : i32
    %c0_i32_7 = arith.constant 0 : i32
    %13 = arith.addi %12, %c0_i32_7 : i32
    %14 = arith.index_cast %13 : i32 to index
    %c1 = arith.constant 1 : index
    %15 = memref.load %arg1[%14, %c1] : memref<4x4xi32, #tpu.memory_space<smem>>
    %16 = arith.index_cast %15 : i32 to index
    %c0_8 = arith.constant 0 : index
    %17 = vector.load %arg2[%16, %c0_8] : memref<224x32xf32, #tpu.memory_space<vmem>>, vector<200x32xf32>
    %18 = arith.truncf %17 : vector<200x32xf32> to vector<200x32xbf16>
    %c0_9 = arith.constant 0 : index
    %c1_10 = arith.constant 1 : index
    %c0_11 = arith.constant 0 : index
    %c0_12 = arith.constant 0 : index
    %19 = vector.load %arg3[%c0_9, %c1_10, %c0_11, %c0_12] : memref<1x4x32x128xbf16, #tpu.memory_space<vmem>>, vector<1x1x32x128xbf16>
    %20 = vector.shape_cast %19 : vector<1x1x32x128xbf16> to vector<32x128xbf16>
    %cst_13 = arith.constant dense<0.000000e+00> : vector<200x128xf32>
    %21 = tpu.matmul %18, %20, %cst_13 {dimension_numbers = #tpu.dot_dimension_numbers<[1], [0], [0], [1], [0, 0, 1, 1], [], []>} : vector<200x32xbf16>, vector<32x128xbf16>, vector<200x128xf32> -> vector<200x128xf32>
    %22 = arith.addf %11, %21 : vector<200x128xf32>
    %c1_i32_14 = arith.constant 1 : i32
    %23 = arith.muli %arg0, %c1_i32_14 : i32
    %c0_i32_15 = arith.constant 0 : i32
    %24 = arith.addi %23, %c0_i32_15 : i32
    %25 = arith.index_cast %24 : i32 to index
    %c2 = arith.constant 2 : index
    %26 = memref.load %arg1[%25, %c2] : memref<4x4xi32, #tpu.memory_space<smem>>
    %27 = arith.index_cast %26 : i32 to index
    %c0_16 = arith.constant 0 : index
    %28 = vector.load %arg2[%27, %c0_16] : memref<224x32xf32, #tpu.memory_space<vmem>>, vector<200x32xf32>
    %29 = arith.truncf %28 : vector<200x32xf32> to vector<200x32xbf16>
    %c0_17 = arith.constant 0 : index
    %c2_18 = arith.constant 2 : index
    %c0_19 = arith.constant 0 : index
    %c0_20 = arith.constant 0 : index
    %30 = vector.load %arg3[%c0_17, %c2_18, %c0_19, %c0_20] : memref<1x4x32x128xbf16, #tpu.memory_space<vmem>>, vector<1x1x32x128xbf16>
    %31 = vector.shape_cast %30 : vector<1x1x32x128xbf16> to vector<32x128xbf16>
    %cst_21 = arith.constant dense<0.000000e+00> : vector<200x128xf32>
    %32 = tpu.matmul %29, %31, %cst_21 {dimension_numbers = #tpu.dot_dimension_numbers<[1], [0], [0], [1], [0, 0, 1, 1], [], []>} : vector<200x32xbf16>, vector<32x128xbf16>, vector<200x128xf32> -> vector<200x128xf32>
    %33 = arith.addf %22, %32 : vector<200x128xf32>
    %c1_i32_22 = arith.constant 1 : i32
    %34 = arith.muli %arg0, %c1_i32_22 : i32
    %c0_i32_23 = arith.constant 0 : i32
    %35 = arith.addi %34, %c0_i32_23 : i32
    %36 = arith.index_cast %35 : i32 to index
    %c3 = arith.constant 3 : index
    %37 = memref.load %arg1[%36, %c3] : memref<4x4xi32, #tpu.memory_space<smem>>
    %38 = arith.index_cast %37 : i32 to index
    %c0_24 = arith.constant 0 : index
    %39 = vector.load %arg2[%38, %c0_24] : memref<224x32xf32, #tpu.memory_space<vmem>>, vector<200x32xf32>
    %40 = arith.truncf %39 : vector<200x32xf32> to vector<200x32xbf16>
    %c0_25 = arith.constant 0 : index
    %c3_26 = arith.constant 3 : index
    %c0_27 = arith.constant 0 : index
    %c0_28 = arith.constant 0 : index
    %41 = vector.load %arg3[%c0_25, %c3_26, %c0_27, %c0_28] : memref<1x4x32x128xbf16, #tpu.memory_space<vmem>>, vector<1x1x32x128xbf16>
    %42 = vector.shape_cast %41 : vector<1x1x32x128xbf16> to vector<32x128xbf16>
    %cst_29 = arith.constant dense<0.000000e+00> : vector<200x128xf32>
    %43 = tpu.matmul %40, %42, %cst_29 {dimension_numbers = #tpu.dot_dimension_numbers<[1], [0], [0], [1], [0, 0, 1, 1], [], []>} : vector<200x32xbf16>, vector<32x128xbf16>, vector<200x128xf32> -> vector<200x128xf32>
    %44 = arith.addf %33, %43 : vector<200x128xf32>
    %c0_30 = arith.constant 0 : index
    %c0_31 = arith.constant 0 : index
    %45 = vector.load %arg4[%c0_30, %c0_31] : memref<1x128xf32, #tpu.memory_space<vmem>>, vector<1x128xf32>
    %46 = vector.broadcast %45 : vector<1x128xf32> to vector<200x128xf32>
    %47 = arith.addf %44, %46 : vector<200x128xf32>
    %48 = arith.negf %47 : vector<200x128xf32>
    %49 = math.exp %48 : vector<200x128xf32>
    %cst_32 = arith.constant 1.000000e+00 : f32
    %50 = vector.broadcast %cst_32 : f32 to vector<200x128xf32>
    %51 = arith.addf %50, %49 : vector<200x128xf32>
    %52 = arith.divf %50, %51 : vector<200x128xf32>
    %c0_33 = arith.constant 0 : index
    %c0_34 = arith.constant 0 : index
    %c0_35 = arith.constant 0 : index
    %53 = vector.load %arg6[%c0_33, %c0_34, %c0_35] : memref<1x200x128xf32, #tpu.memory_space<vmem>>, vector<1x200x128xf32>
    %54 = vector.shape_cast %53 : vector<1x200x128xf32> to vector<200x128xf32>
    %55 = vector.shape_cast %52 : vector<200x128xf32> to vector<1x200x128xf32>
    tpu.vector_store %arg6[%c0_33, %c0_34, %c0_35], %55 {strides = array<i32>} : memref<1x200x128xf32, #tpu.memory_space<vmem>>, vector<1x200x128xf32>,
    return
  }
  func.func @transform_0(%arg0: i32, %arg1: memref<4x4xi32, #tpu.memory_space<smem>>) -> (i32, i32) {
    %c0_i32 = arith.constant 0 : i32
    %c0_i32_0 = arith.constant 0 : i32
    %c0_i32_1 = arith.constant 0 : i32
    return %c0_i32, %c0_i32_0 : i32, i32
  }
  func.func @transform_1(%arg0: i32, %arg1: memref<4x4xi32, #tpu.memory_space<smem>>) -> (i32, i32, i32, i32) {
    %c0_i32 = arith.constant 0 : i32
    %c0_i32_0 = arith.constant 0 : i32
    %c0_i32_1 = arith.constant 0 : i32
    %c0_i32_2 = arith.constant 0 : i32
    return %arg0, %c0_i32, %c0_i32_0, %c0_i32_1 : i32, i32, i32, i32
  }
  func.func @transform_2(%arg0: i32, %arg1: memref<4x4xi32, #tpu.memory_space<smem>>) -> (i32, i32) {
    %c0_i32 = arith.constant 0 : i32
    %c0_i32_0 = arith.constant 0 : i32
    %c0_i32_1 = arith.constant 0 : i32
    return %c0_i32, %c0_i32_0 : i32, i32
  }
  func.func @transform_3(%arg0: i32, %arg1: memref<4x4xi32, #tpu.memory_space<smem>>) -> (i32, i32) {
    %c0_i32 = arith.constant 0 : i32
    %c0_i32_0 = arith.constant 0 : i32
    %c0_i32_1 = arith.constant 0 : i32
    return %c0_i32, %c0_i32_0 : i32, i32
  }
  func.func @transform_4(%arg0: i32, %arg1: memref<4x4xi32, #tpu.memory_space<smem>>) -> (i32, i32, i32) {
    %c0_i32 = arith.constant 0 : i32
    %c0_i32_0 = arith.constant 0 : i32
    %c0_i32_1 = arith.constant 0 : i32
    return %arg0, %c0_i32, %c0_i32_0 : i32, i32, i32
  }
}

</mosaic_0001>

<bundles_post_ra>
// kernel: good_network_forward.5
= control target key start
LH: loop header
LB: loop body
LE: loop exit
PB: predicated region body
PF: predicated region fallthrough
CT: control target
= control target key end

     0   :  { %s2642_s0 = inlined_call_operand.vmem [shape: s32[1,16], index: 0, kind: input, shape index: {}]   ;;  %s2643_s1 = inlined_call_operand.vmem [shape: f32[208,16], index: 1, kind: input, shape index: {}]   ;;  %s2644_s2 = inlined_call_operand.vmem [shape: bf16[1,16,16,128], index: 2, kind: input, shape index: {}]   ;;  %s2645_s3 = inlined_call_operand.vmem [shape: f32[1,128], index: 3, kind: input, shape index: {}]   ;;  %s2646_s4 = inlined_call_operand.vmem [shape: f32[25,1], index: 4, kind: input, shape index: {}]   ;;  %s2647_s5 = inlined_call_operand.vmem [shape: f32[1,50,128], index: 5, kind: output, shape index: {}]  }
   0x1   :  { %s10_s20 = sshll.u32 %s2642_s0, 4  ;;  %s11_s20 = int_to_ptr.vmem [resolvable:$true] %s10_s20 }
   0x2   :  { %s2212_s21 = scalar_lea.vmem %s11_s20, 16  ;;  %p2217_p1 = scmp.lt.s32.totalorder %s11_s20, %s11_s20 }
   0x3   :  { %p2213_p0 = scmp.ne.s32.totalorder %s11_s20, %s2212_s21  ;;  %p2218_p2 = scmp.lt.s32.totalorder %s2212_s21, %s2212_s21 }
   0x5   :  { %p2219_p3 = por %p2218_p2, %p2217_p1 }
   0x7   :  { %p2220_p4 = pnand %p2219_p3, %p2213_p0 }
   0x9   :  { %2223 = shalt.err (!%p2220_p4)  }
   0xa   :  { %s2226_s22 = smov [#allocation3]  }
   0xb   :  { %13 = dma.vmem_to_smem %s11_s20, 16, %s2226_s22, [#allocation2] }
   0xc   :  { %2224 = dma.done.wait [#allocation2], 16 }
   0xd   :  { %2225 = vsyncadd [#allocation2], 4294967280 }
   0xe   :  { %15 = sfence }
   0xf   :  { %v2196_v0 = vld [vmem:[%s2644_s2 + $0x8] sm:$0xff]   ;;  %v2197_v1 = vld [vmem:[%s2644_s2 + $0x40] sm:$0xff]   ;;  %s1769_s0 = sld [smem:[#allocation3 + $0x1]]  ;;  %s1830_s28 = sld [smem:[#allocation3 + $0x8]]  ;;  %vm64_vm0 = vcmask 130048   ;;  %v2200_v11 = vld [vmem:[%s2644_s2 + $0x10] sm:$0xff]  }
  0x10   :  { %1975 = vmatprep.subr.bf16.mxu1 %v2196_v0  ;;  %2055 = vmatprep.subr.bf16.mxu0 %v2197_v1  ;;  %v2198_v2 = vld [vmem:[%s2644_s2] sm:$0xff]   ;;  %v2199_v3 = vld [vmem:[%s2644_s2 + $0x48] sm:$0xff]   ;;  %s26_s6 = sld [smem:[#allocation3]]  ;;  %s1838_s7 = sld [smem:[#allocation3 + $0x9]]  ;;  %v2201_v23 = vld [vmem:[%s2644_s2 + $0x50] sm:$0xff]  }
  0x11   :  { %1976 = vmatpush3.bf16.msra.mxu1 %v2196_v0  ;;  %2056 = vmatpush3.bf16.msra.mxu0 %v2197_v1  ;;  %s1782_s23 = sld [smem:[#allocation3 + $0x2]]  ;;  %v2202_v46 = vld [vmem:[%s2644_s2 + $0x18] sm:$0xff]   ;;  %s1790_s9 = sld [smem:[#allocation3 + $0x3]] }
  0x12   :  { %1985 = vmatprep.subr.bf16.mxu1 %v2198_v2  ;;  %2065 = vmatprep.subr.bf16.mxu0 %v2199_v3  ;;  %s1846_s24 = sld [smem:[#allocation3 + $0xa]]  ;;  %v2203_v47 = vld [vmem:[%s2644_s2 + $0x58] sm:$0xff]   ;;  %s1862_s22 = sld [smem:[#allocation3 + $0xc]] }
  0x13   :  { %s1878_s19 = sld [smem:[#allocation3 + $0xe]] }
  0x15   :  { %s43_s10 = scalar_lea.vmem %s2643_s1, %s1769_s0  ;;  %s861_s13 = scalar_lea.vmem %s2643_s1, %s1830_s28 }
  0x16   :  { %v44_v4 = vld [vmem:[%s43_s10] sm:$0xff]  ;;  %v45_v5 = vld [vmem:[%s43_s10 + $0x8] sm:$0xff]  ;;  %v46_v6 = vld [vmem:[%s43_s10 + $0x10] sm:$0xff]  ;;  %s2285_s18 = scalar_lea.vmem %s2643_s1, %s26_s6  ;;  %s2292_s21 = scalar_lea.vmem %s2643_s1, %s1838_s7 }
  0x17   :  { %v51_v7 = vpack.c.bf16 %v45_v5, %v44_v4  ;;  %v862_v8 = vld [vmem:[%s861_s13] sm:$0xff]  ;;  %v863_v9 = vld [vmem:[%s861_s13 + $0x8] sm:$0xff]  ;;  %v47_v10 = vld [vmem:[%s43_s10 + $0x18] sm:$0xff]  ;;  %s2319_s26 = scalar_lea.vmem %s2643_s1, %s1782_s23  ;;  %s1870_s7 = sld [smem:[#allocation3 + $0xd]] }
  0x18   :  { %v869_v12 = vpack.c.bf16 %v863_v9, %v862_v8  ;;  %v52_v13 = vpack.c.bf16 %v47_v10, %v46_v6  ;;  %v864_v14 = vld [vmem:[%s861_s13 + $0x10] sm:$0xff]  ;;  %v865_v15 = vld [vmem:[%s861_s13 + $0x18] sm:$0xff]  ;;  %v48_v16 = vld [vmem:[%s43_s10 + $0x20] sm:$0xff]  ;;  %s2328_s6 = scalar_lea.vmem %s2643_s1, %s1846_s24  ;;  %s2404_s28 = scalar_lea.vmem %s2643_s1, %s1862_s22 }
  0x19   :  { %1977 = vmatprep.mubr.msk.bf16.mxu1 %vm64_vm0, %v51_v7  ;;  %v870_v17 = vpack.c.bf16 %v865_v15, %v864_v14  ;;  %v49_v18 = vld [vmem:[%s43_s10 + $0x28] sm:$0xff]  ;;  %v866_v19 = vld [vmem:[%s861_s13 + $0x20] sm:$0xff]  ;;  %v50_v24 = vld [vmem:[%s43_s10 + $0x30] sm:$0x3]  ;;  %s1854_s10 = sld [smem:[#allocation3 + $0xb]]  ;;  %s2480_s0 = scalar_lea.vmem %s2643_s1, %s1878_s19 }
  0x1a   :  { %v867_v20 = vld [vmem:[%s861_s13 + $0x28] sm:$0xff]  ;;  %2057 = vmatprep.mubr.msk.bf16.mxu0 %vm64_vm0, %v869_v12  ;;  %1978 = vmatmul.mubr.msk.bf16.vlgmr.msra.gmra.mrb[0].mxu1 %vm64_vm0, %v52_v13  ;;  %v53_v21 = vpack.c.bf16 %v49_v18, %v48_v16  ;;  %v868_v25 = vld [vmem:[%s861_s13 + $0x30] sm:$0x3]  ;;  %v28_v26 = vld [vmem:[%s2285_s18] sm:$0xff]  ;;  %v54_v30 = vpack.c.bf16 %v50_v24, %v50_v24  ;;  %s2357_s13 = scalar_lea.vmem %s2643_s1, %s1790_s9 }
  0x1b   :  { %v871_v22 = vpack.c.bf16 %v867_v20, %v866_v19  ;;  %1986 = vmatpush3.bf16.msra.mxu1 %v2198_v2  ;;  %2058 = vmatmul.mubr.msk.bf16.vlgmr.msra.gmra.mrb[0].mxu0 %vm64_vm0, %v870_v17  ;;  %v29_v27 = vld [vmem:[%s2285_s18 + $0x8] sm:$0xff]  ;;  %v968_v28 = vld [vmem:[%s2292_s21] sm:$0xff]  ;;  %v872_v31 = vpack.c.bf16 %v868_v25, %v868_v25  ;;  %v30_v34 = vld [vmem:[%s2285_s18 + $0x10] sm:$0xff] }
  0x1c   :  { %1981 = vmatprep.mubr.msk.bf16.mxu1 %vm64_vm0, %v53_v21  ;;  %2066 = vmatpush3.bf16.msra.mxu0 %v2199_v3  ;;  %v969_v29 = vld [vmem:[%s2292_s21 + $0x8] sm:$0xff]  ;;  %v35_v32 = vpack.c.bf16 %v29_v27, %v28_v26  ;;  %v31_v35 = vld [vmem:[%s2285_s18 + $0x18] sm:$0xff]  ;;  %v970_v36 = vld [vmem:[%s2292_s21 + $0x10] sm:$0xff] }
  0x1d   :  { %2061 = vmatprep.mubr.msk.bf16.mxu0 %vm64_vm0, %v871_v22  ;;  %1995 = vmatprep.subr.bf16.mxu1 %v2200_v11  ;;  %v975_v33 = vpack.c.bf16 %v969_v29, %v968_v28  ;;  %v971_v37 = vld [vmem:[%s2292_s21 + $0x18] sm:$0xff]  ;;  %v32_v38 = vld [vmem:[%s2285_s18 + $0x20] sm:$0xff]  ;;  %v33_v39 = vld [vmem:[%s2285_s18 + $0x28] sm:$0xff]  ;;  %v36_v42 = vpack.c.bf16 %v31_v35, %v30_v34  ;;  %s2442_s15 = scalar_lea.vmem %s2643_s1, %s1870_s7 }
  0x1e   :  { %2075 = vmatprep.subr.bf16.mxu0 %v2201_v23  ;;  %v972_v40 = vld [vmem:[%s2292_s21 + $0x20] sm:$0xff]  ;;  %v973_v41 = vld [vmem:[%s2292_s21 + $0x28] sm:$0xff]  ;;  %v976_v43 = vpack.c.bf16 %v971_v37, %v970_v36  ;;  %v37_v44 = vpack.c.bf16 %v33_v39, %v32_v38  ;;  %v34_v48 = vld [vmem:[%s2285_s18 + $0x30] sm:$0x3] }
  0x1f   :  { %v977_v45 = vpack.c.bf16 %v973_v41, %v972_v40  ;;  %v974_v49 = vld [vmem:[%s2292_s21 + $0x30] sm:$0x3]  ;;  %v226_v50 = vld [vmem:[%s2319_s26] sm:$0xff]  ;;  %v227_v51 = vld [vmem:[%s2319_s26 + $0x8] sm:$0xff]  ;;  %v38_v54 = vpack.c.bf16 %v34_v48, %v34_v48  ;;  %s2366_s18 = scalar_lea.vmem %s2643_s1, %s1854_s10  ;;  %s1798_s21 = sld [smem:[#allocation3 + $0x4]] }
  0x20   :  { %v1074_v52 = vld [vmem:[%s2328_s6] sm:$0xff]  ;;  %v1075_v53 = vld [vmem:[%s2328_s6 + $0x8] sm:$0xff]  ;;  %v978_v55 = vpack.c.bf16 %v974_v49, %v974_v49  ;;  %v233_v56 = vpack.c.bf16 %v227_v51, %v226_v50  ;;  %v228_v58 = vld [vmem:[%s2319_s26 + $0x10] sm:$0xff] }
  0x21   :  { %v1081_v57 = vpack.c.bf16 %v1075_v53, %v1074_v52  ;;  %v229_v59 = vld [vmem:[%s2319_s26 + $0x18] sm:$0xff]  ;;  %v1076_v60 = vld [vmem:[%s2328_s6 + $0x10] sm:$0xff]  ;;  %v230_v62 = vld [vmem:[%s2319_s26 + $0x20] sm:$0xff] }
  0x22   :  { %1982 = vmatmul.mubr.msk.bf16.gmra.mrb[4].mxu1 %vm64_vm0, %v54_v30  ;;  %v1077_v61 = vld [vmem:[%s2328_s6 + $0x18] sm:$0xff]  ;;  %v231_v63 = vld [vmem:[%s2319_s26 + $0x28] sm:$0xff]  ;;  %v1078_v0 = vld [vmem:[%s2328_s6 + $0x20] sm:$0xff]  ;;  %v234_v2 = vpack.c.bf16 %v229_v59, %v228_v58 }
  0x23   :  { %2062 = vmatmul.mubr.msk.bf16.gmra.mrb[4].mxu0 %vm64_vm0, %v872_v31  ;;  %1987 = vmatprep.mubr.msk.bf16.mxu1 %vm64_vm0, %v35_v32  ;;  %v1079_v1 = vld [vmem:[%s2328_s6 + $0x28] sm:$0xff]  ;;  %v1082_v3 = vpack.c.bf16 %v1077_v61, %v1076_v60  ;;  %v235_v4 = vpack.c.bf16 %v231_v63, %v230_v62  ;;  %v2204_v6 = vld [vmem:[%s2644_s2 + $0x20] sm:$0xff]   ;;  %v232_v8 = vld [vmem:[%s2319_s26 + $0x30] sm:$0x3] }
  0x24   :  { %2067 = vmatprep.mubr.msk.bf16.mxu0 %vm64_vm0, %v975_v33  ;;  %v1083_v5 = vpack.c.bf16 %v1079_v1, %v1078_v0  ;;  %v2205_v7 = vld [vmem:[%s2644_s2 + $0x60] sm:$0xff]   ;;  %v1080_v9 = vld [vmem:[%s2328_s6 + $0x30] sm:$0x3]  ;;  %v1181_v13 = vld [vmem:[%s2366_s18 + $0x8] sm:$0xff]  ;;  %v236_v14 = vpack.c.bf16 %v232_v8, %v232_v8  ;;  %s1806_s6 = sld [smem:[#allocation3 + $0x5]] }
  0x25   :  { %v332_v10 = vld [vmem:[%s2357_s13] sm:$0xff]  ;;  %v1084_v15 = vpack.c.bf16 %v1080_v9, %v1080_v9  ;;  %v334_v18 = vld [vmem:[%s2357_s13 + $0x10] sm:$0xff]  ;;  %v335_v19 = vld [vmem:[%s2357_s13 + $0x18] sm:$0xff]  ;;  %s2395_s24 = scalar_lea.vmem %s2643_s1, %s1798_s21 }
  0x26   :  { %v1180_v12 = vld [vmem:[%s2366_s18] sm:$0xff]  ;;  %v1182_v20 = vld [vmem:[%s2366_s18 + $0x10] sm:$0xff]  ;;  %v1183_v21 = vld [vmem:[%s2366_s18 + $0x18] sm:$0xff]  ;;  %v340_v26 = vpack.c.bf16 %v335_v19, %v334_v18 }
  0x27   :  { %v1187_v17 = vpack.c.bf16 %v1181_v13, %v1180_v12  ;;  %v336_v22 = vld [vmem:[%s2357_s13 + $0x20] sm:$0xff]  ;;  %v1185_v25 = vld [vmem:[%s2366_s18 + $0x28] sm:$0xff]  ;;  %v1188_v27 = vpack.c.bf16 %v1183_v21, %v1182_v20  ;;  %v338_v32 = vld [vmem:[%s2357_s13 + $0x30] sm:$0x3] }
  0x28   :  { %v1184_v24 = vld [vmem:[%s2366_s18 + $0x20] sm:$0xff]  ;;  %v2206_v30 = vld [vmem:[%s2644_s2 + $0x28] sm:$0xff]   ;;  %v1186_v33 = vld [vmem:[%s2366_s18 + $0x30] sm:$0x3]  ;;  %v342_v38 = vpack.c.bf16 %v338_v32, %v338_v32  ;;  %s1814_s18 = sld [smem:[#allocation3 + $0x6]] }
  0x29   :  { %v1189_v29 = vpack.c.bf16 %v1185_v25, %v1184_v24  ;;  %v2207_v31 = vld [vmem:[%s2644_s2 + $0x68] sm:$0xff]   ;;  %v438_v34 = vld [vmem:[%s2395_s24] sm:$0xff]  ;;  %v1190_v39 = vpack.c.bf16 %v1186_v33, %v1186_v33 }
  0x2a   :  { %1988 = vmatmul.mubr.msk.bf16.vlgmr.msra.gmra.mrb[0].mxu1 %vm64_vm0, %v36_v42  ;;  %v439_v35 = vld [vmem:[%s2395_s24 + $0x8] sm:$0xff]  ;;  %v1286_v36 = vld [vmem:[%s2404_s28] sm:$0xff]  ;;  %v440_v42 = vld [vmem:[%s2395_s24 + $0x10] sm:$0xff]  ;;  %s2433_s10 = scalar_lea.vmem %s2643_s1, %s1806_s6 }
  0x2b   :  { %1996 = vmatpush3.bf16.msra.mxu1 %v2200_v11  ;;  %2068 = vmatmul.mubr.msk.bf16.vlgmr.msra.gmra.mrb[0].mxu0 %vm64_vm0, %v976_v43  ;;  %v333_v11 = vld [vmem:[%s2357_s13 + $0x8] sm:$0xff]  ;;  %v445_v40 = vpack.c.bf16 %v439_v35, %v438_v34  ;;  %v441_v43 = vld [vmem:[%s2395_s24 + $0x18] sm:$0xff]  ;;  %v1290_v48 = vld [vmem:[%s2404_s28 + $0x20] sm:$0xff] }
  0x2c   :  { %1991 = vmatprep.mubr.msk.bf16.mxu1 %vm64_vm0, %v37_v44  ;;  %2071 = vmatprep.mubr.msk.bf16.mxu0 %vm64_vm0, %v977_v45  ;;  %v339_v16 = vpack.c.bf16 %v333_v11, %v332_v10  ;;  %v1287_v37 = vld [vmem:[%s2404_s28 + $0x8] sm:$0xff]  ;;  %v1288_v44 = vld [vmem:[%s2404_s28 + $0x10] sm:$0xff]  ;;  %v1289_v45 = vld [vmem:[%s2404_s28 + $0x18] sm:$0xff]  ;;  %v446_v50 = vpack.c.bf16 %v441_v43, %v440_v42 }
  0x2d   :  { %2076 = vmatpush3.bf16.msra.mxu0 %v2201_v23  ;;  %2005 = vmatprep.subr.bf16.mxu1 %v2202_v46  ;;  %v337_v23 = vld [vmem:[%s2357_s13 + $0x28] sm:$0xff]  ;;  %v1293_v41 = vpack.c.bf16 %v1287_v37, %v1286_v36  ;;  %v1294_v51 = vpack.c.bf16 %v1289_v45, %v1288_v44  ;;  %v544_v58 = vld [vmem:[%s2433_s10] sm:$0xff] }
  0x2e   :  { %2085 = vmatprep.subr.bf16.mxu0 %v2203_v47  ;;  %v341_v28 = vpack.c.bf16 %v337_v23, %v336_v22  ;;  %v1291_v49 = vld [vmem:[%s2404_s28 + $0x28] sm:$0xff]  ;;  %v1392_v60 = vld [vmem:[%s2442_s15] sm:$0xff]  ;;  %s2471_s22 = scalar_lea.vmem %s2643_s1, %s1814_s18 }
  0x2f   :  { %v1295_v53 = vpack.c.bf16 %v1291_v49, %v1290_v48  ;;  %v545_v59 = vld [vmem:[%s2433_s10 + $0x8] sm:$0xff]  ;;  %v1396_v8 = vld [vmem:[%s2442_s15 + $0x20] sm:$0xff] }
  0x30   :  { %v1393_v61 = vld [vmem:[%s2442_s15 + $0x8] sm:$0xff]  ;;  %v551_v0 = vpack.c.bf16 %v545_v59, %v544_v58  ;;  %v650_v18 = vld [vmem:[%s2471_s22] sm:$0xff] }
  0x31   :  { %v1399_v1 = vpack.c.bf16 %v1393_v61, %v1392_v60  ;;  %v1397_v9 = vld [vmem:[%s2442_s15 + $0x28] sm:$0xff]  ;;  %v1498_v20 = vld [vmem:[%s2480_s0] sm:$0xff] }
  0x32   :  { %1992 = vmatmul.mubr.msk.bf16.gmra.mrb[8].mxu1 %vm64_vm0, %v38_v54  ;;  %v2208_v54 = vld [vmem:[%s2644_s2 + $0x30] sm:$0xff]   ;;  %v1401_v13 = vpack.c.bf16 %v1397_v9, %v1396_v8  ;;  %v651_v19 = vld [vmem:[%s2471_s22 + $0x8] sm:$0xff]  ;;  %v1502_v32 = vld [vmem:[%s2480_s0 + $0x20] sm:$0xff] }
  0x33   :  { %2072 = vmatmul.mubr.msk.bf16.gmra.mrb[8].mxu0 %vm64_vm0, %v978_v55  ;;  %1997 = vmatprep.mubr.msk.bf16.mxu1 %vm64_vm0, %v233_v56  ;;  %v2209_v55 = vld [vmem:[%s2644_s2 + $0x70] sm:$0xff]   ;;  %v1499_v21 = vld [vmem:[%s2480_s0 + $0x8] sm:$0xff]  ;;  %v657_v24 = vpack.c.bf16 %v651_v19, %v650_v18 }
  0x34   :  { %2077 = vmatprep.mubr.msk.bf16.mxu0 %vm64_vm0, %v1081_v57  ;;  %v444_v56 = vld [vmem:[%s2395_s24 + $0x30] sm:$0x3]  ;;  %v1505_v25 = vpack.c.bf16 %v1499_v21, %v1498_v20  ;;  %v1503_v33 = vld [vmem:[%s2480_s0 + $0x28] sm:$0xff] }
  0x35   :  { %v1292_v57 = vld [vmem:[%s2404_s28 + $0x30] sm:$0x3]  ;;  %v448_v62 = vpack.c.bf16 %v444_v56, %v444_v56  ;;  %s1886_s28 = sld [smem:[#allocation3 + $0xf]]  ;;  %v1507_v37 = vpack.c.bf16 %v1503_v33, %v1502_v32 }
  0x36   :  { %v1296_v63 = vpack.c.bf16 %v1292_v57, %v1292_v57 }
  0x3a   :  { %1998 = vmatmul.mubr.msk.bf16.vlgmr.msra.gmra.mrb[0].mxu1 %vm64_vm0, %v234_v2  ;;  %v546_v2 = vld [vmem:[%s2433_s10 + $0x10] sm:$0xff] }
  0x3b   :  { %2006 = vmatpush3.bf16.msra.mxu1 %v2202_v46  ;;  %2078 = vmatmul.mubr.msk.bf16.vlgmr.msra.gmra.mrb[0].mxu0 %vm64_vm0, %v1082_v3  ;;  %v442_v46 = vld [vmem:[%s2395_s24 + $0x20] sm:$0xff]  ;;  %v547_v3 = vld [vmem:[%s2433_s10 + $0x18] sm:$0xff]  ;;  %s2515_s9 = scalar_lea.vmem %s2643_s1, %s1886_s28 }
  0x3c   :  { %2001 = vmatprep.mubr.msk.bf16.mxu1 %vm64_vm0, %v235_v4  ;;  %2081 = vmatprep.mubr.msk.bf16.mxu0 %vm64_vm0, %v1083_v5  ;;  %v1394_v4 = vld [vmem:[%s2442_s15 + $0x10] sm:$0xff]  ;;  %v1395_v5 = vld [vmem:[%s2442_s15 + $0x18] sm:$0xff]  ;;  %v552_v10 = vpack.c.bf16 %v547_v3, %v546_v2  ;;  %v1604_v42 = vld [vmem:[%s2515_s9] sm:$0xff] }
  0x3d   :  { %2086 = vmatpush3.bf16.msra.mxu0 %v2203_v47  ;;  %2015 = vmatprep.subr.bf16.mxu1 %v2204_v6  ;;  %v443_v47 = vld [vmem:[%s2395_s24 + $0x28] sm:$0xff]  ;;  %v1400_v11 = vpack.c.bf16 %v1395_v5, %v1394_v4  ;;  %v1610_v61 = vld [vmem:[%s2515_s9 + $0x30] sm:$0x3] }
  0x3e   :  { %2095 = vmatprep.subr.bf16.mxu0 %v2205_v7  ;;  %v447_v52 = vpack.c.bf16 %v443_v47, %v442_v46  ;;  %v1605_v43 = vld [vmem:[%s2515_s9 + $0x8] sm:$0xff] }
  0x3f   :  { %v1611_v47 = vpack.c.bf16 %v1605_v43, %v1604_v42 }
  0x42   :  { %2002 = vmatmul.mubr.msk.bf16.gmra.mrb[12].mxu1 %vm64_vm0, %v236_v14  ;;  %v2210_v14 = vld [vmem:[%s2644_s2 + $0x38] sm:$0xff]  }
  0x43   :  { %2082 = vmatmul.mubr.msk.bf16.gmra.mrb[12].mxu0 %vm64_vm0, %v1084_v15  ;;  %2007 = vmatprep.mubr.msk.bf16.mxu1 %vm64_vm0, %v339_v16  ;;  %v2211_v15 = vld [vmem:[%s2644_s2 + $0x78] sm:$0xff]   ;;  %v550_v16 = vld [vmem:[%s2433_s10 + $0x30] sm:$0x3]  ;;  %s1822_s2 = sld [smem:[#allocation3 + $0x7]] }
  0x44   :  { %2087 = vmatprep.mubr.msk.bf16.mxu0 %vm64_vm0, %v1187_v17  ;;  %v1398_v17 = vld [vmem:[%s2442_s15 + $0x30] sm:$0x3]  ;;  %v554_v22 = vpack.c.bf16 %v550_v16, %v550_v16 }
  0x45   :  { %v1402_v23 = vpack.c.bf16 %v1398_v17, %v1398_v17 }
  0x49   :  { %s2509_s6 = scalar_lea.vmem %s2643_s1, %s1822_s2 }
  0x4a   :  { %2008 = vmatmul.mubr.msk.bf16.vlgmr.msra.gmra.mrb[0].mxu1 %vm64_vm0, %v340_v26  ;;  %v652_v26 = vld [vmem:[%s2471_s22 + $0x10] sm:$0xff]  ;;  %v759_v49 = vld [vmem:[%s2509_s6 + $0x18] sm:$0xff] }
  0x4b   :  { %2016 = vmatpush3.bf16.msra.mxu1 %v2204_v6  ;;  %2088 = vmatmul.mubr.msk.bf16.vlgmr.msra.gmra.mrb[0].mxu0 %vm64_vm0, %v1188_v27  ;;  %v548_v6 = vld [vmem:[%s2433_s10 + $0x20] sm:$0xff]  ;;  %v653_v27 = vld [vmem:[%s2471_s22 + $0x18] sm:$0xff]  ;;  %v758_v48 = vld [vmem:[%s2509_s6 + $0x10] sm:$0xff] }
  0x4c   :  { %2011 = vmatprep.mubr.msk.bf16.mxu1 %vm64_vm0, %v341_v28  ;;  %2091 = vmatprep.mubr.msk.bf16.mxu0 %vm64_vm0, %v1189_v29  ;;  %v1500_v28 = vld [vmem:[%s2480_s0 + $0x10] sm:$0xff]  ;;  %v1501_v29 = vld [vmem:[%s2480_s0 + $0x18] sm:$0xff]  ;;  %v658_v34 = vpack.c.bf16 %v653_v27, %v652_v26  ;;  %v764_v56 = vpack.c.bf16 %v759_v49, %v758_v48 }
  0x4d   :  { %2096 = vmatpush3.bf16.msra.mxu0 %v2205_v7  ;;  %2025 = vmatprep.subr.bf16.mxu1 %v2206_v30  ;;  %v549_v7 = vld [vmem:[%s2433_s10 + $0x28] sm:$0xff]  ;;  %v1506_v35 = vpack.c.bf16 %v1501_v29, %v1500_v28  ;;  %v762_v60 = vld [vmem:[%s2509_s6 + $0x30] sm:$0x3] }
  0x4e   :  { %2105 = vmatprep.subr.bf16.mxu0 %v2207_v31  ;;  %v553_v12 = vpack.c.bf16 %v549_v7, %v548_v6 }
  0x52   :  { %2012 = vmatmul.mubr.msk.bf16.gmra.mrb[16].mxu1 %vm64_vm0, %v342_v38  ;;  %v656_v38 = vld [vmem:[%s2471_s22 + $0x30] sm:$0x3] }
  0x53   :  { %2092 = vmatmul.mubr.msk.bf16.gmra.mrb[16].mxu0 %vm64_vm0, %v1190_v39  ;;  %2017 = vmatprep.mubr.msk.bf16.mxu1 %vm64_vm0, %v445_v40  ;;  %v1504_v39 = vld [vmem:[%s2480_s0 + $0x30] sm:$0x3]  ;;  %v756_v40 = vld [vmem:[%s2509_s6] sm:$0xff]  ;;  %v660_v44 = vpack.c.bf16 %v656_v38, %v656_v38 }
  0x54   :  { %2097 = vmatprep.mubr.msk.bf16.mxu0 %vm64_vm0, %v1293_v41  ;;  %v757_v41 = vld [vmem:[%s2509_s6 + $0x8] sm:$0xff]  ;;  %v1508_v45 = vpack.c.bf16 %v1504_v39, %v1504_v39 }
  0x55   :  { %v763_v46 = vpack.c.bf16 %v757_v41, %v756_v40 }
  0x5a   :  { %2018 = vmatmul.mubr.msk.bf16.vlgmr.msra.gmra.mrb[0].mxu1 %vm64_vm0, %v446_v50  ;;  %v1606_v50 = vld [vmem:[%s2515_s9 + $0x10] sm:$0xff] }
  0x5b   :  { %2026 = vmatpush3.bf16.msra.mxu1 %v2206_v30  ;;  %2098 = vmatmul.mubr.msk.bf16.vlgmr.msra.gmra.mrb[0].mxu0 %vm64_vm0, %v1294_v51  ;;  %v654_v30 = vld [vmem:[%s2471_s22 + $0x20] sm:$0xff]  ;;  %v1607_v51 = vld [vmem:[%s2515_s9 + $0x18] sm:$0xff] }
  0x5c   :  { %2021 = vmatprep.mubr.msk.bf16.mxu1 %vm64_vm0, %v447_v52  ;;  %2101 = vmatprep.mubr.msk.bf16.mxu0 %vm64_vm0, %v1295_v53  ;;  %v760_v52 = vld [vmem:[%s2509_s6 + $0x20] sm:$0xff]  ;;  %v761_v53 = vld [vmem:[%s2509_s6 + $0x28] sm:$0xff]  ;;  %v1612_v57 = vpack.c.bf16 %v1607_v51, %v1606_v50 }
  0x5d   :  { %2106 = vmatpush3.bf16.msra.mxu0 %v2207_v31  ;;  %2035 = vmatprep.subr.bf16.mxu1 %v2208_v54  ;;  %v655_v31 = vld [vmem:[%s2471_s22 + $0x28] sm:$0xff]  ;;  %v765_v58 = vpack.c.bf16 %v761_v53, %v760_v52 }
  0x5e   :  { %2115 = vmatprep.subr.bf16.mxu0 %v2209_v55  ;;  %v659_v36 = vpack.c.bf16 %v655_v31, %v654_v30 }
  0x62   :  { %2022 = vmatmul.mubr.msk.bf16.gmra.mrb[20].mxu1 %vm64_vm0, %v448_v62  ;;  %v766_v62 = vpack.c.bf16 %v762_v60, %v762_v60 }
  0x63   :  { %2102 = vmatmul.mubr.msk.bf16.gmra.mrb[20].mxu0 %vm64_vm0, %v1296_v63  ;;  %2027 = vmatprep.mubr.msk.bf16.mxu1 %vm64_vm0, %v551_v0  ;;  %v1614_v63 = vpack.c.bf16 %v1610_v61, %v1610_v61 }
  0x64   :  { %2107 = vmatprep.mubr.msk.bf16.mxu0 %vm64_vm0, %v1399_v1 }
  0x6a   :  { %2028 = vmatmul.mubr.msk.bf16.vlgmr.msra.gmra.mrb[0].mxu1 %vm64_vm0, %v552_v10 }
  0x6b   :  { %2036 = vmatpush3.bf16.msra.mxu1 %v2208_v54  ;;  %2108 = vmatmul.mubr.msk.bf16.vlgmr.msra.gmra.mrb[0].mxu0 %vm64_vm0, %v1400_v11  ;;  %v1608_v54 = vld [vmem:[%s2515_s9 + $0x20] sm:$0xff] }
  0x6c   :  { %2031 = vmatprep.mubr.msk.bf16.mxu1 %vm64_vm0, %v553_v12  ;;  %2111 = vmatprep.mubr.msk.bf16.mxu0 %vm64_vm0, %v1401_v13 }
  0x6d   :  { %2116 = vmatpush3.bf16.msra.mxu0 %v2209_v55  ;;  %2045 = vmatprep.subr.bf16.mxu1 %v2210_v14  ;;  %v1609_v55 = vld [vmem:[%s2515_s9 + $0x28] sm:$0xff] }
  0x6e   :  { %2125 = vmatprep.subr.bf16.mxu0 %v2211_v15  ;;  %v1613_v59 = vpack.c.bf16 %v1609_v55, %v1608_v54 }
  0x72   :  { %2032 = vmatmul.mubr.msk.bf16.gmra.mrb[24].mxu1 %vm64_vm0, %v554_v22 }
  0x73   :  { %2112 = vmatmul.mubr.msk.bf16.gmra.mrb[24].mxu0 %vm64_vm0, %v1402_v23  ;;  %2037 = vmatprep.mubr.msk.bf16.mxu1 %vm64_vm0, %v657_v24 }
  0x74   :  { %2117 = vmatprep.mubr.msk.bf16.mxu0 %vm64_vm0, %v1505_v25 }
  0x7a   :  { %2038 = vmatmul.mubr.msk.bf16.vlgmr.msra.gmra.mrb[0].mxu1 %vm64_vm0, %v658_v34 }
  0x7b   :  { %2046 = vmatpush3.bf16.msra.mxu1 %v2210_v14  ;;  %2118 = vmatmul.mubr.msk.bf16.vlgmr.msra.gmra.mrb[0].mxu0 %vm64_vm0, %v1506_v35 }
  0x7c   :  { %2041 = vmatprep.mubr.msk.bf16.mxu1 %vm64_vm0, %v659_v36  ;;  %2121 = vmatprep.mubr.msk.bf16.mxu0 %vm64_vm0, %v1507_v37 }
  0x7d   :  { %2126 = vmatpush3.bf16.msra.mxu0 %v2211_v15 }
  0x82   :  { %2042 = vmatmul.mubr.msk.bf16.gmra.mrb[28].mxu1 %vm64_vm0, %v660_v44 }
  0x83   :  { %2122 = vmatmul.mubr.msk.bf16.gmra.mrb[28].mxu0 %vm64_vm0, %v1508_v45  ;;  %2047 = vmatprep.mubr.msk.bf16.mxu1 %vm64_vm0, %v763_v46 }
  0x84   :  { %2127 = vmatprep.mubr.msk.bf16.mxu0 %vm64_vm0, %v1611_v47 }
  0x8a   :  { %2048 = vmatmul.mubr.msk.bf16.vlgmr.msra.gmra.mrb[0].mxu1 %vm64_vm0, %v764_v56 }
  0x8b   :  { %2128 = vmatmul.mubr.msk.bf16.vlgmr.msra.gmra.mrb[0].mxu0 %vm64_vm0, %v1612_v57  ;;  %2051 = vmatprep.mubr.msk.bf16.mxu1 %vm64_vm0, %v765_v58 }
  0x8c   :  { %2131 = vmatprep.mubr.msk.bf16.mxu0 %vm64_vm0, %v1613_v59 }
  0x92   :  { %2052 = vmatmul.mubr.msk.bf16.gmra.mrb[32].mxu1 %vm64_vm0, %v766_v62 }
  0x93   :  { %2132 = vmatmul.mubr.msk.bf16.gmra.mrb[32].mxu0 %vm64_vm0, %v1614_v63 }
  0xf5   :  { %v1983_v0 = vpop.f32.mrb[4].mxu1 }
  0xf6   :  { %v127_v1 = vpop.f32.mrb[5].mxu1  ;;  %v2546_v2 = vpop.f32.mrb[4].mxu0 }
  0xf7   :  { %v1984_v3 = vpop.f32.mrb[6].mxu1  ;;  %v2548_v4 = vpop.f32.mrb[5].mxu0 }
  0xf8   :  { %v130_v5 = vpop.f32.mrb[7].mxu1  ;;  %v2064_v6 = vpop.f32.mrb[6].mxu0 }
  0xf9   :  { %v2550_v7 = vpop.f32.mrb[7].mxu0 }
 0x105   :  { %v1993_v8 = vpop.f32.mrb[8].mxu1 }
 0x106   :  { %v218_v9 = vadd.f32 %v1993_v8, %v1983_v0  ;;  %v209_v10 = vpop.f32.mrb[9].mxu1  ;;  %v2552_v11 = vpop.f32.mrb[8].mxu0 }
 0x107   :  { %v210_v12 = vadd.f32 %v209_v10, %v127_v1  ;;  %v1994_v13 = vpop.f32.mrb[10].mxu1  ;;  %v2554_v14 = vpop.f32.mrb[9].mxu0 }
 0x108   :  { %v212_v15 = vpop.f32.mrb[11].mxu1  ;;  %v2074_v16 = vpop.f32.mrb[10].mxu0 }
 0x109   :  { %v213_v17 = vadd.f32 %v212_v15, %v130_v5  ;;  %v2556_v18 = vpop.f32.mrb[11].mxu0 }
 0x115   :  { %v2003_v19 = vpop.f32.mrb[12].mxu1 }
 0x116   :  { %v328_v20 = vadd.f32 %v2003_v19, %v218_v9  ;;  %v308_v21 = vpop.f32.mrb[13].mxu1  ;;  %v2558_v22 = vpop.f32.mrb[12].mxu0 }
 0x117   :  { %v326_v23 = vadd.f32 %v308_v21, %v210_v12  ;;  %v2004_v24 = vpop.f32.mrb[14].mxu1  ;;  %v2560_v25 = vpop.f32.mrb[13].mxu0 }
 0x118   :  { %v311_v26 = vpop.f32.mrb[15].mxu1  ;;  %v2084_v27 = vpop.f32.mrb[14].mxu0 }
 0x119   :  { %v327_v28 = vadd.f32 %v311_v26, %v213_v17  ;;  %v2562_v29 = vpop.f32.mrb[15].mxu0  ;;  %v2591_v17 = vld [vmem:[%s2645_s3] ss:$0 sm:$0xff] }
 0x125   :  { %v2013_v30 = vpop.f32.mrb[16].mxu1 }
 0x126   :  { %v434_v31 = vadd.f32 %v2013_v30, %v328_v20  ;;  %v414_v32 = vpop.f32.mrb[17].mxu1  ;;  %v2564_v33 = vpop.f32.mrb[16].mxu0 }
 0x127   :  { %v432_v34 = vadd.f32 %v414_v32, %v326_v23  ;;  %v2014_v35 = vpop.f32.mrb[18].mxu1  ;;  %v2566_v36 = vpop.f32.mrb[17].mxu0 }
 0x128   :  { %v417_v37 = vpop.f32.mrb[19].mxu1  ;;  %v2094_v38 = vpop.f32.mrb[18].mxu0 }
 0x129   :  { %v433_v39 = vadd.f32 %v417_v37, %v327_v28  ;;  %v2568_v40 = vpop.f32.mrb[19].mxu0 }
 0x135   :  { %v2023_v41 = vpop.f32.mrb[20].mxu1 }
 0x136   :  { %v540_v42 = vadd.f32 %v2023_v41, %v434_v31  ;;  %v520_v43 = vpop.f32.mrb[21].mxu1  ;;  %v2570_v44 = vpop.f32.mrb[20].mxu0 }
 0x137   :  { %v538_v45 = vadd.f32 %v520_v43, %v432_v34  ;;  %v2024_v46 = vpop.f32.mrb[22].mxu1  ;;  %v2572_v47 = vpop.f32.mrb[21].mxu0 }
 0x138   :  { %v523_v48 = vpop.f32.mrb[23].mxu1  ;;  %v2104_v49 = vpop.f32.mrb[22].mxu0 }
 0x139   :  { %v539_v50 = vadd.f32 %v523_v48, %v433_v39  ;;  %v2574_v51 = vpop.f32.mrb[23].mxu0 }
 0x145   :  { %v2033_v52 = vpop.f32.mrb[24].mxu1 }
 0x146   :  { %v646_v53 = vadd.f32 %v2033_v52, %v540_v42  ;;  %v626_v54 = vpop.f32.mrb[25].mxu1  ;;  %v2576_v55 = vpop.f32.mrb[24].mxu0 }
 0x147   :  { %v644_v56 = vadd.f32 %v626_v54, %v538_v45  ;;  %v2034_v57 = vpop.f32.mrb[26].mxu1  ;;  %v2578_v58 = vpop.f32.mrb[25].mxu0 }
 0x148   :  { %v629_v59 = vpop.f32.mrb[27].mxu1  ;;  %v2114_v60 = vpop.f32.mrb[26].mxu0 }
 0x149   :  { %v645_v61 = vadd.f32 %v629_v59, %v539_v50  ;;  %v2580_v62 = vpop.f32.mrb[27].mxu0 }
 0x155   :  { %v2043_v63 = vpop.f32.mrb[28].mxu1 }
 0x156   :  { %v752_v0 = vadd.f32 %v2043_v63, %v646_v53  ;;  %v732_v1 = vpop.f32.mrb[29].mxu1  ;;  %v2582_v3 = vpop.f32.mrb[28].mxu0 }
 0x157   :  { %v750_v5 = vadd.f32 %v732_v1, %v644_v56  ;;  %v2044_v6 = vpop.f32.mrb[30].mxu1  ;;  %v2584_v8 = vpop.f32.mrb[29].mxu0 }
 0x158   :  { %v735_v9 = vpop.f32.mrb[31].mxu1  ;;  %v2124_v10 = vpop.f32.mrb[30].mxu0 }
 0x159   :  { %v751_v12 = vadd.f32 %v735_v9, %v645_v61  ;;  %v2586_v13 = vpop.f32.mrb[31].mxu0 }
 0x15d   :  { %v2049_v15 = vpop.f32.mrb[0].mxu1 }
 0x15e   :  { %v2129_v16 = vpop.f32.mrb[0].mxu0  ;;  %v822_v19 = vpop.f32.mrb[1].mxu1 }
 0x15f   :  { %v2135_v20 = vadd.f32 %v2129_v16, %v2049_v15  ;;  %v1670_v21 = vpop.f32.mrb[1].mxu0  ;;  %v2050_v23 = vpop.f32.mrb[2].mxu1 }
 0x160   :  { %v2136_v24 = vadd.f32 %v1670_v21, %v822_v19  ;;  %v2130_v26 = vpop.f32.mrb[2].mxu0  ;;  %v825_v27 = vpop.f32.mrb[3].mxu1 }
 0x161   :  { %v1716_v28 = vadd.f32 %v2135_v20, %v2591_v17  ;;  %v2137_v30 = vadd.f32 %v2130_v26, %v2050_v23  ;;  %v1673_v31 = vpop.f32.mrb[3].mxu0 }
 0x162   :  { %v1714_v32 = vadd.f32 %v2136_v24, %v2591_v17  ;;  %v2138_v34 = vadd.f32 %v1673_v31, %v825_v27 }
 0x163   :  { %vm1723_vm1 = vcmp.ge.f32.partialorder %v1716_v28, 0.0  ;;  %v1730_v35 = vmul.f32 0.2, %v1716_v28  ;;  %v1717_v37 = vadd.f32 %v2137_v30, %v2591_v17 }
 0x164   :  { %vm1721_vm2 = vcmp.ge.f32.partialorder %v1714_v32, 0.0  ;;  %v1728_v38 = vmul.f32 0.2, %v1714_v32  ;;  %v1715_v39 = vadd.f32 %v2138_v34, %v2591_v17 }
 0x165   :  { %v1737_v41 = vsel %vm1723_vm1, %v1716_v28, %v1730_v35  ;;  %vm1724_vm3 = vcmp.ge.f32.partialorder %v1717_v37, 0.0  ;;  %v1731_v42 = vmul.f32 0.2, %v1717_v37  ;;  %v2053_v43 = vpop.f32.mrb[32].mxu1 }
 0x166   :  { %1744 = vst [vmem:[%s2647_s5 + $0x10] sm:$0xff] %v1737_v41  ;;  %v1735_v45 = vsel %vm1721_vm2, %v1714_v32, %v1728_v38  ;;  %vm1722_vm4 = vcmp.ge.f32.partialorder %v1715_v39, 0.0  ;;  %v1729_v46 = vmul.f32 0.2, %v1715_v39  ;;  %v858_v48 = vadd.f32 %v2053_v43, %v752_v0  ;;  %v838_v49 = vpop.f32.mrb[33].mxu1  ;;  %v2133_v50 = vpop.f32.mrb[32].mxu0 }
 0x167   :  { %1742 = vst [vmem:[%s2647_s5] sm:$0xff] %v1735_v45  ;;  %v1738_v52 = vsel %vm1724_vm3, %v1717_v37, %v1731_v42  ;;  %v856_v53 = vadd.f32 %v838_v49, %v750_v5  ;;  %v2054_v54 = vpop.f32.mrb[34].mxu1  ;;  %v1686_v56 = vpop.f32.mrb[33].mxu0 }
 0x168   :  { %1745 = vst [vmem:[%s2647_s5 + $0x18] sm:$0xff] %v1738_v52  ;;  %v1736_v57 = vsel %vm1722_vm4, %v1715_v39, %v1729_v46  ;;  %v964_v59 = vadd.f32 %v2546_v2, %v858_v48  ;;  %v841_v60 = vpop.f32.mrb[35].mxu1  ;;  %v2134_v61 = vpop.f32.mrb[34].mxu0 }
 0x169   :  { %1743 = vst [vmem:[%s2647_s5 + $0x8] sm:$0xff] %v1736_v57  ;;  %v962_v63 = vadd.f32 %v2548_v4, %v856_v53  ;;  %v857_v0 = vadd.f32 %v841_v60, %v751_v12  ;;  %v1689_v1 = vpop.f32.mrb[35].mxu0 }
 0x16a   :  { %v1070_v5 = vadd.f32 %v2552_v11, %v964_v59 }
 0x16b   :  { %v1068_v6 = vadd.f32 %v2554_v14, %v962_v63  ;;  %v963_v9 = vadd.f32 %v2550_v7, %v857_v0 }
 0x16c   :  { %v1176_v10 = vadd.f32 %v2558_v22, %v1070_v5 }
 0x16d   :  { %v1174_v2 = vadd.f32 %v2560_v25, %v1068_v6  ;;  %v1069_v15 = vadd.f32 %v2556_v18, %v963_v9 }
 0x16e   :  { %v1282_v16 = vadd.f32 %v2564_v33, %v1176_v10 }
 0x16f   :  { %v1175_v19 = vadd.f32 %v2562_v29, %v1069_v15  ;;  %v1280_v4 = vadd.f32 %v2566_v36, %v1174_v2 }
 0x170   :  { %v1388_v12 = vadd.f32 %v2570_v44, %v1282_v16 }
 0x171   :  { %v1386_v11 = vadd.f32 %v2572_v47, %v1280_v4  ;;  %v1281_v14 = vadd.f32 %v2568_v40, %v1175_v19 }
 0x172   :  { %v1494_v7 = vadd.f32 %v2576_v55, %v1388_v12 }
 0x173   :  { %v1492_v22 = vadd.f32 %v2578_v58, %v1386_v11  ;;  %v1387_v25 = vadd.f32 %v2574_v51, %v1281_v14 }
 0x174   :  { %v1600_v18 = vadd.f32 %v2582_v3, %v1494_v7 }
 0x175   :  { %v1598_v33 = vadd.f32 %v2584_v8, %v1492_v22  ;;  %v1493_v29 = vadd.f32 %v2580_v62, %v1387_v25 }
 0x176   :  { %v1706_v20 = vadd.f32 %v2133_v50, %v1600_v18 }
 0x177   :  { %v1704_v36 = vadd.f32 %v1686_v56, %v1598_v33  ;;  %v1599_v44 = vadd.f32 %v2586_v13, %v1493_v29 }
 0x178   :  { %v1720_v47 = vadd.f32 %v2591_v17, %v1706_v20 }
 0x179   :  { %v1718_v40 = vadd.f32 %v2591_v17, %v1704_v36  ;;  %v1705_v21 = vadd.f32 %v1689_v1, %v1599_v44 }
 0x17a   :  { %vm1727_vm5 = vcmp.ge.f32.partialorder %v1720_v47, 0.0  ;;  %v1734_v55 = vmul.f32 0.2, %v1720_v47 }
 0x17b   :  { %vm1725_vm6 = vcmp.ge.f32.partialorder %v1718_v40, 0.0  ;;  %v1732_v58 = vmul.f32 0.2, %v1718_v40  ;;  %v1719_v51 = vadd.f32 %v2591_v17, %v1705_v21 }
 0x17c   :  { %v1741_v3 = vsel %vm1727_vm5, %v1720_v47, %v1734_v55 }
 0x17d   :  { %1748 = vst [vmem:[%s2647_s5 + $0x30] sm:$0x3] %v1741_v3  ;;  %v1739_v62 = vsel %vm1725_vm6, %v1718_v40, %v1732_v58  ;;  %vm1726_vm7 = vcmp.ge.f32.partialorder %v1719_v51, 0.0  ;;  %v1733_v8 = vmul.f32 0.2, %v1719_v51 }
 0x17e   :  { %1746 = vst [vmem:[%s2647_s5 + $0x20] sm:$0xff] %v1739_v62 }
 0x17f   :  { %v1740_v13 = vsel %vm1726_vm7, %v1719_v51, %v1733_v8 }
 0x180   :  { %1747 = vst [vmem:[%s2647_s5 + $0x28] sm:$0xff] %v1740_v13 }

// kernel: good_network_forward.4
= control target key start
LH: loop header
LB: loop body
LE: loop exit
PB: predicated region body
PF: predicated region fallthrough
CT: control target
= control target key end

     0   :  { %s6985_s0 = inlined_call_operand.vmem [shape: s32[1,16], index: 0, kind: input, shape index: {}]   ;;  %s6986_s1 = inlined_call_operand.vmem [shape: f32[664,8], index: 1, kind: input, shape index: {}]   ;;  %s6987_s2 = inlined_call_operand.vmem [shape: bf16[1,16,8,128], index: 2, kind: input, shape index: {}]   ;;  %s6988_s3 = inlined_call_operand.vmem [shape: f32[1,128], index: 3, kind: input, shape index: {}]   ;;  %s6989_s4 = inlined_call_operand.vmem [shape: f32[81,1], index: 4, kind: input, shape index: {}]   ;;  %s6990_s5 = inlined_call_operand.vmem [shape: f32[1,162,128], index: 5, kind: output, shape index: {}]  }
   0x1   :  { %s10_s20 = sshll.u32 %s6985_s0, 4  ;;  %s11_s20 = int_to_ptr.vmem [resolvable:$true] %s10_s20 }
   0x2   :  { %s5044_s21 = scalar_lea.vmem %s11_s20, 16  ;;  %p5049_p1 = scmp.lt.s32.totalorder %s11_s20, %s11_s20 }
   0x3   :  { %p5045_p0 = scmp.ne.s32.totalorder %s11_s20, %s5044_s21  ;;  %p5050_p2 = scmp.lt.s32.totalorder %s5044_s21, %s5044_s21 }
   0x5   :  { %p5051_p3 = por %p5050_p2, %p5049_p1 }
   0x7   :  { %p5052_p4 = pnand %p5051_p3, %p5045_p0 }
   0x9   :  { %5055 = shalt.err (!%p5052_p4)  }
   0xa   :  { %s5058_s22 = smov [#allocation3]  }
   0xb   :  { %13 = dma.vmem_to_smem %s11_s20, 16, %s5058_s22, [#allocation2] }
   0xc   :  { %5056 = dma.done.wait [#allocation2], 16 }
   0xd   :  { %5057 = vsyncadd [#allocation2], 4294967280 }
   0xe   :  { %15 = sfence }
   0xf   :  { %v3900_v0 = vld [vmem:[%s6987_s2 + $0x4] sm:$0xf]  ;;  %vm132_vm0 = vcmask 1043456   ;;  %v60_v1 = vld [vmem:[%s6987_s2] sm:$0xf]  ;;  %v5059_v2 = vmov 0.0  }
  0x10   :  { %4298 = vmatprep.subr.bf16.mxu0 %v5059_v2  ;;  %v134_v3 = vsel %vm132_vm0, %v3900_v0, 0  ;;  %4344 = vmatprep.subr.bf16.mxu1 %v5059_v2  ;;  %v290_v4 = vsel %vm132_vm0, %v60_v1, 0  ;;  %s3899_s26 = sld [smem:[#allocation3 + $0x1]]  ;;  %s26_s27 = sld [smem:[#allocation3]]  ;;  %vm5060_vm1 = vmmov 0   ;;  %vm98_vm2 = vcmask 64512  }
  0x11   :  { %4299 = vmatpush3.bf16.msra.mxu0 %v134_v3  ;;  %4345 = vmatpush3.bf16.msra.mxu1 %v290_v4  ;;  %v3924_v5 = vld [vmem:[%s6987_s2 + $0x8] sm:$0xf]  ;;  %v3937_v6 = vld [vmem:[%s6987_s2 + $0xc] sm:$0xf]  ;;  %s3923_s13 = sld [smem:[#allocation3 + $0x2]]  ;;  %s3936_s14 = sld [smem:[#allocation3 + $0x3]] }
  0x12   :  { %4300 = vmatprep.mubr.msk.bf16.mxu0 %vm5060_vm1, %v5059_v2  ;;  %4346 = vmatprep.mubr.msk.bf16.mxu1 %vm5060_vm1, %v5059_v2  ;;  %v483_v12 = vsel %vm132_vm0, %v3924_v5, 0  ;;  %v697_v14 = vsel %vm132_vm0, %v3937_v6, 0  ;;  %s3949_s25 = sld [smem:[#allocation3 + $0x4]]  ;;  %s3962_s0 = sld [smem:[#allocation3 + $0x5]]  ;;  %vm3522_vm3 = vcmask 1040384   ;;  %vm3621_vm4 = vcmask 1046528  }
  0x13   :  { %4390 = vmatprep.subr.bf16.mxu0 %v5059_v2  ;;  %4436 = vmatprep.subr.bf16.mxu1 %v5059_v2  ;;  %s3975_s11 = sld [smem:[#allocation3 + $0x6]]  ;;  %s4001_s23 = sld [smem:[#allocation3 + $0x8]] }
  0x14   :  { %s4014_s24 = sld [smem:[#allocation3 + $0x9]]  ;;  %s4027_s9 = sld [smem:[#allocation3 + $0xa]] }
  0x15   :  { %s4040_s10 = sld [smem:[#allocation3 + $0xb]]  ;;  %s4053_s21 = sld [smem:[#allocation3 + $0xc]] }
  0x16   :  { %s5117_s7 = scalar_lea.vmem %s6986_s1, %s3899_s26  ;;  %s5127_s12 = scalar_lea.vmem %s6986_s1, %s26_s27 }
  0x17   :  { %v64_v7 = vld [vmem:[%s5117_s7] sm:$0xff]  ;;  %v65_v8 = vld [vmem:[%s5117_s7 + $0x8] sm:$0xff]  ;;  %v66_v15 = vld [vmem:[%s5117_s7 + $0x10] sm:$0xff]  ;;  %s5236_s17 = scalar_lea.vmem %s6986_s1, %s3923_s13  ;;  %s5241_s20 = scalar_lea.vmem %s6986_s1, %s3936_s14 }
  0x18   :  { %v85_v9 = vpack.c.bf16 %v65_v8, %v64_v7  ;;  %v28_v10 = vld [vmem:[%s5127_s12] sm:$0xff]  ;;  %v29_v11 = vld [vmem:[%s5127_s12 + $0x8] sm:$0xff]  ;;  %v67_v16 = vld [vmem:[%s5117_s7 + $0x18] sm:$0xff]  ;;  %s5364_s28 = scalar_lea.vmem %s6986_s1, %s3949_s25  ;;  %s5369_s6 = scalar_lea.vmem %s6986_s1, %s3962_s0 }
  0x19   :  { %v49_v13 = vpack.c.bf16 %v29_v11, %v28_v10  ;;  %v30_v17 = vld [vmem:[%s5127_s12 + $0x10] sm:$0xff]  ;;  %v31_v18 = vld [vmem:[%s5127_s12 + $0x18] sm:$0xff]  ;;  %v86_v19 = vpack.c.bf16 %v67_v16, %v66_v15  ;;  %v68_v21 = vld [vmem:[%s5117_s7 + $0x20] sm:$0xff]  ;;  %s5514_s15 = scalar_lea.vmem %s6986_s1, %s3975_s11  ;;  %s5694_s26 = scalar_lea.vmem %s6986_s1, %s4001_s23 }
  0x1a   :  { %4301 = vmatmul.mubr.msk.bf16.vlgmr.msra.gmra.mrb[0].mxu0 %vm98_vm2, %v85_v9  ;;  %v50_v20 = vpack.c.bf16 %v31_v18, %v30_v17  ;;  %v69_v22 = vld [vmem:[%s5117_s7 + $0x28] sm:$0xff]  ;;  %v32_v23 = vld [vmem:[%s5127_s12 + $0x20] sm:$0xff]  ;;  %v70_v27 = vld [vmem:[%s5117_s7 + $0x30] sm:$0xff]  ;;  %s5701_s29 = scalar_lea.vmem %s6986_s1, %s4014_s24  ;;  %s5887_s13 = scalar_lea.vmem %s6986_s1, %s4027_s9 }
  0x1b   :  { %4347 = vmatmul.mubr.msk.bf16.vlgmr.msra.gmra.mrb[0].mxu1 %vm98_vm2, %v49_v13  ;;  %4391 = vmatpush3.bf16.msra.mxu0 %v483_v12  ;;  %v33_v24 = vld [vmem:[%s5127_s12 + $0x28] sm:$0xff]  ;;  %v87_v25 = vpack.c.bf16 %v69_v22, %v68_v21  ;;  %v71_v28 = vld [vmem:[%s5117_s7 + $0x38] sm:$0xff]  ;;  %v34_v29 = vld [vmem:[%s5127_s12 + $0x30] sm:$0xff]  ;;  %s5892_s16 = scalar_lea.vmem %s6986_s1, %s4040_s10  ;;  %s4066_s22 = sld [smem:[#allocation3 + $0xd]] }
  0x1c   :  { %4437 = vmatpush3.bf16.msra.mxu1 %v697_v14  ;;  %4304 = vmatprep.mubr.msk.bf16.mxu0 %vm5060_vm1, %v5059_v2  ;;  %v51_v26 = vpack.c.bf16 %v33_v24, %v32_v23  ;;  %v35_v30 = vld [vmem:[%s5127_s12 + $0x38] sm:$0xff]  ;;  %v88_v31 = vpack.c.bf16 %v71_v28, %v70_v27  ;;  %v72_v33 = vld [vmem:[%s5117_s7 + $0x40] sm:$0xff]  ;;  %v73_v34 = vld [vmem:[%s5117_s7 + $0x48] sm:$0xff]  ;;  %s6078_s25 = scalar_lea.vmem %s6986_s1, %s4053_s21  ;;  %s4092_s19 = sld [smem:[#allocation3 + $0xf]] }
  0x1d   :  { %4350 = vmatprep.mubr.msk.bf16.mxu1 %vm5060_vm1, %v5059_v2  ;;  %4482 = vmatprep.subr.bf16.mxu0 %v5059_v2  ;;  %v52_v32 = vpack.c.bf16 %v35_v30, %v34_v29  ;;  %v36_v35 = vld [vmem:[%s5127_s12 + $0x40] sm:$0xff]  ;;  %v37_v36 = vld [vmem:[%s5127_s12 + $0x48] sm:$0xff]  ;;  %v89_v37 = vpack.c.bf16 %v73_v34, %v72_v33  ;;  %v74_v39 = vld [vmem:[%s5117_s7 + $0x50] sm:$0xff] }
  0x1e   :  { %4528 = vmatprep.subr.bf16.mxu1 %v5059_v2  ;;  %v53_v38 = vpack.c.bf16 %v37_v36, %v36_v35  ;;  %v75_v40 = vld [vmem:[%s5117_s7 + $0x58] sm:$0xff]  ;;  %v38_v41 = vld [vmem:[%s5127_s12 + $0x50] sm:$0xff]  ;;  %v76_v45 = vld [vmem:[%s5117_s7 + $0x60] sm:$0xff] }
  0x1f   :  { %v39_v42 = vld [vmem:[%s5127_s12 + $0x58] sm:$0xff]  ;;  %v90_v43 = vpack.c.bf16 %v75_v40, %v74_v39  ;;  %v77_v46 = vld [vmem:[%s5117_s7 + $0x68] sm:$0xff]  ;;  %v40_v47 = vld [vmem:[%s5127_s12 + $0x60] sm:$0xff] }
  0x20   :  { %v54_v44 = vpack.c.bf16 %v39_v42, %v38_v41  ;;  %v41_v48 = vld [vmem:[%s5127_s12 + $0x68] sm:$0xff]  ;;  %v91_v49 = vpack.c.bf16 %v77_v46, %v76_v45  ;;  %v78_v51 = vld [vmem:[%s5117_s7 + $0x70] sm:$0xff]  ;;  %v79_v52 = vld [vmem:[%s5117_s7 + $0x78] sm:$0xff] }
  0x21   :  { %v55_v50 = vpack.c.bf16 %v41_v48, %v40_v47  ;;  %v42_v53 = vld [vmem:[%s5127_s12 + $0x70] sm:$0xff]  ;;  %v43_v54 = vld [vmem:[%s5127_s12 + $0x78] sm:$0xff]  ;;  %v92_v55 = vpack.c.bf16 %v79_v52, %v78_v51  ;;  %v80_v57 = vld [vmem:[%s5117_s7 + $0x80] sm:$0xff]  ;;  %s6083_s27 = scalar_lea.vmem %s6986_s1, %s4066_s22 }
  0x22   :  { %4305 = vmatmul.mubr.msk.bf16.gmra.mrb[4].mxu0 %vm98_vm2, %v86_v19  ;;  %v56_v56 = vpack.c.bf16 %v43_v54, %v42_v53  ;;  %v81_v58 = vld [vmem:[%s5117_s7 + $0x88] sm:$0xff]  ;;  %v44_v59 = vld [vmem:[%s5127_s12 + $0x80] sm:$0xff]  ;;  %v82_v63 = vld [vmem:[%s5117_s7 + $0x90] sm:$0xff] }
  0x23   :  { %4351 = vmatmul.mubr.msk.bf16.gmra.mrb[4].mxu1 %vm98_vm2, %v50_v20  ;;  %4308 = vmatprep.mubr.msk.bf16.mxu0 %vm5060_vm1, %v5059_v2  ;;  %v45_v60 = vld [vmem:[%s5127_s12 + $0x88] sm:$0xff]  ;;  %v93_v61 = vpack.c.bf16 %v81_v58, %v80_v57  ;;  %v83_v0 = vld [vmem:[%s5117_s7 + $0x98] sm:$0xff]  ;;  %v46_v1 = vld [vmem:[%s5127_s12 + $0x90] sm:$0xff] }
  0x24   :  { %4354 = vmatprep.mubr.msk.bf16.mxu1 %vm5060_vm1, %v5059_v2  ;;  %v57_v62 = vpack.c.bf16 %v45_v60, %v44_v59  ;;  %v47_v3 = vld [vmem:[%s5127_s12 + $0x98] sm:$0xff]  ;;  %v94_v4 = vpack.c.bf16 %v83_v0, %v82_v63  ;;  %v84_v6 = vld [vmem:[%s5117_s7 + $0xa0] sm:$0x3]  ;;  %v416_v11 = vld [vmem:[%s5236_s17 + $0x8] sm:$0xff] }
  0x25   :  { %v58_v5 = vpack.c.bf16 %v47_v3, %v46_v1  ;;  %v48_v7 = vld [vmem:[%s5127_s12 + $0xa0] sm:$0x3]  ;;  %v95_v8 = vpack.c.bf16 %v84_v6, %v84_v6  ;;  %v630_v13 = vld [vmem:[%s5241_s20 + $0x8] sm:$0xff]  ;;  %v3950_v14 = vld [vmem:[%s6987_s2 + $0x10] sm:$0xf]  ;;  %s3988_s12 = sld [smem:[#allocation3 + $0x7]] }
  0x26   :  { %v59_v9 = vpack.c.bf16 %v48_v7, %v48_v7  ;;  %v415_v10 = vld [vmem:[%s5236_s17] sm:$0xff]  ;;  %v3963_v16 = vld [vmem:[%s6987_s2 + $0x14] sm:$0xf]  ;;  %v911_v18 = vsel %vm132_vm0, %v3950_v14, 0  ;;  %v418_v21 = vld [vmem:[%s5236_s17 + $0x18] sm:$0xff] }
  0x27   :  { %v629_v12 = vld [vmem:[%s5241_s20] sm:$0xff]  ;;  %v436_v15 = vpack.c.bf16 %v416_v11, %v415_v10  ;;  %v1125_v19 = vsel %vm132_vm0, %v3963_v16, 0  ;;  %v417_v20 = vld [vmem:[%s5236_s17 + $0x10] sm:$0xff]  ;;  %v632_v23 = vld [vmem:[%s5241_s20 + $0x18] sm:$0xff] }
  0x28   :  { %v650_v17 = vpack.c.bf16 %v630_v13, %v629_v12  ;;  %v631_v22 = vld [vmem:[%s5241_s20 + $0x10] sm:$0xff]  ;;  %v437_v24 = vpack.c.bf16 %v418_v21, %v417_v20  ;;  %v420_v27 = vld [vmem:[%s5236_s17 + $0x28] sm:$0xff]  ;;  %v633_v28 = vld [vmem:[%s5241_s20 + $0x20] sm:$0xff] }
  0x29   :  { %v634_v29 = vld [vmem:[%s5241_s20 + $0x28] sm:$0xff]  ;;  %v422_v33 = vld [vmem:[%s5236_s17 + $0x38] sm:$0xff]  ;;  %v635_v34 = vld [vmem:[%s5241_s20 + $0x30] sm:$0xff] }
  0x2a   :  { %4309 = vmatmul.mubr.msk.bf16.gmra.mrb[8].mxu0 %vm98_vm2, %v87_v25  ;;  %v651_v25 = vpack.c.bf16 %v632_v23, %v631_v22  ;;  %v636_v35 = vld [vmem:[%s5241_s20 + $0x38] sm:$0xff]  ;;  %v424_v39 = vld [vmem:[%s5236_s17 + $0x48] sm:$0xff]  ;;  %v637_v40 = vld [vmem:[%s5241_s20 + $0x40] sm:$0xff] }
  0x2b   :  { %4355 = vmatmul.mubr.msk.bf16.gmra.mrb[8].mxu1 %vm98_vm2, %v51_v26  ;;  %4312 = vmatprep.mubr.msk.bf16.mxu0 %vm5060_vm1, %v5059_v2  ;;  %v419_v26 = vld [vmem:[%s5236_s17 + $0x20] sm:$0xff]  ;;  %v638_v41 = vld [vmem:[%s5241_s20 + $0x48] sm:$0xff]  ;;  %v426_v45 = vld [vmem:[%s5236_s17 + $0x58] sm:$0xff]  ;;  %s5521_s18 = scalar_lea.vmem %s6986_s1, %s3988_s12 }
  0x2c   :  { %4358 = vmatprep.mubr.msk.bf16.mxu1 %vm5060_vm1, %v5059_v2  ;;  %v438_v30 = vpack.c.bf16 %v420_v27, %v419_v26  ;;  %v639_v46 = vld [vmem:[%s5241_s20 + $0x50] sm:$0xff]  ;;  %v640_v47 = vld [vmem:[%s5241_s20 + $0x58] sm:$0xff]  ;;  %v428_v51 = vld [vmem:[%s5236_s17 + $0x68] sm:$0xff] }
  0x2d   :  { %v641_v52 = vld [vmem:[%s5241_s20 + $0x60] sm:$0xff]  ;;  %v642_v53 = vld [vmem:[%s5241_s20 + $0x68] sm:$0xff]  ;;  %v430_v57 = vld [vmem:[%s5236_s17 + $0x78] sm:$0xff] }
  0x2e   :  { %v643_v58 = vld [vmem:[%s5241_s20 + $0x70] sm:$0xff]  ;;  %v644_v59 = vld [vmem:[%s5241_s20 + $0x78] sm:$0xff]  ;;  %v432_v63 = vld [vmem:[%s5236_s17 + $0x88] sm:$0xff] }
  0x2f   :  { %v645_v0 = vld [vmem:[%s5241_s20 + $0x80] sm:$0xff]  ;;  %v646_v1 = vld [vmem:[%s5241_s20 + $0x88] sm:$0xff]  ;;  %v434_v6 = vld [vmem:[%s5236_s17 + $0x98] sm:$0xff] }
  0x30   :  { %v647_v7 = vld [vmem:[%s5241_s20 + $0x90] sm:$0xff]  ;;  %v435_v11 = vld [vmem:[%s5236_s17 + $0xa0] sm:$0x3]  ;;  %v844_v16 = vld [vmem:[%s5364_s28 + $0x8] sm:$0xff] }
  0x31   :  { %v649_v12 = vld [vmem:[%s5241_s20 + $0xa0] sm:$0x3]  ;;  %v446_v13 = vpack.c.bf16 %v435_v11, %v435_v11  ;;  %v3989_v21 = vld [vmem:[%s6987_s2 + $0x1c] sm:$0xf]  ;;  %v1059_v27 = vld [vmem:[%s5369_s6 + $0x10] sm:$0xff] }
  0x32   :  { %4313 = vmatmul.mubr.msk.bf16.gmra.mrb[12].mxu0 %vm98_vm2, %v88_v31  ;;  %v652_v31 = vpack.c.bf16 %v634_v29, %v633_v28  ;;  %v660_v14 = vpack.c.bf16 %v649_v12, %v649_v12  ;;  %v846_v26 = vld [vmem:[%s5364_s28 + $0x18] sm:$0xff] }
  0x33   :  { %4359 = vmatmul.mubr.msk.bf16.gmra.mrb[12].mxu1 %vm98_vm2, %v52_v32  ;;  %4316 = vmatprep.mubr.msk.bf16.mxu0 %vm5060_vm1, %v5059_v2  ;;  %v421_v32 = vld [vmem:[%s5236_s17 + $0x30] sm:$0xff]  ;;  %v1060_v28 = vld [vmem:[%s5369_s6 + $0x18] sm:$0xff] }
  0x34   :  { %4362 = vmatprep.mubr.msk.bf16.mxu1 %vm5060_vm1, %v5059_v2  ;;  %v439_v36 = vpack.c.bf16 %v422_v33, %v421_v32  ;;  %v848_v32 = vld [vmem:[%s5364_s28 + $0x28] sm:$0xff]  ;;  %v1061_v33 = vld [vmem:[%s5369_s6 + $0x20] sm:$0xff] }
  0x3a   :  { %4317 = vmatmul.mubr.msk.bf16.gmra.mrb[16].mxu0 %vm98_vm2, %v89_v37  ;;  %v653_v37 = vpack.c.bf16 %v636_v35, %v635_v34  ;;  %v1062_v34 = vld [vmem:[%s5369_s6 + $0x28] sm:$0xff] }
  0x3b   :  { %4363 = vmatmul.mubr.msk.bf16.gmra.mrb[16].mxu1 %vm98_vm2, %v53_v38  ;;  %4320 = vmatprep.mubr.msk.bf16.mxu0 %vm5060_vm1, %v5059_v2  ;;  %v423_v38 = vld [vmem:[%s5236_s17 + $0x40] sm:$0xff] }
  0x3c   :  { %4366 = vmatprep.mubr.msk.bf16.mxu1 %vm5060_vm1, %v5059_v2  ;;  %v440_v42 = vpack.c.bf16 %v424_v39, %v423_v38  ;;  %v850_v38 = vld [vmem:[%s5364_s28 + $0x38] sm:$0xff]  ;;  %v1063_v39 = vld [vmem:[%s5369_s6 + $0x30] sm:$0xff] }
  0x42   :  { %4321 = vmatmul.mubr.msk.bf16.gmra.mrb[20].mxu0 %vm98_vm2, %v90_v43  ;;  %v654_v43 = vpack.c.bf16 %v638_v41, %v637_v40  ;;  %v1064_v40 = vld [vmem:[%s5369_s6 + $0x38] sm:$0xff] }
  0x43   :  { %4367 = vmatmul.mubr.msk.bf16.gmra.mrb[20].mxu1 %vm98_vm2, %v54_v44  ;;  %4324 = vmatprep.mubr.msk.bf16.mxu0 %vm5060_vm1, %v5059_v2  ;;  %v425_v44 = vld [vmem:[%s5236_s17 + $0x50] sm:$0xff] }
  0x44   :  { %4370 = vmatprep.mubr.msk.bf16.mxu1 %vm5060_vm1, %v5059_v2  ;;  %v441_v48 = vpack.c.bf16 %v426_v45, %v425_v44  ;;  %v852_v44 = vld [vmem:[%s5364_s28 + $0x48] sm:$0xff]  ;;  %v1065_v45 = vld [vmem:[%s5369_s6 + $0x40] sm:$0xff] }
  0x4a   :  { %4325 = vmatmul.mubr.msk.bf16.gmra.mrb[24].mxu0 %vm98_vm2, %v91_v49  ;;  %v655_v49 = vpack.c.bf16 %v640_v47, %v639_v46  ;;  %v1066_v46 = vld [vmem:[%s5369_s6 + $0x48] sm:$0xff] }
  0x4b   :  { %4371 = vmatmul.mubr.msk.bf16.gmra.mrb[24].mxu1 %vm98_vm2, %v55_v50  ;;  %4328 = vmatprep.mubr.msk.bf16.mxu0 %vm5060_vm1, %v5059_v2  ;;  %v427_v50 = vld [vmem:[%s5236_s17 + $0x60] sm:$0xff] }
  0x4c   :  { %4374 = vmatprep.mubr.msk.bf16.mxu1 %vm5060_vm1, %v5059_v2  ;;  %v442_v54 = vpack.c.bf16 %v428_v51, %v427_v50  ;;  %v854_v50 = vld [vmem:[%s5364_s28 + $0x58] sm:$0xff]  ;;  %v1067_v51 = vld [vmem:[%s5369_s6 + $0x50] sm:$0xff] }
  0x52   :  { %4329 = vmatmul.mubr.msk.bf16.gmra.mrb[28].mxu0 %vm98_vm2, %v92_v55  ;;  %v656_v55 = vpack.c.bf16 %v642_v53, %v641_v52  ;;  %v1068_v52 = vld [vmem:[%s5369_s6 + $0x58] sm:$0xff] }
  0x53   :  { %4375 = vmatmul.mubr.msk.bf16.gmra.mrb[28].mxu1 %vm98_vm2, %v56_v56  ;;  %4332 = vmatprep.mubr.msk.bf16.mxu0 %vm5060_vm1, %v5059_v2  ;;  %v429_v56 = vld [vmem:[%s5236_s17 + $0x70] sm:$0xff] }
  0x54   :  { %4378 = vmatprep.mubr.msk.bf16.mxu1 %vm5060_vm1, %v5059_v2  ;;  %v443_v60 = vpack.c.bf16 %v430_v57, %v429_v56 }
  0x5a   :  { %4333 = vmatmul.mubr.msk.bf16.gmra.mrb[32].mxu0 %vm98_vm2, %v93_v61  ;;  %v657_v61 = vpack.c.bf16 %v644_v59, %v643_v58 }
  0x5b   :  { %4379 = vmatmul.mubr.msk.bf16.gmra.mrb[32].mxu1 %vm98_vm2, %v57_v62  ;;  %4336 = vmatprep.mubr.msk.bf16.mxu0 %vm5060_vm1, %v5059_v2  ;;  %v431_v62 = vld [vmem:[%s5236_s17 + $0x80] sm:$0xff] }
  0x5c   :  { %4382 = vmatprep.mubr.msk.bf16.mxu1 %vm5060_vm1, %v5059_v2  ;;  %v444_v3 = vpack.c.bf16 %v432_v63, %v431_v62 }
  0x62   :  { %4337 = vmatmul.mubr.msk.bf16.gmra.mrb[36].mxu0 %vm98_vm2, %v94_v4  ;;  %v658_v4 = vpack.c.bf16 %v646_v1, %v645_v0  ;;  %v855_v1 = vld [vmem:[%s5364_s28 + $0x60] sm:$0xff] }
  0x63   :  { %4383 = vmatmul.mubr.msk.bf16.gmra.mrb[36].mxu1 %vm98_vm2, %v58_v5  ;;  %4340 = vmatprep.mubr.msk.bf16.mxu0 %vm5060_vm1, %v5059_v2  ;;  %v433_v5 = vld [vmem:[%s5236_s17 + $0x90] sm:$0xff] }
  0x64   :  { %4386 = vmatprep.mubr.msk.bf16.mxu1 %vm5060_vm1, %v5059_v2 }
  0x6a   :  { %4341 = vmatmul.mubr.msk.bf16.gmra.mrb[40].mxu0 %vm98_vm2, %v95_v8  ;;  %v648_v8 = vld [vmem:[%s5241_s20 + $0x98] sm:$0xff] }
  0x6b   :  { %4387 = vmatmul.mubr.msk.bf16.gmra.mrb[40].mxu1 %vm98_vm2, %v59_v9  ;;  %4392 = vmatprep.mubr.msk.bf16.mxu0 %vm5060_vm1, %v5059_v2  ;;  %v445_v9 = vpack.c.bf16 %v434_v6, %v433_v5  ;;  %v659_v10 = vpack.c.bf16 %v648_v8, %v647_v7  ;;  %v1070_v5 = vld [vmem:[%s5369_s6 + $0x68] sm:$0xff] }
  0x6c   :  { %4438 = vmatprep.mubr.msk.bf16.mxu1 %vm5060_vm1, %v5059_v2 }
  0x72   :  { %4393 = vmatmul.mubr.msk.bf16.vlgmr.msra.gmra.mrb[44].mxu0 %vm98_vm2, %v436_v15  ;;  %v843_v15 = vld [vmem:[%s5364_s28] sm:$0xff] }
  0x73   :  { %4439 = vmatmul.mubr.msk.bf16.vlgmr.msra.gmra.mrb[44].mxu1 %vm98_vm2, %v650_v17  ;;  %4483 = vmatpush3.bf16.msra.mxu0 %v911_v18  ;;  %v1057_v17 = vld [vmem:[%s5369_s6] sm:$0xff]  ;;  %v1058_v18 = vld [vmem:[%s5369_s6 + $0x8] sm:$0xff]  ;;  %v864_v20 = vpack.c.bf16 %v844_v16, %v843_v15 }
  0x74   :  { %4529 = vmatpush3.bf16.msra.mxu1 %v1125_v19  ;;  %4396 = vmatprep.mubr.msk.bf16.mxu0 %vm5060_vm1, %v5059_v2  ;;  %v3976_v19 = vld [vmem:[%s6987_s2 + $0x18] sm:$0xf]  ;;  %v1078_v22 = vpack.c.bf16 %v1058_v18, %v1057_v17  ;;  %v857_v18 = vld [vmem:[%s5364_s28 + $0x70] sm:$0xff] }
  0x75   :  { %4442 = vmatprep.mubr.msk.bf16.mxu1 %vm5060_vm1, %v5059_v2  ;;  %4574 = vmatprep.subr.bf16.mxu0 %v5059_v2  ;;  %v1339_v23 = vsel %vm132_vm0, %v3976_v19, 0  ;;  %v858_v19 = vld [vmem:[%s5364_s28 + $0x78] sm:$0xff] }
  0x76   :  { %4620 = vmatprep.subr.bf16.mxu1 %v5059_v2 }
  0x7a   :  { %4397 = vmatmul.mubr.msk.bf16.gmra.mrb[48].mxu0 %vm98_vm2, %v437_v24  ;;  %v1553_v24 = vsel %vm132_vm0, %v3989_v21, 0  ;;  %v1072_v21 = vld [vmem:[%s5369_s6 + $0x78] sm:$0xff] }
  0x7b   :  { %4443 = vmatmul.mubr.msk.bf16.gmra.mrb[48].mxu1 %vm98_vm2, %v651_v25  ;;  %4400 = vmatprep.mubr.msk.bf16.mxu0 %vm5060_vm1, %v5059_v2  ;;  %v845_v25 = vld [vmem:[%s5364_s28 + $0x10] sm:$0xff] }
  0x7c   :  { %4446 = vmatprep.mubr.msk.bf16.mxu1 %vm5060_vm1, %v5059_v2  ;;  %v865_v29 = vpack.c.bf16 %v846_v26, %v845_v25  ;;  %v871_v25 = vpack.c.bf16 %v858_v19, %v857_v18 }
  0x82   :  { %4401 = vmatmul.mubr.msk.bf16.gmra.mrb[52].mxu0 %vm98_vm2, %v438_v30  ;;  %v1079_v30 = vpack.c.bf16 %v1060_v28, %v1059_v27 }
  0x83   :  { %4447 = vmatmul.mubr.msk.bf16.gmra.mrb[52].mxu1 %vm98_vm2, %v652_v31  ;;  %4404 = vmatprep.mubr.msk.bf16.mxu0 %vm5060_vm1, %v5059_v2  ;;  %v847_v31 = vld [vmem:[%s5364_s28 + $0x20] sm:$0xff] }
  0x84   :  { %4450 = vmatprep.mubr.msk.bf16.mxu1 %vm5060_vm1, %v5059_v2  ;;  %v866_v35 = vpack.c.bf16 %v848_v32, %v847_v31 }
  0x8a   :  { %4405 = vmatmul.mubr.msk.bf16.gmra.mrb[56].mxu0 %vm98_vm2, %v439_v36  ;;  %v1080_v36 = vpack.c.bf16 %v1062_v34, %v1061_v33  ;;  %v859_v34 = vld [vmem:[%s5364_s28 + $0x80] sm:$0xff] }
  0x8b   :  { %4451 = vmatmul.mubr.msk.bf16.gmra.mrb[56].mxu1 %vm98_vm2, %v653_v37  ;;  %4408 = vmatprep.mubr.msk.bf16.mxu0 %vm5060_vm1, %v5059_v2  ;;  %v849_v37 = vld [vmem:[%s5364_s28 + $0x30] sm:$0xff] }
  0x8c   :  { %4454 = vmatprep.mubr.msk.bf16.mxu1 %vm5060_vm1, %v5059_v2  ;;  %v867_v41 = vpack.c.bf16 %v850_v38, %v849_v37  ;;  %v1074_v37 = vld [vmem:[%s5369_s6 + $0x88] sm:$0xff] }
  0x92   :  { %4409 = vmatmul.mubr.msk.bf16.gmra.mrb[60].mxu0 %vm98_vm2, %v440_v42  ;;  %v1081_v42 = vpack.c.bf16 %v1064_v40, %v1063_v39 }
  0x93   :  { %4455 = vmatmul.mubr.msk.bf16.gmra.mrb[60].mxu1 %vm98_vm2, %v654_v43  ;;  %4412 = vmatprep.mubr.msk.bf16.mxu0 %vm5060_vm1, %v5059_v2  ;;  %v851_v43 = vld [vmem:[%s5364_s28 + $0x40] sm:$0xff] }
  0x94   :  { %4458 = vmatprep.mubr.msk.bf16.mxu1 %vm5060_vm1, %v5059_v2  ;;  %v868_v47 = vpack.c.bf16 %v852_v44, %v851_v43 }
  0x9a   :  { %4413 = vmatmul.mubr.msk.bf16.gmra.mrb[64].mxu0 %vm98_vm2, %v441_v48  ;;  %v1082_v48 = vpack.c.bf16 %v1066_v46, %v1065_v45 }
  0x9b   :  { %4459 = vmatmul.mubr.msk.bf16.gmra.mrb[64].mxu1 %vm98_vm2, %v655_v49  ;;  %4416 = vmatprep.mubr.msk.bf16.mxu0 %vm5060_vm1, %v5059_v2  ;;  %v853_v49 = vld [vmem:[%s5364_s28 + $0x50] sm:$0xff] }
  0x9c   :  { %4462 = vmatprep.mubr.msk.bf16.mxu1 %vm5060_vm1, %v5059_v2  ;;  %v869_v56 = vpack.c.bf16 %v854_v50, %v853_v49  ;;  %v861_v50 = vld [vmem:[%s5364_s28 + $0x90] sm:$0xff] }
  0xa2   :  { %4417 = vmatmul.mubr.msk.bf16.gmra.mrb[68].mxu0 %vm98_vm2, %v442_v54 }
  0xa3   :  { %4463 = vmatmul.mubr.msk.bf16.gmra.mrb[68].mxu1 %vm98_vm2, %v656_v55  ;;  %4420 = vmatprep.mubr.msk.bf16.mxu0 %vm5060_vm1, %v5059_v2 }
  0xa4   :  { %4466 = vmatprep.mubr.msk.bf16.mxu1 %vm5060_vm1, %v5059_v2 }
  0xaa   :  { %4421 = vmatmul.mubr.msk.bf16.gmra.mrb[72].mxu0 %vm98_vm2, %v443_v60  ;;  %v1083_v60 = vpack.c.bf16 %v1068_v52, %v1067_v51  ;;  %v862_v51 = vld [vmem:[%s5364_s28 + $0x98] sm:$0xff]  ;;  %v1075_v52 = vld [vmem:[%s5369_s6 + $0x90] sm:$0xff] }
  0xab   :  { %4467 = vmatmul.mubr.msk.bf16.gmra.mrb[72].mxu1 %vm98_vm2, %v657_v61  ;;  %4424 = vmatprep.mubr.msk.bf16.mxu0 %vm5060_vm1, %v5059_v2 }
  0xac   :  { %4470 = vmatprep.mubr.msk.bf16.mxu1 %vm5060_vm1, %v5059_v2 }
  0xb2   :  { %4425 = vmatmul.mubr.msk.bf16.gmra.mrb[76].mxu0 %vm98_vm2, %v444_v3  ;;  %v856_v3 = vld [vmem:[%s5364_s28 + $0x68] sm:$0xff] }
  0xb3   :  { %4471 = vmatmul.mubr.msk.bf16.gmra.mrb[76].mxu1 %vm98_vm2, %v658_v4  ;;  %4428 = vmatprep.mubr.msk.bf16.mxu0 %vm5060_vm1, %v5059_v2  ;;  %v1069_v4 = vld [vmem:[%s5369_s6 + $0x60] sm:$0xff] }
  0xb4   :  { %4474 = vmatprep.mubr.msk.bf16.mxu1 %vm5060_vm1, %v5059_v2 }
  0xba   :  { %4429 = vmatmul.mubr.msk.bf16.gmra.mrb[80].mxu0 %vm98_vm2, %v445_v9  ;;  %v870_v9 = vpack.c.bf16 %v856_v3, %v855_v1 }
  0xbb   :  { %4475 = vmatmul.mubr.msk.bf16.gmra.mrb[80].mxu1 %vm98_vm2, %v659_v10  ;;  %4432 = vmatprep.mubr.msk.bf16.mxu0 %vm5060_vm1, %v5059_v2 }
  0xbc   :  { %4478 = vmatprep.mubr.msk.bf16.mxu1 %vm5060_vm1, %v5059_v2 }
  0xc2   :  { %4433 = vmatmul.mubr.msk.bf16.gmra.mrb[84].mxu0 %vm98_vm2, %v446_v13  ;;  %v1084_v13 = vpack.c.bf16 %v1070_v5, %v1069_v4  ;;  %v863_v5 = vld [vmem:[%s5364_s28 + $0xa0] sm:$0x3] }
  0xc3   :  { %4479 = vmatmul.mubr.msk.bf16.gmra.mrb[84].mxu1 %vm98_vm2, %v660_v14  ;;  %4484 = vmatprep.mubr.msk.bf16.mxu0 %vm5060_vm1, %v5059_v2 }
  0xc4   :  { %4530 = vmatprep.mubr.msk.bf16.mxu1 %vm5060_vm1, %v5059_v2 }
  0xca   :  { %4485 = vmatmul.mubr.msk.bf16.vlgmr.msra.gmra.mrb[88].mxu0 %vm98_vm2, %v864_v20  ;;  %v1071_v20 = vld [vmem:[%s5369_s6 + $0x70] sm:$0xff] }
  0xcb   :  { %4531 = vmatmul.mubr.msk.bf16.vlgmr.msra.gmra.mrb[88].mxu1 %vm98_vm2, %v1078_v22  ;;  %4575 = vmatpush3.bf16.msra.mxu0 %v1339_v23 }
  0xcc   :  { %4621 = vmatpush3.bf16.msra.mxu1 %v1553_v24  ;;  %4488 = vmatprep.mubr.msk.bf16.mxu0 %vm5060_vm1, %v5059_v2 }
  0xcd   :  { %4534 = vmatprep.mubr.msk.bf16.mxu1 %vm5060_vm1, %v5059_v2  ;;  %4666 = vmatprep.subr.bf16.mxu0 %v5059_v2 }
  0xce   :  { %4712 = vmatprep.subr.bf16.mxu1 %v5059_v2 }
  0xd2   :  { %4489 = vmatmul.mubr.msk.bf16.gmra.mrb[92].mxu0 %vm98_vm2, %v865_v29  ;;  %v1085_v29 = vpack.c.bf16 %v1072_v21, %v1071_v20  ;;  %v1271_v21 = vld [vmem:[%s5514_s15] sm:$0xff] }
  0xd3   :  { %4535 = vmatmul.mubr.msk.bf16.gmra.mrb[92].mxu1 %vm98_vm2, %v1079_v30  ;;  %4492 = vmatprep.mubr.msk.bf16.mxu0 %vm5060_vm1, %v5059_v2 }
  0xd4   :  { %4538 = vmatprep.mubr.msk.bf16.mxu1 %vm5060_vm1, %v5059_v2 }
  0xda   :  { %4493 = vmatmul.mubr.msk.bf16.gmra.mrb[96].mxu0 %vm98_vm2, %v866_v35  ;;  %v860_v35 = vld [vmem:[%s5364_s28 + $0x88] sm:$0xff]  ;;  %s6296_s28 = scalar_lea.vmem %s6986_s1, %s4092_s19 }
  0xdb   :  { %4539 = vmatmul.mubr.msk.bf16.gmra.mrb[96].mxu1 %vm98_vm2, %v1080_v36  ;;  %4496 = vmatprep.mubr.msk.bf16.mxu0 %vm5060_vm1, %v5059_v2  ;;  %v1073_v36 = vld [vmem:[%s5369_s6 + $0x80] sm:$0xff] }
  0xdc   :  { %4542 = vmatprep.mubr.msk.bf16.mxu1 %vm5060_vm1, %v5059_v2  ;;  %v1086_v45 = vpack.c.bf16 %v1074_v37, %v1073_v36 }
  0xe2   :  { %4497 = vmatmul.mubr.msk.bf16.gmra.mrb[100].mxu0 %vm98_vm2, %v867_v41  ;;  %v872_v41 = vpack.c.bf16 %v860_v35, %v859_v34 }
  0xe3   :  { %4543 = vmatmul.mubr.msk.bf16.gmra.mrb[100].mxu1 %vm98_vm2, %v1081_v42  ;;  %4500 = vmatprep.mubr.msk.bf16.mxu0 %vm5060_vm1, %v5059_v2 }
  0xe4   :  { %4546 = vmatprep.mubr.msk.bf16.mxu1 %vm5060_vm1, %v5059_v2 }
  0xea   :  { %4501 = vmatmul.mubr.msk.bf16.gmra.mrb[104].mxu0 %vm98_vm2, %v868_v47 }
  0xeb   :  { %4547 = vmatmul.mubr.msk.bf16.gmra.mrb[104].mxu1 %vm98_vm2, %v1082_v48  ;;  %4504 = vmatprep.mubr.msk.bf16.mxu0 %vm5060_vm1, %v5059_v2 }
  0xec   :  { %4550 = vmatprep.mubr.msk.bf16.mxu1 %vm5060_vm1, %v5059_v2 }
  0xed   :  { %v170_v53 = vpop.f32.mrb[0].mxu0 }
  0xee   :  { %v326_v54 = vpop.f32.mrb[0].mxu1  ;;  %v4302_v55 = vpop.f32.mrb[1].mxu0 }
  0xef   :  { %v5441_v57 = vadd.f32 %v326_v54, %v170_v53  ;;  %v4348_v58 = vpop.f32.mrb[1].mxu1  ;;  %v173_v59 = vpop.f32.mrb[2].mxu0  ;;  %v1076_v53 = vld [vmem:[%s5369_s6 + $0x98] sm:$0xff] }
  0xf0   :  { %v329_v61 = vpop.f32.mrb[2].mxu1  ;;  %v4303_v62 = vpop.f32.mrb[3].mxu0  ;;  %v873_v58 = vpack.c.bf16 %v862_v51, %v861_v50 }
  0xf1   :  { %v5443_v63 = vadd.f32 %v329_v61, %v173_v59  ;;  %v4349_v0 = vpop.f32.mrb[3].mxu1  ;;  %v1087_v62 = vpack.c.bf16 %v1076_v53, %v1075_v52 }
  0xf2   :  { %4505 = vmatmul.mubr.msk.bf16.gmra.mrb[108].mxu0 %vm98_vm2, %v869_v56 }
  0xf3   :  { %4551 = vmatmul.mubr.msk.bf16.gmra.mrb[108].mxu1 %vm98_vm2, %v1083_v60  ;;  %4508 = vmatprep.mubr.msk.bf16.mxu0 %vm5060_vm1, %v5059_v2 }
  0xf4   :  { %4554 = vmatprep.mubr.msk.bf16.mxu1 %vm5060_vm1, %v5059_v2 }
  0xf5   :  { %v178_v6 = vpop.f32.mrb[4].mxu0 }
  0xf6   :  { %v334_v7 = vpop.f32.mrb[4].mxu1  ;;  %v4306_v8 = vpop.f32.mrb[5].mxu0 }
  0xf7   :  { %v5455_v10 = vadd.f32 %v334_v7, %v178_v6  ;;  %v4352_v11 = vpop.f32.mrb[5].mxu1  ;;  %v181_v12 = vpop.f32.mrb[6].mxu0  ;;  %v1077_v6 = vld [vmem:[%s5369_s6 + $0xa0] sm:$0x3] }
  0xf8   :  { %v337_v14 = vpop.f32.mrb[6].mxu1  ;;  %v4307_v15 = vpop.f32.mrb[7].mxu0  ;;  %v874_v11 = vpack.c.bf16 %v863_v5, %v863_v5  ;;  %v1490_v5 = vld [vmem:[%s5521_s18 + $0x28] sm:$0xff] }
  0xf9   :  { %v5457_v16 = vadd.f32 %v337_v14, %v181_v12  ;;  %v4353_v17 = vpop.f32.mrb[7].mxu1  ;;  %v1088_v15 = vpack.c.bf16 %v1077_v6, %v1077_v6 }
  0xfa   :  { %4509 = vmatmul.mubr.msk.bf16.gmra.mrb[112].mxu0 %vm98_vm2, %v870_v9 }
  0xfb   :  { %4555 = vmatmul.mubr.msk.bf16.gmra.mrb[112].mxu1 %vm98_vm2, %v1084_v13  ;;  %4512 = vmatprep.mubr.msk.bf16.mxu0 %vm5060_vm1, %v5059_v2 }
  0xfc   :  { %4558 = vmatprep.mubr.msk.bf16.mxu1 %vm5060_vm1, %v5059_v2 }
  0xfd   :  { %v186_v22 = vpop.f32.mrb[8].mxu0 }
  0xfe   :  { %v342_v23 = vpop.f32.mrb[8].mxu1  ;;  %v4310_v24 = vpop.f32.mrb[9].mxu0 }
  0xff   :  { %v5469_v26 = vadd.f32 %v342_v23, %v186_v22  ;;  %v4356_v27 = vpop.f32.mrb[9].mxu1  ;;  %v189_v28 = vpop.f32.mrb[10].mxu0  ;;  %v1272_v22 = vld [vmem:[%s5514_s15 + $0x8] sm:$0xff]  ;;  %v1485_v23 = vld [vmem:[%s5521_s18] sm:$0xff] }
 0x100   :  { %v345_v30 = vpop.f32.mrb[10].mxu1  ;;  %v4311_v31 = vpop.f32.mrb[11].mxu0  ;;  %v1486_v24 = vld [vmem:[%s5521_s18 + $0x8] sm:$0xff]  ;;  %v4002_v27 = vld [vmem:[%s6987_s2 + $0x20] sm:$0xf] }
 0x101   :  { %v5471_v32 = vadd.f32 %v345_v30, %v189_v28  ;;  %v4357_v33 = vpop.f32.mrb[11].mxu1  ;;  %v1292_v30 = vpack.c.bf16 %v1272_v22, %v1271_v21  ;;  %v4015_v31 = vld [vmem:[%s6987_s2 + $0x24] sm:$0xf]  ;;  %v1506_v36 = vpack.c.bf16 %v1486_v24, %v1485_v23  ;;  %v1277_v22 = vld [vmem:[%s5514_s15 + $0x30] sm:$0xff]  ;;  %v1278_v23 = vld [vmem:[%s5514_s15 + $0x38] sm:$0xff] }
 0x102   :  { %4513 = vmatmul.mubr.msk.bf16.gmra.mrb[116].mxu0 %vm98_vm2, %v871_v25  ;;  %v1491_v24 = vld [vmem:[%s5521_s18 + $0x30] sm:$0xff] }
 0x103   :  { %4559 = vmatmul.mubr.msk.bf16.gmra.mrb[116].mxu1 %vm98_vm2, %v1085_v29  ;;  %4516 = vmatprep.mubr.msk.bf16.mxu0 %vm5060_vm1, %v5059_v2 }
 0x104   :  { %4562 = vmatprep.mubr.msk.bf16.mxu1 %vm5060_vm1, %v5059_v2 }
 0x105   :  { %v194_v38 = vpop.f32.mrb[12].mxu0 }
 0x106   :  { %v350_v39 = vpop.f32.mrb[12].mxu1  ;;  %v4314_v40 = vpop.f32.mrb[13].mxu0 }
 0x107   :  { %v5483_v42 = vadd.f32 %v350_v39, %v194_v38  ;;  %v4360_v43 = vpop.f32.mrb[13].mxu1  ;;  %v197_v44 = vpop.f32.mrb[14].mxu0  ;;  %v1767_v39 = vsel %vm132_vm0, %v4002_v27, 0 }
 0x108   :  { %v353_v46 = vpop.f32.mrb[14].mxu1  ;;  %v4315_v47 = vpop.f32.mrb[15].mxu0  ;;  %v1981_v43 = vsel %vm132_vm0, %v4015_v31, 0 }
 0x109   :  { %v5485_v48 = vadd.f32 %v353_v46, %v197_v44  ;;  %v4361_v49 = vpop.f32.mrb[15].mxu1  ;;  %v1273_v44 = vld [vmem:[%s5514_s15 + $0x10] sm:$0xff]  ;;  %v1488_v47 = vld [vmem:[%s5521_s18 + $0x18] sm:$0xff] }
 0x10a   :  { %4517 = vmatmul.mubr.msk.bf16.gmra.mrb[120].mxu0 %vm98_vm2, %v872_v41  ;;  %v1487_v46 = vld [vmem:[%s5521_s18 + $0x10] sm:$0xff] }
 0x10b   :  { %4563 = vmatmul.mubr.msk.bf16.gmra.mrb[120].mxu1 %vm98_vm2, %v1086_v45  ;;  %4520 = vmatprep.mubr.msk.bf16.mxu0 %vm5060_vm1, %v5059_v2  ;;  %v1274_v45 = vld [vmem:[%s5514_s15 + $0x18] sm:$0xff] }
 0x10c   :  { %4566 = vmatprep.mubr.msk.bf16.mxu1 %vm5060_vm1, %v5059_v2  ;;  %v1293_v52 = vpack.c.bf16 %v1274_v45, %v1273_v44  ;;  %v1280_v44 = vld [vmem:[%s5514_s15 + $0x48] sm:$0xff]  ;;  %v1493_v45 = vld [vmem:[%s5521_s18 + $0x40] sm:$0xff] }
 0x10d   :  { %v202_v54 = vpop.f32.mrb[16].mxu0 }
 0x10e   :  { %v358_v55 = vpop.f32.mrb[16].mxu1  ;;  %v4318_v56 = vpop.f32.mrb[17].mxu0 }
 0x10f   :  { %v5497_v59 = vadd.f32 %v358_v55, %v202_v54  ;;  %v4364_v60 = vpop.f32.mrb[17].mxu1  ;;  %v205_v61 = vpop.f32.mrb[18].mxu0  ;;  %v1507_v56 = vpack.c.bf16 %v1488_v47, %v1487_v46  ;;  %v1494_v46 = vld [vmem:[%s5521_s18 + $0x48] sm:$0xff] }
 0x110   :  { %v361_v0 = vpop.f32.mrb[18].mxu1  ;;  %v4319_v1 = vpop.f32.mrb[19].mxu0 }
 0x111   :  { %v5499_v3 = vadd.f32 %v361_v0, %v205_v61  ;;  %v4365_v4 = vpop.f32.mrb[19].mxu1  ;;  %v1275_v0 = vld [vmem:[%s5514_s15 + $0x20] sm:$0xff]  ;;  %v1276_v1 = vld [vmem:[%s5514_s15 + $0x28] sm:$0xff] }
 0x112   :  { %4521 = vmatmul.mubr.msk.bf16.gmra.mrb[124].mxu0 %vm98_vm2, %v873_v58  ;;  %v1489_v4 = vld [vmem:[%s5521_s18 + $0x20] sm:$0xff] }
 0x113   :  { %4567 = vmatmul.mubr.msk.bf16.gmra.mrb[124].mxu1 %vm98_vm2, %v1087_v62  ;;  %4524 = vmatprep.mubr.msk.bf16.mxu0 %vm5060_vm1, %v5059_v2 }
 0x114   :  { %4570 = vmatprep.mubr.msk.bf16.mxu1 %vm5060_vm1, %v5059_v2 }
 0x115   :  { %v210_v7 = vpop.f32.mrb[20].mxu0 }
 0x116   :  { %v366_v8 = vpop.f32.mrb[20].mxu1  ;;  %v4322_v9 = vpop.f32.mrb[21].mxu0 }
 0x117   :  { %v5509_v12 = vadd.f32 %v366_v8, %v210_v7  ;;  %v4368_v13 = vpop.f32.mrb[21].mxu1  ;;  %v213_v14 = vpop.f32.mrb[22].mxu0  ;;  %v1294_v9 = vpack.c.bf16 %v1276_v1, %v1275_v0  ;;  %v1281_v0 = vld [vmem:[%s5514_s15 + $0x50] sm:$0xff]  ;;  %v1282_v1 = vld [vmem:[%s5514_s15 + $0x58] sm:$0xff] }
 0x118   :  { %v369_v17 = vpop.f32.mrb[22].mxu1  ;;  %v4323_v18 = vpop.f32.mrb[23].mxu0 }
 0x119   :  { %v5516_v19 = vadd.f32 %v369_v17, %v213_v14  ;;  %v4369_v20 = vpop.f32.mrb[23].mxu1 }
 0x11a   :  { %4525 = vmatmul.mubr.msk.bf16.gmra.mrb[128].mxu0 %vm98_vm2, %v874_v11 }
 0x11b   :  { %4571 = vmatmul.mubr.msk.bf16.gmra.mrb[128].mxu1 %vm98_vm2, %v1088_v15  ;;  %4576 = vmatprep.mubr.msk.bf16.mxu0 %vm5060_vm1, %v5059_v2  ;;  %v1508_v15 = vpack.c.bf16 %v1490_v5, %v1489_v4  ;;  %v1495_v4 = vld [vmem:[%s5521_s18 + $0x50] sm:$0xff]  ;;  %v1496_v5 = vld [vmem:[%s5521_s18 + $0x58] sm:$0xff] }
 0x11c   :  { %4622 = vmatprep.mubr.msk.bf16.mxu1 %vm5060_vm1, %v5059_v2 }
 0x11d   :  { %v218_v25 = vpop.f32.mrb[24].mxu0 }
 0x11e   :  { %v374_v28 = vpop.f32.mrb[24].mxu1  ;;  %v4326_v29 = vpop.f32.mrb[25].mxu0 }
 0x11f   :  { %v5539_v33 = vadd.f32 %v374_v28, %v218_v25  ;;  %v4372_v34 = vpop.f32.mrb[25].mxu1  ;;  %v221_v35 = vpop.f32.mrb[26].mxu0  ;;  %v1492_v25 = vld [vmem:[%s5521_s18 + $0x38] sm:$0xff] }
 0x120   :  { %v377_v37 = vpop.f32.mrb[26].mxu1  ;;  %v4327_v38 = vpop.f32.mrb[27].mxu0 }
 0x121   :  { %v5542_v40 = vadd.f32 %v377_v37, %v221_v35  ;;  %v4373_v41 = vpop.f32.mrb[27].mxu1 }
 0x122   :  { %4577 = vmatmul.mubr.msk.bf16.vlgmr.msra.gmra.mrb[132].mxu0 %vm98_vm2, %v1292_v30  ;;  %v1295_v30 = vpack.c.bf16 %v1278_v23, %v1277_v22 }
 0x123   :  { %4623 = vmatmul.mubr.msk.bf16.vlgmr.msra.gmra.mrb[132].mxu1 %vm98_vm2, %v1506_v36  ;;  %4667 = vmatpush3.bf16.msra.mxu0 %v1767_v39  ;;  %v1509_v36 = vpack.c.bf16 %v1492_v25, %v1491_v24 }
 0x124   :  { %4713 = vmatpush3.bf16.msra.mxu1 %v1981_v43  ;;  %4580 = vmatprep.mubr.msk.bf16.mxu0 %vm5060_vm1, %v5059_v2  ;;  %v1279_v43 = vld [vmem:[%s5514_s15 + $0x40] sm:$0xff] }
 0x125   :  { %v226_v49 = vpop.f32.mrb[28].mxu0  ;;  %4626 = vmatprep.mubr.msk.bf16.mxu1 %vm5060_vm1, %v5059_v2  ;;  %4758 = vmatprep.subr.bf16.mxu0 %v5059_v2 }
 0x126   :  { %v382_v50 = vpop.f32.mrb[28].mxu1  ;;  %v4330_v51 = vpop.f32.mrb[29].mxu0  ;;  %4804 = vmatprep.subr.bf16.mxu1 %v5059_v2 }
 0x127   :  { %v5557_v53 = vadd.f32 %v382_v50, %v226_v49  ;;  %v4376_v54 = vpop.f32.mrb[29].mxu1  ;;  %v229_v55 = vpop.f32.mrb[30].mxu0  ;;  %v1296_v51 = vpack.c.bf16 %v1280_v44, %v1279_v43 }
 0x128   :  { %v385_v58 = vpop.f32.mrb[30].mxu1  ;;  %v4331_v60 = vpop.f32.mrb[31].mxu0 }
 0x129   :  { %v5559_v61 = vadd.f32 %v385_v58, %v229_v55  ;;  %v4377_v62 = vpop.f32.mrb[31].mxu1 }
 0x12a   :  { %4581 = vmatmul.mubr.msk.bf16.gmra.mrb[136].mxu0 %vm98_vm2, %v1293_v52 }
 0x12b   :  { %4627 = vmatmul.mubr.msk.bf16.gmra.mrb[136].mxu1 %vm98_vm2, %v1507_v56  ;;  %4584 = vmatprep.mubr.msk.bf16.mxu0 %vm5060_vm1, %v5059_v2  ;;  %v1510_v56 = vpack.c.bf16 %v1494_v46, %v1493_v45 }
 0x12c   :  { %4630 = vmatprep.mubr.msk.bf16.mxu1 %vm5060_vm1, %v5059_v2 }
 0x12d   :  { %v234_v6 = vpop.f32.mrb[32].mxu0 }
 0x12e   :  { %v390_v7 = vpop.f32.mrb[32].mxu1  ;;  %v4334_v8 = vpop.f32.mrb[33].mxu0 }
 0x12f   :  { %v5571_v11 = vadd.f32 %v390_v7, %v234_v6  ;;  %v4380_v13 = vpop.f32.mrb[33].mxu1  ;;  %v237_v14 = vpop.f32.mrb[34].mxu0 }
 0x130   :  { %v393_v17 = vpop.f32.mrb[34].mxu1  ;;  %v4335_v18 = vpop.f32.mrb[35].mxu0  ;;  %v1297_v13 = vpack.c.bf16 %v1282_v1, %v1281_v0 }
 0x131   :  { %v5573_v20 = vadd.f32 %v393_v17, %v237_v14  ;;  %v4381_v21 = vpop.f32.mrb[35].mxu1  ;;  %v1511_v17 = vpack.c.bf16 %v1496_v5, %v1495_v4 }
 0x132   :  { %4585 = vmatmul.mubr.msk.bf16.gmra.mrb[140].mxu0 %vm98_vm2, %v1294_v9 }
 0x133   :  { %4631 = vmatmul.mubr.msk.bf16.gmra.mrb[140].mxu1 %vm98_vm2, %v1508_v15  ;;  %4588 = vmatprep.mubr.msk.bf16.mxu0 %vm5060_vm1, %v5059_v2 }
 0x134   :  { %4634 = vmatprep.mubr.msk.bf16.mxu1 %vm5060_vm1, %v5059_v2 }
 0x135   :  { %v242_v27 = vpop.f32.mrb[36].mxu0 }
 0x136   :  { %v398_v28 = vpop.f32.mrb[36].mxu1  ;;  %v4338_v29 = vpop.f32.mrb[37].mxu0 }
 0x137   :  { %v5585_v31 = vadd.f32 %v398_v28, %v242_v27  ;;  %v4384_v34 = vpop.f32.mrb[37].mxu1  ;;  %v245_v35 = vpop.f32.mrb[38].mxu0  ;;  %v1284_v27 = vld [vmem:[%s5514_s15 + $0x68] sm:$0xff]  ;;  %v1497_v28 = vld [vmem:[%s5521_s18 + $0x60] sm:$0xff] }
 0x138   :  { %v401_v37 = vpop.f32.mrb[38].mxu1  ;;  %v4339_v38 = vpop.f32.mrb[39].mxu0  ;;  %v1498_v29 = vld [vmem:[%s5521_s18 + $0x68] sm:$0xff] }
 0x139   :  { %v5587_v39 = vadd.f32 %v401_v37, %v245_v35  ;;  %v4385_v41 = vpop.f32.mrb[39].mxu1 }
 0x13a   :  { %4589 = vmatmul.mubr.msk.bf16.gmra.mrb[144].mxu0 %vm98_vm2, %v1295_v30  ;;  %v1512_v41 = vpack.c.bf16 %v1498_v29, %v1497_v28 }
 0x13b   :  { %4635 = vmatmul.mubr.msk.bf16.gmra.mrb[144].mxu1 %vm98_vm2, %v1509_v36  ;;  %4592 = vmatprep.mubr.msk.bf16.mxu0 %vm5060_vm1, %v5059_v2 }
 0x13c   :  { %4638 = vmatprep.mubr.msk.bf16.mxu1 %vm5060_vm1, %v5059_v2 }
 0x13d   :  { %v250_v47 = vpop.f32.mrb[40].mxu0 }
 0x13e   :  { %v406_v49 = vpop.f32.mrb[40].mxu1  ;;  %v4342_v50 = vpop.f32.mrb[41].mxu0 }
 0x13f   :  { %v5599_v52 = vadd.f32 %v406_v49, %v250_v47  ;;  %v4388_v54 = vpop.f32.mrb[41].mxu1  ;;  %v253_v55 = vpop.f32.mrb[42].mxu0  ;;  %v1286_v50 = vld [vmem:[%s5514_s15 + $0x78] sm:$0xff] }
 0x140   :  { %v409_v58 = vpop.f32.mrb[42].mxu1  ;;  %v4343_v60 = vpop.f32.mrb[43].mxu0  ;;  %v1500_v54 = vld [vmem:[%s5521_s18 + $0x78] sm:$0xff] }
 0x141   :  { %v4389_v62 = vpop.f32.mrb[43].mxu1 }
 0x142   :  { %4593 = vmatmul.mubr.msk.bf16.gmra.mrb[148].mxu0 %vm98_vm2, %v1296_v51  ;;  %v1499_v51 = vld [vmem:[%s5521_s18 + $0x70] sm:$0xff] }
 0x143   :  { %4639 = vmatmul.mubr.msk.bf16.gmra.mrb[148].mxu1 %vm98_vm2, %v1510_v56  ;;  %4596 = vmatprep.mubr.msk.bf16.mxu0 %vm5060_vm1, %v5059_v2  ;;  %v1513_v1 = vpack.c.bf16 %v1500_v54, %v1499_v51 }
 0x144   :  { %4642 = vmatprep.mubr.msk.bf16.mxu1 %vm5060_vm1, %v5059_v2 }
 0x145   :  { %v519_v6 = vpop.f32.mrb[44].mxu0 }
 0x146   :  { %v605_v7 = vadd.f32 %v519_v6, %v5441_v57  ;;  %v733_v8 = vpop.f32.mrb[44].mxu1  ;;  %v4394_v9 = vpop.f32.mrb[45].mxu0  ;;  %v1283_v57 = vld [vmem:[%s5514_s15 + $0x60] sm:$0xff] }
 0x147   :  { %v4440_v14 = vpop.f32.mrb[45].mxu1  ;;  %v522_v15 = vpop.f32.mrb[46].mxu0  ;;  %v1298_v36 = vpack.c.bf16 %v1284_v27, %v1283_v57  ;;  %v1287_v9 = vld [vmem:[%s5514_s15 + $0x80] sm:$0xff] }
 0x148   :  { %v5612_v18 = vadd.f32 %v733_v8, %v605_v7  ;;  %v606_v21 = vadd.f32 %v522_v15, %v5443_v63  ;;  %v736_v22 = vpop.f32.mrb[46].mxu1  ;;  %v4395_v23 = vpop.f32.mrb[47].mxu0  ;;  %v1502_v14 = vld [vmem:[%s5521_s18 + $0x88] sm:$0xff] }
 0x149   :  { %v4441_v24 = vpop.f32.mrb[47].mxu1 }
 0x14a   :  { %v5615_v25 = vadd.f32 %v736_v22, %v606_v21  ;;  %4597 = vmatmul.mubr.msk.bf16.gmra.mrb[152].mxu0 %vm98_vm2, %v1297_v13  ;;  %v1288_v13 = vld [vmem:[%s5514_s15 + $0x88] sm:$0xff] }
 0x14b   :  { %4643 = vmatmul.mubr.msk.bf16.gmra.mrb[152].mxu1 %vm98_vm2, %v1511_v17  ;;  %4600 = vmatprep.mubr.msk.bf16.mxu0 %vm5060_vm1, %v5059_v2  ;;  %v1300_v23 = vpack.c.bf16 %v1288_v13, %v1287_v9 }
 0x14c   :  { %4646 = vmatprep.mubr.msk.bf16.mxu1 %vm5060_vm1, %v5059_v2 }
 0x14d   :  { %v527_v63 = vpop.f32.mrb[48].mxu0 }
 0x14e   :  { %v607_v30 = vadd.f32 %v527_v63, %v5455_v10  ;;  %v741_v34 = vpop.f32.mrb[48].mxu1  ;;  %v4398_v35 = vpop.f32.mrb[49].mxu0  ;;  %v1285_v10 = vld [vmem:[%s5514_s15 + $0x70] sm:$0xff] }
 0x14f   :  { %v4444_v37 = vpop.f32.mrb[49].mxu1  ;;  %v530_v38 = vpop.f32.mrb[50].mxu0  ;;  %v1299_v60 = vpack.c.bf16 %v1286_v50, %v1285_v10  ;;  %v1289_v35 = vld [vmem:[%s5514_s15 + $0x90] sm:$0xff] }
 0x150   :  { %v5628_v43 = vadd.f32 %v741_v34, %v607_v30  ;;  %v608_v44 = vadd.f32 %v530_v38, %v5457_v16  ;;  %v744_v45 = vpop.f32.mrb[50].mxu1  ;;  %v4399_v46 = vpop.f32.mrb[51].mxu0  ;;  %v1504_v37 = vld [vmem:[%s5521_s18 + $0x98] sm:$0xff] }
 0x151   :  { %v4445_v47 = vpop.f32.mrb[51].mxu1 }
 0x152   :  { %v5631_v49 = vadd.f32 %v744_v45, %v608_v44  ;;  %4601 = vmatmul.mubr.msk.bf16.gmra.mrb[156].mxu0 %vm98_vm2, %v1298_v36  ;;  %v1290_v36 = vld [vmem:[%s5514_s15 + $0x98] sm:$0xff] }
 0x153   :  { %4647 = vmatmul.mubr.msk.bf16.gmra.mrb[156].mxu1 %vm98_vm2, %v1512_v41  ;;  %4604 = vmatprep.mubr.msk.bf16.mxu0 %vm5060_vm1, %v5059_v2  ;;  %v1301_v46 = vpack.c.bf16 %v1290_v36, %v1289_v35 }
 0x154   :  { %4650 = vmatprep.mubr.msk.bf16.mxu1 %vm5060_vm1, %v5059_v2 }
 0x155   :  { %v535_v16 = vpop.f32.mrb[52].mxu0 }
 0x156   :  { %v609_v55 = vadd.f32 %v535_v16, %v5469_v26  ;;  %v749_v56 = vpop.f32.mrb[52].mxu1  ;;  %v4402_v58 = vpop.f32.mrb[53].mxu0 }
 0x157   :  { %v4448_v62 = vpop.f32.mrb[53].mxu1  ;;  %v538_v0 = vpop.f32.mrb[54].mxu0  ;;  %v1291_v58 = vld [vmem:[%s5514_s15 + $0xa0] sm:$0x3] }
 0x158   :  { %v610_v4 = vadd.f32 %v538_v0, %v5471_v32  ;;  %v752_v5 = vpop.f32.mrb[54].mxu1  ;;  %v4403_v6 = vpop.f32.mrb[55].mxu0  ;;  %v5645_v7 = vadd.f32 %v749_v56, %v609_v55  ;;  %v1501_v32 = vld [vmem:[%s5521_s18 + $0x80] sm:$0xff] }
 0x159   :  { %v4449_v8 = vpop.f32.mrb[55].mxu1  ;;  %v1514_v27 = vpack.c.bf16 %v1502_v14, %v1501_v32 }
 0x15a   :  { %4605 = vmatmul.mubr.msk.bf16.gmra.mrb[160].mxu0 %vm98_vm2, %v1299_v60  ;;  %v5648_v26 = vadd.f32 %v752_v5, %v610_v4  ;;  %v1302_v4 = vpack.c.bf16 %v1291_v58, %v1291_v58 }
 0x15b   :  { %4651 = vmatmul.mubr.msk.bf16.gmra.mrb[160].mxu1 %vm98_vm2, %v1513_v1  ;;  %4608 = vmatprep.mubr.msk.bf16.mxu0 %vm5060_vm1, %v5059_v2 }
 0x15c   :  { %4654 = vmatprep.mubr.msk.bf16.mxu1 %vm5060_vm1, %v5059_v2 }
 0x15d   :  { %v543_v15 = vpop.f32.mrb[56].mxu0 }
 0x15e   :  { %v611_v17 = vadd.f32 %v543_v15, %v5483_v42  ;;  %v757_v21 = vpop.f32.mrb[56].mxu1  ;;  %v4406_v22 = vpop.f32.mrb[57].mxu0  ;;  %v1699_v15 = vld [vmem:[%s5694_s26] sm:$0xff] }
 0x15f   :  { %v4452_v24 = vpop.f32.mrb[57].mxu1  ;;  %v546_v57 = vpop.f32.mrb[58].mxu0  ;;  %v1914_v22 = vld [vmem:[%s5701_s29 + $0x8] sm:$0xff] }
 0x160   :  { %v612_v28 = vadd.f32 %v546_v57, %v5485_v48  ;;  %v760_v29 = vpop.f32.mrb[58].mxu1  ;;  %v4407_v63 = vpop.f32.mrb[59].mxu0  ;;  %v5661_v30 = vadd.f32 %v757_v21, %v611_v17  ;;  %v1503_v48 = vld [vmem:[%s5521_s18 + $0x90] sm:$0xff]  ;;  %v1700_v17 = vld [vmem:[%s5694_s26 + $0x8] sm:$0xff]  ;;  %v1913_v21 = vld [vmem:[%s5701_s29] sm:$0xff] }
 0x161   :  { %v4453_v34 = vpop.f32.mrb[59].mxu1  ;;  %v1515_v50 = vpack.c.bf16 %v1504_v37, %v1503_v48  ;;  %v4028_v24 = vld [vmem:[%s6987_s2 + $0x28] sm:$0xf]  ;;  %v4041_v63 = vld [vmem:[%s6987_s2 + $0x2c] sm:$0xf]  ;;  %v1934_v36 = vpack.c.bf16 %v1914_v22, %v1913_v21 }
 0x162   :  { %4609 = vmatmul.mubr.msk.bf16.gmra.mrb[164].mxu0 %vm98_vm2, %v1300_v23  ;;  %v5664_v42 = vadd.f32 %v760_v29, %v612_v28  ;;  %v1720_v29 = vpack.c.bf16 %v1700_v17, %v1699_v15 }
 0x163   :  { %4655 = vmatmul.mubr.msk.bf16.gmra.mrb[164].mxu1 %vm98_vm2, %v1514_v27  ;;  %4612 = vmatprep.mubr.msk.bf16.mxu0 %vm5060_vm1, %v5059_v2 }
 0x164   :  { %4658 = vmatprep.mubr.msk.bf16.mxu1 %vm5060_vm1, %v5059_v2 }
 0x165   :  { %v551_v38 = vpop.f32.mrb[60].mxu0 }
 0x166   :  { %v613_v41 = vadd.f32 %v551_v38, %v5497_v59  ;;  %v765_v44 = vpop.f32.mrb[60].mxu1  ;;  %v4410_v45 = vpop.f32.mrb[61].mxu0 }
 0x167   :  { %v4456_v47 = vpop.f32.mrb[61].mxu1  ;;  %v554_v10 = vpop.f32.mrb[62].mxu0  ;;  %v2409_v45 = vsel %vm132_vm0, %v4041_v63, 0 }
 0x168   :  { %v614_v51 = vadd.f32 %v554_v10, %v5499_v3  ;;  %v768_v54 = vpop.f32.mrb[62].mxu1  ;;  %v4411_v16 = vpop.f32.mrb[63].mxu0  ;;  %v5677_v55 = vadd.f32 %v765_v44, %v613_v41  ;;  %v1505_v3 = vld [vmem:[%s5521_s18 + $0xa0] sm:$0x3]  ;;  %v1701_v47 = vld [vmem:[%s5694_s26 + $0x10] sm:$0xff]  ;;  %v1702_v10 = vld [vmem:[%s5694_s26 + $0x18] sm:$0xff] }
 0x169   :  { %v4457_v56 = vpop.f32.mrb[63].mxu1  ;;  %v1516_v8 = vpack.c.bf16 %v1505_v3, %v1505_v3  ;;  %v1721_v58 = vpack.c.bf16 %v1702_v10, %v1701_v47  ;;  %s4079_s18 = sld [smem:[#allocation3 + $0xe]] }
 0x16a   :  { %4613 = vmatmul.mubr.msk.bf16.gmra.mrb[168].mxu0 %vm98_vm2, %v1301_v46  ;;  %v5680_v59 = vadd.f32 %v768_v54, %v614_v51 }
 0x16b   :  { %4659 = vmatmul.mubr.msk.bf16.gmra.mrb[168].mxu1 %vm98_vm2, %v1515_v50  ;;  %4616 = vmatprep.mubr.msk.bf16.mxu0 %vm5060_vm1, %v5059_v2  ;;  %v1916_v50 = vld [vmem:[%s5701_s29 + $0x18] sm:$0xff] }
 0x16c   :  { %4662 = vmatprep.mubr.msk.bf16.mxu1 %vm5060_vm1, %v5059_v2 }
 0x16d   :  { %v559_v60 = vpop.f32.mrb[64].mxu0 }
 0x16e   :  { %v615_v62 = vadd.f32 %v559_v60, %v5509_v12  ;;  %v773_v0 = vpop.f32.mrb[64].mxu1  ;;  %v4414_v1 = vpop.f32.mrb[65].mxu0 }
 0x16f   :  { %v4460_v5 = vpop.f32.mrb[65].mxu1  ;;  %v562_v6 = vpop.f32.mrb[66].mxu0  ;;  %s6291_s0 = scalar_lea.vmem %s6986_s1, %s4079_s18 }
 0x170   :  { %v616_v9 = vadd.f32 %v562_v6, %v5516_v19  ;;  %v776_v13 = vpop.f32.mrb[66].mxu1  ;;  %v4415_v32 = vpop.f32.mrb[67].mxu0  ;;  %v5696_v14 = vadd.f32 %v773_v0, %v615_v62 }
 0x171   :  { %v4461_v12 = vpop.f32.mrb[67].mxu1 }
 0x172   :  { %4617 = vmatmul.mubr.msk.bf16.gmra.mrb[172].mxu0 %vm98_vm2, %v1302_v4  ;;  %v5704_v19 = vadd.f32 %v776_v13, %v616_v9  ;;  %v1704_v9 = vld [vmem:[%s5694_s26 + $0x28] sm:$0xff] }
 0x173   :  { %4663 = vmatmul.mubr.msk.bf16.gmra.mrb[172].mxu1 %vm98_vm2, %v1516_v8  ;;  %4668 = vmatprep.mubr.msk.bf16.mxu0 %vm5060_vm1, %v5059_v2  ;;  %v1703_v8 = vld [vmem:[%s5694_s26 + $0x20] sm:$0xff]  ;;  %v1918_v13 = vld [vmem:[%s5701_s29 + $0x28] sm:$0xff] }
 0x174   :  { %4714 = vmatprep.mubr.msk.bf16.mxu1 %vm5060_vm1, %v5059_v2  ;;  %v1722_v21 = vpack.c.bf16 %v1704_v9, %v1703_v8 }
 0x175   :  { %v567_v23 = vpop.f32.mrb[68].mxu0 }
 0x176   :  { %v617_v57 = vadd.f32 %v567_v23, %v5539_v33  ;;  %v781_v27 = vpop.f32.mrb[68].mxu1  ;;  %v4418_v28 = vpop.f32.mrb[69].mxu0  ;;  %v2195_v33 = vsel %vm132_vm0, %v4028_v24, 0 }
 0x177   :  { %v4464_v34 = vpop.f32.mrb[69].mxu1  ;;  %v570_v35 = vpop.f32.mrb[70].mxu0 }
 0x178   :  { %v618_v48 = vadd.f32 %v570_v35, %v5542_v40  ;;  %v784_v37 = vpop.f32.mrb[70].mxu1  ;;  %v4419_v38 = vpop.f32.mrb[71].mxu0  ;;  %v5724_v41 = vadd.f32 %v781_v27, %v617_v57  ;;  %v1915_v40 = vld [vmem:[%s5701_s29 + $0x10] sm:$0xff]  ;;  %v1706_v35 = vld [vmem:[%s5694_s26 + $0x38] sm:$0xff] }
 0x179   :  { %v4465_v44 = vpop.f32.mrb[71].mxu1  ;;  %v1935_v62 = vpack.c.bf16 %v1916_v50, %v1915_v40  ;;  %v1705_v34 = vld [vmem:[%s5694_s26 + $0x30] sm:$0xff] }
 0x17a   :  { %4669 = vmatmul.mubr.msk.bf16.vlgmr.msra.gmra.mrb[176].mxu0 %vm98_vm2, %v1720_v29  ;;  %v5728_v46 = vadd.f32 %v784_v37, %v618_v48  ;;  %v1723_v44 = vpack.c.bf16 %v1706_v35, %v1705_v34 }
 0x17b   :  { %4715 = vmatmul.mubr.msk.bf16.vlgmr.msra.gmra.mrb[176].mxu1 %vm98_vm2, %v1934_v36  ;;  %4759 = vmatpush3.bf16.msra.mxu0 %v2195_v33  ;;  %v1920_v36 = vld [vmem:[%s5701_s29 + $0x38] sm:$0xff] }
 0x17c   :  { %4805 = vmatpush3.bf16.msra.mxu1 %v2409_v45  ;;  %4672 = vmatprep.mubr.msk.bf16.mxu0 %vm5060_vm1, %v5059_v2 }
 0x17d   :  { %v575_v51 = vpop.f32.mrb[72].mxu0  ;;  %4718 = vmatprep.mubr.msk.bf16.mxu1 %vm5060_vm1, %v5059_v2  ;;  %4850 = vmatprep.subr.bf16.mxu0 %v5059_v2 }
 0x17e   :  { %v619_v54 = vadd.f32 %v575_v51, %v5557_v53  ;;  %v789_v16 = vpop.f32.mrb[72].mxu1  ;;  %v4422_v56 = vpop.f32.mrb[73].mxu0  ;;  %4896 = vmatprep.subr.bf16.mxu1 %v5059_v2 }
 0x17f   :  { %v4468_v3 = vpop.f32.mrb[73].mxu1  ;;  %v578_v60 = vpop.f32.mrb[74].mxu0  ;;  %v1707_v56 = vld [vmem:[%s5694_s26 + $0x40] sm:$0xff] }
 0x180   :  { %v620_v0 = vadd.f32 %v578_v60, %v5559_v61  ;;  %v792_v1 = vpop.f32.mrb[74].mxu1  ;;  %v4423_v4 = vpop.f32.mrb[75].mxu0  ;;  %v5743_v5 = vadd.f32 %v789_v16, %v619_v54  ;;  %v1917_v61 = vld [vmem:[%s5701_s29 + $0x20] sm:$0xff]  ;;  %v1922_v3 = vld [vmem:[%s5701_s29 + $0x48] sm:$0xff] }
 0x181   :  { %v4469_v6 = vpop.f32.mrb[75].mxu1  ;;  %v1936_v24 = vpack.c.bf16 %v1918_v13, %v1917_v61 }
 0x182   :  { %4673 = vmatmul.mubr.msk.bf16.gmra.mrb[180].mxu0 %vm98_vm2, %v1721_v58  ;;  %v5746_v53 = vadd.f32 %v792_v1, %v620_v0  ;;  %v1708_v58 = vld [vmem:[%s5694_s26 + $0x48] sm:$0xff] }
 0x183   :  { %4719 = vmatmul.mubr.msk.bf16.gmra.mrb[180].mxu1 %vm98_vm2, %v1935_v62  ;;  %4676 = vmatprep.mubr.msk.bf16.mxu0 %vm5060_vm1, %v5059_v2  ;;  %v1724_v4 = vpack.c.bf16 %v1708_v58, %v1707_v56 }
 0x184   :  { %4722 = vmatprep.mubr.msk.bf16.mxu1 %vm5060_vm1, %v5059_v2 }
 0x185   :  { %v583_v32 = vpop.f32.mrb[76].mxu0 }
 0x186   :  { %v621_v12 = vadd.f32 %v583_v32, %v5571_v11  ;;  %v797_v15 = vpop.f32.mrb[76].mxu1  ;;  %v4426_v17 = vpop.f32.mrb[77].mxu0 }
 0x187   :  { %v4472_v22 = vpop.f32.mrb[77].mxu1  ;;  %v586_v23 = vpop.f32.mrb[78].mxu0  ;;  %v1923_v17 = vld [vmem:[%s5701_s29 + $0x50] sm:$0xff] }
 0x188   :  { %v622_v57 = vadd.f32 %v586_v23, %v5573_v20  ;;  %v800_v27 = vpop.f32.mrb[78].mxu1  ;;  %v4427_v28 = vpop.f32.mrb[79].mxu0  ;;  %v5759_v29 = vadd.f32 %v797_v15, %v621_v12  ;;  %v1919_v20 = vld [vmem:[%s5701_s29 + $0x30] sm:$0xff]  ;;  %v1710_v15 = vld [vmem:[%s5694_s26 + $0x58] sm:$0xff] }
 0x189   :  { %v4473_v63 = vpop.f32.mrb[79].mxu1  ;;  %v1937_v10 = vpack.c.bf16 %v1920_v36, %v1919_v20 }
 0x18a   :  { %4677 = vmatmul.mubr.msk.bf16.gmra.mrb[184].mxu0 %vm98_vm2, %v1722_v21  ;;  %v5762_v11 = vadd.f32 %v800_v27, %v622_v57  ;;  %v1924_v21 = vld [vmem:[%s5701_s29 + $0x58] sm:$0xff] }
 0x18b   :  { %4723 = vmatmul.mubr.msk.bf16.gmra.mrb[184].mxu1 %vm98_vm2, %v1936_v24  ;;  %4680 = vmatprep.mubr.msk.bf16.mxu0 %vm5060_vm1, %v5059_v2  ;;  %v1939_v34 = vpack.c.bf16 %v1924_v21, %v1923_v17 }
 0x18c   :  { %4726 = vmatprep.mubr.msk.bf16.mxu1 %vm5060_vm1, %v5059_v2 }
 0x18d   :  { %v591_v48 = vpop.f32.mrb[80].mxu0 }
 0x18e   :  { %v623_v37 = vadd.f32 %v591_v48, %v5585_v31  ;;  %v805_v38 = vpop.f32.mrb[80].mxu1  ;;  %v4430_v33 = vpop.f32.mrb[81].mxu0 }
 0x18f   :  { %v4476_v45 = vpop.f32.mrb[81].mxu1  ;;  %v594_v47 = vpop.f32.mrb[82].mxu0  ;;  %v1712_v33 = vld [vmem:[%s5694_s26 + $0x68] sm:$0xff] }
 0x190   :  { %v624_v40 = vadd.f32 %v594_v47, %v5587_v39  ;;  %v808_v50 = vpop.f32.mrb[82].mxu1  ;;  %v4431_v51 = vpop.f32.mrb[83].mxu0  ;;  %v5775_v54 = vadd.f32 %v805_v38, %v623_v37  ;;  %v1921_v39 = vld [vmem:[%s5701_s29 + $0x40] sm:$0xff] }
 0x191   :  { %v4477_v16 = vpop.f32.mrb[83].mxu1  ;;  %v1938_v9 = vpack.c.bf16 %v1922_v3, %v1921_v39  ;;  %v1711_v38 = vld [vmem:[%s5694_s26 + $0x60] sm:$0xff] }
 0x192   :  { %4681 = vmatmul.mubr.msk.bf16.gmra.mrb[188].mxu0 %vm98_vm2, %v1723_v44  ;;  %v5778_v31 = vadd.f32 %v808_v50, %v624_v40  ;;  %v1926_v44 = vld [vmem:[%s5701_s29 + $0x68] sm:$0xff]  ;;  %v1726_v50 = vpack.c.bf16 %v1712_v33, %v1711_v38 }
 0x193   :  { %4727 = vmatmul.mubr.msk.bf16.gmra.mrb[188].mxu1 %vm98_vm2, %v1937_v10  ;;  %4684 = vmatprep.mubr.msk.bf16.mxu0 %vm5060_vm1, %v5059_v2 }
 0x194   :  { %4730 = vmatprep.mubr.msk.bf16.mxu1 %vm5060_vm1, %v5059_v2 }
 0x195   :  { %v599_v60 = vpop.f32.mrb[84].mxu0 }
 0x196   :  { %v625_v62 = vadd.f32 %v599_v60, %v5599_v52  ;;  %v813_v0 = vpop.f32.mrb[84].mxu1  ;;  %v4434_v1 = vpop.f32.mrb[85].mxu0  ;;  %v1709_v52 = vld [vmem:[%s5694_s26 + $0x50] sm:$0xff] }
 0x197   :  { %v4480_v6 = vpop.f32.mrb[85].mxu1  ;;  %v602_v8 = vpop.f32.mrb[86].mxu0  ;;  %v1725_v27 = vpack.c.bf16 %v1710_v15, %v1709_v52  ;;  %v1714_v1 = vld [vmem:[%s5694_s26 + $0x78] sm:$0xff] }
 0x198   :  { %v816_v61 = vpop.f32.mrb[86].mxu1  ;;  %v4435_v13 = vpop.f32.mrb[87].mxu0  ;;  %v5790_v32 = vadd.f32 %v813_v0, %v625_v62  ;;  %v1713_v0 = vld [vmem:[%s5694_s26 + $0x70] sm:$0xff] }
 0x199   :  { %v4481_v12 = vpop.f32.mrb[87].mxu1  ;;  %v1727_v13 = vpack.c.bf16 %v1714_v1, %v1713_v0 }
 0x19a   :  { %4685 = vmatmul.mubr.msk.bf16.gmra.mrb[192].mxu0 %vm98_vm2, %v1724_v4  ;;  %v1928_v4 = vld [vmem:[%s5701_s29 + $0x78] sm:$0xff] }
 0x19b   :  { %4731 = vmatmul.mubr.msk.bf16.gmra.mrb[192].mxu1 %vm98_vm2, %v1938_v9  ;;  %4688 = vmatprep.mubr.msk.bf16.mxu0 %vm5060_vm1, %v5059_v2 }
 0x19c   :  { %4734 = vmatprep.mubr.msk.bf16.mxu1 %vm5060_vm1, %v5059_v2 }
 0x19d   :  { %v947_v22 = vpop.f32.mrb[88].mxu0 }
 0x19e   :  { %v1033_v23 = vadd.f32 %v947_v22, %v5612_v18  ;;  %v1161_v24 = vpop.f32.mrb[88].mxu1  ;;  %v4486_v57 = vpop.f32.mrb[89].mxu0 }
 0x19f   :  { %v4532_v28 = vpop.f32.mrb[89].mxu1  ;;  %v950_v63 = vpop.f32.mrb[90].mxu0 }
 0x1a0   :  { %v1034_v35 = vadd.f32 %v950_v63, %v5615_v25  ;;  %v1164_v20 = vpop.f32.mrb[90].mxu1  ;;  %v4487_v36 = vpop.f32.mrb[91].mxu0  ;;  %v5804_v48 = vadd.f32 %v1161_v24, %v1033_v23  ;;  %v1925_v25 = vld [vmem:[%s5701_s29 + $0x60] sm:$0xff]  ;;  %v1930_v63 = vld [vmem:[%s5701_s29 + $0x88] sm:$0xff] }
 0x1a1   :  { %v4533_v37 = vpop.f32.mrb[91].mxu1  ;;  %v1940_v56 = vpack.c.bf16 %v1926_v44, %v1925_v25  ;;  %v1929_v28 = vld [vmem:[%s5701_s29 + $0x80] sm:$0xff] }
 0x1a2   :  { %4689 = vmatmul.mubr.msk.bf16.gmra.mrb[196].mxu0 %vm98_vm2, %v1725_v27  ;;  %v5807_v18 = vadd.f32 %v1164_v20, %v1034_v35  ;;  %v1716_v27 = vld [vmem:[%s5694_s26 + $0x88] sm:$0xff]  ;;  %v1942_v33 = vpack.c.bf16 %v1930_v63, %v1929_v28 }
 0x1a3   :  { %4735 = vmatmul.mubr.msk.bf16.gmra.mrb[196].mxu1 %vm98_vm2, %v1939_v34  ;;  %4692 = vmatprep.mubr.msk.bf16.mxu0 %vm5060_vm1, %v5059_v2 }
 0x1a4   :  { %4738 = vmatprep.mubr.msk.bf16.mxu1 %vm5060_vm1, %v5059_v2 }
 0x1a5   :  { %v955_v45 = vpop.f32.mrb[92].mxu0 }
 0x1a6   :  { %v1035_v47 = vadd.f32 %v955_v45, %v5628_v43  ;;  %v1169_v10 = vpop.f32.mrb[92].mxu1  ;;  %v4490_v40 = vpop.f32.mrb[93].mxu0 }
 0x1a7   :  { %v4536_v51 = vpop.f32.mrb[93].mxu1  ;;  %v958_v16 = vpop.f32.mrb[94].mxu0 }
 0x1a8   :  { %v1036_v58 = vadd.f32 %v958_v16, %v5631_v49  ;;  %v1172_v39 = vpop.f32.mrb[94].mxu1  ;;  %v4491_v3 = vpop.f32.mrb[95].mxu0  ;;  %v5820_v60 = vadd.f32 %v1169_v10, %v1035_v47  ;;  %v1927_v49 = vld [vmem:[%s5701_s29 + $0x70] sm:$0xff]  ;;  %v1932_v16 = vld [vmem:[%s5701_s29 + $0x98] sm:$0xff] }
 0x1a9   :  { %v4537_v62 = vpop.f32.mrb[95].mxu1  ;;  %v1941_v15 = vpack.c.bf16 %v1928_v4, %v1927_v49  ;;  %v1931_v51 = vld [vmem:[%s5701_s29 + $0x90] sm:$0xff] }
 0x1aa   :  { %4693 = vmatmul.mubr.msk.bf16.gmra.mrb[200].mxu0 %vm98_vm2, %v1726_v50  ;;  %v5823_v43 = vadd.f32 %v1172_v39, %v1036_v58  ;;  %v1718_v50 = vld [vmem:[%s5694_s26 + $0x98] sm:$0xff]  ;;  %v1943_v1 = vpack.c.bf16 %v1932_v16, %v1931_v51 }
 0x1ab   :  { %4739 = vmatmul.mubr.msk.bf16.gmra.mrb[200].mxu1 %vm98_vm2, %v1940_v56  ;;  %4696 = vmatprep.mubr.msk.bf16.mxu0 %vm5060_vm1, %v5059_v2 }
 0x1ac   :  { %4742 = vmatprep.mubr.msk.bf16.mxu1 %vm5060_vm1, %v5059_v2 }
 0x1ad   :  { %v963_v6 = vpop.f32.mrb[96].mxu0 }
 0x1ae   :  { %v1037_v8 = vadd.f32 %v963_v6, %v5645_v7  ;;  %v1177_v9 = vpop.f32.mrb[96].mxu1  ;;  %v4494_v61 = vpop.f32.mrb[97].mxu0  ;;  %v1715_v7 = vld [vmem:[%s5694_s26 + $0x80] sm:$0xff] }
 0x1af   :  { %v4540_v12 = vpop.f32.mrb[97].mxu1  ;;  %v966_v52 = vpop.f32.mrb[98].mxu0  ;;  %v1728_v36 = vpack.c.bf16 %v1716_v27, %v1715_v7 }
 0x1b0   :  { %v5835_v17 = vadd.f32 %v1177_v9, %v1037_v8  ;;  %v1038_v21 = vadd.f32 %v966_v52, %v5648_v26  ;;  %v1180_v22 = vpop.f32.mrb[98].mxu1  ;;  %v4495_v23 = vpop.f32.mrb[99].mxu0 }
 0x1b1   :  { %v4541_v24 = vpop.f32.mrb[99].mxu1 }
 0x1b2   :  { %v5838_v57 = vadd.f32 %v1180_v22, %v1038_v21  ;;  %4697 = vmatmul.mubr.msk.bf16.gmra.mrb[204].mxu0 %vm98_vm2, %v1727_v13  ;;  %v1933_v13 = vld [vmem:[%s5701_s29 + $0xa0] sm:$0x3] }
 0x1b3   :  { %4743 = vmatmul.mubr.msk.bf16.gmra.mrb[204].mxu1 %vm98_vm2, %v1941_v15  ;;  %4700 = vmatprep.mubr.msk.bf16.mxu0 %vm5060_vm1, %v5059_v2  ;;  %v1944_v24 = vpack.c.bf16 %v1933_v13, %v1933_v13 }
 0x1b4   :  { %4746 = vmatprep.mubr.msk.bf16.mxu1 %vm5060_vm1, %v5059_v2 }
 0x1b5   :  { %v971_v26 = vpop.f32.mrb[100].mxu0 }
 0x1b6   :  { %v1039_v34 = vadd.f32 %v971_v26, %v5661_v30  ;;  %v1185_v35 = vpop.f32.mrb[100].mxu1  ;;  %v4498_v20 = vpop.f32.mrb[101].mxu0  ;;  %v1717_v30 = vld [vmem:[%s5694_s26 + $0x90] sm:$0xff] }
 0x1b7   :  { %v4544_v37 = vpop.f32.mrb[101].mxu1  ;;  %v974_v38 = vpop.f32.mrb[102].mxu0  ;;  %v1729_v3 = vpack.c.bf16 %v1718_v50, %v1717_v30  ;;  %v2342_v20 = vld [vmem:[%s5892_s16 + $0x8] sm:$0xff] }
 0x1b8   :  { %v5851_v25 = vadd.f32 %v1185_v35, %v1039_v34  ;;  %v1040_v44 = vadd.f32 %v974_v38, %v5664_v42  ;;  %v1188_v45 = vpop.f32.mrb[102].mxu1  ;;  %v4499_v47 = vpop.f32.mrb[103].mxu0  ;;  %v2128_v34 = vld [vmem:[%s5887_s13 + $0x8] sm:$0xff]  ;;  %v2341_v35 = vld [vmem:[%s5892_s16] sm:$0xff]  ;;  %v4054_v37 = vld [vmem:[%s6987_s2 + $0x30] sm:$0xf] }
 0x1b9   :  { %v4545_v10 = vpop.f32.mrb[103].mxu1  ;;  %v4067_v47 = vld [vmem:[%s6987_s2 + $0x34] sm:$0xf]  ;;  %v2362_v50 = vpack.c.bf16 %v2342_v20, %v2341_v35 }
 0x1ba   :  { %v5854_v40 = vadd.f32 %v1188_v45, %v1040_v44  ;;  %4701 = vmatmul.mubr.msk.bf16.gmra.mrb[208].mxu0 %vm98_vm2, %v1728_v36 }
 0x1bb   :  { %4747 = vmatmul.mubr.msk.bf16.gmra.mrb[208].mxu1 %vm98_vm2, %v1942_v33  ;;  %4704 = vmatprep.mubr.msk.bf16.mxu0 %vm5060_vm1, %v5059_v2 }
 0x1bc   :  { %4750 = vmatprep.mubr.msk.bf16.mxu1 %vm5060_vm1, %v5059_v2 }
 0x1bd   :  { %v979_v42 = vpop.f32.mrb[104].mxu0 }
 0x1be   :  { %v1041_v56 = vadd.f32 %v979_v42, %v5677_v55  ;;  %v1193_v58 = vpop.f32.mrb[104].mxu1  ;;  %v4502_v39 = vpop.f32.mrb[105].mxu0  ;;  %v1719_v55 = vld [vmem:[%s5694_s26 + $0xa0] sm:$0x3] }
 0x1bf   :  { %v4548_v62 = vpop.f32.mrb[105].mxu1  ;;  %v982_v0 = vpop.f32.mrb[106].mxu0  ;;  %v1730_v21 = vpack.c.bf16 %v1719_v55, %v1719_v55  ;;  %v2837_v39 = vsel %vm132_vm0, %v4067_v47, 0 }
 0x1c0   :  { %v5867_v49 = vadd.f32 %v1193_v58, %v1041_v56  ;;  %v1042_v4 = vadd.f32 %v982_v0, %v5680_v59  ;;  %v1196_v6 = vpop.f32.mrb[106].mxu1  ;;  %v4503_v8 = vpop.f32.mrb[107].mxu0  ;;  %v2623_v56 = vsel %vm132_vm0, %v4054_v37, 0  ;;  %v2129_v62 = vld [vmem:[%s5887_s13 + $0x10] sm:$0xff]  ;;  %v2130_v0 = vld [vmem:[%s5887_s13 + $0x18] sm:$0xff] }
 0x1c1   :  { %v4549_v9 = vpop.f32.mrb[107].mxu1  ;;  %v2149_v55 = vpack.c.bf16 %v2130_v0, %v2129_v62 }
 0x1c2   :  { %v5870_v61 = vadd.f32 %v1196_v6, %v1042_v4  ;;  %4705 = vmatmul.mubr.msk.bf16.gmra.mrb[212].mxu0 %vm98_vm2, %v1729_v3 }
 0x1c3   :  { %4751 = vmatmul.mubr.msk.bf16.gmra.mrb[212].mxu1 %vm98_vm2, %v1943_v1  ;;  %4708 = vmatprep.mubr.msk.bf16.mxu0 %vm5060_vm1, %v5059_v2  ;;  %v2344_v1 = vld [vmem:[%s5892_s16 + $0x18] sm:$0xff] }
 0x1c4   :  { %4754 = vmatprep.mubr.msk.bf16.mxu1 %vm5060_vm1, %v5059_v2 }
 0x1c5   :  { %v987_v59 = vpop.f32.mrb[108].mxu0 }
 0x1c6   :  { %v1043_v12 = vadd.f32 %v987_v59, %v5696_v14  ;;  %v1201_v52 = vpop.f32.mrb[108].mxu1  ;;  %v4506_v15 = vpop.f32.mrb[109].mxu0 }
 0x1c7   :  { %v4552_v22 = vpop.f32.mrb[109].mxu1  ;;  %v990_v23 = vpop.f32.mrb[110].mxu0 }
 0x1c8   :  { %v5881_v7 = vadd.f32 %v1201_v52, %v1043_v12  ;;  %v1044_v27 = vadd.f32 %v990_v23, %v5704_v19  ;;  %v1204_v28 = vpop.f32.mrb[110].mxu1  ;;  %v4507_v63 = vpop.f32.mrb[111].mxu0  ;;  %v2127_v19 = vld [vmem:[%s5887_s13] sm:$0xff] }
 0x1c9   :  { %v4553_v14 = vpop.f32.mrb[111].mxu1  ;;  %v2148_v45 = vpack.c.bf16 %v2128_v34, %v2127_v19  ;;  %v2346_v63 = vld [vmem:[%s5892_s16 + $0x28] sm:$0xff] }
 0x1ca   :  { %v5894_v26 = vadd.f32 %v1204_v28, %v1044_v27  ;;  %4709 = vmatmul.mubr.msk.bf16.gmra.mrb[216].mxu0 %vm98_vm2, %v1730_v21  ;;  %v2132_v27 = vld [vmem:[%s5887_s13 + $0x28] sm:$0xff]  ;;  %v2345_v28 = vld [vmem:[%s5892_s16 + $0x20] sm:$0xff] }
 0x1cb   :  { %4755 = vmatmul.mubr.msk.bf16.gmra.mrb[216].mxu1 %vm98_vm2, %v1944_v24  ;;  %4760 = vmatprep.mubr.msk.bf16.mxu0 %vm5060_vm1, %v5059_v2  ;;  %v2131_v24 = vld [vmem:[%s5887_s13 + $0x20] sm:$0xff]  ;;  %v2364_v37 = vpack.c.bf16 %v2346_v63, %v2345_v28 }
 0x1cc   :  { %4806 = vmatprep.mubr.msk.bf16.mxu1 %vm5060_vm1, %v5059_v2  ;;  %v2150_v35 = vpack.c.bf16 %v2132_v27, %v2131_v24 }
 0x1cd   :  { %v995_v36 = vpop.f32.mrb[112].mxu0 }
 0x1ce   :  { %v1045_v38 = vadd.f32 %v995_v36, %v5724_v41  ;;  %v1209_v33 = vpop.f32.mrb[112].mxu1  ;;  %v4510_v44 = vpop.f32.mrb[113].mxu0 }
 0x1cf   :  { %v4556_v10 = vpop.f32.mrb[113].mxu1  ;;  %v998_v30 = vpop.f32.mrb[114].mxu0 }
 0x1d0   :  { %v5913_v51 = vadd.f32 %v1209_v33, %v1045_v38  ;;  %v1046_v16 = vadd.f32 %v998_v30, %v5728_v46  ;;  %v1212_v42 = vpop.f32.mrb[114].mxu1  ;;  %v4511_v41 = vpop.f32.mrb[115].mxu0  ;;  %v2343_v46 = vld [vmem:[%s5892_s16 + $0x10] sm:$0xff]  ;;  %v2134_v30 = vld [vmem:[%s5887_s13 + $0x38] sm:$0xff] }
 0x1d1   :  { %v4557_v58 = vpop.f32.mrb[115].mxu1  ;;  %v2363_v12 = vpack.c.bf16 %v2344_v1, %v2343_v46 }
 0x1d2   :  { %v5918_v3 = vadd.f32 %v1212_v42, %v1046_v16  ;;  %4761 = vmatmul.mubr.msk.bf16.vlgmr.msra.gmra.mrb[220].mxu0 %vm98_vm2, %v2148_v45  ;;  %v2348_v16 = vld [vmem:[%s5892_s16 + $0x38] sm:$0xff] }
 0x1d3   :  { %4807 = vmatmul.mubr.msk.bf16.vlgmr.msra.gmra.mrb[220].mxu1 %vm98_vm2, %v2362_v50  ;;  %4851 = vmatpush3.bf16.msra.mxu0 %v2623_v56  ;;  %v2347_v50 = vld [vmem:[%s5892_s16 + $0x30] sm:$0xff] }
 0x1d4   :  { %4897 = vmatpush3.bf16.msra.mxu1 %v2837_v39  ;;  %4764 = vmatprep.mubr.msk.bf16.mxu0 %vm5060_vm1, %v5059_v2  ;;  %v2365_v0 = vpack.c.bf16 %v2348_v16, %v2347_v50 }
 0x1d5   :  { %v1003_v4 = vpop.f32.mrb[116].mxu0  ;;  %4810 = vmatprep.mubr.msk.bf16.mxu1 %vm5060_vm1, %v5059_v2  ;;  %4942 = vmatprep.subr.bf16.mxu0 %v5059_v2 }
 0x1d6   :  { %v1047_v6 = vadd.f32 %v1003_v4, %v5743_v5  ;;  %v1217_v8 = vpop.f32.mrb[116].mxu1  ;;  %v4514_v9 = vpop.f32.mrb[117].mxu0  ;;  %4988 = vmatprep.subr.bf16.mxu1 %v5059_v2 }
 0x1d7   :  { %v4560_v13 = vpop.f32.mrb[117].mxu1  ;;  %v1006_v59 = vpop.f32.mrb[118].mxu0 }
 0x1d8   :  { %v5933_v52 = vadd.f32 %v1217_v8, %v1047_v6  ;;  %v1048_v15 = vadd.f32 %v1006_v59, %v5746_v53  ;;  %v1220_v21 = vpop.f32.mrb[118].mxu1  ;;  %v4515_v22 = vpop.f32.mrb[119].mxu0  ;;  %v2349_v13 = vld [vmem:[%s5892_s16 + $0x40] sm:$0xff]  ;;  %v2350_v59 = vld [vmem:[%s5892_s16 + $0x48] sm:$0xff] }
 0x1d9   :  { %v4561_v23 = vpop.f32.mrb[119].mxu1  ;;  %v2366_v27 = vpack.c.bf16 %v2350_v59, %v2349_v13 }
 0x1da   :  { %v5936_v5 = vadd.f32 %v1220_v21, %v1048_v15  ;;  %4765 = vmatmul.mubr.msk.bf16.gmra.mrb[224].mxu0 %vm98_vm2, %v2149_v55  ;;  %v2136_v55 = vld [vmem:[%s5887_s13 + $0x48] sm:$0xff] }
 0x1db   :  { %4811 = vmatmul.mubr.msk.bf16.gmra.mrb[224].mxu1 %vm98_vm2, %v2363_v12  ;;  %4768 = vmatprep.mubr.msk.bf16.mxu0 %vm5060_vm1, %v5059_v2 }
 0x1dc   :  { %4814 = vmatprep.mubr.msk.bf16.mxu1 %vm5060_vm1, %v5059_v2 }
 0x1dd   :  { %v1011_v53 = vpop.f32.mrb[120].mxu0 }
 0x1de   :  { %v1049_v14 = vadd.f32 %v1011_v53, %v5759_v29  ;;  %v1225_v19 = vpop.f32.mrb[120].mxu1  ;;  %v4518_v34 = vpop.f32.mrb[121].mxu0  ;;  %v2133_v29 = vld [vmem:[%s5887_s13 + $0x30] sm:$0xff] }
 0x1df   :  { %v4564_v20 = vpop.f32.mrb[121].mxu1  ;;  %v1014_v36 = vpop.f32.mrb[122].mxu0  ;;  %v2151_v58 = vpack.c.bf16 %v2134_v30, %v2133_v29  ;;  %v2351_v34 = vld [vmem:[%s5892_s16 + $0x50] sm:$0xff] }
 0x1e0   :  { %v5949_v38 = vadd.f32 %v1225_v19, %v1049_v14  ;;  %v1050_v33 = vadd.f32 %v1014_v36, %v5762_v11  ;;  %v1228_v44 = vpop.f32.mrb[122].mxu1  ;;  %v4519_v45 = vpop.f32.mrb[123].mxu0  ;;  %v2138_v19 = vld [vmem:[%s5887_s13 + $0x58] sm:$0xff] }
 0x1e1   :  { %v4565_v47 = vpop.f32.mrb[123].mxu1 }
 0x1e2   :  { %v5952_v10 = vadd.f32 %v1228_v44, %v1050_v33  ;;  %4769 = vmatmul.mubr.msk.bf16.gmra.mrb[228].mxu0 %vm98_vm2, %v2150_v35  ;;  %v2352_v35 = vld [vmem:[%s5892_s16 + $0x58] sm:$0xff] }
 0x1e3   :  { %4815 = vmatmul.mubr.msk.bf16.gmra.mrb[228].mxu1 %vm98_vm2, %v2364_v37  ;;  %4772 = vmatprep.mubr.msk.bf16.mxu0 %vm5060_vm1, %v5059_v2  ;;  %v2367_v29 = vpack.c.bf16 %v2352_v35, %v2351_v34 }
 0x1e4   :  { %4818 = vmatprep.mubr.msk.bf16.mxu1 %vm5060_vm1, %v5059_v2 }
 0x1e5   :  { %v1019_v11 = vpop.f32.mrb[124].mxu0 }
 0x1e6   :  { %v1051_v42 = vadd.f32 %v1019_v11, %v5775_v54  ;;  %v1233_v41 = vpop.f32.mrb[124].mxu1  ;;  %v4522_v56 = vpop.f32.mrb[125].mxu0  ;;  %v2135_v54 = vld [vmem:[%s5887_s13 + $0x40] sm:$0xff] }
 0x1e7   :  { %v4568_v39 = vpop.f32.mrb[125].mxu1  ;;  %v1022_v62 = vpop.f32.mrb[126].mxu0  ;;  %v2152_v22 = vpack.c.bf16 %v2136_v55, %v2135_v54  ;;  %v2140_v56 = vld [vmem:[%s5887_s13 + $0x68] sm:$0xff] }
 0x1e8   :  { %v5965_v46 = vadd.f32 %v1233_v41, %v1051_v42  ;;  %v1052_v1 = vadd.f32 %v1022_v62, %v5778_v31  ;;  %v1236_v4 = vpop.f32.mrb[126].mxu1  ;;  %v4523_v6 = vpop.f32.mrb[127].mxu0  ;;  %v2354_v39 = vld [vmem:[%s5892_s16 + $0x68] sm:$0xff] }
 0x1e9   :  { %v4569_v8 = vpop.f32.mrb[127].mxu1 }
 0x1ea   :  { %v5968_v9 = vadd.f32 %v1236_v4, %v1052_v1  ;;  %4773 = vmatmul.mubr.msk.bf16.gmra.mrb[232].mxu0 %vm98_vm2, %v2151_v58  ;;  %v2353_v58 = vld [vmem:[%s5892_s16 + $0x60] sm:$0xff] }
 0x1eb   :  { %4819 = vmatmul.mubr.msk.bf16.gmra.mrb[232].mxu1 %vm98_vm2, %v2365_v0  ;;  %4776 = vmatprep.mubr.msk.bf16.mxu0 %vm5060_vm1, %v5059_v2  ;;  %v2368_v54 = vpack.c.bf16 %v2354_v39, %v2353_v58 }
 0x1ec   :  { %4822 = vmatprep.mubr.msk.bf16.mxu1 %vm5060_vm1, %v5059_v2 }
 0x1ed   :  { %v1027_v31 = vpop.f32.mrb[128].mxu0 }
 0x1ee   :  { %v1053_v12 = vadd.f32 %v1027_v31, %v5790_v32  ;;  %v1241_v15 = vpop.f32.mrb[128].mxu1  ;;  %v4526_v21 = vpop.f32.mrb[129].mxu0  ;;  %v2137_v32 = vld [vmem:[%s5887_s13 + $0x50] sm:$0xff] }
 0x1ef   :  { %v4572_v23 = vpop.f32.mrb[129].mxu1  ;;  %v1030_v24 = vpop.f32.mrb[130].mxu0  ;;  %v2153_v44 = vpack.c.bf16 %v2138_v19, %v2137_v32  ;;  %v2142_v21 = vld [vmem:[%s5887_s13 + $0x78] sm:$0xff] }
 0x1f0   :  { %v5981_v28 = vadd.f32 %v1241_v15, %v1053_v12  ;;  %v1244_v63 = vpop.f32.mrb[130].mxu1  ;;  %v4527_v53 = vpop.f32.mrb[131].mxu0  ;;  %v2356_v23 = vld [vmem:[%s5892_s16 + $0x78] sm:$0xff] }
 0x1f1   :  { %v4573_v14 = vpop.f32.mrb[131].mxu1 }
 0x1f2   :  { %4777 = vmatmul.mubr.msk.bf16.gmra.mrb[236].mxu0 %vm98_vm2, %v2152_v22  ;;  %v2355_v22 = vld [vmem:[%s5892_s16 + $0x70] sm:$0xff] }
 0x1f3   :  { %4823 = vmatmul.mubr.msk.bf16.gmra.mrb[236].mxu1 %vm98_vm2, %v2366_v27  ;;  %4780 = vmatprep.mubr.msk.bf16.mxu0 %vm5060_vm1, %v5059_v2  ;;  %v2369_v19 = vpack.c.bf16 %v2356_v23, %v2355_v22 }
 0x1f4   :  { %4826 = vmatprep.mubr.msk.bf16.mxu1 %vm5060_vm1, %v5059_v2 }
 0x1f5   :  { %v1375_v20 = vpop.f32.mrb[132].mxu0 }
 0x1f6   :  { %v1461_v36 = vadd.f32 %v1375_v20, %v5804_v48  ;;  %v1589_v37 = vpop.f32.mrb[132].mxu1  ;;  %v4578_v33 = vpop.f32.mrb[133].mxu0  ;;  %v2139_v48 = vld [vmem:[%s5887_s13 + $0x60] sm:$0xff] }
 0x1f7   :  { %v4624_v45 = vpop.f32.mrb[133].mxu1  ;;  %v1378_v47 = vpop.f32.mrb[134].mxu0  ;;  %v2154_v4 = vpack.c.bf16 %v2140_v56, %v2139_v48 }
 0x1f8   :  { %v5994_v30 = vadd.f32 %v1589_v37, %v1461_v36  ;;  %v1462_v50 = vadd.f32 %v1378_v47, %v5807_v18  ;;  %v1592_v16 = vpop.f32.mrb[134].mxu1  ;;  %v4579_v11 = vpop.f32.mrb[135].mxu0  ;;  %v2357_v45 = vld [vmem:[%s5892_s16 + $0x80] sm:$0xff]  ;;  %v2358_v47 = vld [vmem:[%s5892_s16 + $0x88] sm:$0xff] }
 0x1f9   :  { %v4625_v42 = vpop.f32.mrb[135].mxu1  ;;  %v2370_v56 = vpack.c.bf16 %v2358_v47, %v2357_v45 }
 0x1fa   :  { %v5997_v41 = vadd.f32 %v1592_v16, %v1462_v50  ;;  %4781 = vmatmul.mubr.msk.bf16.gmra.mrb[240].mxu0 %vm98_vm2, %v2153_v44  ;;  %v2144_v44 = vld [vmem:[%s5887_s13 + $0x88] sm:$0xff] }
 0x1fb   :  { %4827 = vmatmul.mubr.msk.bf16.gmra.mrb[240].mxu1 %vm98_vm2, %v2367_v29  ;;  %4784 = vmatprep.mubr.msk.bf16.mxu0 %vm5060_vm1, %v5059_v2 }
 0x1fc   :  { %4830 = vmatprep.mubr.msk.bf16.mxu1 %vm5060_vm1, %v5059_v2 }
 0x1fd   :  { %v1383_v18 = vpop.f32.mrb[136].mxu0 }
 0x1fe   :  { %v1463_v62 = vadd.f32 %v1383_v18, %v5820_v60  ;;  %v1597_v0 = vpop.f32.mrb[136].mxu1  ;;  %v4582_v1 = vpop.f32.mrb[137].mxu0  ;;  %v2141_v60 = vld [vmem:[%s5887_s13 + $0x70] sm:$0xff] }
 0x1ff   :  { %v4628_v6 = vpop.f32.mrb[137].mxu1  ;;  %v1386_v8 = vpop.f32.mrb[138].mxu0  ;;  %v2155_v53 = vpack.c.bf16 %v2142_v21, %v2141_v60 }
 0x200   :  { %v6010_v55 = vadd.f32 %v1597_v0, %v1463_v62  ;;  %v1464_v13 = vadd.f32 %v1386_v8, %v5823_v43  ;;  %v1600_v59 = vpop.f32.mrb[138].mxu1  ;;  %v4583_v31 = vpop.f32.mrb[139].mxu0  ;;  %v2359_v6 = vld [vmem:[%s5892_s16 + $0x90] sm:$0xff]  ;;  %v2360_v8 = vld [vmem:[%s5892_s16 + $0x98] sm:$0xff] }
 0x201   :  { %v4629_v12 = vpop.f32.mrb[139].mxu1  ;;  %v2371_v21 = vpack.c.bf16 %v2360_v8, %v2359_v6 }
 0x202   :  { %v6013_v15 = vadd.f32 %v1600_v59, %v1464_v13  ;;  %4785 = vmatmul.mubr.msk.bf16.gmra.mrb[244].mxu0 %vm98_vm2, %v2154_v4  ;;  %v2146_v4 = vld [vmem:[%s5887_s13 + $0x98] sm:$0xff] }
 0x203   :  { %4831 = vmatmul.mubr.msk.bf16.gmra.mrb[244].mxu1 %vm98_vm2, %v2368_v54  ;;  %4788 = vmatprep.mubr.msk.bf16.mxu0 %vm5060_vm1, %v5059_v2 }
 0x204   :  { %4834 = vmatprep.mubr.msk.bf16.mxu1 %vm5060_vm1, %v5059_v2 }
 0x205   :  { %v1391_v43 = vpop.f32.mrb[140].mxu0 }
 0x206   :  { %v1465_v24 = vadd.f32 %v1391_v43, %v5835_v17  ;;  %v1605_v27 = vpop.f32.mrb[140].mxu1  ;;  %v4586_v63 = vpop.f32.mrb[141].mxu0  ;;  %v2143_v17 = vld [vmem:[%s5887_s13 + $0x80] sm:$0xff] }
 0x207   :  { %v4632_v14 = vpop.f32.mrb[141].mxu1  ;;  %v1394_v32 = vpop.f32.mrb[142].mxu0  ;;  %v2156_v11 = vpack.c.bf16 %v2144_v44, %v2143_v17 }
 0x208   :  { %v6026_v34 = vadd.f32 %v1605_v27, %v1465_v24  ;;  %v1466_v35 = vadd.f32 %v1394_v32, %v5838_v57  ;;  %v1608_v20 = vpop.f32.mrb[142].mxu1  ;;  %v4587_v36 = vpop.f32.mrb[143].mxu0 }
 0x209   :  { %v4633_v37 = vpop.f32.mrb[143].mxu1 }
 0x20a   :  { %v6029_v33 = vadd.f32 %v1608_v20, %v1466_v35  ;;  %4789 = vmatmul.mubr.msk.bf16.gmra.mrb[248].mxu0 %vm98_vm2, %v2155_v53  ;;  %v2361_v53 = vld [vmem:[%s5892_s16 + $0xa0] sm:$0x3] }
 0x20b   :  { %4835 = vmatmul.mubr.msk.bf16.gmra.mrb[248].mxu1 %vm98_vm2, %v2369_v19  ;;  %4792 = vmatprep.mubr.msk.bf16.mxu0 %vm5060_vm1, %v5059_v2  ;;  %v2372_v37 = vpack.c.bf16 %v2361_v53, %v2361_v53 }
 0x20c   :  { %4838 = vmatprep.mubr.msk.bf16.mxu1 %vm5060_vm1, %v5059_v2 }
 0x20d   :  { %v1399_v57 = vpop.f32.mrb[144].mxu0 }
 0x20e   :  { %v1467_v29 = vadd.f32 %v1399_v57, %v5851_v25  ;;  %v1613_v50 = vpop.f32.mrb[144].mxu1  ;;  %v4590_v16 = vpop.f32.mrb[145].mxu0  ;;  %v2145_v25 = vld [vmem:[%s5887_s13 + $0x90] sm:$0xff] }
 0x20f   :  { %v4636_v42 = vpop.f32.mrb[145].mxu1  ;;  %v1402_v48 = vpop.f32.mrb[146].mxu0  ;;  %v2157_v31 = vpack.c.bf16 %v2146_v4, %v2145_v25  ;;  %v2770_v16 = vld [vmem:[%s6083_s27 + $0x8] sm:$0xff] }
 0x210   :  { %v6042_v58 = vadd.f32 %v1613_v50, %v1467_v29  ;;  %v1468_v39 = vadd.f32 %v1402_v48, %v5854_v40  ;;  %v1616_v18 = vpop.f32.mrb[146].mxu1  ;;  %v4591_v62 = vpop.f32.mrb[147].mxu0  ;;  %v2556_v29 = vld [vmem:[%s6078_s25 + $0x8] sm:$0xff]  ;;  %v2769_v50 = vld [vmem:[%s6083_s27] sm:$0xff]  ;;  %v4080_v42 = vld [vmem:[%s6987_s2 + $0x38] sm:$0xf] }
 0x211   :  { %v4637_v0 = vpop.f32.mrb[147].mxu1  ;;  %v4093_v62 = vld [vmem:[%s6987_s2 + $0x3c] sm:$0xf]  ;;  %v2790_v4 = vpack.c.bf16 %v2770_v16, %v2769_v50 }
 0x212   :  { %v6045_v1 = vadd.f32 %v1616_v18, %v1468_v39  ;;  %4793 = vmatmul.mubr.msk.bf16.gmra.mrb[252].mxu0 %vm98_vm2, %v2156_v11 }
 0x213   :  { %4839 = vmatmul.mubr.msk.bf16.gmra.mrb[252].mxu1 %vm98_vm2, %v2370_v56  ;;  %4796 = vmatprep.mubr.msk.bf16.mxu0 %vm5060_vm1, %v5059_v2 }
 0x214   :  { %4842 = vmatprep.mubr.msk.bf16.mxu1 %vm5060_vm1, %v5059_v2 }
 0x215   :  { %v1407_v40 = vpop.f32.mrb[148].mxu0 }
 0x216   :  { %v1469_v54 = vadd.f32 %v1407_v40, %v5867_v49  ;;  %v1621_v13 = vpop.f32.mrb[148].mxu1  ;;  %v4594_v59 = vpop.f32.mrb[149].mxu0  ;;  %v2147_v49 = vld [vmem:[%s5887_s13 + $0xa0] sm:$0x3] }
 0x217   :  { %v4640_v12 = vpop.f32.mrb[149].mxu1  ;;  %v1410_v60 = vpop.f32.mrb[150].mxu0  ;;  %v2158_v35 = vpack.c.bf16 %v2147_v49, %v2147_v49  ;;  %v3265_v59 = vsel %vm132_vm0, %v4093_v62, 0 }
 0x218   :  { %v6058_v22 = vadd.f32 %v1621_v13, %v1469_v54  ;;  %v1470_v23 = vadd.f32 %v1410_v60, %v5870_v61  ;;  %v1624_v43 = vpop.f32.mrb[150].mxu1  ;;  %v4595_v24 = vpop.f32.mrb[151].mxu0  ;;  %v3051_v54 = vsel %vm132_vm0, %v4080_v42, 0  ;;  %v2557_v12 = vld [vmem:[%s6078_s25 + $0x10] sm:$0xff]  ;;  %v2558_v60 = vld [vmem:[%s6078_s25 + $0x18] sm:$0xff] }
 0x219   :  { %v4641_v27 = vpop.f32.mrb[151].mxu1  ;;  %v2577_v49 = vpack.c.bf16 %v2558_v60, %v2557_v12 }
 0x21a   :  { %v6061_v63 = vadd.f32 %v1624_v43, %v1470_v23  ;;  %4797 = vmatmul.mubr.msk.bf16.gmra.mrb[0].mxu0 %vm98_vm2, %v2157_v31 }
 0x21b   :  { %4843 = vmatmul.mubr.msk.bf16.gmra.mrb[0].mxu1 %vm98_vm2, %v2371_v21  ;;  %4800 = vmatprep.mubr.msk.bf16.mxu0 %vm5060_vm1, %v5059_v2  ;;  %v2772_v21 = vld [vmem:[%s6083_s27 + $0x18] sm:$0xff] }
 0x21c   :  { %4846 = vmatprep.mubr.msk.bf16.mxu1 %vm5060_vm1, %v5059_v2 }
 0x21d   :  { %v1415_v61 = vpop.f32.mrb[152].mxu0 }
 0x21e   :  { %v1471_v14 = vadd.f32 %v1415_v61, %v5881_v7  ;;  %v1629_v32 = vpop.f32.mrb[152].mxu1  ;;  %v4598_v19 = vpop.f32.mrb[153].mxu0 }
 0x21f   :  { %v4644_v20 = vpop.f32.mrb[153].mxu1  ;;  %v1418_v36 = vpop.f32.mrb[154].mxu0 }
 0x220   :  { %v6072_v17 = vadd.f32 %v1629_v32, %v1471_v14  ;;  %v1472_v44 = vadd.f32 %v1418_v36, %v5894_v26  ;;  %v1632_v45 = vpop.f32.mrb[154].mxu1  ;;  %v4599_v47 = vpop.f32.mrb[155].mxu0  ;;  %v2555_v26 = vld [vmem:[%s6078_s25] sm:$0xff] }
 0x221   :  { %v4645_v7 = vpop.f32.mrb[155].mxu1  ;;  %v2576_v18 = vpack.c.bf16 %v2556_v29, %v2555_v26  ;;  %v2774_v47 = vld [vmem:[%s6083_s27 + $0x28] sm:$0xff] }
 0x222   :  { %v6085_v57 = vadd.f32 %v1632_v45, %v1472_v44  ;;  %4801 = vmatmul.mubr.msk.bf16.gmra.mrb[4].mxu0 %vm98_vm2, %v2158_v35  ;;  %v2560_v44 = vld [vmem:[%s6078_s25 + $0x28] sm:$0xff]  ;;  %v2773_v45 = vld [vmem:[%s6083_s27 + $0x20] sm:$0xff] }
 0x223   :  { %4847 = vmatmul.mubr.msk.bf16.gmra.mrb[4].mxu1 %vm98_vm2, %v2372_v37  ;;  %4852 = vmatprep.mubr.msk.bf16.mxu0 %vm5060_vm1, %v5059_v2  ;;  %v2792_v42 = vpack.c.bf16 %v2774_v47, %v2773_v45 }
 0x224   :  { %4898 = vmatprep.mubr.msk.bf16.mxu1 %vm5060_vm1, %v5059_v2 }
 0x225   :  { %v1423_v11 = vpop.f32.mrb[156].mxu0 }
 0x226   :  { %v1473_v48 = vadd.f32 %v1423_v11, %v5913_v51  ;;  %v1637_v56 = vpop.f32.mrb[156].mxu1  ;;  %v4602_v39 = vpop.f32.mrb[157].mxu0 }
 0x227   :  { %v4648_v0 = vpop.f32.mrb[157].mxu1  ;;  %v1426_v25 = vpop.f32.mrb[158].mxu0 }
 0x228   :  { %v6104_v6 = vadd.f32 %v1637_v56, %v1473_v48  ;;  %v1474_v8 = vadd.f32 %v1426_v25, %v5918_v3  ;;  %v1640_v40 = vpop.f32.mrb[158].mxu1  ;;  %v4603_v51 = vpop.f32.mrb[159].mxu0  ;;  %v2771_v3 = vld [vmem:[%s6083_s27 + $0x10] sm:$0xff]  ;;  %v2562_v25 = vld [vmem:[%s6078_s25 + $0x38] sm:$0xff] }
 0x229   :  { %v4649_v13 = vpop.f32.mrb[159].mxu1  ;;  %v2791_v14 = vpack.c.bf16 %v2772_v21, %v2771_v3 }
 0x22a   :  { %v6109_v31 = vadd.f32 %v1640_v40, %v1474_v8  ;;  %4853 = vmatmul.mubr.msk.bf16.vlgmr.msra.gmra.mrb[8].mxu0 %vm98_vm2, %v2576_v18  ;;  %v2776_v8 = vld [vmem:[%s6083_s27 + $0x38] sm:$0xff] }
 0x22b   :  { %4899 = vmatmul.mubr.msk.bf16.vlgmr.msra.gmra.mrb[8].mxu1 %vm98_vm2, %v2790_v4  ;;  %4943 = vmatpush3.bf16.msra.mxu0 %v3051_v54  ;;  %v2775_v4 = vld [vmem:[%s6083_s27 + $0x30] sm:$0xff] }
 0x22c   :  { %4989 = vmatpush3.bf16.msra.mxu1 %v3265_v59  ;;  %4856 = vmatprep.mubr.msk.bf16.mxu0 %vm5060_vm1, %v5059_v2  ;;  %v2793_v60 = vpack.c.bf16 %v2776_v8, %v2775_v4 }
 0x22d   :  { %v1431_v23 = vpop.f32.mrb[160].mxu0  ;;  %4902 = vmatprep.mubr.msk.bf16.mxu1 %vm5060_vm1, %v5059_v2 }
 0x22e   :  { %v1475_v43 = vadd.f32 %v1431_v23, %v5933_v52  ;;  %v1645_v24 = vpop.f32.mrb[160].mxu1  ;;  %v4606_v27 = vpop.f32.mrb[161].mxu0  ;;  %v2559_v52 = vld [vmem:[%s6078_s25 + $0x20] sm:$0xff] }
 0x22f   :  { %v4652_v53 = vpop.f32.mrb[161].mxu1  ;;  %v1434_v61 = vpop.f32.mrb[162].mxu0  ;;  %v2578_v50 = vpack.c.bf16 %v2560_v44, %v2559_v52 }
 0x230   :  { %v6122_v32 = vadd.f32 %v1645_v24, %v1475_v43  ;;  %v1476_v19 = vadd.f32 %v1434_v61, %v5936_v5  ;;  %v1648_v35 = vpop.f32.mrb[162].mxu1  ;;  %v4607_v20 = vpop.f32.mrb[163].mxu0  ;;  %v2777_v53 = vld [vmem:[%s6083_s27 + $0x40] sm:$0xff]  ;;  %v2778_v61 = vld [vmem:[%s6083_s27 + $0x48] sm:$0xff] }
 0x231   :  { %v4653_v36 = vpop.f32.mrb[163].mxu1  ;;  %v2794_v44 = vpack.c.bf16 %v2778_v61, %v2777_v53 }
 0x232   :  { %v6125_v37 = vadd.f32 %v1648_v35, %v1476_v19  ;;  %4857 = vmatmul.mubr.msk.bf16.gmra.mrb[12].mxu0 %vm98_vm2, %v2577_v49  ;;  %v2564_v49 = vld [vmem:[%s6078_s25 + $0x48] sm:$0xff] }
 0x233   :  { %4903 = vmatmul.mubr.msk.bf16.gmra.mrb[12].mxu1 %vm98_vm2, %v2791_v14  ;;  %4860 = vmatprep.mubr.msk.bf16.mxu0 %vm5060_vm1, %v5059_v2 }
 0x234   :  { %4906 = vmatprep.mubr.msk.bf16.mxu1 %vm5060_vm1, %v5059_v2 }
 0x235   :  { %v1439_v5 = vpop.f32.mrb[164].mxu0 }
 0x236   :  { %v1477_v7 = vadd.f32 %v1439_v5, %v5949_v38  ;;  %v1653_v26 = vpop.f32.mrb[164].mxu1  ;;  %v4610_v29 = vpop.f32.mrb[165].mxu0  ;;  %v2561_v38 = vld [vmem:[%s6078_s25 + $0x30] sm:$0xff] }
 0x237   :  { %v4656_v16 = vpop.f32.mrb[165].mxu1  ;;  %v1442_v11 = vpop.f32.mrb[166].mxu0  ;;  %v2579_v13 = vpack.c.bf16 %v2562_v25, %v2561_v38  ;;  %v2779_v29 = vld [vmem:[%s6083_s27 + $0x50] sm:$0xff] }
 0x238   :  { %v6138_v48 = vadd.f32 %v1653_v26, %v1477_v7  ;;  %v1478_v56 = vadd.f32 %v1442_v11, %v5952_v10  ;;  %v1656_v39 = vpop.f32.mrb[166].mxu1  ;;  %v4611_v18 = vpop.f32.mrb[167].mxu0  ;;  %v2566_v26 = vld [vmem:[%s6078_s25 + $0x58] sm:$0xff] }
 0x239   :  { %v4657_v62 = vpop.f32.mrb[167].mxu1 }
 0x23a   :  { %v6141_v0 = vadd.f32 %v1656_v39, %v1478_v56  ;;  %4861 = vmatmul.mubr.msk.bf16.gmra.mrb[16].mxu0 %vm98_vm2, %v2578_v50  ;;  %v2780_v50 = vld [vmem:[%s6083_s27 + $0x58] sm:$0xff] }
 0x23b   :  { %4907 = vmatmul.mubr.msk.bf16.gmra.mrb[16].mxu1 %vm98_vm2, %v2792_v42  ;;  %4864 = vmatprep.mubr.msk.bf16.mxu0 %vm5060_vm1, %v5059_v2  ;;  %v2795_v38 = vpack.c.bf16 %v2780_v50, %v2779_v29 }
 0x23c   :  { %4910 = vmatprep.mubr.msk.bf16.mxu1 %vm5060_vm1, %v5059_v2 }
 0x23d   :  { %v1447_v10 = vpop.f32.mrb[168].mxu0 }
 0x23e   :  { %v1479_v40 = vadd.f32 %v1447_v10, %v5965_v46  ;;  %v1661_v51 = vpop.f32.mrb[168].mxu1  ;;  %v4614_v54 = vpop.f32.mrb[169].mxu0  ;;  %v2563_v46 = vld [vmem:[%s6078_s25 + $0x40] sm:$0xff] }
 0x23f   :  { %v4660_v59 = vpop.f32.mrb[169].mxu1  ;;  %v1450_v12 = vpop.f32.mrb[170].mxu0  ;;  %v2580_v20 = vpack.c.bf16 %v2564_v49, %v2563_v46  ;;  %v2568_v54 = vld [vmem:[%s6078_s25 + $0x68] sm:$0xff] }
 0x240   :  { %v6154_v3 = vadd.f32 %v1661_v51, %v1479_v40  ;;  %v1480_v21 = vadd.f32 %v1450_v12, %v5968_v9  ;;  %v1664_v23 = vpop.f32.mrb[170].mxu1  ;;  %v4615_v43 = vpop.f32.mrb[171].mxu0  ;;  %v2782_v59 = vld [vmem:[%s6083_s27 + $0x68] sm:$0xff] }
 0x241   :  { %v4661_v24 = vpop.f32.mrb[171].mxu1 }
 0x242   :  { %v6157_v27 = vadd.f32 %v1664_v23, %v1480_v21  ;;  %4865 = vmatmul.mubr.msk.bf16.gmra.mrb[20].mxu0 %vm98_vm2, %v2579_v13  ;;  %v2781_v13 = vld [vmem:[%s6083_s27 + $0x60] sm:$0xff] }
 0x243   :  { %4911 = vmatmul.mubr.msk.bf16.gmra.mrb[20].mxu1 %vm98_vm2, %v2793_v60  ;;  %4868 = vmatprep.mubr.msk.bf16.mxu0 %vm5060_vm1, %v5059_v2  ;;  %v2796_v46 = vpack.c.bf16 %v2782_v59, %v2781_v13  ;;  %v3439_v59 = vld [vmem:[%s6989_s4 + $0x18] sm:$0xff] }
 0x244   :  { %4914 = vmatprep.mubr.msk.bf16.mxu1 %vm5060_vm1, %v5059_v2 }
 0x245   :  { %v1455_v9 = vpop.f32.mrb[172].mxu0 }
 0x246   :  { %v1481_v14 = vadd.f32 %v1455_v9, %v5981_v28  ;;  %v1669_v19 = vpop.f32.mrb[172].mxu1  ;;  %v4618_v35 = vpop.f32.mrb[173].mxu0  ;;  %v2565_v28 = vld [vmem:[%s6078_s25 + $0x50] sm:$0xff] }
 0x247   :  { %v4664_v36 = vpop.f32.mrb[173].mxu1  ;;  %v1458_v52 = vpop.f32.mrb[174].mxu0  ;;  %v2581_v39 = vpack.c.bf16 %v2566_v26, %v2565_v28  ;;  %v3436_v35 = vld [vmem:[%s6989_s4] sm:$0xff]  ;;  %v3437_v26 = vld [vmem:[%s6989_s4 + $0x8] sm:$0xff] }
 0x248   :  { %v6170_v45 = vadd.f32 %v1669_v19, %v1481_v14  ;;  %v1672_v47 = vpop.f32.mrb[174].mxu1  ;;  %v4619_v5 = vpop.f32.mrb[175].mxu0  ;;  %v2783_v36 = vld [vmem:[%s6083_s27 + $0x70] sm:$0xff]  ;;  %v2784_v52 = vld [vmem:[%s6083_s27 + $0x78] sm:$0xff] }
 0x249   :  { %v4665_v7 = vpop.f32.mrb[175].mxu1 }
 0x24a   :  { %4869 = vmatmul.mubr.msk.bf16.gmra.mrb[24].mxu0 %vm98_vm2, %v2580_v20  ;;  %v2569_v20 = vld [vmem:[%s6078_s25 + $0x70] sm:$0xff] }
 0x24b   :  { %4915 = vmatmul.mubr.msk.bf16.gmra.mrb[24].mxu1 %vm98_vm2, %v2794_v44  ;;  %4872 = vmatprep.mubr.msk.bf16.mxu0 %vm5060_vm1, %v5059_v2 }
 0x24c   :  { %4918 = vmatprep.mubr.msk.bf16.mxu1 %vm5060_vm1, %v5059_v2 }
 0x24d   :  { %v1803_v16 = vpop.f32.mrb[176].mxu0 }
 0x24e   :  { %v1889_v11 = vadd.f32 %v1803_v16, %v5994_v30  ;;  %v2017_v42 = vpop.f32.mrb[176].mxu1  ;;  %v4670_v56 = vpop.f32.mrb[177].mxu0  ;;  %v2567_v30 = vld [vmem:[%s6078_s25 + $0x60] sm:$0xff]  ;;  %v2797_v16 = vpack.c.bf16 %v2784_v52, %v2783_v36  ;;  %v3441_v52 = vld [vmem:[%s6989_s4 + $0x28] sm:$0xff] }
 0x24f   :  { %v4716_v18 = vpop.f32.mrb[177].mxu1  ;;  %v1806_v62 = vpop.f32.mrb[178].mxu0  ;;  %v2582_v23 = vpack.c.bf16 %v2568_v54, %v2567_v30 }
 0x250   :  { %v6183_v25 = vadd.f32 %v2017_v42, %v1889_v11  ;;  %v1890_v4 = vadd.f32 %v1806_v62, %v5997_v41  ;;  %v2020_v8 = vpop.f32.mrb[178].mxu1  ;;  %v4671_v10 = vpop.f32.mrb[179].mxu0  ;;  %v3438_v62 = vld [vmem:[%s6989_s4 + $0x10] sm:$0xff] }
 0x251   :  { %v4717_v40 = vpop.f32.mrb[179].mxu1 }
 0x252   :  { %v6186_v51 = vadd.f32 %v2020_v8, %v1890_v4  ;;  %4873 = vmatmul.mubr.msk.bf16.gmra.mrb[28].mxu0 %vm98_vm2, %v2581_v39  ;;  %v2572_v4 = vld [vmem:[%s6078_s25 + $0x88] sm:$0xff] }
 0x253   :  { %4919 = vmatmul.mubr.msk.bf16.gmra.mrb[28].mxu1 %vm98_vm2, %v2795_v38  ;;  %4876 = vmatprep.mubr.msk.bf16.mxu0 %vm5060_vm1, %v5059_v2  ;;  %v2571_v38 = vld [vmem:[%s6078_s25 + $0x80] sm:$0xff]  ;;  %v2786_v8 = vld [vmem:[%s6083_s27 + $0x88] sm:$0xff] }
 0x254   :  { %4922 = vmatprep.mubr.msk.bf16.mxu1 %vm5060_vm1, %v5059_v2  ;;  %v2584_v13 = vpack.c.bf16 %v2572_v4, %v2571_v38  ;;  %v3443_v4 = vld [vmem:[%s6989_s4 + $0x38] sm:$0xff] }
 0x255   :  { %v1811_v41 = vpop.f32.mrb[180].mxu0 }
 0x256   :  { %v1891_v12 = vadd.f32 %v1811_v41, %v6010_v55  ;;  %v2025_v60 = vpop.f32.mrb[180].mxu1  ;;  %v4674_v21 = vpop.f32.mrb[181].mxu0  ;;  %v5061_v55 = vmov 0  }
 0x257   :  { %v4720_v43 = vpop.f32.mrb[181].mxu1  ;;  %v1814_v24 = vpop.f32.mrb[182].mxu0  ;;  %5038 = vset.pattern.permute.xlu0 %v5061_v55  ;;  %5039 = vset.pattern.permute.xlu1 %v5061_v55 }
 0x258   :  { %v6199_v49 = vadd.f32 %v2025_v60, %v1891_v12  ;;  %v1892_v53 = vadd.f32 %v1814_v24, %v6013_v15  ;;  %v2028_v61 = vpop.f32.mrb[182].mxu1  ;;  %v4675_v9 = vpop.f32.mrb[183].mxu0  ;;  %v2570_v15 = vld [vmem:[%s6078_s25 + $0x78] sm:$0xff]  ;;  %3449 = vperm.xlu0 %5038, %v3436_v35   ;;  %3459 = vperm.xlu1 %5039, %v3438_v62  }
 0x259   :  { %v4721_v14 = vpop.f32.mrb[183].mxu1  ;;  %v2583_v28 = vpack.c.bf16 %v2570_v15, %v2569_v20  ;;  %v2574_v9 = vld [vmem:[%s6078_s25 + $0x98] sm:$0xff] }
 0x25a   :  { %v6202_v19 = vadd.f32 %v2028_v61, %v1892_v53  ;;  %4877 = vmatmul.mubr.msk.bf16.gmra.mrb[32].mxu0 %vm98_vm2, %v2582_v23  ;;  %v3440_v53 = vld [vmem:[%s6989_s4 + $0x20] sm:$0xff]  ;;  %v2573_v61 = vld [vmem:[%s6078_s25 + $0x90] sm:$0xff]  ;;  %v2788_v14 = vld [vmem:[%s6083_s27 + $0x98] sm:$0xff] }
 0x25b   :  { %4923 = vmatmul.mubr.msk.bf16.gmra.mrb[32].mxu1 %vm98_vm2, %v2796_v46  ;;  %4880 = vmatprep.mubr.msk.bf16.mxu0 %vm5060_vm1, %v5059_v2  ;;  %v2585_v36 = vpack.c.bf16 %v2574_v9, %v2573_v61  ;;  %v3445_v9 = vld [vmem:[%s6989_s4 + $0x48] sm:$0xff] }
 0x25c   :  { %4926 = vmatprep.mubr.msk.bf16.mxu1 %vm5060_vm1, %v5059_v2  ;;  %3454 = vperm.xlu0 %5038, %v3437_v26  }
 0x25d   :  { %v1819_v44 = vpop.f32.mrb[184].mxu0  ;;  %3464 = vperm.xlu1 %5039, %v3439_v59  }
 0x25e   :  { %v1893_v47 = vadd.f32 %v1819_v44, %v6026_v34  ;;  %v2033_v5 = vpop.f32.mrb[184].mxu1  ;;  %v4678_v7 = vpop.f32.mrb[185].mxu0 }
 0x25f   :  { %v4724_v29 = vpop.f32.mrb[185].mxu1  ;;  %v1822_v50 = vpop.f32.mrb[186].mxu0 }
 0x260   :  { %v6221_v11 = vadd.f32 %v2033_v5, %v1893_v47  ;;  %v1894_v42 = vadd.f32 %v1822_v50, %v6029_v33  ;;  %v2036_v56 = vpop.f32.mrb[186].mxu1  ;;  %v4679_v34 = vpop.f32.mrb[187].mxu0  ;;  %v2785_v33 = vld [vmem:[%s6083_s27 + $0x80] sm:$0xff]  ;;  %3469 = vperm.xlu0 %5038, %v3440_v53  }
 0x261   :  { %v4725_v39 = vpop.f32.mrb[187].mxu1  ;;  %v2798_v60 = vpack.c.bf16 %v2786_v8, %v2785_v33  ;;  %3474 = vperm.xlu1 %5039, %v3441_v52  }
 0x262   :  { %v6224_v18 = vadd.f32 %v2036_v56, %v1894_v42  ;;  %4881 = vmatmul.mubr.msk.bf16.gmra.mrb[36].mxu0 %vm98_vm2, %v2583_v28  ;;  %v2575_v42 = vld [vmem:[%s6078_s25 + $0xa0] sm:$0x3] }
 0x263   :  { %4927 = vmatmul.mubr.msk.bf16.gmra.mrb[36].mxu1 %vm98_vm2, %v2797_v16  ;;  %4884 = vmatprep.mubr.msk.bf16.mxu0 %vm5060_vm1, %v5059_v2  ;;  %v3442_v16 = vld [vmem:[%s6989_s4 + $0x30] sm:$0xff]  ;;  %v2586_v38 = vpack.c.bf16 %v2575_v42, %v2575_v42 }
 0x264   :  { %4930 = vmatprep.mubr.msk.bf16.mxu1 %vm5060_vm1, %v5059_v2  ;;  %3479 = vperm.xlu0 %5038, %v3442_v16  }
 0x265   :  { %v1827_v10 = vpop.f32.mrb[188].mxu0  ;;  %3484 = vperm.xlu1 %5039, %v3443_v4  }
 0x266   :  { %v1895_v40 = vadd.f32 %v1827_v10, %v6042_v58  ;;  %v2041_v30 = vpop.f32.mrb[188].mxu1  ;;  %v4682_v54 = vpop.f32.mrb[189].mxu0 }
 0x267   :  { %v4728_v41 = vpop.f32.mrb[189].mxu1  ;;  %v1830_v12 = vpop.f32.mrb[190].mxu0 }
 0x268   :  { %v6243_v21 = vadd.f32 %v2041_v30, %v1895_v40  ;;  %v1896_v23 = vadd.f32 %v1830_v12, %v6045_v1  ;;  %v2044_v43 = vpop.f32.mrb[190].mxu1  ;;  %v4683_v58 = vpop.f32.mrb[191].mxu0  ;;  %v2787_v1 = vld [vmem:[%s6083_s27 + $0x90] sm:$0xff]  ;;  %v2983_v41 = vld [vmem:[%s6291_s0] sm:$0xff]  ;;  %v2984_v12 = vld [vmem:[%s6291_s0 + $0x8] sm:$0xff] }
 0x269   :  { %v4729_v24 = vpop.f32.mrb[191].mxu1  ;;  %v2799_v5 = vpack.c.bf16 %v2788_v14, %v2787_v1  ;;  %v3004_v61 = vpack.c.bf16 %v2984_v12, %v2983_v41  ;;  %3494 = vperm.xlu1 %5039, %v3445_v9  }
 0x26a   :  { %v6246_v46 = vadd.f32 %v2044_v43, %v1896_v23  ;;  %4885 = vmatmul.mubr.msk.bf16.gmra.mrb[40].mxu0 %vm98_vm2, %v2584_v13  ;;  %v3198_v23 = vld [vmem:[%s6296_s28 + $0x8] sm:$0xff] }
 0x26b   :  { %4931 = vmatmul.mubr.msk.bf16.gmra.mrb[40].mxu1 %vm98_vm2, %v2798_v60  ;;  %4888 = vmatprep.mubr.msk.bf16.mxu0 %vm5060_vm1, %v5059_v2  ;;  %v3197_v60 = vld [vmem:[%s6296_s28] sm:$0xff] }
 0x26c   :  { %4934 = vmatprep.mubr.msk.bf16.mxu1 %vm5060_vm1, %v5059_v2 }
 0x26d   :  { %v1835_v55 = vpop.f32.mrb[192].mxu0 }
 0x26e   :  { %v1897_v35 = vadd.f32 %v1835_v55, %v6058_v22  ;;  %v2049_v20 = vpop.f32.mrb[192].mxu1  ;;  %v4686_v15 = vpop.f32.mrb[193].mxu0  ;;  %v3218_v55 = vpack.c.bf16 %v3198_v23, %v3197_v60 }
 0x26f   :  { %v4732_v44 = vpop.f32.mrb[193].mxu1  ;;  %v1838_v47 = vpop.f32.mrb[194].mxu0 }
 0x270   :  { %v6265_v7 = vadd.f32 %v2049_v20, %v1897_v35  ;;  %v1898_v28 = vadd.f32 %v1838_v47, %v6061_v63  ;;  %v2052_v26 = vpop.f32.mrb[194].mxu1  ;;  %v4687_v29 = vpop.f32.mrb[195].mxu0  ;;  %v2789_v63 = vld [vmem:[%s6083_s27 + $0xa0] sm:$0x3]  ;;  %v3446_v44 = vld [vmem:[%s6989_s4 + $0x50] sm:$0x1] }
 0x271   :  { %v4733_v22 = vpop.f32.mrb[195].mxu1  ;;  %v2800_v10 = vpack.c.bf16 %v2789_v63, %v2789_v63  ;;  %v2985_v47 = vld [vmem:[%s6291_s0 + $0x10] sm:$0xff] }
 0x272   :  { %v6268_v50 = vadd.f32 %v2052_v26, %v1898_v28  ;;  %4889 = vmatmul.mubr.msk.bf16.gmra.mrb[44].mxu0 %vm98_vm2, %v2585_v36  ;;  %v3200_v28 = vld [vmem:[%s6296_s28 + $0x18] sm:$0xff] }
 0x273   :  { %4935 = vmatmul.mubr.msk.bf16.gmra.mrb[44].mxu1 %vm98_vm2, %v2799_v5  ;;  %4892 = vmatprep.mubr.msk.bf16.mxu0 %vm5060_vm1, %v5059_v2  ;;  %v2986_v5 = vld [vmem:[%s6291_s0 + $0x18] sm:$0xff] }
 0x274   :  { %4938 = vmatprep.mubr.msk.bf16.mxu1 %vm5060_vm1, %v5059_v2  ;;  %v3005_v42 = vpack.c.bf16 %v2986_v5, %v2985_v47 }
 0x275   :  { %v1843_v56 = vpop.f32.mrb[196].mxu0 }
 0x276   :  { %v1899_v34 = vadd.f32 %v1843_v56, %v6072_v17  ;;  %v2057_v39 = vpop.f32.mrb[196].mxu1  ;;  %v4690_v62 = vpop.f32.mrb[197].mxu0 }
 0x277   :  { %v4736_v33 = vpop.f32.mrb[197].mxu1  ;;  %v1846_v8 = vpop.f32.mrb[198].mxu0 }
 0x278   :  { %v6285_v40 = vadd.f32 %v2057_v39, %v1899_v34  ;;  %v1900_v30 = vadd.f32 %v1846_v8, %v6085_v57  ;;  %v2060_v54 = vpop.f32.mrb[198].mxu1  ;;  %v4691_v13 = vpop.f32.mrb[199].mxu0  ;;  %v3444_v57 = vld [vmem:[%s6989_s4 + $0x40] sm:$0xff] }
 0x279   :  { %v4737_v17 = vpop.f32.mrb[199].mxu1  ;;  %3489 = vperm.xlu0 %5038, %v3444_v57  }
 0x27a   :  { %v6301_v59 = vadd.f32 %v2060_v54, %v1900_v30  ;;  %4893 = vmatmul.mubr.msk.bf16.gmra.mrb[48].mxu0 %vm98_vm2, %v2586_v38  ;;  %v3201_v30 = vld [vmem:[%s6296_s28 + $0x20] sm:$0xff]  ;;  %v3202_v54 = vld [vmem:[%s6296_s28 + $0x28] sm:$0xff] }
 0x27b   :  { %4939 = vmatmul.mubr.msk.bf16.gmra.mrb[48].mxu1 %vm98_vm2, %v2800_v10  ;;  %4944 = vmatprep.mubr.msk.bf16.mxu0 %vm5060_vm1, %v5059_v2  ;;  %v2988_v10 = vld [vmem:[%s6291_s0 + $0x28] sm:$0xff]  ;;  %v3220_v23 = vpack.c.bf16 %v3202_v54, %v3201_v30 }
 0x27c   :  { %4990 = vmatprep.mubr.msk.bf16.mxu1 %vm5060_vm1, %v5059_v2 }
 0x27d   :  { %v1851_v43 = vpop.f32.mrb[200].mxu0  ;;  %3499 = vperm.xlu0 %5038, %v3446_v44  }
 0x27e   :  { %v1901_v58 = vadd.f32 %v1851_v43, %v6104_v6  ;;  %v2065_v24 = vpop.f32.mrb[200].mxu1  ;;  %v4694_v53 = vpop.f32.mrb[201].mxu0 }
 0x27f   :  { %v4740_v1 = vpop.f32.mrb[201].mxu1  ;;  %v1854_v14 = vpop.f32.mrb[202].mxu0 }
 0x280   :  { %v6317_v35 = vadd.f32 %v2065_v24, %v1901_v58  ;;  %v1902_v20 = vadd.f32 %v1854_v14, %v6109_v31  ;;  %v2068_v6 = vpop.f32.mrb[202].mxu1  ;;  %v4695_v15 = vpop.f32.mrb[203].mxu0  ;;  %v3199_v31 = vld [vmem:[%s6296_s28 + $0x10] sm:$0xff]  ;;  %v2990_v1 = vld [vmem:[%s6291_s0 + $0x38] sm:$0xff] }
 0x281   :  { %v4741_v36 = vpop.f32.mrb[203].mxu1  ;;  %v3219_v34 = vpack.c.bf16 %v3200_v28, %v3199_v31  ;;  %v3203_v14 = vld [vmem:[%s6296_s28 + $0x30] sm:$0xff] }
 0x282   :  { %v6320_v52 = vadd.f32 %v2068_v6, %v1902_v20  ;;  %4945 = vmatmul.mubr.msk.bf16.vlgmr.msra.gmra.mrb[52].mxu0 %vm98_vm2, %v3004_v61 }
 0x283   :  { %4991 = vmatmul.mubr.msk.bf16.vlgmr.msra.gmra.mrb[52].mxu1 %vm98_vm2, %v3218_v55  ;;  %4948 = vmatprep.mubr.msk.bf16.mxu0 %vm5060_vm1, %v5059_v2  ;;  %v3204_v55 = vld [vmem:[%s6296_s28 + $0x38] sm:$0xff] }
 0x284   :  { %4994 = vmatprep.mubr.msk.bf16.mxu1 %vm5060_vm1, %v5059_v2  ;;  %v3221_v5 = vpack.c.bf16 %v3204_v55, %v3203_v14 }
 0x285   :  { %v1859_v26 = vpop.f32.mrb[204].mxu0 }
 0x286   :  { %v1903_v29 = vadd.f32 %v1859_v26, %v6122_v32  ;;  %v2073_v22 = vpop.f32.mrb[204].mxu1  ;;  %v4698_v16 = vpop.f32.mrb[205].mxu0  ;;  %v2987_v32 = vld [vmem:[%s6291_s0 + $0x20] sm:$0xff] }
 0x287   :  { %v4744_v63 = vpop.f32.mrb[205].mxu1  ;;  %v1862_v56 = vpop.f32.mrb[206].mxu0  ;;  %v3006_v41 = vpack.c.bf16 %v2988_v10, %v2987_v32 }
 0x288   :  { %v6336_v39 = vadd.f32 %v2073_v22, %v1903_v29  ;;  %v1904_v62 = vadd.f32 %v1862_v56, %v6125_v37  ;;  %v2076_v38 = vpop.f32.mrb[206].mxu1  ;;  %v4699_v4 = vpop.f32.mrb[207].mxu0  ;;  %v3205_v63 = vld [vmem:[%s6296_s28 + $0x40] sm:$0xff]  ;;  %v3206_v56 = vld [vmem:[%s6296_s28 + $0x48] sm:$0xff] }
 0x289   :  { %v4745_v33 = vpop.f32.mrb[207].mxu1  ;;  %v3222_v10 = vpack.c.bf16 %v3206_v56, %v3205_v63 }
 0x28a   :  { %v6339_v8 = vadd.f32 %v2076_v38, %v1904_v62  ;;  %4949 = vmatmul.mubr.msk.bf16.gmra.mrb[56].mxu0 %vm98_vm2, %v3005_v42  ;;  %v2992_v42 = vld [vmem:[%s6291_s0 + $0x48] sm:$0xff] }
 0x28b   :  { %4995 = vmatmul.mubr.msk.bf16.gmra.mrb[56].mxu1 %vm98_vm2, %v3219_v34  ;;  %4952 = vmatprep.mubr.msk.bf16.mxu0 %vm5060_vm1, %v5059_v2 }
 0x28c   :  { %4998 = vmatprep.mubr.msk.bf16.mxu1 %vm5060_vm1, %v5059_v2 }
 0x28d   :  { %v1867_v37 = vpop.f32.mrb[208].mxu0 }
 0x28e   :  { %v1905_v13 = vadd.f32 %v1867_v37, %v6138_v48  ;;  %v2081_v17 = vpop.f32.mrb[208].mxu1  ;;  %v4702_v57 = vpop.f32.mrb[209].mxu0  ;;  %v2989_v48 = vld [vmem:[%s6291_s0 + $0x30] sm:$0xff] }
 0x28f   :  { %v4748_v12 = vpop.f32.mrb[209].mxu1  ;;  %v1870_v60 = vpop.f32.mrb[210].mxu0  ;;  %v3007_v36 = vpack.c.bf16 %v2990_v1, %v2989_v48  ;;  %v3207_v57 = vld [vmem:[%s6296_s28 + $0x50] sm:$0xff] }
 0x290   :  { %v6352_v43 = vadd.f32 %v2081_v17, %v1905_v13  ;;  %v1906_v58 = vadd.f32 %v1870_v60, %v6141_v0  ;;  %v2084_v24 = vpop.f32.mrb[210].mxu1  ;;  %v4703_v53 = vpop.f32.mrb[211].mxu0  ;;  %v2994_v17 = vld [vmem:[%s6291_s0 + $0x58] sm:$0xff] }
 0x291   :  { %v4749_v61 = vpop.f32.mrb[211].mxu1 }
 0x292   :  { %v6355_v9 = vadd.f32 %v2084_v24, %v1906_v58  ;;  %4953 = vmatmul.mubr.msk.bf16.gmra.mrb[60].mxu0 %vm98_vm2, %v3006_v41  ;;  %v3208_v41 = vld [vmem:[%s6296_s28 + $0x58] sm:$0xff] }
 0x293   :  { %4999 = vmatmul.mubr.msk.bf16.gmra.mrb[60].mxu1 %vm98_vm2, %v3220_v23  ;;  %4956 = vmatprep.mubr.msk.bf16.mxu0 %vm5060_vm1, %v5059_v2  ;;  %v3223_v48 = vpack.c.bf16 %v3208_v41, %v3207_v57 }
 0x294   :  { %5002 = vmatprep.mubr.msk.bf16.mxu1 %vm5060_vm1, %v5059_v2 }
 0x295   :  { %v1875_v0 = vpop.f32.mrb[212].mxu0 }
 0x296   :  { %v1907_v20 = vadd.f32 %v1875_v0, %v6154_v3  ;;  %v2089_v6 = vpop.f32.mrb[212].mxu1  ;;  %v4706_v15 = vpop.f32.mrb[213].mxu0  ;;  %v2991_v3 = vld [vmem:[%s6291_s0 + $0x40] sm:$0xff] }
 0x297   :  { %v4752_v44 = vpop.f32.mrb[213].mxu1  ;;  %v1878_v47 = vpop.f32.mrb[214].mxu0  ;;  %v3008_v4 = vpack.c.bf16 %v2992_v42, %v2991_v3  ;;  %v2996_v15 = vld [vmem:[%s6291_s0 + $0x68] sm:$0xff] }
 0x298   :  { %v6368_v31 = vadd.f32 %v2089_v6, %v1907_v20  ;;  %v1908_v28 = vadd.f32 %v1878_v47, %v6157_v27  ;;  %v2092_v26 = vpop.f32.mrb[214].mxu1  ;;  %v4707_v29 = vpop.f32.mrb[215].mxu0  ;;  %v3210_v44 = vld [vmem:[%s6296_s28 + $0x68] sm:$0xff] }
 0x299   :  { %v4753_v22 = vpop.f32.mrb[215].mxu1 }
 0x29a   :  { %v6371_v16 = vadd.f32 %v2092_v26, %v1908_v28  ;;  %4957 = vmatmul.mubr.msk.bf16.gmra.mrb[64].mxu0 %vm98_vm2, %v3007_v36  ;;  %v3209_v36 = vld [vmem:[%s6296_s28 + $0x60] sm:$0xff] }
 0x29b   :  { %5003 = vmatmul.mubr.msk.bf16.gmra.mrb[64].mxu1 %vm98_vm2, %v3221_v5  ;;  %4960 = vmatprep.mubr.msk.bf16.mxu0 %vm5060_vm1, %v5059_v2  ;;  %v3224_v3 = vpack.c.bf16 %v3210_v44, %v3209_v36 }
 0x29c   :  { %5006 = vmatprep.mubr.msk.bf16.mxu1 %vm5060_vm1, %v5059_v2 }
 0x29d   :  { %v1883_v27 = vpop.f32.mrb[216].mxu0 }
 0x29e   :  { %v1909_v34 = vadd.f32 %v1883_v27, %v6170_v45  ;;  %v2097_v62 = vpop.f32.mrb[216].mxu1  ;;  %v4710_v38 = vpop.f32.mrb[217].mxu0  ;;  %v2993_v45 = vld [vmem:[%s6291_s0 + $0x50] sm:$0xff] }
 0x29f   :  { %v4756_v33 = vpop.f32.mrb[217].mxu1  ;;  %v1886_v32 = vpop.f32.mrb[218].mxu0  ;;  %v3009_v24 = vpack.c.bf16 %v2994_v17, %v2993_v45  ;;  %v2998_v38 = vld [vmem:[%s6291_s0 + $0x78] sm:$0xff] }
 0x2a0   :  { %v6384_v30 = vadd.f32 %v2097_v62, %v1909_v34  ;;  %v2100_v54 = vpop.f32.mrb[218].mxu1  ;;  %v4711_v37 = vpop.f32.mrb[219].mxu0  ;;  %v3212_v33 = vld [vmem:[%s6296_s28 + $0x78] sm:$0xff] }
 0x2a1   :  { %v4757_v13 = vpop.f32.mrb[219].mxu1 }
 0x2a2   :  { %4961 = vmatmul.mubr.msk.bf16.gmra.mrb[68].mxu0 %vm98_vm2, %v3008_v4  ;;  %v3211_v4 = vld [vmem:[%s6296_s28 + $0x70] sm:$0xff] }
 0x2a3   :  { %5007 = vmatmul.mubr.msk.bf16.gmra.mrb[68].mxu1 %vm98_vm2, %v3222_v10  ;;  %4964 = vmatprep.mubr.msk.bf16.mxu0 %vm5060_vm1, %v5059_v2  ;;  %v3225_v17 = vpack.c.bf16 %v3212_v33, %v3211_v4 }
 0x2a4   :  { %5010 = vmatprep.mubr.msk.bf16.mxu1 %vm5060_vm1, %v5059_v2 }
 0x2a5   :  { %v2231_v12 = vpop.f32.mrb[220].mxu0 }
 0x2a6   :  { %v2317_v60 = vadd.f32 %v2231_v12, %v6183_v25  ;;  %v2445_v23 = vpop.f32.mrb[220].mxu1  ;;  %v4762_v58 = vpop.f32.mrb[221].mxu0  ;;  %v2995_v25 = vld [vmem:[%s6291_s0 + $0x60] sm:$0xff] }
 0x2a7   :  { %v4808_v53 = vpop.f32.mrb[221].mxu1  ;;  %v2234_v61 = vpop.f32.mrb[222].mxu0  ;;  %v3010_v26 = vpack.c.bf16 %v2996_v15, %v2995_v25 }
 0x2a8   :  { %v6397_v1 = vadd.f32 %v2445_v23, %v2317_v60  ;;  %v2318_v14 = vadd.f32 %v2234_v61, %v6186_v51  ;;  %v2448_v55 = vpop.f32.mrb[222].mxu1  ;;  %v4763_v0 = vpop.f32.mrb[223].mxu0  ;;  %v3213_v53 = vld [vmem:[%s6296_s28 + $0x80] sm:$0xff]  ;;  %v3214_v61 = vld [vmem:[%s6296_s28 + $0x88] sm:$0xff] }
 0x2a9   :  { %v4809_v20 = vpop.f32.mrb[223].mxu1  ;;  %v3226_v15 = vpack.c.bf16 %v3214_v61, %v3213_v53 }
 0x2aa   :  { %v6400_v6 = vadd.f32 %v2448_v55, %v2318_v14  ;;  %4965 = vmatmul.mubr.msk.bf16.gmra.mrb[72].mxu0 %vm98_vm2, %v3009_v24  ;;  %v3000_v24 = vld [vmem:[%s6291_s0 + $0x88] sm:$0xff] }
 0x2ab   :  { %5011 = vmatmul.mubr.msk.bf16.gmra.mrb[72].mxu1 %vm98_vm2, %v3223_v48  ;;  %4968 = vmatprep.mubr.msk.bf16.mxu0 %vm5060_vm1, %v5059_v2 }
 0x2ac   :  { %5014 = vmatprep.mubr.msk.bf16.mxu1 %vm5060_vm1, %v5059_v2 }
 0x2ad   :  { %v2239_v51 = vpop.f32.mrb[224].mxu0 }
 0x2ae   :  { %v2319_v47 = vadd.f32 %v2239_v51, %v6199_v49  ;;  %v2453_v5 = vpop.f32.mrb[224].mxu1  ;;  %v4766_v28 = vpop.f32.mrb[225].mxu0  ;;  %v2997_v49 = vld [vmem:[%s6291_s0 + $0x70] sm:$0xff] }
 0x2af   :  { %v4812_v29 = vpop.f32.mrb[225].mxu1  ;;  %v2242_v22 = vpop.f32.mrb[226].mxu0  ;;  %v3011_v37 = vpack.c.bf16 %v2998_v38, %v2997_v49 }
 0x2b0   :  { %v6413_v42 = vadd.f32 %v2453_v5, %v2319_v47  ;;  %v2320_v63 = vadd.f32 %v2242_v22, %v6202_v19  ;;  %v2456_v56 = vpop.f32.mrb[226].mxu1  ;;  %v4767_v27 = vpop.f32.mrb[227].mxu0  ;;  %v3215_v29 = vld [vmem:[%s6296_s28 + $0x90] sm:$0xff]  ;;  %v3216_v22 = vld [vmem:[%s6296_s28 + $0x98] sm:$0xff] }
 0x2b1   :  { %v4813_v34 = vpop.f32.mrb[227].mxu1  ;;  %v3227_v38 = vpack.c.bf16 %v3216_v22, %v3215_v29 }
 0x2b2   :  { %v6416_v62 = vadd.f32 %v2456_v56, %v2320_v63  ;;  %4969 = vmatmul.mubr.msk.bf16.gmra.mrb[76].mxu0 %vm98_vm2, %v3010_v26  ;;  %v3002_v26 = vld [vmem:[%s6291_s0 + $0x98] sm:$0xff] }
 0x2b3   :  { %5015 = vmatmul.mubr.msk.bf16.gmra.mrb[76].mxu1 %vm98_vm2, %v3224_v3  ;;  %4972 = vmatprep.mubr.msk.bf16.mxu0 %vm5060_vm1, %v5059_v2 }
 0x2b4   :  { %5018 = vmatprep.mubr.msk.bf16.mxu1 %vm5060_vm1, %v5059_v2 }
 0x2b5   :  { %v2247_v19 = vpop.f32.mrb[228].mxu0 }
 0x2b6   :  { %v2321_v32 = vadd.f32 %v2247_v19, %v6221_v11  ;;  %v2461_v10 = vpop.f32.mrb[228].mxu1  ;;  %v4770_v54 = vpop.f32.mrb[229].mxu0  ;;  %v2999_v11 = vld [vmem:[%s6291_s0 + $0x80] sm:$0xff] }
 0x2b7   :  { %v4816_v13 = vpop.f32.mrb[229].mxu1  ;;  %v2250_v45 = vpop.f32.mrb[230].mxu0  ;;  %v3012_v0 = vpack.c.bf16 %v3000_v24, %v2999_v11 }
 0x2b8   :  { %v6429_v57 = vadd.f32 %v2461_v10, %v2321_v32  ;;  %v2322_v41 = vadd.f32 %v2250_v45, %v6224_v18  ;;  %v2464_v12 = vpop.f32.mrb[230].mxu1  ;;  %v4771_v60 = vpop.f32.mrb[231].mxu0 }
 0x2b9   :  { %v4817_v23 = vpop.f32.mrb[231].mxu1 }
 0x2ba   :  { %v6432_v58 = vadd.f32 %v2464_v12, %v2322_v41  ;;  %4973 = vmatmul.mubr.msk.bf16.gmra.mrb[80].mxu0 %vm98_vm2, %v3011_v37  ;;  %v3217_v37 = vld [vmem:[%s6296_s28 + $0xa0] sm:$0x3] }
 0x2bb   :  { %5019 = vmatmul.mubr.msk.bf16.gmra.mrb[80].mxu1 %vm98_vm2, %v3225_v17  ;;  %4976 = vmatprep.mubr.msk.bf16.mxu0 %vm5060_vm1, %v5059_v2  ;;  %v3228_v23 = vpack.c.bf16 %v3217_v37, %v3217_v37 }
 0x2bc   :  { %5022 = vmatprep.mubr.msk.bf16.mxu1 %vm5060_vm1, %v5059_v2 }
 0x2bd   :  { %v2255_v18 = vpop.f32.mrb[232].mxu0 }
 0x2be   :  { %v2323_v48 = vadd.f32 %v2255_v18, %v6243_v21  ;;  %v2469_v14 = vpop.f32.mrb[232].mxu1  ;;  %v4774_v55 = vpop.f32.mrb[233].mxu0  ;;  %v3001_v21 = vld [vmem:[%s6291_s0 + $0x90] sm:$0xff] }
 0x2bf   :  { %v4820_v20 = vpop.f32.mrb[233].mxu1  ;;  %v2258_v25 = vpop.f32.mrb[234].mxu0  ;;  %v3013_v27 = vpack.c.bf16 %v3002_v26, %v3001_v21 }
 0x2c0   :  { %v6445_v36 = vadd.f32 %v2469_v14, %v2323_v48  ;;  %v2324_v44 = vadd.f32 %v2258_v25, %v6246_v46  ;;  %v2472_v51 = vpop.f32.mrb[234].mxu1  ;;  %v4775_v47 = vpop.f32.mrb[235].mxu0 }
 0x2c1   :  { %v4821_v5 = vpop.f32.mrb[235].mxu1 }
 0x2c2   :  { %v6448_v28 = vadd.f32 %v2472_v51, %v2324_v44  ;;  %4977 = vmatmul.mubr.msk.bf16.gmra.mrb[84].mxu0 %vm98_vm2, %v3012_v0 }
 0x2c3   :  { %5023 = vmatmul.mubr.msk.bf16.gmra.mrb[84].mxu1 %vm98_vm2, %v3226_v15  ;;  %4980 = vmatprep.mubr.msk.bf16.mxu0 %vm5060_vm1, %v5059_v2 }
 0x2c4   :  { %5026 = vmatprep.mubr.msk.bf16.mxu1 %vm5060_vm1, %v5059_v2 }
 0x2c5   :  { %v2263_v46 = vpop.f32.mrb[236].mxu0 }
 0x2c6   :  { %v2325_v3 = vadd.f32 %v2263_v46, %v6265_v7  ;;  %v2477_v63 = vpop.f32.mrb[236].mxu1  ;;  %v4778_v56 = vpop.f32.mrb[237].mxu0  ;;  %v3003_v7 = vld [vmem:[%s6291_s0 + $0xa0] sm:$0x3] }
 0x2c7   :  { %v4824_v34 = vpop.f32.mrb[237].mxu1  ;;  %v2266_v49 = vpop.f32.mrb[238].mxu0  ;;  %v3014_v41 = vpack.c.bf16 %v3003_v7, %v3003_v7 }
 0x2c8   :  { %v6461_v4 = vadd.f32 %v2477_v63, %v2325_v3  ;;  %v2326_v33 = vadd.f32 %v2266_v49, %v6268_v50  ;;  %v2480_v19 = vpop.f32.mrb[238].mxu1  ;;  %v4779_v32 = vpop.f32.mrb[239].mxu0 }
 0x2c9   :  { %v4825_v10 = vpop.f32.mrb[239].mxu1 }
 0x2ca   :  { %v6464_v54 = vadd.f32 %v2480_v19, %v2326_v33  ;;  %4981 = vmatmul.mubr.msk.bf16.gmra.mrb[88].mxu0 %vm98_vm2, %v3013_v27 }
 0x2cb   :  { %5027 = vmatmul.mubr.msk.bf16.gmra.mrb[88].mxu1 %vm98_vm2, %v3227_v38  ;;  %4984 = vmatprep.mubr.msk.bf16.mxu0 %vm5060_vm1, %v5059_v2 }
 0x2cc   :  { %5030 = vmatprep.mubr.msk.bf16.mxu1 %vm5060_vm1, %v5059_v2 }
 0x2cd   :  { %v2271_v13 = vpop.f32.mrb[240].mxu0 }
 0x2ce   :  { %v2327_v50 = vadd.f32 %v2271_v13, %v6285_v40  ;;  %v2485_v45 = vpop.f32.mrb[240].mxu1  ;;  %v4782_v17 = vpop.f32.mrb[241].mxu0 }
 0x2cf   :  { %v4828_v12 = vpop.f32.mrb[241].mxu1  ;;  %v2274_v60 = vpop.f32.mrb[242].mxu0 }
 0x2d0   :  { %v6475_v11 = vadd.f32 %v2485_v45, %v2327_v50  ;;  %v2328_v24 = vadd.f32 %v2274_v60, %v6301_v59  ;;  %v2488_v53 = vpop.f32.mrb[242].mxu1  ;;  %v4783_v61 = vpop.f32.mrb[243].mxu0 }
 0x2d1   :  { %v4829_v18 = vpop.f32.mrb[243].mxu1 }
 0x2d2   :  { %v6478_v48 = vadd.f32 %v2488_v53, %v2328_v24  ;;  %4985 = vmatmul.mubr.msk.bf16.gmra.mrb[92].mxu0 %vm98_vm2, %v3014_v41 }
 0x2d3   :  { %5031 = vmatmul.mubr.msk.bf16.gmra.mrb[92].mxu1 %vm98_vm2, %v3228_v23 }
 0x2d5   :  { %v2279_v2 = vpop.f32.mrb[244].mxu0 }
 0x2d6   :  { %v2329_v40 = vadd.f32 %v2279_v2, %v6317_v35  ;;  %v2493_v14 = vpop.f32.mrb[244].mxu1  ;;  %v4786_v55 = vpop.f32.mrb[245].mxu0 }
 0x2d7   :  { %v4832_v0 = vpop.f32.mrb[245].mxu1  ;;  %v2282_v20 = vpop.f32.mrb[246].mxu0 }
 0x2d8   :  { %v6483_v25 = vadd.f32 %v2493_v14, %v2329_v40  ;;  %v2330_v59 = vadd.f32 %v2282_v20, %v6320_v52  ;;  %v2496_v15 = vpop.f32.mrb[246].mxu1  ;;  %v4787_v44 = vpop.f32.mrb[247].mxu0 }
 0x2d9   :  { %v4833_v51 = vpop.f32.mrb[247].mxu1 }
 0x2da   :  { %v6486_v47 = vadd.f32 %v2496_v15, %v2330_v59 }
 0x2dd   :  { %v2287_v5 = vpop.f32.mrb[248].mxu0 }
 0x2de   :  { %v2331_v21 = vadd.f32 %v2287_v5, %v6336_v39  ;;  %v2501_v26 = vpop.f32.mrb[248].mxu1  ;;  %v4790_v29 = vpop.f32.mrb[249].mxu0 }
 0x2df   :  { %v4836_v22 = vpop.f32.mrb[249].mxu1  ;;  %v2290_v35 = vpop.f32.mrb[250].mxu0 }
 0x2e0   :  { %v6489_v46 = vadd.f32 %v2501_v26, %v2331_v21  ;;  %v2332_v3 = vadd.f32 %v2290_v35, %v6339_v8  ;;  %v2504_v63 = vpop.f32.mrb[250].mxu1  ;;  %v4791_v56 = vpop.f32.mrb[251].mxu0 }
 0x2e1   :  { %v4837_v27 = vpop.f32.mrb[251].mxu1 }
 0x2e2   :  { %v6492_v52 = vadd.f32 %v2504_v63, %v2332_v3 }
 0x2e5   :  { %v2295_v34 = vpop.f32.mrb[252].mxu0 }
 0x2e6   :  { %v2333_v49 = vadd.f32 %v2295_v34, %v6352_v43  ;;  %v2509_v38 = vpop.f32.mrb[252].mxu1  ;;  %v4794_v33 = vpop.f32.mrb[253].mxu0 }
 0x2e7   :  { %v4840_v19 = vpop.f32.mrb[253].mxu1  ;;  %v2298_v39 = vpop.f32.mrb[254].mxu0 }
 0x2e8   :  { %v6495_v32 = vadd.f32 %v2509_v38, %v2333_v49  ;;  %v2334_v10 = vadd.f32 %v2298_v39, %v6355_v9  ;;  %v2512_v7 = vpop.f32.mrb[254].mxu1  ;;  %v4795_v37 = vpop.f32.mrb[255].mxu0 }
 0x2e9   :  { %v4841_v13 = vpop.f32.mrb[255].mxu1 }
 0x2ea   :  { %v6498_v8 = vadd.f32 %v2512_v7, %v2334_v10 }
 0x2ed   :  { %v2303_v50 = vpop.f32.mrb[0].mxu0 }
 0x2ee   :  { %v2335_v45 = vadd.f32 %v2303_v50, %v6368_v31  ;;  %v2517_v17 = vpop.f32.mrb[0].mxu1  ;;  %v4798_v41 = vpop.f32.mrb[1].mxu0 }
 0x2ef   :  { %v4844_v12 = vpop.f32.mrb[1].mxu1  ;;  %v2306_v43 = vpop.f32.mrb[2].mxu0 }
 0x2f0   :  { %v6501_v60 = vadd.f32 %v2517_v17, %v2335_v45  ;;  %v2336_v23 = vadd.f32 %v2306_v43, %v6371_v16  ;;  %v2520_v24 = vpop.f32.mrb[2].mxu1  ;;  %v4799_v53 = vpop.f32.mrb[3].mxu0 }
 0x2f1   :  { %v4845_v61 = vpop.f32.mrb[3].mxu1 }
 0x2f2   :  { %v6504_v9 = vadd.f32 %v2520_v24, %v2336_v23 }
 0x2f5   :  { %v2311_v18 = vpop.f32.mrb[4].mxu0 }
 0x2f6   :  { %v2337_v2 = vadd.f32 %v2311_v18, %v6384_v30  ;;  %v2525_v40 = vpop.f32.mrb[4].mxu1  ;;  %v4802_v14 = vpop.f32.mrb[5].mxu0 }
 0x2f7   :  { %v4848_v55 = vpop.f32.mrb[5].mxu1  ;;  %v2314_v31 = vpop.f32.mrb[6].mxu0 }
 0x2f8   :  { %v6507_v0 = vadd.f32 %v2525_v40, %v2337_v2  ;;  %v2528_v20 = vpop.f32.mrb[6].mxu1  ;;  %v4803_v59 = vpop.f32.mrb[7].mxu0 }
 0x2f9   :  { %v4849_v15 = vpop.f32.mrb[7].mxu1 }
 0x2fd   :  { %v2659_v44 = vpop.f32.mrb[8].mxu0 }
 0x2fe   :  { %v2745_v16 = vadd.f32 %v2659_v44, %v6397_v1  ;;  %v2873_v51 = vpop.f32.mrb[8].mxu1  ;;  %v4854_v5 = vpop.f32.mrb[9].mxu0 }
 0x2ff   :  { %v4900_v21 = vpop.f32.mrb[9].mxu1  ;;  %v2662_v26 = vpop.f32.mrb[10].mxu0 }
 0x300   :  { %v6510_v29 = vadd.f32 %v2873_v51, %v2745_v16  ;;  %v2746_v30 = vadd.f32 %v2662_v26, %v6400_v6  ;;  %v2876_v22 = vpop.f32.mrb[10].mxu1  ;;  %v4855_v35 = vpop.f32.mrb[11].mxu0 }
 0x301   :  { %v4901_v3 = vpop.f32.mrb[11].mxu1 }
 0x302   :  { %v6513_v63 = vadd.f32 %v2876_v22, %v2746_v30 }
 0x305   :  { %v2667_v56 = vpop.f32.mrb[12].mxu0 }
 0x306   :  { %v2747_v27 = vadd.f32 %v2667_v56, %v6413_v42  ;;  %v2881_v34 = vpop.f32.mrb[12].mxu1  ;;  %v4858_v49 = vpop.f32.mrb[13].mxu0 }
 0x307   :  { %v4904_v38 = vpop.f32.mrb[13].mxu1  ;;  %v2670_v1 = vpop.f32.mrb[14].mxu0 }
 0x308   :  { %v6516_v33 = vadd.f32 %v2881_v34, %v2747_v27  ;;  %v2748_v19 = vadd.f32 %v2670_v1, %v6416_v62  ;;  %v2884_v39 = vpop.f32.mrb[14].mxu1  ;;  %v4859_v10 = vpop.f32.mrb[15].mxu0 }
 0x309   :  { %v4905_v7 = vpop.f32.mrb[15].mxu1 }
 0x30a   :  { %v6519_v6 = vadd.f32 %v2884_v39, %v2748_v19 }
 0x30d   :  { %v2675_v37 = vpop.f32.mrb[16].mxu0 }
 0x30e   :  { %v2749_v13 = vadd.f32 %v2675_v37, %v6429_v57  ;;  %v2889_v50 = vpop.f32.mrb[16].mxu1  ;;  %v4862_v45 = vpop.f32.mrb[17].mxu0 }
 0x30f   :  { %v4908_v17 = vpop.f32.mrb[17].mxu1  ;;  %v2678_v42 = vpop.f32.mrb[18].mxu0 }
 0x310   :  { %v6522_v41 = vadd.f32 %v2889_v50, %v2749_v13  ;;  %v2750_v12 = vadd.f32 %v2678_v42, %v6432_v58  ;;  %v2892_v43 = vpop.f32.mrb[18].mxu1  ;;  %v4863_v23 = vpop.f32.mrb[19].mxu0 }
 0x311   :  { %v4909_v24 = vpop.f32.mrb[19].mxu1 }
 0x312   :  { %v6525_v62 = vadd.f32 %v2892_v43, %v2750_v12 }
 0x315   :  { %v2683_v53 = vpop.f32.mrb[20].mxu0 }
 0x316   :  { %v2751_v61 = vadd.f32 %v2683_v53, %v6445_v36  ;;  %v2897_v18 = vpop.f32.mrb[20].mxu1  ;;  %v4866_v2 = vpop.f32.mrb[21].mxu0 }
 0x317   :  { %v4912_v40 = vpop.f32.mrb[21].mxu1  ;;  %v2686_v57 = vpop.f32.mrb[22].mxu0 }
 0x318   :  { %v6528_v14 = vadd.f32 %v2897_v18, %v2751_v61  ;;  %v2752_v55 = vadd.f32 %v2686_v57, %v6448_v28  ;;  %v2900_v31 = vpop.f32.mrb[22].mxu1  ;;  %v4867_v20 = vpop.f32.mrb[23].mxu0 }
 0x319   :  { %v4913_v59 = vpop.f32.mrb[23].mxu1 }
 0x31a   :  { %v6531_v58 = vadd.f32 %v2900_v31, %v2752_v55 }
 0x31d   :  { %v2691_v15 = vpop.f32.mrb[24].mxu0 }
 0x31e   :  { %v2753_v44 = vadd.f32 %v2691_v15, %v6461_v4  ;;  %v2905_v16 = vpop.f32.mrb[24].mxu1  ;;  %v4870_v51 = vpop.f32.mrb[25].mxu0 }
 0x31f   :  { %v4916_v5 = vpop.f32.mrb[25].mxu1  ;;  %v2694_v36 = vpop.f32.mrb[26].mxu0 }
 0x320   :  { %v6534_v21 = vadd.f32 %v2905_v16, %v2753_v44  ;;  %v2754_v26 = vadd.f32 %v2694_v36, %v6464_v54  ;;  %v2908_v30 = vpop.f32.mrb[26].mxu1  ;;  %v4871_v22 = vpop.f32.mrb[27].mxu0 }
 0x321   :  { %v4917_v35 = vpop.f32.mrb[27].mxu1 }
 0x322   :  { %v6537_v28 = vadd.f32 %v2908_v30, %v2754_v26 }
 0x325   :  { %v2699_v3 = vpop.f32.mrb[28].mxu0 }
 0x326   :  { %v2755_v56 = vadd.f32 %v2699_v3, %v6475_v11  ;;  %v2913_v27 = vpop.f32.mrb[28].mxu1  ;;  %v4874_v34 = vpop.f32.mrb[29].mxu0 }
 0x327   :  { %v4920_v49 = vpop.f32.mrb[29].mxu1  ;;  %v2702_v4 = vpop.f32.mrb[30].mxu0 }
 0x328   :  { %v6540_v38 = vadd.f32 %v2913_v27, %v2755_v56  ;;  %v2756_v1 = vadd.f32 %v2702_v4, %v6478_v48  ;;  %v2916_v19 = vpop.f32.mrb[30].mxu1  ;;  %v4875_v39 = vpop.f32.mrb[31].mxu0 }
 0x329   :  { %v4921_v10 = vpop.f32.mrb[31].mxu1 }
 0x32a   :  { %v6543_v54 = vadd.f32 %v2916_v19, %v2756_v1 }
 0x32d   :  { %v2707_v7 = vpop.f32.mrb[32].mxu0 }
 0x32e   :  { %v2757_v37 = vadd.f32 %v2707_v7, %v6483_v25  ;;  %v2921_v13 = vpop.f32.mrb[32].mxu1  ;;  %v4878_v50 = vpop.f32.mrb[33].mxu0 }
 0x32f   :  { %v4924_v45 = vpop.f32.mrb[33].mxu1  ;;  %v2710_v11 = vpop.f32.mrb[34].mxu0 }
 0x330   :  { %v6546_v17 = vadd.f32 %v2921_v13, %v2757_v37  ;;  %v2758_v42 = vadd.f32 %v2710_v11, %v6486_v47  ;;  %v2924_v12 = vpop.f32.mrb[34].mxu1  ;;  %v4879_v43 = vpop.f32.mrb[35].mxu0 }
 0x331   :  { %v4925_v23 = vpop.f32.mrb[35].mxu1 }
 0x332   :  { %v6549_v48 = vadd.f32 %v2924_v12, %v2758_v42  ;;  %v6572_v23 = vpop.permute.xlu0 %3449 }
 0x335   :  { %v2715_v24 = vpop.f32.mrb[36].mxu0 }
 0x336   :  { %v2759_v53 = vadd.f32 %v2715_v24, %v6489_v46  ;;  %v2929_v61 = vpop.f32.mrb[36].mxu1  ;;  %v4882_v18 = vpop.f32.mrb[37].mxu0 }
 0x337   :  { %v4928_v2 = vpop.f32.mrb[37].mxu1  ;;  %v2718_v25 = vpop.f32.mrb[38].mxu0 }
 0x338   :  { %v6552_v40 = vadd.f32 %v2929_v61, %v2759_v53  ;;  %v2760_v57 = vadd.f32 %v2718_v25, %v6492_v52  ;;  %v2932_v55 = vpop.f32.mrb[38].mxu1  ;;  %v4883_v31 = vpop.f32.mrb[39].mxu0 }
 0x339   :  { %v4929_v20 = vpop.f32.mrb[39].mxu1 }
 0x33a   :  { %v6555_v47 = vadd.f32 %v2932_v55, %v2760_v57 }
 0x33d   :  { %v2723_v59 = vpop.f32.mrb[40].mxu0 }
 0x33e   :  { %v2761_v15 = vadd.f32 %v2723_v59, %v6495_v32  ;;  %v2937_v44 = vpop.f32.mrb[40].mxu1  ;;  %v4886_v16 = vpop.f32.mrb[41].mxu0 }
 0x33f   :  { %v4932_v51 = vpop.f32.mrb[41].mxu1  ;;  %v2726_v46 = vpop.f32.mrb[42].mxu0 }
 0x340   :  { %v6558_v5 = vadd.f32 %v2937_v44, %v2761_v15  ;;  %v2762_v36 = vadd.f32 %v2726_v46, %v6498_v8  ;;  %v2940_v26 = vpop.f32.mrb[42].mxu1  ;;  %v4887_v30 = vpop.f32.mrb[43].mxu0 }
 0x341   :  { %v4933_v22 = vpop.f32.mrb[43].mxu1  ;;  %v6591_v51 = vpop.permute.xlu1 %3459 }
 0x342   :  { %v6561_v52 = vadd.f32 %v2940_v26, %v2762_v36 }
 0x345   :  { %v2731_v35 = vpop.f32.mrb[44].mxu0 }
 0x346   :  { %v2763_v3 = vadd.f32 %v2731_v35, %v6501_v60  ;;  %v2945_v56 = vpop.f32.mrb[44].mxu1  ;;  %v4890_v27 = vpop.f32.mrb[45].mxu0 }
 0x347   :  { %v4936_v34 = vpop.f32.mrb[45].mxu1  ;;  %v2734_v32 = vpop.f32.mrb[46].mxu0 }
 0x348   :  { %v6564_v49 = vadd.f32 %v2945_v56, %v2763_v3  ;;  %v2764_v4 = vadd.f32 %v2734_v32, %v6504_v9  ;;  %v2948_v1 = vpop.f32.mrb[46].mxu1  ;;  %v4891_v19 = vpop.f32.mrb[47].mxu0 }
 0x349   :  { %v4937_v39 = vpop.f32.mrb[47].mxu1 }
 0x34a   :  { %v6567_v8 = vadd.f32 %v2948_v1, %v2764_v4 }
 0x34d   :  { %v2739_v10 = vpop.f32.mrb[48].mxu0 }
 0x34e   :  { %v2765_v7 = vadd.f32 %v2739_v10, %v6507_v0  ;;  %v2953_v37 = vpop.f32.mrb[48].mxu1  ;;  %v4894_v13 = vpop.f32.mrb[49].mxu0  ;;  %v6578_v0 = vld [vmem:[%s6988_s3] ss:$0 sm:$0xff] }
 0x34f   :  { %v4940_v50 = vpop.f32.mrb[49].mxu1  ;;  %v2742_v60 = vpop.f32.mrb[50].mxu0 }
 0x350   :  { %v6570_v45 = vadd.f32 %v2953_v37, %v2765_v7  ;;  %v2956_v11 = vpop.f32.mrb[50].mxu1  ;;  %v4895_v42 = vpop.f32.mrb[51].mxu0 }
 0x351   :  { %v4941_v12 = vpop.f32.mrb[51].mxu1  ;;  %v6602_v10 = vpop.permute.xlu1 %3464 }
 0x355   :  { %v3087_v43 = vpop.f32.mrb[52].mxu0 }
 0x356   :  { %v3173_v9 = vadd.f32 %v3087_v43, %v6510_v29  ;;  %v3301_v24 = vpop.f32.mrb[52].mxu1  ;;  %v4946_v53 = vpop.f32.mrb[53].mxu0 }
 0x357   :  { %v4992_v61 = vpop.f32.mrb[53].mxu1  ;;  %v3090_v18 = vpop.f32.mrb[54].mxu0 }
 0x358   :  { %v3387_v2 = vadd.f32 %v3301_v24, %v3173_v9  ;;  %v3174_v25 = vadd.f32 %v3090_v18, %v6513_v63  ;;  %v3304_v57 = vpop.f32.mrb[54].mxu1  ;;  %v4947_v55 = vpop.f32.mrb[55].mxu0 }
 0x359   :  { %v4993_v31 = vpop.f32.mrb[55].mxu1  ;;  %v6584_v29 = vpop.permute.xlu0 %3454 }
 0x35a   :  { %v6582_v20 = vadd.f32 %v6578_v0, %v3387_v2  ;;  %v3388_v59 = vadd.f32 %v3304_v57, %v3174_v25 }
 0x35c   :  { %v6587_v15 = vadd.f32 %v6578_v0, %v3388_v59  ;;  %v3502_v44 = vmul.f32 %v6572_v23, %v6582_v20 }
 0x35d   :  { %v3095_v16 = vpop.f32.mrb[56].mxu0  ;;  %v6615_v31 = vpop.permute.xlu0 %3469 }
 0x35e   :  { %v3503_v63 = vmul.f32 %v6584_v29, %v6587_v15  ;;  %v3175_v46 = vadd.f32 %v3095_v16, %v6516_v33  ;;  %v3309_v36 = vpop.f32.mrb[56].mxu1  ;;  %v4950_v26 = vpop.f32.mrb[57].mxu0  ;;  %v3532_v30 = vmul.f32 %v3502_v44, %v6582_v20 }
 0x35f   :  { %v4996_v22 = vpop.f32.mrb[57].mxu1  ;;  %v3098_v35 = vpop.f32.mrb[58].mxu0 }
 0x360   :  { %v3513_v3 = vadd.f32 %v3503_v63, %v3502_v44  ;;  %v3533_v56 = vmul.f32 %v3503_v63, %v6587_v15  ;;  %v3389_v27 = vadd.f32 %v3309_v36, %v3175_v46  ;;  %v3176_v34 = vadd.f32 %v3098_v35, %v6519_v6  ;;  %v3312_v32 = vpop.f32.mrb[58].mxu1  ;;  %v4951_v4 = vpop.f32.mrb[59].mxu0 }
 0x361   :  { %v4997_v1 = vpop.f32.mrb[59].mxu1  ;;  %v6622_v63 = vpop.permute.xlu1 %3474 }
 0x362   :  { %v3543_v19 = vadd.f32 %v3533_v56, %v3532_v30  ;;  %v6600_v39 = vadd.f32 %v6578_v0, %v3389_v27  ;;  %v3390_v33 = vadd.f32 %v3312_v32, %v3176_v34 }
 0x364   :  { %v6605_v7 = vadd.f32 %v6578_v0, %v3390_v33  ;;  %v3504_v37 = vmul.f32 %v6591_v51, %v6600_v39 }
 0x365   :  { %v3103_v13 = vpop.f32.mrb[60].mxu0 }
 0x366   :  { %v3514_v50 = vadd.f32 %v3513_v3, %v3504_v37  ;;  %v3534_v6 = vmul.f32 %v3504_v37, %v6600_v39  ;;  %v3505_v60 = vmul.f32 %v6602_v10, %v6605_v7  ;;  %v3177_v11 = vadd.f32 %v3103_v13, %v6522_v41  ;;  %v3317_v42 = vpop.f32.mrb[60].mxu1  ;;  %v4954_v12 = vpop.f32.mrb[61].mxu0 }
 0x367   :  { %v5000_v43 = vpop.f32.mrb[61].mxu1  ;;  %v3106_v9 = vpop.f32.mrb[62].mxu0 }
 0x368   :  { %v3544_v24 = vadd.f32 %v3543_v19, %v3534_v6  ;;  %v3515_v53 = vadd.f32 %v3514_v50, %v3505_v60  ;;  %v3535_v61 = vmul.f32 %v3505_v60, %v6605_v7  ;;  %v3391_v18 = vadd.f32 %v3317_v42, %v3177_v11  ;;  %v3320_v2 = vpop.f32.mrb[62].mxu1  ;;  %v4955_v25 = vpop.f32.mrb[63].mxu0 }
 0x369   :  { %v3178_v57 = vadd.f32 %v3106_v9, %v6525_v62  ;;  %v5001_v55 = vpop.f32.mrb[63].mxu1  ;;  %v6633_v50 = vpop.permute.xlu0 %3479 }
 0x36a   :  { %v3545_v59 = vadd.f32 %v3544_v24, %v3535_v61  ;;  %v6618_v44 = vadd.f32 %v6578_v0, %v3391_v18  ;;  %v6638_v11 = vpop.permute.xlu1 %3484 }
 0x36b   :  { %v3392_v41 = vadd.f32 %v3320_v2, %v3178_v57 }
 0x36c   :  { %v3506_v16 = vmul.f32 %v6615_v31, %v6618_v44 }
 0x36d   :  { %v6625_v46 = vadd.f32 %v6578_v0, %v3392_v41  ;;  %v3111_v36 = vpop.f32.mrb[64].mxu0 }
 0x36e   :  { %v3516_v26 = vadd.f32 %v3515_v53, %v3506_v16  ;;  %v3536_v62 = vmul.f32 %v3506_v16, %v6618_v44  ;;  %v3179_v30 = vadd.f32 %v3111_v36, %v6528_v14  ;;  %v3325_v22 = vpop.f32.mrb[64].mxu1  ;;  %v4958_v35 = vpop.f32.mrb[65].mxu0 }
 0x36f   :  { %v3507_v3 = vmul.f32 %v6622_v63, %v6625_v46  ;;  %v5004_v56 = vpop.f32.mrb[65].mxu1  ;;  %v3114_v27 = vpop.f32.mrb[66].mxu0 }
 0x370   :  { %v3546_v34 = vadd.f32 %v3545_v59, %v3536_v62  ;;  %v3393_v32 = vadd.f32 %v3325_v22, %v3179_v30  ;;  %v3180_v4 = vadd.f32 %v3114_v27, %v6531_v58  ;;  %v3328_v1 = vpop.f32.mrb[66].mxu1  ;;  %v4959_v19 = vpop.f32.mrb[67].mxu0 }
 0x371   :  { %v3517_v33 = vadd.f32 %v3516_v26, %v3507_v3  ;;  %v3537_v37 = vmul.f32 %v3507_v3, %v6625_v46  ;;  %v5005_v13 = vpop.f32.mrb[67].mxu1  ;;  %v6651_v30 = vpop.permute.xlu0 %3489 }
 0x372   :  { %v6636_v14 = vadd.f32 %v6578_v0, %v3393_v32  ;;  %v3394_v6 = vadd.f32 %v3328_v1, %v3180_v4  ;;  %v6658_v56 = vpop.permute.xlu1 %3494 }
 0x373   :  { %v3547_v60 = vadd.f32 %v3546_v34, %v3537_v37  ;;  %v3568_v37 = vrot.slane %v6584_v29, 7 }
 0x374   :  { %v6641_v42 = vadd.f32 %v6578_v0, %v3394_v6  ;;  %v3508_v58 = vmul.f32 %v6633_v50, %v6636_v14 }
 0x375   :  { %v3119_v12 = vpop.f32.mrb[68].mxu0 }
 0x376   :  { %v3518_v43 = vadd.f32 %v3517_v33, %v3508_v58  ;;  %v3538_v9 = vmul.f32 %v3508_v58, %v6636_v14  ;;  %v3509_v24 = vmul.f32 %v6638_v11, %v6641_v42  ;;  %v3181_v53 = vadd.f32 %v3119_v12, %v6534_v21  ;;  %v3333_v61 = vpop.f32.mrb[68].mxu1  ;;  %v4962_v18 = vpop.f32.mrb[69].mxu0 }
 0x377   :  { %v5008_v2 = vpop.f32.mrb[69].mxu1  ;;  %v3122_v25 = vpop.f32.mrb[70].mxu0  ;;  %v3567_v33 = vrot.slane %v6572_v23, 7 }
 0x378   :  { %v3548_v57 = vadd.f32 %v3547_v60, %v3538_v9  ;;  %v3519_v55 = vadd.f32 %v3518_v43, %v3509_v24  ;;  %v3539_v59 = vmul.f32 %v3509_v24, %v6641_v42  ;;  %v3395_v41 = vadd.f32 %v3333_v61, %v3181_v53  ;;  %v3336_v16 = vpop.f32.mrb[70].mxu1  ;;  %v4963_v36 = vpop.f32.mrb[71].mxu0 }
 0x379   :  { %v3182_v26 = vadd.f32 %v3122_v25, %v6537_v28  ;;  %v5009_v62 = vpop.f32.mrb[71].mxu1  ;;  %v6671_v18 = vpop.permute.xlu0 %3499  ;;  %v3569_v2 = vsel %vm3522_vm3, %v3567_v33, %v3568_v37  ;;  %v3570_v25 = vrot.slane %v6591_v51, 7 }
 0x37a   :  { %v3549_v22 = vadd.f32 %v3548_v57, %v3539_v59  ;;  %v6654_v35 = vadd.f32 %v6578_v0, %v3395_v41 }
 0x37b   :  { %v3396_v21 = vadd.f32 %v3336_v16, %v3182_v26  ;;  %v3572_v16 = vrot.slane %v6602_v10, 7  ;;  %v3571_v51 = vsel %vm3522_vm3, %v3568_v37, %v3570_v25 }
 0x37c   :  { %v3510_v3 = vmul.f32 %v6651_v30, %v6654_v35 }
 0x37d   :  { %v6661_v27 = vadd.f32 %v6578_v0, %v3396_v21  ;;  %v3127_v34 = vpop.f32.mrb[72].mxu0 }
 0x37e   :  { %v3520_v32 = vadd.f32 %v3519_v55, %v3510_v3  ;;  %v3540_v28 = vmul.f32 %v3510_v3, %v6654_v35  ;;  %v3183_v4 = vadd.f32 %v3127_v34, %v6540_v38  ;;  %v3341_v1 = vpop.f32.mrb[72].mxu1  ;;  %v4966_v19 = vpop.f32.mrb[73].mxu0 }
 0x37f   :  { %v3511_v13 = vmul.f32 %v6658_v56, %v6661_v27  ;;  %v5012_v6 = vpop.f32.mrb[73].mxu1  ;;  %v3130_v60 = vpop.f32.mrb[74].mxu0 }
 0x380   :  { %v3550_v58 = vadd.f32 %v3549_v22, %v3540_v28  ;;  %v3397_v12 = vadd.f32 %v3341_v1, %v3183_v4  ;;  %v3184_v43 = vadd.f32 %v3130_v60, %v6543_v54  ;;  %v3344_v9 = vpop.f32.mrb[74].mxu1  ;;  %v4967_v24 = vpop.f32.mrb[75].mxu0  ;;  %v3574_v4 = vrot.slane %v6615_v31, 7 }
 0x381   :  { %v3521_v53 = vadd.f32 %v3520_v32, %v3511_v13  ;;  %v3541_v38 = vmul.f32 %v3511_v13, %v6661_v27  ;;  %v5013_v61 = vpop.f32.mrb[75].mxu1  ;;  %v3576_v1 = vrot.slane %v6622_v63, 7 }
 0x382   :  { %v6674_v23 = vadd.f32 %v6578_v0, %v3397_v12  ;;  %v3398_v29 = vadd.f32 %v3344_v9, %v3184_v43 }
 0x383   :  { %v3551_v57 = vadd.f32 %v3550_v58, %v3541_v38 }
 0x384   :  { %v6679_v55 = vadd.f32 %v6578_v0, %v3398_v29  ;;  %v3512_v54 = vmul.f32 %v6671_v18, %v6674_v23  ;;  %v3599_v59 = vmul.f32 %v3567_v33, %v6674_v23 }
 0x385   :  { %v3135_v41 = vpop.f32.mrb[76].mxu0 }
 0x386   :  { %v3600_v36 = vmul.f32 %v3569_v2, %v6679_v55  ;;  %v3523_v26 = vsel %vm3522_vm3, %v3512_v54, 0.0  ;;  %v3349_v62 = vpop.f32.mrb[76].mxu1  ;;  %v4970_v22 = vpop.f32.mrb[77].mxu0  ;;  %v3542_v3 = vmul.f32 %v3512_v54, %v6674_v23  ;;  %v3185_v34 = vadd.f32 %v3135_v41, %v6546_v17 }
 0x387   :  { %v3524_v21 = vadd.f32 %v3523_v26, %v3521_v53  ;;  %v5016_v32 = vpop.f32.mrb[77].mxu1  ;;  %v3138_v28 = vpop.f32.mrb[78].mxu0  ;;  %v3672_v6 = vmul.f32 %v3599_v59, %v6674_v23  ;;  %v3573_v17 = vsel %vm3522_vm3, %v3570_v25, %v3572_v16  ;;  %v3622_v61 = vrot.slane %v3599_v59, 1 }
 0x388   :  { %v3673_v10 = vmul.f32 %v3600_v36, %v6679_v55  ;;  %v3186_v19 = vadd.f32 %v3138_v28, %v6549_v48  ;;  %v3352_v33 = vpop.f32.mrb[78].mxu1  ;;  %v4971_v13 = vpop.f32.mrb[79].mxu0  ;;  %v3552_v60 = vsel %vm3522_vm3, %v3542_v3, 0.0  ;;  %v3399_v58 = vadd.f32 %v3349_v62, %v3185_v34 }
 0x389   :  { %v3525_v37 = vrot.slane %v3524_v21, 4  ;;  %v5017_v12 = vpop.f32.mrb[79].mxu1  ;;  %v3623_v43 = vrot.slane %v3600_v36, 1  ;;  %v3553_v9 = vadd.f32 %v3552_v60, %v3551_v57  ;;  %v3575_v48 = vsel %vm3522_vm3, %v3572_v16, %v3574_v4 }
 0x38a   :  { %v3400_v31 = vadd.f32 %v3352_v33, %v3186_v19  ;;  %v3695_v24 = vrot.slane %v3673_v10, 1  ;;  %v6698_v38 = vadd.f32 %v6578_v0, %v3399_v58  ;;  %v6707_v25 = vsel %vm3522_vm3, %v3574_v4, %v3576_v1 }
 0x38b   :  { %v3526_v53 = vadd.f32 %v3525_v37, %v3524_v21  ;;  %v3554_v29 = vrot.slane %v3553_v9, 4  ;;  %v3694_v57 = vrot.slane %v3672_v6, 1  ;;  %v3624_v26 = vsel %vm3621_vm4, %v3622_v61, %v3623_v43 }
 0x38c   :  { %v6702_v2 = vadd.f32 %v6578_v0, %v3400_v31  ;;  %v3601_v41 = vmul.f32 %v3571_v51, %v6698_v38 }
 0x38d   :  { %v3527_v54 = vrot.slane %v3526_v53, 2  ;;  %v3143_v36 = vpop.f32.mrb[80].mxu0  ;;  %v3555_v62 = vadd.f32 %v3554_v29, %v3553_v9  ;;  %v3696_v3 = vsel %vm3621_vm4, %v3694_v57, %v3695_v24 }
 0x38e   :  { %v6712_v16 = vmul.f32 %v3573_v17, %v6702_v2  ;;  %v3187_v59 = vadd.f32 %v3143_v36, %v6552_v40  ;;  %v3357_v22 = vpop.f32.mrb[80].mxu1  ;;  %v4974_v21 = vpop.f32.mrb[81].mxu0  ;;  %v3625_v32 = vrot.slane %v3601_v41, 1  ;;  %v3674_v28 = vmul.f32 %v3601_v41, %v6698_v38 }
 0x38f   :  { %v3528_v34 = vadd.f32 %v3527_v54, %v3526_v53  ;;  %v5020_v4 = vpop.f32.mrb[81].mxu1  ;;  %v3146_v10 = vpop.f32.mrb[82].mxu0  ;;  %v3556_v51 = vrot.slane %v3555_v62, 2 }
 0x390   :  { %v3627_v19 = vrot.slane %v6712_v16, 1  ;;  %v6720_v33 = vmul.f32 %v6712_v16, %v6702_v2  ;;  %v3401_v13 = vadd.f32 %v3357_v22, %v3187_v59  ;;  %v3360_v6 = vpop.f32.mrb[82].mxu1  ;;  %v4975_v40 = vpop.f32.mrb[83].mxu0  ;;  %v3626_v60 = vsel %vm3621_vm4, %v3623_v43, %v3625_v32 }
 0x391   :  { %v3529_v37 = vrot.slane %v3528_v34, 1  ;;  %v3697_v58 = vrot.slane %v3674_v28, 1  ;;  %v3188_v12 = vadd.f32 %v3146_v10, %v6555_v47  ;;  %v5021_v17 = vpop.f32.mrb[83].mxu1  ;;  %v3557_v9 = vadd.f32 %v3556_v51, %v3555_v62 }
 0x392   :  { %v3654_v31 = vadd.f32 %v3626_v60, %v3624_v26  ;;  %v3628_v53 = vsel %vm3621_vm4, %v3625_v32, %v3627_v19  ;;  %v3699_v61 = vrot.slane %v6720_v33, 1  ;;  %v6728_v54 = vadd.f32 %v6578_v0, %v3401_v13 }
 0x393   :  { %v3530_v29 = vadd.f32 %v3529_v37, %v3528_v34  ;;  %v3698_v57 = vsel %vm3621_vm4, %v3695_v24, %v3697_v58  ;;  %v3402_v41 = vadd.f32 %v3360_v6, %v3188_v12  ;;  %v3558_v36 = vrot.slane %v3557_v9, 1 }
 0x394   :  { %v3726_v16 = vadd.f32 %v3698_v57, %v3696_v3  ;;  %v3655_v43 = vadd.f32 %v3654_v31, %v3628_v53  ;;  %v3700_v59 = vsel %vm3621_vm4, %v3697_v58, %v3699_v61  ;;  %v3578_v47 = vrot.slane %v6633_v50, 7 }
 0x395   :  { %v3580_v26 = vrot.slane %v6638_v11, 7  ;;  %v6733_v62 = vmul.f32 0.015625, %v3530_v29  ;;  %v3603_v22 = vmul.f32 %v3575_v48, %v6728_v54  ;;  %v3151_v21 = vpop.f32.mrb[84].mxu0  ;;  %v3559_v34 = vadd.f32 %v3558_v36, %v3557_v9 }
 0x396   :  { %v3727_v24 = vadd.f32 %v3726_v16, %v3700_v59  ;;  %v6737_v32 = vadd.f32 %v6578_v0, %v3402_v41  ;;  %v3189_v28 = vadd.f32 %v3151_v21, %v6558_v5  ;;  %v3365_v3 = vpop.f32.mrb[84].mxu1  ;;  %v4978_v4 = vpop.f32.mrb[85].mxu0  ;;  %v3579_v29 = vsel %vm3522_vm3, %v3576_v1, %v3578_v47 }
 0x397   :  { %v3563_v10 = vmul.f32 %v6733_v62, %v6733_v62  ;;  %v3750_v50 = vsub.f32 %v6582_v20, %v6733_v62  ;;  %v3751_v51 = vsub.f32 %v6587_v15, %v6733_v62  ;;  %v3752_v48 = vsub.f32 %v6600_v39, %v6733_v62  ;;  %v5024_v33 = vpop.f32.mrb[85].mxu1  ;;  %v3154_v13 = vpop.f32.mrb[86].mxu0 }
 0x398   :  { %v3562_v6 = vmul.f32 0.015625, %v3559_v34  ;;  %v3753_v5 = vsub.f32 %v6605_v7, %v6733_v62  ;;  %v3754_v40 = vsub.f32 %v6618_v44, %v6733_v62  ;;  %v3755_v37 = vsub.f32 %v6625_v46, %v6733_v62  ;;  %v3368_v60 = vpop.f32.mrb[86].mxu1  ;;  %v4979_v58 = vpop.f32.mrb[87].mxu0 }
 0x399   :  { %v3756_v12 = vsub.f32 %v6636_v14, %v6733_v62  ;;  %v3757_v17 = vsub.f32 %v6641_v42, %v6733_v62  ;;  %v3758_v9 = vsub.f32 %v6654_v35, %v6733_v62  ;;  %v3759_v31 = vsub.f32 %v6661_v27, %v6733_v62  ;;  %v5025_v53 = vpop.f32.mrb[87].mxu1 }
 0x39a   :  { %v3564_v57 = vsub.f32 %v3562_v6, %v3563_v10  ;;  %v3629_v41 = vrot.slane %v3603_v22, 1  ;;  %v3676_v36 = vmul.f32 %v3603_v22, %v6728_v54  ;;  %v3581_v16 = vsel %vm3522_vm3, %v3578_v47, %v3580_v26 }
 0x39b   :  { %v3604_v59 = vmul.f32 %v6707_v25, %v6737_v32  ;;  %v3403_v21 = vadd.f32 %v3365_v3, %v3189_v28  ;;  %v3190_v34 = vadd.f32 %v3154_v13, %v6561_v52  ;;  %v3582_v4 = vrot.slane %v6651_v30, 7 }
 0x39c   :  { %v3565_v33 = vadd.f32 1e-05, %v3564_v57  ;;  %v3630_v63 = vsel %vm3621_vm4, %v3627_v19, %v3629_v41  ;;  %v3701_v1 = vrot.slane %v3676_v36, 1 }
 0x39d   :  { %v3656_v10 = vadd.f32 %v3655_v43, %v3630_v63  ;;  %v3631_v6 = vrot.slane %v3604_v59, 1  ;;  %v3677_v22 = vmul.f32 %v3604_v59, %v6737_v32  ;;  %v6776_v58 = vadd.f32 %v6578_v0, %v3403_v21  ;;  %v3159_v47 = vpop.f32.mrb[88].mxu0 }
 0x39e   :  { %5040 = vrsqrt.f32 %v3565_v33  ;;  %v3702_v25 = vsel %vm3621_vm4, %v3699_v61, %v3701_v1  ;;  %v3404_v28 = vadd.f32 %v3368_v60, %v3190_v34  ;;  %v3191_v52 = vadd.f32 %v3159_v47, %v6564_v49  ;;  %v3373_v3 = vpop.f32.mrb[88].mxu1  ;;  %v4982_v30 = vpop.f32.mrb[89].mxu0 }
 0x39f   :  { %v3728_v13 = vadd.f32 %v3727_v24, %v3702_v25  ;;  %v3632_v19 = vsel %vm3621_vm4, %v3629_v41, %v3631_v6  ;;  %v3703_v53 = vrot.slane %v3677_v22, 1  ;;  %v3605_v43 = vmul.f32 %v3579_v29, %v6776_v58  ;;  %v5028_v57 = vpop.f32.mrb[89].mxu1  ;;  %v3162_v36 = vpop.f32.mrb[90].mxu0 }
 0x3a0   :  { %v3657_v59 = vadd.f32 %v3656_v10, %v3632_v19  ;;  %v6783_v21 = vadd.f32 %v6578_v0, %v3404_v28  ;;  %v3405_v33 = vadd.f32 %v3373_v3, %v3191_v52  ;;  %v3192_v61 = vadd.f32 %v3162_v36, %v6567_v8  ;;  %v3376_v60 = vpop.f32.mrb[90].mxu1  ;;  %v4983_v34 = vpop.f32.mrb[91].mxu0 }
 0x3a1   :  { %v3584_v49 = vrot.slane %v6658_v56, 7  ;;  %v3704_v24 = vsel %vm3621_vm4, %v3701_v1, %v3703_v53  ;;  %v3633_v63 = vrot.slane %v3605_v43, 1  ;;  %v3678_v41 = vmul.f32 %v3605_v43, %v6776_v58  ;;  %v5029_v22 = vpop.f32.mrb[91].mxu1 }
 0x3a2   :  { %v3729_v29 = vadd.f32 %v3728_v13, %v3704_v24  ;;  %v3606_v47 = vmul.f32 %v3581_v16, %v6783_v21  ;;  %v6791_v10 = vadd.f32 %v6578_v0, %v3405_v33  ;;  %v3406_v25 = vadd.f32 %v3376_v60, %v3192_v61 }
 0x3a3   :  { %v3583_v8 = vsel %vm3522_vm3, %v3580_v26, %v3582_v4  ;;  %v3634_v28 = vsel %vm3621_vm4, %v3631_v6, %v3633_v63  ;;  %v3705_v52 = vrot.slane %v3678_v41, 1  ;;  %v3585_v16 = vsel %vm3522_vm3, %v3582_v4, %v3584_v49 }
 0x3a4   :  { %v3658_v3 = vadd.f32 %v3657_v59, %v3634_v28  ;;  %v3635_v1 = vrot.slane %v3606_v47, 1  ;;  %v6798_v30 = vmul.f32 %v3606_v47, %v6783_v21  ;;  %v6801_v13 = vmul.f32 %v3583_v8, %v6791_v10 }
 0x3a5   :  { %v3706_v19 = vsel %vm3621_vm4, %v3703_v53, %v3705_v52  ;;  %v6808_v11 = vadd.f32 %v6578_v0, %v3406_v25  ;;  %v3167_v26 = vpop.f32.mrb[92].mxu0  ;;  %v3586_v61 = vrot.slane %v6671_v18, 7  ;;  %v3760_v4 = vsub.f32 %v6674_v23, %v6733_v62 }
 0x3a6   :  { %v3730_v6 = vadd.f32 %v3729_v29, %v3706_v19  ;;  %v3636_v43 = vsel %vm3621_vm4, %v3633_v63, %v3635_v1  ;;  %v3707_v57 = vrot.slane %v6798_v30, 1  ;;  %v3637_v36 = vrot.slane %v6801_v13, 1  ;;  %v6813_v59 = vpop.f32.mrb[92].mxu1  ;;  %v4986_v33 = vpop.f32.mrb[93].mxu0 }
 0x3a7   :  { %v3659_v53 = vadd.f32 %v3658_v3, %v3636_v43  ;;  %v6819_v60 = vadd.f32 %v3167_v26, %v6570_v45  ;;  %v5032_v34 = vpop.f32.mrb[93].mxu1  ;;  %v3170_v24 = vpop.f32.mrb[94].mxu0  ;;  %v6829_v29 = vmul.f32 %v6801_v13, %v6791_v10  ;;  %v6832_v47 = vmul.f32 %v3585_v16, %v6808_v11 }
 0x3a8   :  { %v5041_v41 = vpop.eup %5040  ;;  %v3708_v63 = vsel %vm3621_vm4, %v3705_v52, %v3707_v57  ;;  %v3638_v22 = vsel %vm3621_vm4, %v3635_v1, %v3637_v36  ;;  %v3384_v45 = vpop.f32.mrb[94].mxu1 }
 0x3a9   :  { %v4987_v25 = vpop.f32.mrb[95].mxu0  ;;  %v3761_v8 = vmul.f32 %v5041_v41, %v3750_v50  ;;  %v3762_v28 = vmul.f32 %v5041_v41, %v3751_v51  ;;  %v3763_v52 = vmul.f32 %v5041_v41, %v3752_v48  ;;  %v3764_v3 = vmul.f32 %v5041_v41, %v3753_v5  ;;  %v5033_v1 = vpop.f32.mrb[95].mxu1 }
 0x3aa   :  { %v3765_v16 = vmul.f32 %v5041_v41, %v3754_v40  ;;  %v3766_v20 = vmul.f32 %v5041_v41, %v3755_v37  ;;  %v3767_v15 = vmul.f32 %v5041_v41, %v3756_v12  ;;  %v3768_v39 = vmul.f32 %v5041_v41, %v3757_v17 }
 0x3ab   :  { %v3769_v7 = vmul.f32 %v5041_v41, %v3758_v9  ;;  %v3770_v44 = vmul.f32 %v5041_v41, %v3759_v31  ;;  %v6864_v50 = vmul.f32 %v5041_v41, %v3760_v4  ;;  %vm3795_vm5 = vcmp.ge.f32.partialorder %v3761_v8, 0.0 }
 0x3ac   :  { %vm3796_vm6 = vcmp.ge.f32.partialorder %v3762_v28, 0.0  ;;  %vm3797_vm7 = vcmp.ge.f32.partialorder %v3763_v52, 0.0  ;;  %vm3798_vm8 = vcmp.ge.f32.partialorder %v3764_v3, 0.0  ;;  %vm3799_vm9 = vcmp.ge.f32.partialorder %v3765_v16, 0.0 }
 0x3ad   :  { %vm3800_vm10 = vcmp.ge.f32.partialorder %v3766_v20, 0.0  ;;  %vm3801_vm11 = vcmp.ge.f32.partialorder %v3767_v15, 0.0  ;;  %vm3802_vm12 = vcmp.ge.f32.partialorder %v3768_v39, 0.0  ;;  %vm3803_vm13 = vcmp.ge.f32.partialorder %v3769_v7, 0.0 }
 0x3ae   :  { %vm3804_vm14 = vcmp.ge.f32.partialorder %v3770_v44, 0.0  ;;  %v3816_v46 = vmul.f32 0.2, %v3761_v8  ;;  %v3817_v14 = vmul.f32 0.2, %v3762_v28  ;;  %v3731_v42 = vadd.f32 %v3730_v6, %v3708_v63 }
 0x3af   :  { %v3818_v35 = vmul.f32 0.2, %v3763_v52  ;;  %v3819_v51 = vmul.f32 0.2, %v3764_v3  ;;  %v3820_v48 = vmul.f32 0.2, %v3765_v16  ;;  %v3660_v27 = vadd.f32 %v3659_v53, %v3638_v22 }
 0x3b0   :  { %v3821_v62 = vmul.f32 0.2, %v3766_v20  ;;  %v3822_v5 = vmul.f32 0.2, %v3767_v15  ;;  %v3823_v40 = vmul.f32 0.2, %v3768_v39  ;;  %v3837_v37 = vsel %vm3795_vm5, %v3761_v8, %v3816_v46 }
 0x3b1   :  { %v3824_v12 = vmul.f32 0.2, %v3769_v7  ;;  %v3825_v17 = vmul.f32 0.2, %v3770_v44  ;;  %v3838_v9 = vsel %vm3796_vm6, %v3762_v28, %v3817_v14  ;;  %v3839_v31 = vsel %vm3797_vm7, %v3763_v52, %v3818_v35  ;;  %3858 = vst [vmem:[%s6990_s5] sm:$0xff] %v3837_v37 }
 0x3b2   :  { %v3840_v19 = vsel %vm3798_vm8, %v3764_v3, %v3819_v51  ;;  %v3841_v26 = vsel %vm3799_vm9, %v3765_v16, %v3820_v48  ;;  %v3842_v6 = vsel %vm3800_vm10, %v3766_v20, %v3821_v62  ;;  %v3843_v43 = vsel %vm3801_vm11, %v3767_v15, %v3822_v5  ;;  %3859 = vst [vmem:[%s6990_s5 + $0x8] sm:$0xff] %v3838_v9 }
 0x3b3   :  { %3860 = vst [vmem:[%s6990_s5 + $0x10] sm:$0xff] %v3839_v31  ;;  %v3844_v33 = vsel %vm3802_vm12, %v3768_v39, %v3823_v40  ;;  %v3845_v4 = vsel %vm3803_vm13, %v3769_v7, %v3824_v12  ;;  %v3846_v53 = vsel %vm3804_vm14, %v3770_v44, %v3825_v17  ;;  %3861 = vst [vmem:[%s6990_s5 + $0x18] sm:$0xff] %v3840_v19  ;;  %v3709_v34 = vrot.slane %v6829_v29, 1 }
 0x3b4   :  { %3862 = vst [vmem:[%s6990_s5 + $0x20] sm:$0xff] %v3841_v26  ;;  %3863 = vst [vmem:[%s6990_s5 + $0x28] sm:$0xff] %v3842_v6  ;;  %v3639_v24 = vrot.slane %v6832_v47, 1  ;;  %v3681_v41 = vmul.f32 %v6832_v47, %v6808_v11  ;;  %v3407_v63 = vadd.f32 %v6813_v59, %v6819_v60  ;;  %v3587_v47 = vsel %vm3522_vm3, %v3584_v49, %v3586_v61 }
 0x3b5   :  { %3864 = vst [vmem:[%s6990_s5 + $0x30] sm:$0xff] %v3843_v43  ;;  %3865 = vst [vmem:[%s6990_s5 + $0x38] sm:$0xff] %v3844_v33  ;;  %v3710_v22 = vsel %vm3621_vm4, %v3707_v57, %v3709_v34 }
 0x3b6   :  { %3866 = vst [vmem:[%s6990_s5 + $0x40] sm:$0xff] %v3845_v4  ;;  %3867 = vst [vmem:[%s6990_s5 + $0x48] sm:$0xff] %v3846_v53  ;;  %v3732_v29 = vadd.f32 %v3731_v42, %v3710_v22  ;;  %v3640_v45 = vsel %vm3621_vm4, %v3637_v36, %v3639_v24  ;;  %v3711_v25 = vrot.slane %v3681_v41, 1  ;;  %v3435_v8 = vadd.f32 %v6578_v0, %v3407_v63 }
 0x3b7   :  { %v3661_v28 = vadd.f32 %v3660_v27, %v3640_v45 }
 0x3b8   :  { %v3712_v59 = vsel %vm3621_vm4, %v3709_v34, %v3711_v25  ;;  %v3609_v30 = vmul.f32 %v3587_v47, %v3435_v8 }
 0x3b9   :  { %v3733_v60 = vadd.f32 %v3732_v29, %v3712_v59 }
 0x3ba   :  { %v3641_v57 = vrot.slane %v3609_v30, 1  ;;  %v3682_v52 = vmul.f32 %v3609_v30, %v3435_v8 }
 0x3bc   :  { %v3642_v13 = vsel %vm3621_vm4, %v3639_v24, %v3641_v57  ;;  %v3713_v3 = vrot.slane %v3682_v52, 1  ;;  %v3663_v1 = vsel %vm3522_vm3, %v3641_v57, 0.0 }
 0x3bd   :  { %v3662_v36 = vadd.f32 %v3661_v28, %v3642_v13 }
 0x3be   :  { %v3714_v0 = vsel %vm3621_vm4, %v3711_v25, %v3713_v3  ;;  %v3735_v56 = vsel %vm3522_vm3, %v3713_v3, 0.0 }
 0x3bf   :  { %v3664_v18 = vadd.f32 %v3663_v1, %v3662_v36  ;;  %v3734_v16 = vadd.f32 %v3733_v60, %v3714_v0 }
 0x3c1   :  { %v3665_v49 = vrot.slane %v3664_v18, 4  ;;  %v3736_v61 = vadd.f32 %v3735_v56, %v3734_v16 }
 0x3c3   :  { %v3666_v20 = vadd.f32 %v3665_v49, %v3664_v18  ;;  %v3737_v15 = vrot.slane %v3736_v61, 4 }
 0x3c5   :  { %v3667_v39 = vrot.slane %v3666_v20, 2  ;;  %v3738_v7 = vadd.f32 %v3737_v15, %v3736_v61 }
 0x3c7   :  { %v3668_v44 = vadd.f32 %v3667_v39, %v3666_v20  ;;  %v3739_v46 = vrot.slane %v3738_v7, 2 }
 0x3c9   :  { %v3669_v14 = vrot.slane %v3668_v44, 1  ;;  %v3740_v42 = vadd.f32 %v3739_v46, %v3738_v7 }
 0x3cb   :  { %v3670_v35 = vadd.f32 %v3669_v14, %v3668_v44  ;;  %v3741_v51 = vrot.slane %v3740_v42, 1 }
 0x3cd   :  { %v3742_v48 = vadd.f32 %v3741_v51, %v3740_v42  ;;  %v3744_v27 = vmul.f32 0.015625, %v3670_v35 }
 0x3cf   :  { %v3745_v62 = vmul.f32 0.015625, %v3742_v48  ;;  %v3746_v5 = vmul.f32 %v3744_v27, %v3744_v27  ;;  %v3773_v40 = vsub.f32 %v6679_v55, %v3744_v27  ;;  %v3774_v37 = vsub.f32 %v6698_v38, %v3744_v27 }
 0x3d0   :  { %v3775_v12 = vsub.f32 %v6702_v2, %v3744_v27  ;;  %v3776_v17 = vsub.f32 %v6728_v54, %v3744_v27  ;;  %v3777_v9 = vsub.f32 %v6737_v32, %v3744_v27  ;;  %v3778_v19 = vsub.f32 %v6776_v58, %v3744_v27 }
 0x3d1   :  { %v3747_v31 = vsub.f32 %v3745_v62, %v3746_v5  ;;  %v3779_v26 = vsub.f32 %v6783_v21, %v3744_v27  ;;  %v3780_v6 = vsub.f32 %v6791_v10, %v3744_v27  ;;  %v3781_v43 = vsub.f32 %v6808_v11, %v3744_v27 }
 0x3d2   :  { %v3782_v33 = vsub.f32 %v3435_v8, %v3744_v27  ;;  %v3772_v55 = vsub.f32 %v6674_v23, %v3744_v27 }
 0x3d3   :  { %v3748_v4 = vadd.f32 1e-05, %v3747_v31 }
 0x3d5   :  { %5042 = vrsqrt.f32 %v3748_v4 }
 0x3df   :  { %v5043_v38 = vpop.eup %5042 }
 0x3e0   :  { %v3783_v2 = vmul.f32 %v5043_v38, %v3772_v55  ;;  %v3784_v53 = vmul.f32 %v5043_v38, %v3773_v40  ;;  %v3785_v54 = vmul.f32 %v5043_v38, %v3774_v37  ;;  %v3786_v34 = vmul.f32 %v5043_v38, %v3775_v12 }
 0x3e1   :  { %v3787_v32 = vmul.f32 %v5043_v38, %v3776_v17  ;;  %v3788_v24 = vmul.f32 %v5043_v38, %v3777_v9  ;;  %v3789_v41 = vmul.f32 %v5043_v38, %v3778_v19  ;;  %v3790_v58 = vmul.f32 %v5043_v38, %v3779_v26 }
 0x3e2   :  { %v3791_v63 = vmul.f32 %v5043_v38, %v3780_v6  ;;  %v3792_v21 = vmul.f32 %v5043_v38, %v3781_v43  ;;  %v3793_v22 = vmul.f32 %v5043_v38, %v3782_v33  ;;  %v3794_v10 = vsel %vm3522_vm3, %v6864_v50, %v3783_v2 }
 0x3e3   :  { %vm3805_vm15 = vcmp.ge.f32.partialorder %v3794_v10, 0.0  ;;  %vm3806_vm0 = vcmp.ge.f32.partialorder %v3784_v53, 0.0  ;;  %vm3807_vm1 = vcmp.ge.f32.partialorder %v3785_v54, 0.0  ;;  %vm3808_vm2 = vcmp.ge.f32.partialorder %v3786_v34, 0.0 }
 0x3e4   :  { %vm3809_vm4 = vcmp.ge.f32.partialorder %v3787_v32, 0.0  ;;  %vm3810_vm5 = vcmp.ge.f32.partialorder %v3788_v24, 0.0  ;;  %vm3811_vm6 = vcmp.ge.f32.partialorder %v3789_v41, 0.0  ;;  %vm3812_vm7 = vcmp.ge.f32.partialorder %v3790_v58, 0.0 }
 0x3e5   :  { %vm3813_vm8 = vcmp.ge.f32.partialorder %v3791_v63, 0.0  ;;  %vm3814_vm9 = vcmp.ge.f32.partialorder %v3792_v21, 0.0  ;;  %vm3815_vm10 = vcmp.ge.f32.partialorder %v3793_v22, 0.0  ;;  %v3826_v23 = vmul.f32 0.2, %v3794_v10 }
 0x3e6   :  { %v3827_v11 = vmul.f32 0.2, %v3784_v53  ;;  %v3828_v29 = vmul.f32 0.2, %v3785_v54  ;;  %v3829_v45 = vmul.f32 0.2, %v3786_v34 }
 0x3e7   :  { %v3830_v25 = vmul.f32 0.2, %v3787_v32  ;;  %v3831_v8 = vmul.f32 0.2, %v3788_v24  ;;  %v3832_v47 = vmul.f32 0.2, %v3789_v41  ;;  %v3847_v50 = vsel %vm3805_vm15, %v3794_v10, %v3826_v23 }
 0x3e8   :  { %v3833_v28 = vmul.f32 0.2, %v3790_v58  ;;  %v3834_v59 = vmul.f32 0.2, %v3791_v63  ;;  %v3835_v30 = vmul.f32 0.2, %v3792_v21  ;;  %v3848_v60 = vsel %vm3806_vm0, %v3784_v53, %v3827_v11 }
 0x3e9   :  { %3868 = vst [vmem:[%s6990_s5 + $0x50] sm:$0xff] %v3847_v50  ;;  %v3836_v57 = vmul.f32 0.2, %v3793_v22  ;;  %v3849_v52 = vsel %vm3807_vm1, %v3785_v54, %v3828_v29  ;;  %v3850_v13 = vsel %vm3808_vm2, %v3786_v34, %v3829_v45  ;;  %v3851_v3 = vsel %vm3809_vm4, %v3787_v32, %v3830_v25  ;;  %3869 = vst [vmem:[%s6990_s5 + $0x58] sm:$0xff] %v3848_v60 }
 0x3ea   :  { %v3852_v36 = vsel %vm3810_vm5, %v3788_v24, %v3831_v8  ;;  %v3853_v1 = vsel %vm3811_vm6, %v3789_v41, %v3832_v47  ;;  %v3854_v0 = vsel %vm3812_vm7, %v3790_v58, %v3833_v28  ;;  %v3855_v18 = vsel %vm3813_vm8, %v3791_v63, %v3834_v59  ;;  %3870 = vst [vmem:[%s6990_s5 + $0x60] sm:$0xff] %v3849_v52 }
 0x3eb   :  { %3871 = vst [vmem:[%s6990_s5 + $0x68] sm:$0xff] %v3850_v13  ;;  %3872 = vst [vmem:[%s6990_s5 + $0x70] sm:$0xff] %v3851_v3  ;;  %v3856_v16 = vsel %vm3814_vm9, %v3792_v21, %v3835_v30  ;;  %v3857_v56 = vsel %vm3815_vm10, %v3793_v22, %v3836_v57 }
 0x3ec   :  { %3873 = vst [vmem:[%s6990_s5 + $0x78] sm:$0xff] %v3852_v36  ;;  %3874 = vst [vmem:[%s6990_s5 + $0x80] sm:$0xff] %v3853_v1 }
 0x3ed   :  { %3875 = vst [vmem:[%s6990_s5 + $0x88] sm:$0xff] %v3854_v0  ;;  %3876 = vst [vmem:[%s6990_s5 + $0x90] sm:$0xff] %v3855_v18 }
 0x3ee   :  { %3877 = vst [vmem:[%s6990_s5 + $0x98] sm:$0xff] %v3856_v16  ;;  %3878 = vst [vmem:[%s6990_s5 + $0xa0] sm:$0x3] %v3857_v56 }

// kernel: good_network_forward.6
= control target key start
LH: loop header
LB: loop body
LE: loop exit
PB: predicated region body
PF: predicated region fallthrough
CT: control target
= control target key end

     0   :  { %s4497_s0 = inlined_call_operand.vmem [shape: s32[4,4], index: 0, kind: input, shape index: {}]   ;;  %s4498_s1 = inlined_call_operand.vmem [shape: f32[88,16], index: 1, kind: input, shape index: {}]   ;;  %s4499_s2 = inlined_call_operand.vmem [shape: bf16[4,4,16,128], index: 2, kind: input, shape index: {}]   ;;  %s4500_s3 = inlined_call_operand.vmem [shape: f32[1,128], index: 3, kind: input, shape index: {}]   ;;  %s4501_s4 = inlined_call_operand.vmem [shape: f32[36,1], index: 4, kind: input, shape index: {}]   ;;  %s4502_s5 = inlined_call_operand.vmem [shape: f32[4,72,128], index: 5, kind: output, shape index: {}]  }
   0x1   :  { %s10_s20 = sshll.u32 %s4497_s0, 4  ;;  %s11_s20 = int_to_ptr.vmem [resolvable:$true] %s10_s20 }
   0x2   :  { %s3256_s21 = scalar_lea.vmem %s11_s20, 64  ;;  %p3261_p1 = scmp.lt.s32.totalorder %s11_s20, %s11_s20 }
   0x3   :  { %p3257_p0 = scmp.ne.s32.totalorder %s11_s20, %s3256_s21  ;;  %p3262_p2 = scmp.lt.s32.totalorder %s3256_s21, %s3256_s21 }
   0x5   :  { %p3263_p3 = por %p3262_p2, %p3261_p1 }
   0x7   :  { %p3264_p4 = pnand %p3263_p3, %p3257_p0 }
   0x9   :  { %3267 = shalt.err (!%p3264_p4)  }
   0xa   :  { %s3270_s22 = smov [#allocation3]  }
   0xb   :  { %13 = dma.vmem_to_smem %s11_s20, 64, %s3270_s22, [#allocation2] }
   0xc   :  { %3268 = dma.done.wait [#allocation2], 64 }
   0xd   :  { %3269 = vsyncadd [#allocation2], 4294967232 }
   0xe   :  { %15 = sfence }
   0xf   :  { %v3235_v0 = vld [vmem:[%s4499_s2 + $0x8] sm:$0xff]   ;;  %v3271_v1 = vmov 0.0   ;;  %v3236_v2 = vld [vmem:[%s4499_s2] sm:$0xff]   ;;  %vm3272_vm0 = vmmov 0   ;;  %s2612_s26 = sld [smem:[#allocation3 + $0x1]]  ;;  %s27_s27 = sld [smem:[#allocation3]] }
  0x10   :  { %2877 = vmatprep.subr.bf16.mxu0 %v3271_v1  ;;  %2899 = vmatprep.subr.bf16.mxu1 %v3271_v1  ;;  %v3273_v3 = vmov 0   ;;  %v3237_v4 = vld [vmem:[%s4499_s2 + $0x10] sm:$0xff]   ;;  %vm71_vm1 = vcmask 130048   ;;  %v3238_v10 = vld [vmem:[%s4499_s2 + $0x18] sm:$0xff]   ;;  %v1952_v28 = vld [vmem:[%s4501_s4] sm:$0xff]  ;;  %s2627_s19 = sld [smem:[#allocation3 + $0x2]] }
  0x11   :  { %2878 = vmatpush3.bf16.msra.mxu0 %v3235_v0  ;;  %2879 = vmatprep.mubr.msk.bf16.mxu0 %vm3272_vm0, %v3271_v1  ;;  %v1953_v31 = vld [vmem:[%s4501_s4 + $0x8] sm:$0xff]  ;;  %v1954_v32 = vld [vmem:[%s4501_s4 + $0x10] sm:$0xff]  ;;  %s2636_s20 = sld [smem:[#allocation3 + $0x3]]  ;;  %v1955_v33 = vld [vmem:[%s4501_s4 + $0x18] sm:$0xff]  ;;  %s2646_s9 = sld [smem:[#allocation3 + $0x80]]  ;;  %vm1990_vm2 = vcmask 1043456  }
  0x12   :  { %2900 = vmatpush3.bf16.msra.mxu1 %v3236_v2  ;;  %2901 = vmatprep.mubr.msk.bf16.mxu1 %vm3272_vm0, %v3271_v1  ;;  %v1956_v36 = vld [vmem:[%s4501_s4 + $0x20] sm:$0xf]  ;;  %v3239_v45 = vld [vmem:[%s4499_s2 + $0x28] sm:$0xff]   ;;  %s2673_s21 = sld [smem:[#allocation3 + $0x83]]  ;;  %s2682_s6 = sld [smem:[#allocation3 + $0x100]] }
  0x13   :  { %2921 = vmatprep.subr.bf16.mxu0 %v3271_v1  ;;  %2943 = vmatprep.subr.bf16.mxu1 %v3271_v1  ;;  %v3240_v46 = vld [vmem:[%s4499_s2 + $0x20] sm:$0xff]   ;;  %s2700_s17 = sld [smem:[#allocation3 + $0x102]]  ;;  %s2709_s18 = sld [smem:[#allocation3 + $0x103]] }
  0x14   :  { %3233 = vset.pattern.permute.xlu0 %v3273_v3  ;;  %3234 = vset.pattern.permute.xlu1 %v3273_v3  ;;  %s2721_s28 = sld [smem:[#allocation3 + $0x181]]  ;;  %s3829_s16 = sld [smem:[#allocation3 + $0x183]] }
  0x15   :  { %s3324_s30 = scalar_lea.vmem %s4498_s1, %s2612_s26  ;;  %s3329_s8 = scalar_lea.vmem %s4498_s1, %s27_s27  ;;  %1959 = vperm.xlu0 %3233, %v1952_v28   ;;  %1969 = vperm.xlu1 %3234, %v1954_v32  }
  0x16   :  { %v48_v5 = vld [vmem:[%s3324_s30] sm:$0xff]  ;;  %v49_v6 = vld [vmem:[%s3324_s30 + $0x8] sm:$0xff]  ;;  %v50_v12 = vld [vmem:[%s3324_s30 + $0x10] sm:$0xff]  ;;  %s3399_s26 = scalar_lea.vmem %s4498_s1, %s2627_s19 }
  0x17   :  { %v29_v7 = vld [vmem:[%s3329_s8] sm:$0xff]  ;;  %v57_v8 = vpack.c.bf16 %v49_v6, %v48_v5  ;;  %v30_v9 = vld [vmem:[%s3329_s8 + $0x8] sm:$0xff]  ;;  %v51_v13 = vld [vmem:[%s3324_s30 + $0x18] sm:$0xff]  ;;  %s3404_s29 = scalar_lea.vmem %s4498_s1, %s2636_s20  ;;  %s3470_s15 = scalar_lea.vmem %s4498_s1, %s2646_s9 }
  0x18   :  { %v38_v11 = vpack.c.bf16 %v30_v9, %v29_v7  ;;  %v31_v14 = vld [vmem:[%s3329_s8 + $0x10] sm:$0xff]  ;;  %v32_v15 = vld [vmem:[%s3329_s8 + $0x18] sm:$0xff]  ;;  %v58_v16 = vpack.c.bf16 %v51_v13, %v50_v12  ;;  %v52_v18 = vld [vmem:[%s3324_s30 + $0x20] sm:$0xff]  ;;  %s2664_s20 = sld [smem:[#allocation3 + $0x82]] }
  0x19   :  { %2880 = vmatmul.mubr.msk.bf16.vlgmr.msra.gmra.mrb[0].mxu0 %vm71_vm1, %v57_v8  ;;  %v39_v17 = vpack.c.bf16 %v32_v15, %v31_v14  ;;  %v53_v19 = vld [vmem:[%s3324_s30 + $0x28] sm:$0xff]  ;;  %v33_v20 = vld [vmem:[%s3329_s8 + $0x20] sm:$0xff]  ;;  %v54_v24 = vld [vmem:[%s3324_s30 + $0x30] sm:$0xff]  ;;  %1964 = vperm.xlu0 %3233, %v1953_v31  }
  0x1a   :  { %2902 = vmatmul.mubr.msk.bf16.vlgmr.msra.gmra.mrb[0].mxu1 %vm71_vm1, %v38_v11  ;;  %2922 = vmatpush3.bf16.msra.mxu0 %v3237_v4  ;;  %v34_v21 = vld [vmem:[%s3329_s8 + $0x28] sm:$0xff]  ;;  %v59_v22 = vpack.c.bf16 %v53_v19, %v52_v18  ;;  %v55_v25 = vld [vmem:[%s3324_s30 + $0x38] sm:$0xff]  ;;  %v35_v26 = vld [vmem:[%s3329_s8 + $0x30] sm:$0xff]  ;;  %s3871_s22 = scalar_lea.vmem %s4498_s1, %s3829_s16 }
  0x1b   :  { %2944 = vmatpush3.bf16.msra.mxu1 %v3238_v10  ;;  %2883 = vmatprep.mubr.msk.bf16.mxu0 %vm3272_vm0, %v3271_v1  ;;  %v40_v23 = vpack.c.bf16 %v34_v21, %v33_v20  ;;  %v36_v27 = vld [vmem:[%s3329_s8 + $0x38] sm:$0xff]  ;;  %v60_v29 = vpack.c.bf16 %v55_v25, %v54_v24  ;;  %v56_v34 = vld [vmem:[%s3324_s30 + $0x40] sm:$0xff]  ;;  %v256_v40 = vld [vmem:[%s3399_s26 + $0x8] sm:$0xff]  ;;  %s2685_s30 = sld [smem:[#allocation3 + $0x101]] }
  0x1c   :  { %2905 = vmatprep.mubr.msk.bf16.mxu1 %vm3272_vm0, %v3271_v1  ;;  %2965 = vmatprep.subr.bf16.mxu0 %v3271_v1  ;;  %v41_v30 = vpack.c.bf16 %v36_v27, %v35_v26  ;;  %v37_v35 = vld [vmem:[%s3329_s8 + $0x40] sm:$0xff]  ;;  %v61_v37 = vpack.c.bf16 %v56_v34, %v56_v34  ;;  %v378_v42 = vld [vmem:[%s3404_s29 + $0x8] sm:$0xff]  ;;  %v257_v47 = vld [vmem:[%s3399_s26 + $0x10] sm:$0xff]  ;;  %s2649_s8 = sld [smem:[#allocation3 + $0x81]] }
  0x1d   :  { %2987 = vmatprep.subr.bf16.mxu1 %v3271_v1  ;;  %1974 = vperm.xlu1 %3234, %v1955_v33   ;;  %v42_v38 = vpack.c.bf16 %v37_v35, %v37_v35  ;;  %v255_v39 = vld [vmem:[%s3399_s26] sm:$0xff]  ;;  %v258_v48 = vld [vmem:[%s3399_s26 + $0x18] sm:$0xff]  ;;  %v379_v49 = vld [vmem:[%s3404_s29 + $0x10] sm:$0xff] }
  0x1e   :  { %1979 = vperm.xlu0 %3233, %v1956_v36   ;;  %v377_v41 = vld [vmem:[%s3404_s29] sm:$0xff]  ;;  %v264_v43 = vpack.c.bf16 %v256_v40, %v255_v39  ;;  %v380_v50 = vld [vmem:[%s3404_s29 + $0x18] sm:$0xff]  ;;  %v265_v51 = vpack.c.bf16 %v258_v48, %v257_v47  ;;  %v260_v54 = vld [vmem:[%s3399_s26 + $0x28] sm:$0xff]  ;;  %s3531_s24 = scalar_lea.vmem %s4498_s1, %s2664_s20 }
  0x1f   :  { %v386_v44 = vpack.c.bf16 %v378_v42, %v377_v41  ;;  %v387_v52 = vpack.c.bf16 %v380_v50, %v379_v49  ;;  %v259_v53 = vld [vmem:[%s3399_s26 + $0x20] sm:$0xff]  ;;  %v382_v56 = vld [vmem:[%s3404_s29 + $0x28] sm:$0xff]  ;;  %v261_v59 = vld [vmem:[%s3399_s26 + $0x30] sm:$0xff] }
  0x20   :  { %v381_v55 = vld [vmem:[%s3404_s29 + $0x20] sm:$0xff]  ;;  %v266_v57 = vpack.c.bf16 %v260_v54, %v259_v53  ;;  %v262_v60 = vld [vmem:[%s3399_s26 + $0x38] sm:$0xff]  ;;  %v383_v61 = vld [vmem:[%s3404_s29 + $0x30] sm:$0xff] }
  0x21   :  { %2884 = vmatmul.mubr.msk.bf16.gmra.mrb[4].mxu0 %vm71_vm1, %v58_v16  ;;  %v388_v58 = vpack.c.bf16 %v382_v56, %v381_v55  ;;  %v384_v62 = vld [vmem:[%s3404_s29 + $0x38] sm:$0xff]  ;;  %v267_v63 = vpack.c.bf16 %v262_v60, %v261_v59  ;;  %v263_v2 = vld [vmem:[%s3399_s26 + $0x40] sm:$0xff]  ;;  %v517_v9 = vld [vmem:[%s3470_s15 + $0x8] sm:$0xff]  ;;  %s3536_s26 = scalar_lea.vmem %s4498_s1, %s2673_s21  ;;  %s3597_s9 = scalar_lea.vmem %s4498_s1, %s2685_s30 }
  0x22   :  { %2906 = vmatmul.mubr.msk.bf16.gmra.mrb[4].mxu1 %vm71_vm1, %v39_v17  ;;  %2887 = vmatprep.mubr.msk.bf16.mxu0 %vm3272_vm0, %v3271_v1  ;;  %v389_v0 = vpack.c.bf16 %v384_v62, %v383_v61  ;;  %v385_v3 = vld [vmem:[%s3404_s29 + $0x40] sm:$0xff]  ;;  %v268_v4 = vpack.c.bf16 %v263_v2, %v263_v2  ;;  %s3465_s12 = scalar_lea.vmem %s4498_s1, %s2649_s8  ;;  %v3241_v12 = vld [vmem:[%s4499_s2 + $0x30] sm:$0xff]   ;;  %v3242_v13 = vld [vmem:[%s4499_s2 + $0x38] sm:$0xff]   ;;  %s3663_s21 = scalar_lea.vmem %s4498_s1, %s2700_s17 }
  0x23   :  { %2909 = vmatprep.mubr.msk.bf16.mxu1 %vm3272_vm0, %v3271_v1  ;;  %v390_v5 = vpack.c.bf16 %v385_v3, %v385_v3  ;;  %v536_v6 = vld [vmem:[%s3465_s12] sm:$0xff]  ;;  %v537_v7 = vld [vmem:[%s3465_s12 + $0x8] sm:$0xff]  ;;  %v538_v14 = vld [vmem:[%s3465_s12 + $0x10] sm:$0xff]  ;;  %s2718_s29 = sld [smem:[#allocation3 + $0x180]] }
  0x24   :  { %v516_v8 = vld [vmem:[%s3470_s15] sm:$0xff]  ;;  %v545_v10 = vpack.c.bf16 %v537_v7, %v536_v6  ;;  %v539_v15 = vld [vmem:[%s3465_s12 + $0x18] sm:$0xff]  ;;  %v518_v16 = vld [vmem:[%s3470_s15 + $0x10] sm:$0xff] }
  0x25   :  { %v525_v11 = vpack.c.bf16 %v517_v9, %v516_v8  ;;  %v519_v17 = vld [vmem:[%s3470_s15 + $0x18] sm:$0xff]  ;;  %v546_v18 = vpack.c.bf16 %v539_v15, %v538_v14  ;;  %v540_v20 = vld [vmem:[%s3465_s12 + $0x20] sm:$0xff]  ;;  %v541_v21 = vld [vmem:[%s3465_s12 + $0x28] sm:$0xff] }
  0x26   :  { %v526_v19 = vpack.c.bf16 %v519_v17, %v518_v16  ;;  %v547_v24 = vpack.c.bf16 %v541_v21, %v540_v20  ;;  %v542_v26 = vld [vmem:[%s3465_s12 + $0x30] sm:$0xff]  ;;  %v543_v27 = vld [vmem:[%s3465_s12 + $0x38] sm:$0xff]  ;;  %v544_v32 = vld [vmem:[%s3465_s12 + $0x40] sm:$0xff]  ;;  %s3602_s12 = scalar_lea.vmem %s4498_s1, %s2682_s6  ;;  %s3739_s6 = scalar_lea.vmem %s4498_s1, %s2721_s28 }
  0x27   :  { %v522_v28 = vld [vmem:[%s3470_s15 + $0x30] sm:$0xff]  ;;  %v524_v33 = vld [vmem:[%s3470_s15 + $0x40] sm:$0xff]  ;;  %v549_v34 = vpack.c.bf16 %v544_v32, %v544_v32  ;;  %v865_v39 = vld [vmem:[%s3536_s26 + $0x8] sm:$0xff] }
  0x28   :  { %v529_v35 = vpack.c.bf16 %v524_v33, %v524_v33  ;;  %v742_v36 = vld [vmem:[%s3531_s24] sm:$0xff]  ;;  %v3243_v42 = vld [vmem:[%s4499_s2 + $0x48] sm:$0xff]   ;;  %v867_v47 = vld [vmem:[%s3536_s26 + $0x18] sm:$0xff] }
  0x29   :  { %2888 = vmatmul.mubr.msk.bf16.gmra.mrb[8].mxu0 %vm71_vm1, %v59_v22  ;;  %v520_v22 = vld [vmem:[%s3470_s15 + $0x20] sm:$0xff]  ;;  %v869_v53 = vld [vmem:[%s3536_s26 + $0x28] sm:$0xff]  ;;  %v748_v56 = vld [vmem:[%s3531_s24 + $0x30] sm:$0xff] }
  0x2a   :  { %2910 = vmatmul.mubr.msk.bf16.gmra.mrb[8].mxu1 %vm71_vm1, %v40_v23  ;;  %2891 = vmatprep.mubr.msk.bf16.mxu0 %vm3272_vm0, %v3271_v1  ;;  %v521_v23 = vld [vmem:[%s3470_s15 + $0x28] sm:$0xff]  ;;  %v746_v50 = vld [vmem:[%s3531_s24 + $0x20] sm:$0xff]  ;;  %v871_v59 = vld [vmem:[%s3536_s26 + $0x38] sm:$0xff] }
  0x2b   :  { %2913 = vmatprep.mubr.msk.bf16.mxu1 %vm3272_vm0, %v3271_v1  ;;  %v527_v25 = vpack.c.bf16 %v521_v23, %v520_v22  ;;  %v750_v62 = vld [vmem:[%s3531_s24 + $0x40] sm:$0xff]  ;;  %v997_v6 = vld [vmem:[%s3602_s12 + $0x8] sm:$0xff]  ;;  %v3245_v9 = vld [vmem:[%s4499_s2 + $0x50] sm:$0xff]  }
  0x2c   :  { %v1016_v3 = vld [vmem:[%s3597_s9] sm:$0xff]  ;;  %v999_v14 = vld [vmem:[%s3602_s12 + $0x18] sm:$0xff]  ;;  %v1001_v20 = vld [vmem:[%s3602_s12 + $0x28] sm:$0xff] }
  0x2d   :  { %v1020_v17 = vld [vmem:[%s3597_s9 + $0x20] sm:$0xff]  ;;  %v1022_v23 = vld [vmem:[%s3597_s9 + $0x30] sm:$0xff] }
  0x2e   :  { %v1222_v33 = vld [vmem:[%s3663_s21] sm:$0xff] }
  0x31   :  { %2892 = vmatmul.mubr.msk.bf16.gmra.mrb[12].mxu0 %vm71_vm1, %v60_v29  ;;  %v523_v29 = vld [vmem:[%s3470_s15 + $0x38] sm:$0xff]  ;;  %s3827_s15 = sld [smem:[#allocation3 + $0x182]] }
  0x32   :  { %2914 = vmatmul.mubr.msk.bf16.gmra.mrb[12].mxu1 %vm71_vm1, %v41_v30  ;;  %2895 = vmatprep.mubr.msk.bf16.mxu0 %vm3272_vm0, %v3271_v1  ;;  %v548_v30 = vpack.c.bf16 %v543_v27, %v542_v26  ;;  %v528_v31 = vpack.c.bf16 %v523_v29, %v522_v28  ;;  %v1003_v26 = vld [vmem:[%s3602_s12 + $0x38] sm:$0xff]  ;;  %v1024_v29 = vld [vmem:[%s3597_s9 + $0x40] sm:$0xff] }
  0x33   :  { %2917 = vmatprep.mubr.msk.bf16.mxu1 %vm3272_vm0, %v3271_v1 }
  0x37   :  { %s3864_s19 = scalar_lea.vmem %s4498_s1, %s3827_s15 }
  0x39   :  { %2896 = vmatmul.mubr.msk.bf16.gmra.mrb[16].mxu0 %vm71_vm1, %v61_v37  ;;  %v743_v37 = vld [vmem:[%s3531_s24 + $0x8] sm:$0xff] }
  0x3a   :  { %2918 = vmatmul.mubr.msk.bf16.gmra.mrb[16].mxu1 %vm71_vm1, %v42_v38  ;;  %2923 = vmatprep.mubr.msk.bf16.mxu0 %vm3272_vm0, %v3271_v1  ;;  %v864_v38 = vld [vmem:[%s3536_s26] sm:$0xff]  ;;  %v751_v40 = vpack.c.bf16 %v743_v37, %v742_v36 }
  0x3b   :  { %2945 = vmatprep.mubr.msk.bf16.mxu1 %vm3272_vm0, %v3271_v1  ;;  %v873_v41 = vpack.c.bf16 %v865_v39, %v864_v38  ;;  %v3247_v39 = vld [vmem:[%s4499_s2 + $0x68] sm:$0xff]  }
  0x41   :  { %2924 = vmatmul.mubr.msk.bf16.vlgmr.msra.gmra.mrb[20].mxu0 %vm71_vm1, %v264_v43  ;;  %v3244_v43 = vld [vmem:[%s4499_s2 + $0x40] sm:$0xff]  }
  0x42   :  { %2946 = vmatmul.mubr.msk.bf16.vlgmr.msra.gmra.mrb[20].mxu1 %vm71_vm1, %v386_v44  ;;  %2966 = vmatpush3.bf16.msra.mxu0 %v3239_v45  ;;  %v744_v44 = vld [vmem:[%s3531_s24 + $0x10] sm:$0xff]  ;;  %v745_v45 = vld [vmem:[%s3531_s24 + $0x18] sm:$0xff] }
  0x43   :  { %2988 = vmatpush3.bf16.msra.mxu1 %v3240_v46  ;;  %2927 = vmatprep.mubr.msk.bf16.mxu0 %vm3272_vm0, %v3271_v1  ;;  %v866_v46 = vld [vmem:[%s3536_s26 + $0x10] sm:$0xff]  ;;  %v752_v48 = vpack.c.bf16 %v745_v45, %v744_v44 }
  0x44   :  { %2949 = vmatprep.mubr.msk.bf16.mxu1 %vm3272_vm0, %v3271_v1  ;;  %3009 = vmatprep.subr.bf16.mxu0 %v3271_v1  ;;  %v874_v49 = vpack.c.bf16 %v867_v47, %v866_v46  ;;  %v1226_v47 = vld [vmem:[%s3663_s21 + $0x20] sm:$0xff] }
  0x45   :  { %3031 = vmatprep.subr.bf16.mxu1 %v3271_v1 }
  0x49   :  { %2928 = vmatmul.mubr.msk.bf16.gmra.mrb[24].mxu0 %vm71_vm1, %v265_v51  ;;  %v747_v51 = vld [vmem:[%s3531_s24 + $0x28] sm:$0xff] }
  0x4a   :  { %2950 = vmatmul.mubr.msk.bf16.gmra.mrb[24].mxu1 %vm71_vm1, %v387_v52  ;;  %2931 = vmatprep.mubr.msk.bf16.mxu0 %vm3272_vm0, %v3271_v1  ;;  %v868_v52 = vld [vmem:[%s3536_s26 + $0x20] sm:$0xff]  ;;  %v753_v54 = vpack.c.bf16 %v747_v51, %v746_v50 }
  0x4b   :  { %2953 = vmatprep.mubr.msk.bf16.mxu1 %vm3272_vm0, %v3271_v1  ;;  %v875_v55 = vpack.c.bf16 %v869_v53, %v868_v52 }
  0x51   :  { %2932 = vmatmul.mubr.msk.bf16.gmra.mrb[28].mxu0 %vm71_vm1, %v266_v57  ;;  %v749_v57 = vld [vmem:[%s3531_s24 + $0x38] sm:$0xff]  ;;  %s3668_s24 = scalar_lea.vmem %s4498_s1, %s2709_s18 }
  0x52   :  { %2954 = vmatmul.mubr.msk.bf16.gmra.mrb[28].mxu1 %vm71_vm1, %v388_v58  ;;  %2935 = vmatprep.mubr.msk.bf16.mxu0 %vm3272_vm0, %v3271_v1  ;;  %v870_v58 = vld [vmem:[%s3536_s26 + $0x30] sm:$0xff]  ;;  %v754_v60 = vpack.c.bf16 %v749_v57, %v748_v56  ;;  %v1345_v36 = vld [vmem:[%s3668_s24 + $0x8] sm:$0xff]  ;;  %v1347_v44 = vld [vmem:[%s3668_s24 + $0x18] sm:$0xff] }
  0x53   :  { %2957 = vmatprep.mubr.msk.bf16.mxu1 %vm3272_vm0, %v3271_v1  ;;  %v876_v61 = vpack.c.bf16 %v871_v59, %v870_v58  ;;  %v1349_v50 = vld [vmem:[%s3668_s24 + $0x28] sm:$0xff] }
  0x59   :  { %2936 = vmatmul.mubr.msk.bf16.gmra.mrb[32].mxu0 %vm71_vm1, %v267_v63  ;;  %v872_v63 = vld [vmem:[%s3536_s26 + $0x40] sm:$0xff] }
  0x5a   :  { %2958 = vmatmul.mubr.msk.bf16.gmra.mrb[32].mxu1 %vm71_vm1, %v389_v0  ;;  %2939 = vmatprep.mubr.msk.bf16.mxu0 %vm3272_vm0, %v3271_v1  ;;  %v755_v0 = vpack.c.bf16 %v750_v62, %v750_v62  ;;  %v877_v2 = vpack.c.bf16 %v872_v63, %v872_v63  ;;  %v1228_v63 = vld [vmem:[%s3663_s21 + $0x30] sm:$0xff] }
  0x5b   :  { %2961 = vmatprep.mubr.msk.bf16.mxu1 %vm3272_vm0, %v3271_v1 }
  0x61   :  { %2940 = vmatmul.mubr.msk.bf16.gmra.mrb[36].mxu0 %vm71_vm1, %v268_v4  ;;  %v1017_v4 = vld [vmem:[%s3597_s9 + $0x8] sm:$0xff] }
  0x62   :  { %2962 = vmatmul.mubr.msk.bf16.gmra.mrb[36].mxu1 %vm71_vm1, %v390_v5  ;;  %2967 = vmatprep.mubr.msk.bf16.mxu0 %vm3272_vm0, %v3271_v1  ;;  %v996_v5 = vld [vmem:[%s3602_s12] sm:$0xff]  ;;  %v1025_v7 = vpack.c.bf16 %v1017_v4, %v1016_v3  ;;  %v1351_v3 = vld [vmem:[%s3668_s24 + $0x38] sm:$0xff] }
  0x63   :  { %2989 = vmatprep.mubr.msk.bf16.mxu1 %vm3272_vm0, %v3271_v1  ;;  %v1005_v8 = vpack.c.bf16 %v997_v6, %v996_v5 }
  0x69   :  { %2968 = vmatmul.mubr.msk.bf16.vlgmr.msra.gmra.mrb[40].mxu0 %vm71_vm1, %v545_v10  ;;  %v3246_v10 = vld [vmem:[%s4499_s2 + $0x58] sm:$0xff]  }
  0x6a   :  { %2990 = vmatmul.mubr.msk.bf16.vlgmr.msra.gmra.mrb[40].mxu1 %vm71_vm1, %v525_v11  ;;  %3010 = vmatpush3.bf16.msra.mxu0 %v3241_v12  ;;  %v1018_v11 = vld [vmem:[%s3597_s9 + $0x10] sm:$0xff]  ;;  %v1019_v12 = vld [vmem:[%s3597_s9 + $0x18] sm:$0xff] }
  0x6b   :  { %3032 = vmatpush3.bf16.msra.mxu1 %v3242_v13  ;;  %2971 = vmatprep.mubr.msk.bf16.mxu0 %vm3272_vm0, %v3271_v1  ;;  %v998_v13 = vld [vmem:[%s3602_s12 + $0x10] sm:$0xff]  ;;  %v1026_v15 = vpack.c.bf16 %v1019_v12, %v1018_v11 }
  0x6c   :  { %2993 = vmatprep.mubr.msk.bf16.mxu1 %vm3272_vm0, %v3271_v1  ;;  %3053 = vmatprep.subr.bf16.mxu0 %v3271_v1  ;;  %v1006_v16 = vpack.c.bf16 %v999_v14, %v998_v13 }
  0x6d   :  { %3075 = vmatprep.subr.bf16.mxu1 %v3271_v1 }
  0x71   :  { %2972 = vmatmul.mubr.msk.bf16.gmra.mrb[44].mxu0 %vm71_vm1, %v546_v18  ;;  %v1021_v18 = vld [vmem:[%s3597_s9 + $0x28] sm:$0xff] }
  0x72   :  { %2994 = vmatmul.mubr.msk.bf16.gmra.mrb[44].mxu1 %vm71_vm1, %v526_v19  ;;  %2975 = vmatprep.mubr.msk.bf16.mxu0 %vm3272_vm0, %v3271_v1  ;;  %v1000_v19 = vld [vmem:[%s3602_s12 + $0x20] sm:$0xff]  ;;  %v1027_v21 = vpack.c.bf16 %v1021_v18, %v1020_v17 }
  0x73   :  { %2997 = vmatprep.mubr.msk.bf16.mxu1 %vm3272_vm0, %v3271_v1  ;;  %v1007_v22 = vpack.c.bf16 %v1001_v20, %v1000_v19  ;;  %v1352_v17 = vld [vmem:[%s3668_s24 + $0x40] sm:$0xff] }
  0x79   :  { %2976 = vmatmul.mubr.msk.bf16.gmra.mrb[48].mxu0 %vm71_vm1, %v547_v24  ;;  %v1023_v24 = vld [vmem:[%s3597_s9 + $0x38] sm:$0xff]  ;;  %s3746_s9 = scalar_lea.vmem %s4498_s1, %s2718_s29 }
  0x7a   :  { %2998 = vmatmul.mubr.msk.bf16.gmra.mrb[48].mxu1 %vm71_vm1, %v527_v25  ;;  %2979 = vmatprep.mubr.msk.bf16.mxu0 %vm3272_vm0, %v3271_v1  ;;  %v1002_v25 = vld [vmem:[%s3602_s12 + $0x30] sm:$0xff]  ;;  %v1028_v27 = vpack.c.bf16 %v1023_v24, %v1022_v23 }
  0x7b   :  { %3001 = vmatprep.mubr.msk.bf16.mxu1 %vm3272_vm0, %v3271_v1  ;;  %v1008_v28 = vpack.c.bf16 %v1003_v26, %v1002_v25  ;;  %v1357_v25 = vpack.c.bf16 %v1352_v17, %v1352_v17 }
  0x81   :  { %2980 = vmatmul.mubr.msk.bf16.gmra.mrb[52].mxu0 %vm71_vm1, %v548_v30  ;;  %v1004_v30 = vld [vmem:[%s3602_s12 + $0x40] sm:$0xff] }
  0x82   :  { %3002 = vmatmul.mubr.msk.bf16.gmra.mrb[52].mxu1 %vm71_vm1, %v528_v31  ;;  %2983 = vmatprep.mubr.msk.bf16.mxu0 %vm3272_vm0, %v3271_v1  ;;  %v1029_v31 = vpack.c.bf16 %v1024_v29, %v1024_v29  ;;  %v1009_v32 = vpack.c.bf16 %v1004_v30, %v1004_v30  ;;  %v1496_v30 = vld [vmem:[%s3739_s6] sm:$0xff] }
  0x83   :  { %3005 = vmatprep.mubr.msk.bf16.mxu1 %vm3272_vm0, %v3271_v1 }
  0x89   :  { %2984 = vmatmul.mubr.msk.bf16.gmra.mrb[56].mxu0 %vm71_vm1, %v549_v34  ;;  %v1223_v34 = vld [vmem:[%s3663_s21 + $0x8] sm:$0xff] }
  0x8a   :  { %3006 = vmatmul.mubr.msk.bf16.gmra.mrb[56].mxu1 %vm71_vm1, %v529_v35  ;;  %3011 = vmatprep.mubr.msk.bf16.mxu0 %vm3272_vm0, %v3271_v1  ;;  %v1344_v35 = vld [vmem:[%s3668_s24] sm:$0xff]  ;;  %v1231_v37 = vpack.c.bf16 %v1223_v34, %v1222_v33  ;;  %v1477_v33 = vld [vmem:[%s3746_s9 + $0x8] sm:$0xff] }
  0x8b   :  { %3033 = vmatprep.mubr.msk.bf16.mxu1 %vm3272_vm0, %v3271_v1  ;;  %v1353_v38 = vpack.c.bf16 %v1345_v36, %v1344_v35 }
  0x91   :  { %3012 = vmatmul.mubr.msk.bf16.vlgmr.msra.gmra.mrb[60].mxu0 %vm71_vm1, %v751_v40  ;;  %v3248_v40 = vld [vmem:[%s4499_s2 + $0x60] sm:$0xff]  }
  0x92   :  { %3034 = vmatmul.mubr.msk.bf16.vlgmr.msra.gmra.mrb[60].mxu1 %vm71_vm1, %v873_v41  ;;  %3054 = vmatpush3.bf16.msra.mxu0 %v3243_v42  ;;  %v1224_v41 = vld [vmem:[%s3663_s21 + $0x10] sm:$0xff]  ;;  %v1225_v42 = vld [vmem:[%s3663_s21 + $0x18] sm:$0xff] }
  0x93   :  { %3076 = vmatpush3.bf16.msra.mxu1 %v3244_v43  ;;  %3015 = vmatprep.mubr.msk.bf16.mxu0 %vm3272_vm0, %v3271_v1  ;;  %v1346_v43 = vld [vmem:[%s3668_s24 + $0x10] sm:$0xff]  ;;  %v1232_v45 = vpack.c.bf16 %v1225_v42, %v1224_v41 }
  0x94   :  { %3037 = vmatprep.mubr.msk.bf16.mxu1 %vm3272_vm0, %v3271_v1  ;;  %3097 = vmatprep.subr.bf16.mxu0 %v3271_v1  ;;  %v1354_v46 = vpack.c.bf16 %v1347_v44, %v1346_v43  ;;  %v3249_v42 = vld [vmem:[%s4499_s2 + $0x70] sm:$0xff]  }
  0x95   :  { %3119 = vmatprep.subr.bf16.mxu1 %v3271_v1 }
  0x99   :  { %3016 = vmatmul.mubr.msk.bf16.gmra.mrb[64].mxu0 %vm71_vm1, %v752_v48  ;;  %v1227_v48 = vld [vmem:[%s3663_s21 + $0x28] sm:$0xff] }
  0x9a   :  { %3038 = vmatmul.mubr.msk.bf16.gmra.mrb[64].mxu1 %vm71_vm1, %v874_v49  ;;  %3019 = vmatprep.mubr.msk.bf16.mxu0 %vm3272_vm0, %v3271_v1  ;;  %v1348_v49 = vld [vmem:[%s3668_s24 + $0x20] sm:$0xff] }
  0x9b   :  { %3041 = vmatprep.mubr.msk.bf16.mxu1 %vm3272_vm0, %v3271_v1  ;;  %v1355_v58 = vpack.c.bf16 %v1349_v50, %v1348_v49  ;;  %v1499_v49 = vld [vmem:[%s3739_s6 + $0x18] sm:$0xff]  ;;  %v1478_v50 = vld [vmem:[%s3746_s9 + $0x10] sm:$0xff] }
  0xa1   :  { %3020 = vmatmul.mubr.msk.bf16.gmra.mrb[68].mxu0 %vm71_vm1, %v753_v54  ;;  %v1233_v54 = vpack.c.bf16 %v1227_v48, %v1226_v47  ;;  %v1498_v48 = vld [vmem:[%s3739_s6 + $0x10] sm:$0xff] }
  0xa2   :  { %3042 = vmatmul.mubr.msk.bf16.gmra.mrb[68].mxu1 %vm71_vm1, %v875_v55  ;;  %3023 = vmatprep.mubr.msk.bf16.mxu0 %vm3272_vm0, %v3271_v1 }
  0xa3   :  { %3045 = vmatprep.mubr.msk.bf16.mxu1 %vm3272_vm0, %v3271_v1 }
  0xa9   :  { %3024 = vmatmul.mubr.msk.bf16.gmra.mrb[72].mxu0 %vm71_vm1, %v754_v60 }
  0xaa   :  { %3046 = vmatmul.mubr.msk.bf16.gmra.mrb[72].mxu1 %vm71_vm1, %v876_v61  ;;  %3027 = vmatprep.mubr.msk.bf16.mxu0 %vm3272_vm0, %v3271_v1 }
  0xab   :  { %3049 = vmatprep.mubr.msk.bf16.mxu1 %vm3272_vm0, %v3271_v1 }
  0xb1   :  { %3028 = vmatmul.mubr.msk.bf16.gmra.mrb[76].mxu0 %vm71_vm1, %v755_v0  ;;  %v1229_v0 = vld [vmem:[%s3663_s21 + $0x38] sm:$0xff] }
  0xb2   :  { %3050 = vmatmul.mubr.msk.bf16.gmra.mrb[76].mxu1 %vm71_vm1, %v877_v2  ;;  %3055 = vmatprep.mubr.msk.bf16.mxu0 %vm3272_vm0, %v3271_v1  ;;  %v1350_v2 = vld [vmem:[%s3668_s24 + $0x30] sm:$0xff] }
  0xb3   :  { %3077 = vmatprep.mubr.msk.bf16.mxu1 %vm3272_vm0, %v3271_v1  ;;  %v1356_v11 = vpack.c.bf16 %v1351_v3, %v1350_v2  ;;  %v1500_v2 = vld [vmem:[%s3739_s6 + $0x20] sm:$0xff]  ;;  %v1501_v3 = vld [vmem:[%s3739_s6 + $0x28] sm:$0xff] }
  0xb9   :  { %3056 = vmatmul.mubr.msk.bf16.vlgmr.msra.gmra.mrb[80].mxu0 %vm71_vm1, %v1025_v7  ;;  %v1234_v7 = vpack.c.bf16 %v1229_v0, %v1228_v63 }
  0xba   :  { %3078 = vmatmul.mubr.msk.bf16.vlgmr.msra.gmra.mrb[80].mxu1 %vm71_vm1, %v1005_v8  ;;  %3098 = vmatpush3.bf16.msra.mxu0 %v3245_v9 }
  0xbb   :  { %3120 = vmatpush3.bf16.msra.mxu1 %v3246_v10  ;;  %3059 = vmatprep.mubr.msk.bf16.mxu0 %vm3272_vm0, %v3271_v1 }
  0xbc   :  { %3081 = vmatprep.mubr.msk.bf16.mxu1 %vm3272_vm0, %v3271_v1  ;;  %3141 = vmatprep.subr.bf16.mxu0 %v3271_v1 }
  0xbd   :  { %3163 = vmatprep.subr.bf16.mxu1 %v3271_v1 }
  0xc1   :  { %3060 = vmatmul.mubr.msk.bf16.gmra.mrb[84].mxu0 %vm71_vm1, %v1026_v15 }
  0xc2   :  { %3082 = vmatmul.mubr.msk.bf16.gmra.mrb[84].mxu1 %vm71_vm1, %v1006_v16  ;;  %3063 = vmatprep.mubr.msk.bf16.mxu0 %vm3272_vm0, %v3271_v1  ;;  %v1230_v16 = vld [vmem:[%s3663_s21 + $0x40] sm:$0xff] }
  0xc3   :  { %3085 = vmatprep.mubr.msk.bf16.mxu1 %vm3272_vm0, %v3271_v1 }
  0xc9   :  { %3064 = vmatmul.mubr.msk.bf16.gmra.mrb[88].mxu0 %vm71_vm1, %v1027_v21  ;;  %v1235_v21 = vpack.c.bf16 %v1230_v16, %v1230_v16 }
  0xca   :  { %3086 = vmatmul.mubr.msk.bf16.gmra.mrb[88].mxu1 %vm71_vm1, %v1007_v22  ;;  %3067 = vmatprep.mubr.msk.bf16.mxu0 %vm3272_vm0, %v3271_v1 }
  0xcb   :  { %3089 = vmatprep.mubr.msk.bf16.mxu1 %vm3272_vm0, %v3271_v1 }
  0xd1   :  { %3068 = vmatmul.mubr.msk.bf16.gmra.mrb[92].mxu0 %vm71_vm1, %v1028_v27 }
  0xd2   :  { %3090 = vmatmul.mubr.msk.bf16.gmra.mrb[92].mxu1 %vm71_vm1, %v1008_v28  ;;  %3071 = vmatprep.mubr.msk.bf16.mxu0 %vm3272_vm0, %v3271_v1 }
  0xd3   :  { %3093 = vmatprep.mubr.msk.bf16.mxu1 %vm3272_vm0, %v3271_v1 }
  0xd9   :  { %3072 = vmatmul.mubr.msk.bf16.gmra.mrb[96].mxu0 %vm71_vm1, %v1029_v31  ;;  %v1497_v31 = vld [vmem:[%s3739_s6 + $0x8] sm:$0xff] }
  0xda   :  { %3094 = vmatmul.mubr.msk.bf16.gmra.mrb[96].mxu1 %vm71_vm1, %v1009_v32  ;;  %3099 = vmatprep.mubr.msk.bf16.mxu0 %vm3272_vm0, %v3271_v1  ;;  %v1476_v32 = vld [vmem:[%s3746_s9] sm:$0xff] }
  0xdb   :  { %3121 = vmatprep.mubr.msk.bf16.mxu1 %vm3272_vm0, %v3271_v1  ;;  %v1485_v41 = vpack.c.bf16 %v1477_v33, %v1476_v32  ;;  %v3819_v33 = vpop.permute.xlu1 %1969 }
  0xe1   :  { %3100 = vmatmul.mubr.msk.bf16.vlgmr.msra.gmra.mrb[100].mxu0 %vm71_vm1, %v1231_v37  ;;  %v1505_v37 = vpack.c.bf16 %v1497_v31, %v1496_v30  ;;  %v1482_v30 = vld [vmem:[%s3746_s9 + $0x30] sm:$0xff]  ;;  %v1483_v31 = vld [vmem:[%s3746_s9 + $0x38] sm:$0xff] }
  0xe2   :  { %3122 = vmatmul.mubr.msk.bf16.vlgmr.msra.gmra.mrb[100].mxu1 %vm71_vm1, %v1353_v38  ;;  %3142 = vmatpush3.bf16.msra.mxu0 %v3247_v39 }
  0xe3   :  { %3164 = vmatpush3.bf16.msra.mxu1 %v3248_v40  ;;  %3103 = vmatprep.mubr.msk.bf16.mxu0 %vm3272_vm0, %v3271_v1 }
  0xe4   :  { %3125 = vmatprep.mubr.msk.bf16.mxu1 %vm3272_vm0, %v3271_v1  ;;  %3185 = vmatprep.subr.bf16.mxu0 %v3271_v1 }
  0xe5   :  { %3207 = vmatprep.subr.bf16.mxu1 %v3271_v1 }
  0xe9   :  { %3104 = vmatmul.mubr.msk.bf16.gmra.mrb[104].mxu0 %vm71_vm1, %v1232_v45  ;;  %v3250_v45 = vld [vmem:[%s4499_s2 + $0x78] sm:$0xff]  }
  0xea   :  { %3126 = vmatmul.mubr.msk.bf16.gmra.mrb[104].mxu1 %vm71_vm1, %v1354_v46  ;;  %3107 = vmatprep.mubr.msk.bf16.mxu0 %vm3272_vm0, %v3271_v1 }
  0xeb   :  { %3129 = vmatprep.mubr.msk.bf16.mxu1 %vm3272_vm0, %v3271_v1 }
  0xec   :  { %v121_v51 = vpop.f32.mrb[0].mxu0 }
  0xed   :  { %v214_v52 = vpop.f32.mrb[0].mxu1  ;;  %v2881_v53 = vpop.f32.mrb[1].mxu0 }
  0xee   :  { %v3708_v55 = vadd.f32 %v214_v52, %v121_v51  ;;  %v2903_v56 = vpop.f32.mrb[1].mxu1  ;;  %v124_v57 = vpop.f32.mrb[2].mxu0  ;;  %v1479_v51 = vld [vmem:[%s3746_s9 + $0x18] sm:$0xff] }
  0xef   :  { %v217_v59 = vpop.f32.mrb[2].mxu1  ;;  %v2882_v60 = vpop.f32.mrb[3].mxu0  ;;  %v1506_v56 = vpack.c.bf16 %v1499_v49, %v1498_v48 }
  0xf0   :  { %v3710_v61 = vadd.f32 %v217_v59, %v124_v57  ;;  %v2904_v62 = vpop.f32.mrb[3].mxu1  ;;  %v1486_v60 = vpack.c.bf16 %v1479_v51, %v1478_v50 }
  0xf1   :  { %3108 = vmatmul.mubr.msk.bf16.gmra.mrb[108].mxu0 %vm71_vm1, %v1233_v54 }
  0xf2   :  { %3130 = vmatmul.mubr.msk.bf16.gmra.mrb[108].mxu1 %vm71_vm1, %v1355_v58  ;;  %3111 = vmatprep.mubr.msk.bf16.mxu0 %vm3272_vm0, %v3271_v1 }
  0xf3   :  { %3133 = vmatprep.mubr.msk.bf16.mxu1 %vm3272_vm0, %v3271_v1 }
  0xf4   :  { %v129_v4 = vpop.f32.mrb[4].mxu0 }
  0xf5   :  { %v222_v5 = vpop.f32.mrb[4].mxu1  ;;  %v2885_v6 = vpop.f32.mrb[5].mxu0 }
  0xf6   :  { %v3722_v8 = vadd.f32 %v222_v5, %v129_v4  ;;  %v2907_v9 = vpop.f32.mrb[5].mxu1  ;;  %v132_v10 = vpop.f32.mrb[6].mxu0  ;;  %v1480_v4 = vld [vmem:[%s3746_s9 + $0x20] sm:$0xff]  ;;  %v1481_v5 = vld [vmem:[%s3746_s9 + $0x28] sm:$0xff] }
  0xf7   :  { %v225_v12 = vpop.f32.mrb[6].mxu1  ;;  %v2886_v13 = vpop.f32.mrb[7].mxu0  ;;  %v1487_v17 = vpack.c.bf16 %v1481_v5, %v1480_v4 }
  0xf8   :  { %v3724_v14 = vadd.f32 %v225_v12, %v132_v10  ;;  %v2908_v15 = vpop.f32.mrb[7].mxu1  ;;  %v1507_v12 = vpack.c.bf16 %v1501_v3, %v1500_v2  ;;  %v3796_v13 = vld [vmem:[%s4500_s3] ss:$0 sm:$0xff] }
  0xf9   :  { %3112 = vmatmul.mubr.msk.bf16.gmra.mrb[112].mxu0 %vm71_vm1, %v1234_v7  ;;  %v3790_v7 = vpop.permute.xlu0 %1959 }
  0xfa   :  { %3134 = vmatmul.mubr.msk.bf16.gmra.mrb[112].mxu1 %vm71_vm1, %v1356_v11  ;;  %3115 = vmatprep.mubr.msk.bf16.mxu0 %vm3272_vm0, %v3271_v1 }
  0xfb   :  { %3137 = vmatprep.mubr.msk.bf16.mxu1 %vm3272_vm0, %v3271_v1 }
  0xfc   :  { %v137_v18 = vpop.f32.mrb[8].mxu0 }
  0xfd   :  { %v230_v19 = vpop.f32.mrb[8].mxu1  ;;  %v2889_v20 = vpop.f32.mrb[9].mxu0 }
  0xfe   :  { %v3734_v22 = vadd.f32 %v230_v19, %v137_v18  ;;  %v2911_v23 = vpop.f32.mrb[9].mxu1  ;;  %v140_v24 = vpop.f32.mrb[10].mxu0 }
  0xff   :  { %v233_v26 = vpop.f32.mrb[10].mxu1  ;;  %v2890_v27 = vpop.f32.mrb[11].mxu0 }
 0x100   :  { %v3741_v28 = vadd.f32 %v233_v26, %v140_v24  ;;  %v2912_v29 = vpop.f32.mrb[11].mxu1  ;;  %v1502_v26 = vld [vmem:[%s3739_s6 + $0x30] sm:$0xff]  ;;  %v1503_v27 = vld [vmem:[%s3739_s6 + $0x38] sm:$0xff] }
 0x101   :  { %3116 = vmatmul.mubr.msk.bf16.gmra.mrb[116].mxu0 %vm71_vm1, %v1235_v21 }
 0x102   :  { %3138 = vmatmul.mubr.msk.bf16.gmra.mrb[116].mxu1 %vm71_vm1, %v1357_v25  ;;  %3143 = vmatprep.mubr.msk.bf16.mxu0 %vm3272_vm0, %v3271_v1  ;;  %v3804_v25 = vpop.permute.xlu0 %1964 }
 0x103   :  { %3165 = vmatprep.mubr.msk.bf16.mxu1 %vm3272_vm0, %v3271_v1 }
 0x104   :  { %v145_v34 = vpop.f32.mrb[12].mxu0 }
 0x105   :  { %v238_v35 = vpop.f32.mrb[12].mxu1  ;;  %v2893_v36 = vpop.f32.mrb[13].mxu0 }
 0x106   :  { %v3758_v38 = vadd.f32 %v238_v35, %v145_v34  ;;  %v2915_v39 = vpop.f32.mrb[13].mxu1  ;;  %v148_v40 = vpop.f32.mrb[14].mxu0 }
 0x107   :  { %v241_v43 = vpop.f32.mrb[14].mxu1  ;;  %v2894_v44 = vpop.f32.mrb[15].mxu0  ;;  %v1508_v39 = vpack.c.bf16 %v1503_v27, %v1502_v26  ;;  %v1702_v26 = vld [vmem:[%s3864_s19] sm:$0xff] }
 0x108   :  { %v3766_v46 = vadd.f32 %v241_v43, %v148_v40  ;;  %v2916_v47 = vpop.f32.mrb[15].mxu1  ;;  %v1488_v43 = vpack.c.bf16 %v1483_v31, %v1482_v30  ;;  %v1825_v30 = vld [vmem:[%s3871_s22 + $0x8] sm:$0xff] }
 0x109   :  { %3144 = vmatmul.mubr.msk.bf16.vlgmr.msra.gmra.mrb[120].mxu0 %vm71_vm1, %v1505_v37 }
 0x10a   :  { %3166 = vmatmul.mubr.msk.bf16.vlgmr.msra.gmra.mrb[120].mxu1 %vm71_vm1, %v1485_v41  ;;  %3186 = vmatpush3.bf16.msra.mxu0 %v3249_v42 }
 0x10b   :  { %3208 = vmatpush3.bf16.msra.mxu1 %v3250_v45  ;;  %3147 = vmatprep.mubr.msk.bf16.mxu0 %vm3272_vm0, %v3271_v1 }
 0x10c   :  { %v153_v52 = vpop.f32.mrb[16].mxu0  ;;  %3169 = vmatprep.mubr.msk.bf16.mxu1 %vm3272_vm0, %v3271_v1 }
 0x10d   :  { %v246_v53 = vpop.f32.mrb[16].mxu1  ;;  %v2897_v54 = vpop.f32.mrb[17].mxu0 }
 0x10e   :  { %v3778_v57 = vadd.f32 %v246_v53, %v153_v52  ;;  %v2919_v58 = vpop.f32.mrb[17].mxu1  ;;  %v156_v59 = vpop.f32.mrb[18].mxu0  ;;  %v1504_v54 = vld [vmem:[%s3739_s6 + $0x40] sm:$0xff] }
 0x10f   :  { %v249_v62 = vpop.f32.mrb[18].mxu1  ;;  %v2898_v63 = vpop.f32.mrb[19].mxu0  ;;  %v1484_v59 = vld [vmem:[%s3746_s9 + $0x40] sm:$0xff] }
 0x110   :  { %v2920_v0 = vpop.f32.mrb[19].mxu1  ;;  %v1509_v62 = vpack.c.bf16 %v1504_v54, %v1504_v54 }
 0x111   :  { %3148 = vmatmul.mubr.msk.bf16.gmra.mrb[124].mxu0 %vm71_vm1, %v1506_v56  ;;  %v3837_v56 = vpop.permute.xlu1 %1974 }
 0x112   :  { %3170 = vmatmul.mubr.msk.bf16.gmra.mrb[124].mxu1 %vm71_vm1, %v1486_v60  ;;  %3151 = vmatprep.mubr.msk.bf16.mxu0 %vm3272_vm0, %v3271_v1 }
 0x113   :  { %3173 = vmatprep.mubr.msk.bf16.mxu1 %vm3272_vm0, %v3271_v1 }
 0x114   :  { %v327_v6 = vpop.f32.mrb[20].mxu0 }
 0x115   :  { %v365_v9 = vadd.f32 %v327_v6, %v3708_v55  ;;  %v449_v10 = vpop.f32.mrb[20].mxu1  ;;  %v2925_v11 = vpop.f32.mrb[21].mxu0  ;;  %v3854_v6 = vrot.slane %v3790_v7, 4 }
 0x116   :  { %v2947_v15 = vpop.f32.mrb[21].mxu1  ;;  %v330_v16 = vpop.f32.mrb[22].mxu0 }
 0x117   :  { %v487_v18 = vadd.f32 %v449_v10, %v365_v9  ;;  %v366_v19 = vadd.f32 %v330_v16, %v3710_v61  ;;  %v452_v20 = vpop.f32.mrb[22].mxu1  ;;  %v2926_v55 = vpop.f32.mrb[23].mxu0  ;;  %v2126_v9 = vrot.slane %v3804_v25, 4 }
 0x118   :  { %v2948_v21 = vpop.f32.mrb[23].mxu1 }
 0x119   :  { %v3800_v23 = vadd.f32 %v3796_v13, %v487_v18  ;;  %v488_v24 = vadd.f32 %v452_v20, %v366_v19  ;;  %3152 = vmatmul.mubr.msk.bf16.gmra.mrb[128].mxu0 %vm71_vm1, %v1507_v12  ;;  %v1489_v12 = vpack.c.bf16 %v1484_v59, %v1484_v59  ;;  %v3883_v27 = vsel %vm1990_vm2, %v3854_v6, %v2126_v9  ;;  %v1705_v59 = vld [vmem:[%s3864_s19 + $0x18] sm:$0xff] }
 0x11a   :  { %3174 = vmatmul.mubr.msk.bf16.gmra.mrb[128].mxu1 %vm71_vm1, %v1487_v17  ;;  %3155 = vmatprep.mubr.msk.bf16.mxu0 %vm3272_vm0, %v3271_v1 }
 0x11b   :  { %v3811_v61 = vadd.f32 %v3796_v13, %v488_v24  ;;  %v1982_v29 = vmul.f32 %v3790_v7, %v3800_v23  ;;  %3177 = vmatprep.mubr.msk.bf16.mxu1 %vm3272_vm0, %v3271_v1 }
 0x11c   :  { %v335_v32 = vpop.f32.mrb[24].mxu0 }
 0x11d   :  { %v1983_v34 = vmul.f32 %v3804_v25, %v3811_v61  ;;  %v367_v35 = vadd.f32 %v335_v32, %v3722_v8  ;;  %v457_v36 = vpop.f32.mrb[24].mxu1  ;;  %v2929_v37 = vpop.f32.mrb[25].mxu0  ;;  %v2000_v40 = vmul.f32 %v1982_v29, %v3800_v23 }
 0x11e   :  { %v2951_v41 = vpop.f32.mrb[25].mxu1  ;;  %v338_v42 = vpop.f32.mrb[26].mxu0 }
 0x11f   :  { %v1987_v44 = vadd.f32 %v1983_v34, %v1982_v29  ;;  %v2001_v45 = vmul.f32 %v1983_v34, %v3811_v61  ;;  %v489_v47 = vadd.f32 %v457_v36, %v367_v35  ;;  %v368_v48 = vadd.f32 %v338_v42, %v3724_v14  ;;  %v460_v49 = vpop.f32.mrb[26].mxu1  ;;  %v2930_v50 = vpop.f32.mrb[27].mxu0  ;;  %v1824_v29 = vld [vmem:[%s3871_s22] sm:$0xff] }
 0x120   :  { %v2952_v8 = vpop.f32.mrb[27].mxu1  ;;  %v2128_v35 = vrot.slane %v3819_v33, 4 }
 0x121   :  { %v2005_v51 = vadd.f32 %v2001_v45, %v2000_v40  ;;  %v3832_v52 = vadd.f32 %v3796_v13, %v489_v47  ;;  %v490_v53 = vadd.f32 %v460_v49, %v368_v48  ;;  %3156 = vmatmul.mubr.msk.bf16.gmra.mrb[132].mxu0 %vm71_vm1, %v1508_v39  ;;  %v2130_v40 = vrot.slane %v3837_v56, 4 }
 0x122   :  { %3178 = vmatmul.mubr.msk.bf16.gmra.mrb[132].mxu1 %vm71_vm1, %v1488_v43  ;;  %3159 = vmatprep.mubr.msk.bf16.mxu0 %vm3272_vm0, %v3271_v1  ;;  %v1833_v45 = vpack.c.bf16 %v1825_v30, %v1824_v29 }
 0x123   :  { %v3842_v14 = vadd.f32 %v3796_v13, %v490_v53  ;;  %v1984_v58 = vmul.f32 %v3819_v33, %v3832_v52  ;;  %3181 = vmatprep.mubr.msk.bf16.mxu1 %vm3272_vm0, %v3271_v1 }
 0x124   :  { %v343_v60 = vpop.f32.mrb[28].mxu0 }
 0x125   :  { %v2002_v63 = vmul.f32 %v1984_v58, %v3832_v52  ;;  %v1985_v0 = vmul.f32 %v3837_v56, %v3842_v14  ;;  %v1988_v2 = vadd.f32 %v1987_v44, %v1984_v58  ;;  %v369_v3 = vadd.f32 %v343_v60, %v3734_v22  ;;  %v465_v4 = vpop.f32.mrb[28].mxu1  ;;  %v2933_v5 = vpop.f32.mrb[29].mxu0 }
 0x126   :  { %v2955_v10 = vpop.f32.mrb[29].mxu1  ;;  %v346_v11 = vpop.f32.mrb[30].mxu0  ;;  %v3909_v58 = vsel %vm1990_vm2, %v2126_v9, %v2128_v35 }
 0x127   :  { %v3857_v15 = vadd.f32 %v1988_v2, %v1985_v0  ;;  %v2003_v16 = vmul.f32 %v1985_v0, %v3842_v14  ;;  %v2006_v17 = vadd.f32 %v2005_v51, %v2002_v63  ;;  %v491_v18 = vadd.f32 %v465_v4, %v369_v3  ;;  %v468_v19 = vpop.f32.mrb[30].mxu1  ;;  %v2934_v20 = vpop.f32.mrb[31].mxu0  ;;  %v1826_v0 = vld [vmem:[%s3871_s22 + $0x10] sm:$0xff]  ;;  %v1827_v2 = vld [vmem:[%s3871_s22 + $0x18] sm:$0xff] }
 0x128   :  { %v370_v22 = vadd.f32 %v346_v11, %v3741_v28  ;;  %v2956_v55 = vpop.f32.mrb[31].mxu1  ;;  %v1703_v28 = vld [vmem:[%s3864_s19 + $0x8] sm:$0xff]  ;;  %v3916_v60 = vpop.permute.xlu0 %1979 }
 0x129   :  { %v3873_v21 = vadd.f32 %v2006_v17, %v2003_v16  ;;  %3160 = vmatmul.mubr.msk.bf16.gmra.mrb[136].mxu0 %vm71_vm1, %v1509_v62  ;;  %v3890_v31 = vadd.f32 %v3796_v13, %v491_v18  ;;  %v1711_v39 = vpack.c.bf16 %v1703_v28, %v1702_v26  ;;  %v2132_v5 = vrot.slane %v3916_v60, 4 }
 0x12a   :  { %v492_v24 = vadd.f32 %v468_v19, %v370_v22  ;;  %3182 = vmatmul.mubr.msk.bf16.gmra.mrb[136].mxu1 %vm71_vm1, %v1489_v12  ;;  %3187 = vmatprep.mubr.msk.bf16.mxu0 %vm3272_vm0, %v3271_v1 }
 0x12b   :  { %3209 = vmatprep.mubr.msk.bf16.mxu1 %vm3272_vm0, %v3271_v1  ;;  %v2139_v50 = vmul.f32 %v3854_v6, %v3890_v31 }
 0x12c   :  { %v3893_v32 = vadd.f32 %v3796_v13, %v492_v24  ;;  %v351_v34 = vpop.f32.mrb[32].mxu0  ;;  %v1834_v24 = vpack.c.bf16 %v1827_v2, %v1826_v0 }
 0x12d   :  { %v473_v36 = vpop.f32.mrb[32].mxu1  ;;  %v2937_v37 = vpop.f32.mrb[33].mxu0  ;;  %v371_v42 = vadd.f32 %v351_v34, %v3758_v38  ;;  %v3905_v38 = vsel %vm1990_vm2, %v2128_v35, %v2130_v40  ;;  %v2175_v4 = vmul.f32 %v2139_v50, %v3890_v31  ;;  %v2149_v19 = vrot.slane %v2139_v50, 4  ;;  %v1828_v50 = vld [vmem:[%s3871_s22 + $0x20] sm:$0xff] }
 0x12e   :  { %v2140_v41 = vmul.f32 %v3883_v27, %v3893_v32  ;;  %v2959_v43 = vpop.f32.mrb[33].mxu1  ;;  %v354_v44 = vpop.f32.mrb[34].mxu0  ;;  %v3939_v37 = vsel %vm1990_vm2, %v2130_v40, %v2132_v5  ;;  %v1707_v40 = vld [vmem:[%s3864_s19 + $0x28] sm:$0xff] }
 0x12f   :  { %v372_v47 = vadd.f32 %v354_v44, %v3766_v46  ;;  %v476_v48 = vpop.f32.mrb[34].mxu1  ;;  %v2938_v49 = vpop.f32.mrb[35].mxu0  ;;  %v493_v51 = vadd.f32 %v473_v36, %v371_v42  ;;  %v1704_v46 = vld [vmem:[%s3864_s19 + $0x10] sm:$0xff]  ;;  %v2185_v36 = vrot.slane %v2175_v4, 4 }
 0x130   :  { %v2960_v8 = vpop.f32.mrb[35].mxu1  ;;  %v2176_v54 = vmul.f32 %v2140_v41, %v3893_v32  ;;  %v2150_v3 = vrot.slane %v2140_v41, 4  ;;  %v1712_v18 = vpack.c.bf16 %v1705_v59, %v1704_v46 }
 0x131   :  { %v494_v53 = vadd.f32 %v476_v48, %v372_v47  ;;  %3188 = vmatmul.mubr.msk.bf16.vlgmr.msra.gmra.mrb[140].mxu0 %vm71_vm1, %v1711_v39  ;;  %v3919_v62 = vadd.f32 %v3796_v13, %v493_v51  ;;  %v1706_v47 = vld [vmem:[%s3864_s19 + $0x20] sm:$0xff]  ;;  %v1829_v8 = vld [vmem:[%s3871_s22 + $0x28] sm:$0xff] }
 0x132   :  { %3210 = vmatmul.mubr.msk.bf16.vlgmr.msra.gmra.mrb[140].mxu1 %vm71_vm1, %v1833_v45  ;;  %3191 = vmatprep.mubr.msk.bf16.mxu0 %vm3272_vm0, %v3271_v1  ;;  %v2186_v20 = vrot.slane %v2176_v54, 4  ;;  %v1713_v5 = vpack.c.bf16 %v1707_v40, %v1706_v47 }
 0x133   :  { %v3922_v63 = vadd.f32 %v3796_v13, %v494_v53  ;;  %3213 = vmatprep.mubr.msk.bf16.mxu1 %vm3272_vm0, %v3271_v1  ;;  %v2141_v10 = vmul.f32 %v3909_v58, %v3919_v62 }
 0x134   :  { %v359_v9 = vpop.f32.mrb[36].mxu0  ;;  %v2187_v51 = vsel %vm1990_vm2, %v2185_v36, %v2186_v20 }
 0x135   :  { %v2142_v11 = vmul.f32 %v3905_v38, %v3922_v63  ;;  %v373_v12 = vadd.f32 %v359_v9, %v3778_v57  ;;  %v481_v16 = vpop.f32.mrb[36].mxu1  ;;  %v2941_v17 = vpop.f32.mrb[37].mxu0  ;;  %v2152_v26 = vrot.slane %v2141_v10, 4  ;;  %v2177_v28 = vmul.f32 %v2141_v10, %v3919_v62 }
 0x136   :  { %v2963_v22 = vpop.f32.mrb[37].mxu1  ;;  %v362_v55 = vpop.f32.mrb[38].mxu0  ;;  %v2151_v57 = vsel %vm1990_vm2, %v2149_v19, %v2150_v3  ;;  %v1835_v9 = vpack.c.bf16 %v1829_v8, %v1828_v50 }
 0x137   :  { %v2154_v29 = vrot.slane %v2142_v11, 4  ;;  %v2178_v30 = vmul.f32 %v2142_v11, %v3922_v63  ;;  %v484_v34 = vpop.f32.mrb[38].mxu1  ;;  %v2942_v35 = vpop.f32.mrb[39].mxu0  ;;  %v495_v39 = vadd.f32 %v481_v16, %v373_v12  ;;  %v2153_v42 = vsel %vm1990_vm2, %v2150_v3, %v2152_v26 }
 0x138   :  { %v2964_v41 = vpop.f32.mrb[39].mxu1  ;;  %v2188_v43 = vrot.slane %v2177_v28, 4  ;;  %v2163_v48 = vadd.f32 %v2153_v42, %v2151_v57  ;;  %v1708_v35 = vld [vmem:[%s3864_s19 + $0x30] sm:$0xff]  ;;  %v1709_v57 = vld [vmem:[%s3864_s19 + $0x38] sm:$0xff] }
 0x139   :  { %v2155_v44 = vsel %vm1990_vm2, %v2152_v26, %v2154_v29  ;;  %v2190_v45 = vrot.slane %v2178_v30, 4  ;;  %3192 = vmatmul.mubr.msk.bf16.gmra.mrb[144].mxu0 %vm71_vm1, %v1712_v18  ;;  %v3946_v49 = vadd.f32 %v3796_v13, %v495_v39  ;;  %v1830_v39 = vld [vmem:[%s3871_s22 + $0x30] sm:$0xff]  ;;  %v1831_v41 = vld [vmem:[%s3871_s22 + $0x38] sm:$0xff] }
 0x13a   :  { %3214 = vmatmul.mubr.msk.bf16.gmra.mrb[144].mxu1 %vm71_vm1, %v1834_v24  ;;  %3195 = vmatprep.mubr.msk.bf16.mxu0 %vm3272_vm0, %v3271_v1  ;;  %v2189_v53 = vsel %vm1990_vm2, %v2186_v20, %v2188_v43  ;;  %v2164_v59 = vadd.f32 %v2163_v48, %v2155_v44  ;;  %v1714_v48 = vpack.c.bf16 %v1709_v57, %v1708_v35 }
 0x13b   :  { %v2191_v54 = vsel %vm1990_vm2, %v2188_v43, %v2190_v45  ;;  %3217 = vmatprep.mubr.msk.bf16.mxu1 %vm3272_vm0, %v3271_v1  ;;  %v2199_v46 = vadd.f32 %v2189_v53, %v2187_v51  ;;  %v2143_v0 = vmul.f32 %v3939_v37, %v3946_v49  ;;  %v1836_v51 = vpack.c.bf16 %v1831_v41, %v1830_v39 }
 0x13c   :  { %v608_v2 = vpop.f32.mrb[40].mxu0 }
 0x13d   :  { %v701_v3 = vpop.f32.mrb[40].mxu1  ;;  %v2969_v4 = vpop.f32.mrb[41].mxu0  ;;  %v2200_v10 = vadd.f32 %v2199_v46, %v2191_v54  ;;  %v2156_v11 = vrot.slane %v2143_v0, 4  ;;  %v2179_v12 = vmul.f32 %v2143_v0, %v3946_v49  ;;  %v1710_v0 = vld [vmem:[%s3864_s19 + $0x40] sm:$0xff] }
 0x13e   :  { %v3962_v16 = vadd.f32 %v701_v3, %v608_v2  ;;  %v2991_v17 = vpop.f32.mrb[41].mxu1  ;;  %v611_v18 = vpop.f32.mrb[42].mxu0  ;;  %v1832_v2 = vld [vmem:[%s3871_s22 + $0x40] sm:$0xff] }
 0x13f   :  { %v704_v19 = vpop.f32.mrb[42].mxu1  ;;  %v2970_v20 = vpop.f32.mrb[43].mxu0  ;;  %v2157_v22 = vsel %vm1990_vm2, %v2154_v29, %v2156_v11  ;;  %v2192_v55 = vrot.slane %v2179_v12, 4  ;;  %v2166_v30 = vsel %vm1990_vm2, %v2156_v11, 0.0  ;;  %v1837_v17 = vpack.c.bf16 %v1832_v2, %v1832_v2 }
 0x140   :  { %v3965_v24 = vadd.f32 %v704_v19, %v611_v18  ;;  %v2992_v26 = vpop.f32.mrb[43].mxu1  ;;  %v2165_v28 = vadd.f32 %v2164_v59, %v2157_v22 }
 0x141   :  { %3196 = vmatmul.mubr.msk.bf16.gmra.mrb[148].mxu0 %vm71_vm1, %v1713_v5  ;;  %v2193_v34 = vsel %vm1990_vm2, %v2190_v45, %v2192_v55  ;;  %v2202_v42 = vsel %vm1990_vm2, %v2192_v55, 0.0 }
 0x142   :  { %3218 = vmatmul.mubr.msk.bf16.gmra.mrb[148].mxu1 %vm71_vm1, %v1835_v9  ;;  %3199 = vmatprep.mubr.msk.bf16.mxu0 %vm3272_vm0, %v3271_v1  ;;  %v3975_v29 = vadd.f32 %v2166_v30, %v2165_v28  ;;  %v2201_v36 = vadd.f32 %v2200_v10, %v2193_v34  ;;  %v1715_v9 = vpack.c.bf16 %v1710_v0, %v1710_v0 }
 0x143   :  { %3221 = vmatprep.mubr.msk.bf16.mxu1 %vm3272_vm0, %v3271_v1 }
 0x144   :  { %v616_v43 = vpop.f32.mrb[44].mxu0  ;;  %v3982_v44 = vadd.f32 %v2202_v42, %v2201_v36 }
 0x145   :  { %v709_v45 = vpop.f32.mrb[44].mxu1  ;;  %v2973_v47 = vpop.f32.mrb[45].mxu0 }
 0x146   :  { %v3984_v40 = vadd.f32 %v709_v45, %v616_v43  ;;  %v2995_v50 = vpop.f32.mrb[45].mxu1  ;;  %v619_v8 = vpop.f32.mrb[46].mxu0 }
 0x147   :  { %v712_v53 = vpop.f32.mrb[46].mxu1  ;;  %v2974_v54 = vpop.f32.mrb[47].mxu0 }
 0x148   :  { %v3986_v46 = vadd.f32 %v712_v53, %v619_v8  ;;  %v2996_v59 = vpop.f32.mrb[47].mxu1  ;;  %v1986_v53 = vmul.f32 %v3916_v60, %v3890_v31 }
 0x149   :  { %3200 = vmatmul.mubr.msk.bf16.gmra.mrb[152].mxu0 %vm71_vm1, %v1714_v48 }
 0x14a   :  { %3222 = vmatmul.mubr.msk.bf16.gmra.mrb[152].mxu1 %vm71_vm1, %v1836_v51  ;;  %3203 = vmatprep.mubr.msk.bf16.mxu0 %vm3272_vm0, %v3271_v1  ;;  %v2004_v59 = vmul.f32 %v1986_v53, %v3890_v31 }
 0x14b   :  { %3225 = vmatprep.mubr.msk.bf16.mxu1 %vm3272_vm0, %v3271_v1 }
 0x14c   :  { %v624_v3 = vpop.f32.mrb[48].mxu0 }
 0x14d   :  { %v717_v4 = vpop.f32.mrb[48].mxu1  ;;  %v2977_v5 = vpop.f32.mrb[49].mxu0 }
 0x14e   :  { %v3996_v10 = vadd.f32 %v717_v4, %v624_v3  ;;  %v2999_v11 = vpop.f32.mrb[49].mxu1  ;;  %v627_v12 = vpop.f32.mrb[50].mxu0 }
 0x14f   :  { %v720_v18 = vpop.f32.mrb[50].mxu1  ;;  %v2978_v19 = vpop.f32.mrb[51].mxu0 }
 0x150   :  { %v3998_v20 = vadd.f32 %v720_v18, %v627_v12  ;;  %v3000_v22 = vpop.f32.mrb[51].mxu1 }
 0x151   :  { %3204 = vmatmul.mubr.msk.bf16.gmra.mrb[156].mxu0 %vm71_vm1, %v1715_v9  ;;  %v1991_v9 = vsel %vm1990_vm2, %v1986_v53, 0.0  ;;  %v2008_v22 = vsel %vm1990_vm2, %v2004_v59, 0.0 }
 0x152   :  { %3226 = vmatmul.mubr.msk.bf16.gmra.mrb[156].mxu1 %vm71_vm1, %v1837_v17 }
 0x154   :  { %v632_v1 = vpop.f32.mrb[52].mxu0 }
 0x155   :  { %v725_v55 = vpop.f32.mrb[52].mxu1  ;;  %v2981_v26 = vpop.f32.mrb[53].mxu0 }
 0x156   :  { %v4002_v28 = vadd.f32 %v725_v55, %v632_v1  ;;  %v3003_v30 = vpop.f32.mrb[53].mxu1  ;;  %v635_v34 = vpop.f32.mrb[54].mxu0 }
 0x157   :  { %v728_v35 = vpop.f32.mrb[54].mxu1  ;;  %v2982_v57 = vpop.f32.mrb[55].mxu0 }
 0x158   :  { %v4004_v36 = vadd.f32 %v728_v35, %v635_v34  ;;  %v3004_v39 = vpop.f32.mrb[55].mxu1  ;;  %v2009_v34 = vadd.f32 %v2008_v22, %v3873_v21 }
 0x15c   :  { %v640_v41 = vpop.f32.mrb[56].mxu0 }
 0x15d   :  { %v733_v42 = vpop.f32.mrb[56].mxu1  ;;  %v2985_v43 = vpop.f32.mrb[57].mxu0 }
 0x15e   :  { %v4006_v45 = vadd.f32 %v733_v42, %v640_v41  ;;  %v3007_v47 = vpop.f32.mrb[57].mxu1  ;;  %v643_v48 = vpop.f32.mrb[58].mxu0 }
 0x15f   :  { %v736_v50 = vpop.f32.mrb[58].mxu1  ;;  %v2986_v8 = vpop.f32.mrb[59].mxu0 }
 0x160   :  { %v3008_v51 = vpop.f32.mrb[59].mxu1 }
 0x164   :  { %v814_v54 = vpop.f32.mrb[60].mxu0 }
 0x165   :  { %v852_v0 = vadd.f32 %v814_v54, %v3962_v16  ;;  %v936_v2 = vpop.f32.mrb[60].mxu1  ;;  %v3013_v3 = vpop.f32.mrb[61].mxu0  ;;  %v1992_v16 = vadd.f32 %v1991_v9, %v3857_v15  ;;  %v2010_v54 = vrot.slane %v2009_v34, 4 }
 0x166   :  { %v3035_v4 = vpop.f32.mrb[61].mxu1  ;;  %v817_v5 = vpop.f32.mrb[62].mxu0 }
 0x167   :  { %v974_v11 = vadd.f32 %v936_v2, %v852_v0  ;;  %v853_v12 = vadd.f32 %v817_v5, %v3965_v24  ;;  %v939_v17 = vpop.f32.mrb[62].mxu1  ;;  %v3014_v18 = vpop.f32.mrb[63].mxu0  ;;  %v1993_v42 = vrot.slane %v1992_v16, 4  ;;  %v2011_v9 = vadd.f32 %v2010_v54, %v2009_v34 }
 0x168   :  { %v3036_v19 = vpop.f32.mrb[63].mxu1 }
 0x169   :  { %v4016_v1 = vadd.f32 %v3796_v13, %v974_v11  ;;  %v975_v55 = vadd.f32 %v939_v17, %v853_v12  ;;  %v1994_v3 = vadd.f32 %v1993_v42, %v1992_v16  ;;  %v2012_v42 = vrot.slane %v2011_v9, 2 }
 0x16b   :  { %v2017_v26 = vmul.f32 %v3790_v7, %v4016_v1  ;;  %v4022_v30 = vadd.f32 %v3796_v13, %v975_v55  ;;  %v1995_v55 = vrot.slane %v1994_v3, 2 }
 0x16c   :  { %v822_v24 = vpop.f32.mrb[64].mxu0 }
 0x16d   :  { %v2018_v35 = vmul.f32 %v3804_v25, %v4022_v30  ;;  %v854_v57 = vadd.f32 %v822_v24, %v3984_v40  ;;  %v944_v39 = vpop.f32.mrb[64].mxu1  ;;  %v3017_v41 = vpop.f32.mrb[65].mxu0  ;;  %v2034_v43 = vmul.f32 %v2017_v26, %v4016_v1 }
 0x16e   :  { %v3039_v15 = vpop.f32.mrb[65].mxu1  ;;  %v825_v47 = vpop.f32.mrb[66].mxu0 }
 0x16f   :  { %v2022_v48 = vadd.f32 %v2018_v35, %v2017_v26  ;;  %v2035_v50 = vmul.f32 %v2018_v35, %v4022_v30  ;;  %v976_v8 = vadd.f32 %v944_v39, %v854_v57  ;;  %v855_v51 = vadd.f32 %v825_v47, %v3986_v46  ;;  %v947_v21 = vpop.f32.mrb[66].mxu1  ;;  %v3018_v53 = vpop.f32.mrb[67].mxu0 }
 0x170   :  { %v3040_v59 = vpop.f32.mrb[67].mxu1 }
 0x171   :  { %v2039_v0 = vadd.f32 %v2035_v50, %v2034_v43  ;;  %v4032_v40 = vadd.f32 %v3796_v13, %v976_v8  ;;  %v977_v2 = vadd.f32 %v947_v21, %v855_v51  ;;  %v1996_v50 = vadd.f32 %v1995_v55, %v1994_v3 }
 0x172   :  { %v2013_v51 = vadd.f32 %v2012_v42, %v2011_v9 }
 0x173   :  { %v2019_v4 = vmul.f32 %v3819_v33, %v4032_v40  ;;  %v4037_v5 = vadd.f32 %v3796_v13, %v977_v2 }
 0x174   :  { %v830_v11 = vpop.f32.mrb[68].mxu0  ;;  %v2014_v55 = vrot.slane %v2013_v51, 1 }
 0x175   :  { %v2023_v12 = vadd.f32 %v2022_v48, %v2019_v4  ;;  %v2036_v46 = vmul.f32 %v2019_v4, %v4032_v40  ;;  %v2020_v17 = vmul.f32 %v3837_v56, %v4037_v5  ;;  %v856_v18 = vadd.f32 %v830_v11, %v3996_v10  ;;  %v952_v19 = vpop.f32.mrb[68].mxu1  ;;  %v3021_v22 = vpop.f32.mrb[69].mxu0 }
 0x176   :  { %v3043_v16 = vpop.f32.mrb[69].mxu1  ;;  %v833_v26 = vpop.f32.mrb[70].mxu0 }
 0x177   :  { %v2040_v24 = vadd.f32 %v2039_v0, %v2036_v46  ;;  %v2024_v35 = vadd.f32 %v2023_v12, %v2020_v17  ;;  %v2037_v57 = vmul.f32 %v2020_v17, %v4037_v5  ;;  %v978_v39 = vadd.f32 %v952_v19, %v856_v18  ;;  %v955_v34 = vpop.f32.mrb[70].mxu1  ;;  %v3022_v41 = vpop.f32.mrb[71].mxu0 }
 0x178   :  { %v857_v43 = vadd.f32 %v833_v26, %v3998_v20  ;;  %v3044_v15 = vpop.f32.mrb[71].mxu1  ;;  %v1997_v46 = vrot.slane %v1996_v50, 1 }
 0x179   :  { %v2041_v47 = vadd.f32 %v2040_v24, %v2037_v57  ;;  %v4046_v48 = vadd.f32 %v3796_v13, %v978_v39  ;;  %v2015_v15 = vadd.f32 %v2014_v55, %v2013_v51 }
 0x17a   :  { %v979_v10 = vadd.f32 %v955_v34, %v857_v43  ;;  %v1998_v42 = vadd.f32 %v1997_v46, %v1996_v50 }
 0x17b   :  { %v2021_v8 = vmul.f32 %v3916_v60, %v4046_v48  ;;  %v2211_v4 = vmul.f32 %v3854_v6, %v4046_v48 }
 0x17c   :  { %v4051_v21 = vadd.f32 %v3796_v13, %v979_v10  ;;  %v838_v53 = vpop.f32.mrb[72].mxu0 }
 0x17d   :  { %v2025_v54 = vsel %vm1990_vm2, %v2021_v8, 0.0  ;;  %v2038_v59 = vmul.f32 %v2021_v8, %v4046_v48  ;;  %v960_v20 = vpop.f32.mrb[72].mxu1  ;;  %v3025_v0 = vpop.f32.mrb[73].mxu0  ;;  %v858_v11 = vadd.f32 %v838_v53, %v4002_v28  ;;  %v2247_v41 = vmul.f32 %v2211_v4, %v4046_v48 }
 0x17e   :  { %4509 = vst [vmem:[#allocation5_spill] sm:$0xff] %v4051_v21  ;;  %v2026_v2 = vadd.f32 %v2025_v54, %v2024_v35  ;;  %v2212_v3 = vmul.f32 %v3883_v27, %v4051_v21  ;;  %v3047_v9 = vpop.f32.mrb[73].mxu1  ;;  %v841_v12 = vpop.f32.mrb[74].mxu0  ;;  %v2221_v54 = vrot.slane %v2211_v4, 4 }
 0x17f   :  { %v2042_v17 = vsel %vm1990_vm2, %v2038_v59, 0.0  ;;  %v859_v18 = vadd.f32 %v841_v12, %v4004_v36  ;;  %v963_v19 = vpop.f32.mrb[74].mxu1  ;;  %v3026_v22 = vpop.f32.mrb[75].mxu0  ;;  %v980_v35 = vadd.f32 %v960_v20, %v858_v11  ;;  %v2257_v12 = vrot.slane %v2247_v41, 4 }
 0x180   :  { %v2027_v16 = vrot.slane %v2026_v2, 4  ;;  %v2043_v26 = vadd.f32 %v2042_v17, %v2041_v47  ;;  %v3048_v24 = vpop.f32.mrb[75].mxu1  ;;  %v2248_v28 = vmul.f32 %v2212_v3, %v4051_v21  ;;  %v2222_v47 = vrot.slane %v2212_v3, 4 }
 0x181   :  { %v981_v57 = vadd.f32 %v963_v19, %v859_v18  ;;  %v4065_v43 = vadd.f32 %v3796_v13, %v980_v35 }
 0x182   :  { %v2028_v39 = vadd.f32 %v2027_v16, %v2026_v2  ;;  %v2044_v34 = vrot.slane %v2043_v26, 4  ;;  %v2258_v46 = vrot.slane %v2248_v28, 4 }
 0x183   :  { %4510 = vst [vmem:[#allocation6_spill] sm:$0xff] %v4065_v43  ;;  %v4068_v36 = vadd.f32 %v3796_v13, %v981_v57  ;;  %v2213_v59 = vmul.f32 %v3909_v58, %v4065_v43 }
 0x184   :  { %v2029_v10 = vrot.slane %v2028_v39, 2  ;;  %v2045_v8 = vadd.f32 %v2044_v34, %v2043_v26  ;;  %v846_v53 = vpop.f32.mrb[76].mxu0 }
 0x185   :  { %4511 = vst [vmem:[#allocation7_spill] sm:$0xff] %v4068_v36  ;;  %v2214_v20 = vmul.f32 %v3905_v38, %v4068_v36  ;;  %v860_v50 = vadd.f32 %v846_v53, %v4006_v45  ;;  %v968_v0 = vpop.f32.mrb[76].mxu1  ;;  %v3029_v2 = vpop.f32.mrb[77].mxu0  ;;  %v2224_v18 = vrot.slane %v2213_v59, 4  ;;  %v2249_v3 = vmul.f32 %v2213_v59, %v4065_v43 }
 0x186   :  { %v2030_v11 = vadd.f32 %v2029_v10, %v2028_v39  ;;  %v2046_v9 = vrot.slane %v2045_v8, 2  ;;  %v3051_v51 = vpop.f32.mrb[77].mxu1  ;;  %v849_v17 = vpop.f32.mrb[78].mxu0  ;;  %v2223_v45 = vsel %vm1990_vm2, %v2221_v54, %v2222_v47 }
 0x187   :  { %v2226_v4 = vrot.slane %v2214_v20, 4  ;;  %v2250_v19 = vmul.f32 %v2214_v20, %v4068_v36  ;;  %v971_v22 = vpop.f32.mrb[78].mxu1  ;;  %v3030_v55 = vpop.f32.mrb[79].mxu0  ;;  %v982_v24 = vadd.f32 %v968_v0, %v860_v50  ;;  %v2225_v57 = vsel %vm1990_vm2, %v2222_v47, %v2224_v18 }
 0x188   :  { %v2031_v16 = vrot.slane %v2030_v11, 1  ;;  %v2047_v26 = vadd.f32 %v2046_v9, %v2045_v8  ;;  %v3052_v35 = vpop.f32.mrb[79].mxu1  ;;  %v2260_v39 = vrot.slane %v2249_v3, 4  ;;  %v2235_v53 = vadd.f32 %v2225_v57, %v2223_v45 }
 0x189   :  { %v2227_v34 = vsel %vm1990_vm2, %v2224_v18, %v2226_v4  ;;  %v2262_v41 = vrot.slane %v2250_v19, 4  ;;  %v4081_v59 = vadd.f32 %v3796_v13, %v982_v24  ;;  %v2168_v20 = vrot.slane %v3975_v29, 4 }
 0x18a   :  { %v2032_v28 = vadd.f32 %v2031_v16, %v2030_v11  ;;  %v2048_v10 = vrot.slane %v2047_v26, 1  ;;  %v2259_v8 = vsel %vm1990_vm2, %v2257_v12, %v2258_v46  ;;  %v2261_v54 = vsel %vm1990_vm2, %v2258_v46, %v2260_v39 }
 0x18b   :  { %4512 = vst [vmem:[#allocation8_spill] sm:$0xff] %v4081_v59  ;;  %v2263_v50 = vsel %vm1990_vm2, %v2260_v39, %v2262_v41  ;;  %v2271_v2 = vadd.f32 %v2261_v54, %v2259_v8  ;;  %v2236_v9 = vadd.f32 %v2235_v53, %v2227_v34  ;;  %v2215_v11 = vmul.f32 %v3939_v37, %v4081_v59 }
 0x18c   :  { %v4087_v0 = vadd.f32 %v2032_v28, %v1998_v42  ;;  %v2049_v47 = vadd.f32 %v2048_v10, %v2047_v26  ;;  %v1088_v51 = vpop.f32.mrb[80].mxu0  ;;  %v2204_v3 = vrot.slane %v3982_v44, 4  ;;  %v2169_v24 = vadd.f32 %v2168_v20, %v3975_v29 }
 0x18d   :  { %v1181_v17 = vpop.f32.mrb[80].mxu1  ;;  %v3057_v18 = vpop.f32.mrb[81].mxu0  ;;  %v2272_v12 = vadd.f32 %v2271_v2, %v2263_v50  ;;  %v2228_v42 = vrot.slane %v2215_v11, 4  ;;  %v2251_v16 = vmul.f32 %v2215_v11, %v4081_v59 }
 0x18e   :  { %v4092_v19 = vadd.f32 %v2049_v47, %v2015_v15  ;;  %v4094_v22 = vadd.f32 %v1181_v17, %v1088_v51  ;;  %v3079_v46 = vpop.f32.mrb[81].mxu1  ;;  %v1091_v55 = vpop.f32.mrb[82].mxu0  ;;  %v2205_v15 = vadd.f32 %v2204_v3, %v3982_v44  ;;  %v2170_v8 = vrot.slane %v2169_v24, 2 }
 0x18f   :  { %v1184_v26 = vpop.f32.mrb[82].mxu1  ;;  %v3058_v45 = vpop.f32.mrb[83].mxu0  ;;  %v2229_v39 = vsel %vm1990_vm2, %v2226_v4, %v2228_v42  ;;  %v2264_v34 = vrot.slane %v2251_v16, 4  ;;  %v2238_v10 = vsel %vm1990_vm2, %v2228_v42, 0.0 }
 0x190   :  { %v4098_v35 = vadd.f32 %v1184_v26, %v1091_v55  ;;  %v3080_v57 = vpop.f32.mrb[83].mxu1  ;;  %v2237_v28 = vadd.f32 %v2236_v9, %v2229_v39  ;;  %v2206_v51 = vrot.slane %v2205_v15, 2  ;;  %v2171_v46 = vadd.f32 %v2170_v8, %v2169_v24 }
 0x191   :  { %v2265_v53 = vsel %vm1990_vm2, %v2262_v41, %v2264_v34  ;;  %v2274_v2 = vsel %vm1990_vm2, %v2264_v34, 0.0 }
 0x192   :  { %v2239_v54 = vadd.f32 %v2238_v10, %v2237_v28  ;;  %v2273_v50 = vadd.f32 %v2272_v12, %v2265_v53  ;;  %v2207_v16 = vadd.f32 %v2206_v51, %v2205_v15  ;;  %v2172_v57 = vrot.slane %v2171_v46, 1 }
 0x194   :  { %v1096_v47 = vpop.f32.mrb[84].mxu0  ;;  %v2240_v11 = vrot.slane %v2239_v54, 4  ;;  %v2275_v17 = vadd.f32 %v2274_v2, %v2273_v50  ;;  %v2208_v50 = vrot.slane %v2207_v16, 1 }
 0x195   :  { %v1189_v29 = vpop.f32.mrb[84].mxu1  ;;  %v3061_v20 = vpop.f32.mrb[85].mxu0 }
 0x196   :  { %v4105_v4 = vadd.f32 %v1189_v29, %v1096_v47  ;;  %v3083_v18 = vpop.f32.mrb[85].mxu1  ;;  %v1099_v44 = vpop.f32.mrb[86].mxu0  ;;  %v2241_v55 = vadd.f32 %v2240_v11, %v2239_v54  ;;  %v2276_v41 = vrot.slane %v2275_v17, 4  ;;  %v2173_v11 = vadd.f32 %v2172_v57, %v2171_v46 }
 0x197   :  { %v1192_v9 = vpop.f32.mrb[86].mxu1  ;;  %v3062_v3 = vpop.f32.mrb[87].mxu0 }
 0x198   :  { %v4107_v42 = vadd.f32 %v1192_v9, %v1099_v44  ;;  %v3084_v12 = vpop.f32.mrb[87].mxu1  ;;  %v2242_v26 = vrot.slane %v2241_v55, 2  ;;  %v2277_v45 = vadd.f32 %v2276_v41, %v2275_v17  ;;  %v2209_v44 = vadd.f32 %v2208_v50, %v2207_v16 }
 0x19a   :  { %v2243_v39 = vadd.f32 %v2242_v26, %v2241_v55  ;;  %v2278_v34 = vrot.slane %v2277_v45, 2 }
 0x19c   :  { %v1104_v28 = vpop.f32.mrb[88].mxu0  ;;  %v2244_v47 = vrot.slane %v2243_v39, 1  ;;  %v2279_v2 = vadd.f32 %v2278_v34, %v2277_v45 }
 0x19d   :  { %v1197_v10 = vpop.f32.mrb[88].mxu1  ;;  %v3065_v53 = vpop.f32.mrb[89].mxu0 }
 0x19e   :  { %v4109_v29 = vadd.f32 %v1197_v10, %v1104_v28  ;;  %v3087_v24 = vpop.f32.mrb[89].mxu1  ;;  %v1107_v8 = vpop.f32.mrb[90].mxu0  ;;  %v2245_v18 = vadd.f32 %v2244_v47, %v2243_v39  ;;  %v2280_v15 = vrot.slane %v2279_v2, 1 }
 0x19f   :  { %v1200_v54 = vpop.f32.mrb[90].mxu1  ;;  %v3066_v20 = vpop.f32.mrb[91].mxu0 }
 0x1a0   :  { %v4111_v51 = vadd.f32 %v1200_v54, %v1107_v8  ;;  %v3088_v17 = vpop.f32.mrb[91].mxu1  ;;  %v4113_v9 = vadd.f32 %v2245_v18, %v2173_v11  ;;  %v2281_v3 = vadd.f32 %v2280_v15, %v2279_v2 }
 0x1a2   :  { %v4115_v55 = vadd.f32 %v2281_v3, %v2209_v44 }
 0x1a4   :  { %v1112_v41 = vpop.f32.mrb[92].mxu0 }
 0x1a5   :  { %v1205_v12 = vpop.f32.mrb[92].mxu1  ;;  %v3069_v26 = vpop.f32.mrb[93].mxu0 }
 0x1a6   :  { %v4117_v45 = vadd.f32 %v1205_v12, %v1112_v41  ;;  %v3091_v34 = vpop.f32.mrb[93].mxu1  ;;  %v1115_v28 = vpop.f32.mrb[94].mxu0 }
 0x1a7   :  { %v1208_v10 = vpop.f32.mrb[94].mxu1  ;;  %v3070_v46 = vpop.f32.mrb[95].mxu0 }
 0x1a8   :  { %v4119_v57 = vadd.f32 %v1208_v10, %v1115_v28  ;;  %v3092_v39 = vpop.f32.mrb[95].mxu1 }
 0x1ac   :  { %v1120_v53 = vpop.f32.mrb[96].mxu0 }
 0x1ad   :  { %v1213_v47 = vpop.f32.mrb[96].mxu1  ;;  %v3073_v16 = vpop.f32.mrb[97].mxu0 }
 0x1ae   :  { %v4121_v50 = vadd.f32 %v1213_v47, %v1120_v53  ;;  %v3095_v2 = vpop.f32.mrb[97].mxu1  ;;  %v1123_v24 = vpop.f32.mrb[98].mxu0 }
 0x1af   :  { %v1216_v8 = vpop.f32.mrb[98].mxu1  ;;  %v3074_v54 = vpop.f32.mrb[99].mxu0 }
 0x1b0   :  { %v3096_v20 = vpop.f32.mrb[99].mxu1 }
 0x1b4   :  { %v1294_v11 = vpop.f32.mrb[100].mxu0 }
 0x1b5   :  { %v1332_v18 = vadd.f32 %v1294_v11, %v4094_v22  ;;  %v1416_v15 = vpop.f32.mrb[100].mxu1  ;;  %v3101_v17 = vpop.f32.mrb[101].mxu0 }
 0x1b6   :  { %v3123_v44 = vpop.f32.mrb[101].mxu1  ;;  %v1297_v3 = vpop.f32.mrb[102].mxu0 }
 0x1b7   :  { %v1454_v41 = vadd.f32 %v1416_v15, %v1332_v18  ;;  %v1333_v12 = vadd.f32 %v1297_v3, %v4098_v35  ;;  %v1419_v26 = vpop.f32.mrb[102].mxu1  ;;  %v3102_v34 = vpop.f32.mrb[103].mxu0 }
 0x1b8   :  { %v3124_v28 = vpop.f32.mrb[103].mxu1 }
 0x1b9   :  { %v4126_v10 = vadd.f32 %v3796_v13, %v1454_v41  ;;  %v1455_v46 = vadd.f32 %v1419_v26, %v1333_v12 }
 0x1bb   :  { %v2051_v39 = vmul.f32 %v3790_v7, %v4126_v10  ;;  %v4131_v53 = vadd.f32 %v3796_v13, %v1455_v46 }
 0x1bc   :  { %v1302_v22 = vpop.f32.mrb[104].mxu0 }
 0x1bd   :  { %v2052_v47 = vmul.f32 %v3804_v25, %v4131_v53  ;;  %v1334_v16 = vadd.f32 %v1302_v22, %v4105_v4  ;;  %v1424_v35 = vpop.f32.mrb[104].mxu1  ;;  %v3105_v2 = vpop.f32.mrb[105].mxu0  ;;  %v2068_v24 = vmul.f32 %v2051_v39, %v4126_v10  ;;  %v4142_v4 = vld [vmem:[%s4500_s3] ss:$0 sm:$0xff] }
 0x1be   :  { %v3127_v8 = vpop.f32.mrb[105].mxu1  ;;  %v1305_v54 = vpop.f32.mrb[106].mxu0 }
 0x1bf   :  { %v2056_v20 = vadd.f32 %v2052_v47, %v2051_v39  ;;  %v2069_v11 = vmul.f32 %v2052_v47, %v4131_v53  ;;  %v1456_v18 = vadd.f32 %v1424_v35, %v1334_v16  ;;  %v1335_v15 = vadd.f32 %v1305_v54, %v4107_v42  ;;  %v1427_v13 = vpop.f32.mrb[106].mxu1  ;;  %v3106_v17 = vpop.f32.mrb[107].mxu0 }
 0x1c0   :  { %v3128_v44 = vpop.f32.mrb[107].mxu1 }
 0x1c1   :  { %v2073_v3 = vadd.f32 %v2069_v11, %v2068_v24  ;;  %v4145_v41 = vadd.f32 %v4142_v4, %v1456_v18  ;;  %v1457_v12 = vadd.f32 %v1427_v13, %v1335_v15 }
 0x1c3   :  { %v2053_v26 = vmul.f32 %v3819_v33, %v4145_v41  ;;  %v4150_v34 = vadd.f32 %v4142_v4, %v1457_v12 }
 0x1c4   :  { %v1310_v42 = vpop.f32.mrb[108].mxu0 }
 0x1c5   :  { %v2057_v28 = vadd.f32 %v2056_v20, %v2053_v26  ;;  %v2070_v46 = vmul.f32 %v2053_v26, %v4145_v41  ;;  %v2054_v39 = vmul.f32 %v3837_v56, %v4150_v34  ;;  %v1336_v22 = vadd.f32 %v1310_v42, %v4109_v29  ;;  %v1432_v47 = vpop.f32.mrb[108].mxu1  ;;  %v3109_v16 = vpop.f32.mrb[109].mxu0 }
 0x1c6   :  { %v3131_v35 = vpop.f32.mrb[109].mxu1  ;;  %v1313_v2 = vpop.f32.mrb[110].mxu0 }
 0x1c7   :  { %v2074_v24 = vadd.f32 %v2073_v3, %v2070_v46  ;;  %v2058_v8 = vadd.f32 %v2057_v28, %v2054_v39  ;;  %v2071_v54 = vmul.f32 %v2054_v39, %v4150_v34  ;;  %v1458_v11 = vadd.f32 %v1432_v47, %v1336_v22  ;;  %v1435_v18 = vpop.f32.mrb[110].mxu1  ;;  %v3110_v15 = vpop.f32.mrb[111].mxu0 }
 0x1c8   :  { %v1337_v20 = vadd.f32 %v1313_v2, %v4111_v51  ;;  %v3132_v13 = vpop.f32.mrb[111].mxu1 }
 0x1c9   :  { %v2075_v17 = vadd.f32 %v2074_v24, %v2071_v54  ;;  %v4159_v44 = vadd.f32 %v4142_v4, %v1458_v11 }
 0x1ca   :  { %v1459_v12 = vadd.f32 %v1435_v18, %v1337_v20 }
 0x1cb   :  { %v2055_v29 = vmul.f32 %v3916_v60, %v4159_v44  ;;  %v2283_v22 = vmul.f32 %v3854_v6, %v4159_v44 }
 0x1cc   :  { %v4164_v26 = vadd.f32 %v4142_v4, %v1459_v12  ;;  %v1318_v3 = vpop.f32.mrb[112].mxu0 }
 0x1cd   :  { %v2059_v42 = vsel %vm1990_vm2, %v2055_v29, 0.0  ;;  %v2072_v28 = vmul.f32 %v2055_v29, %v4159_v44  ;;  %v1440_v46 = vpop.f32.mrb[112].mxu1  ;;  %v3113_v39 = vpop.f32.mrb[113].mxu0  ;;  %v1338_v16 = vadd.f32 %v1318_v3, %v4117_v45 }
 0x1ce   :  { %4513 = vst [vmem:[#allocation9_spill] sm:$0xff] %v4164_v26  ;;  %v2060_v51 = vadd.f32 %v2059_v42, %v2058_v8  ;;  %v2284_v47 = vmul.f32 %v3883_v27, %v4164_v26  ;;  %v3135_v35 = vpop.f32.mrb[113].mxu1  ;;  %v1321_v2 = vpop.f32.mrb[114].mxu0  ;;  %v2319_v39 = vmul.f32 %v2283_v22, %v4159_v44 }
 0x1cf   :  { %v2076_v24 = vsel %vm1990_vm2, %v2072_v28, 0.0  ;;  %v1339_v54 = vadd.f32 %v1321_v2, %v4119_v57  ;;  %v1443_v11 = vpop.f32.mrb[114].mxu1  ;;  %v3114_v18 = vpop.f32.mrb[115].mxu0  ;;  %v1460_v8 = vadd.f32 %v1440_v46, %v1338_v16 }
 0x1d0   :  { %v2061_v15 = vrot.slane %v2060_v51, 4  ;;  %v2077_v20 = vadd.f32 %v2076_v24, %v2075_v17  ;;  %v3136_v13 = vpop.f32.mrb[115].mxu1  ;;  %v2320_v59 = vmul.f32 %v2284_v47, %v4164_v26  ;;  %v2294_v35 = vrot.slane %v2284_v47, 4 }
 0x1d1   :  { %v1461_v12 = vadd.f32 %v1443_v11, %v1339_v54  ;;  %v4178_v45 = vadd.f32 %v4142_v4, %v1460_v8  ;;  %v2293_v17 = vrot.slane %v2283_v22, 4 }
 0x1d2   :  { %v2062_v29 = vadd.f32 %v2061_v15, %v2060_v51  ;;  %v2078_v42 = vrot.slane %v2077_v20, 4  ;;  %v2329_v15 = vrot.slane %v2319_v39, 4  ;;  %v2330_v13 = vrot.slane %v2320_v59, 4 }
 0x1d3   :  { %4514 = vst [vmem:[#allocation10_spill] sm:$0xff] %v4178_v45  ;;  %v4181_v3 = vadd.f32 %v4142_v4, %v1461_v12  ;;  %v2285_v46 = vmul.f32 %v3909_v58, %v4178_v45 }
 0x1d4   :  { %v2063_v57 = vrot.slane %v2062_v29, 2  ;;  %v2079_v28 = vadd.f32 %v2078_v42, %v2077_v20  ;;  %v1326_v2 = vpop.f32.mrb[116].mxu0 }
 0x1d5   :  { %v2286_v51 = vmul.f32 %v3905_v38, %v4181_v3  ;;  %v1340_v16 = vadd.f32 %v1326_v2, %v4121_v50  ;;  %v1448_v24 = vpop.f32.mrb[116].mxu1  ;;  %v3117_v54 = vpop.f32.mrb[117].mxu0  ;;  %v2296_v20 = vrot.slane %v2285_v46, 4  ;;  %v2321_v47 = vmul.f32 %v2285_v46, %v4178_v45 }
 0x1d6   :  { %v2064_v11 = vadd.f32 %v2063_v57, %v2062_v29  ;;  %v2080_v18 = vrot.slane %v2079_v28, 2  ;;  %v3139_v8 = vpop.f32.mrb[117].mxu1  ;;  %v1329_v12 = vpop.f32.mrb[118].mxu0  ;;  %v2295_v50 = vsel %vm1990_vm2, %v2293_v17, %v2294_v35 }
 0x1d7   :  { %v2298_v22 = vrot.slane %v2286_v51, 4  ;;  %v2322_v42 = vmul.f32 %v2286_v51, %v4181_v3  ;;  %v1451_v26 = vpop.f32.mrb[118].mxu1  ;;  %v3118_v36 = vpop.f32.mrb[119].mxu0  ;;  %v1462_v2 = vadd.f32 %v1448_v24, %v1340_v16  ;;  %v2297_v29 = vsel %vm1990_vm2, %v2294_v35, %v2296_v20 }
 0x1d8   :  { %v2065_v43 = vrot.slane %v2064_v11, 1  ;;  %v2081_v21 = vadd.f32 %v2080_v18, %v2079_v28  ;;  %v3140_v54 = vpop.f32.mrb[119].mxu1  ;;  %v2332_v39 = vrot.slane %v2321_v47, 4  ;;  %v2307_v46 = vadd.f32 %v2297_v29, %v2295_v50 }
 0x1d9   :  { %v2299_v59 = vsel %vm1990_vm2, %v2296_v20, %v2298_v22  ;;  %v2334_v57 = vrot.slane %v2322_v42, 4  ;;  %v4194_v45 = vadd.f32 %v4142_v4, %v1462_v2  ;;  %v2331_v36 = vsel %vm1990_vm2, %v2329_v15, %v2330_v13 }
 0x1da   :  { %v2066_v8 = vadd.f32 %v2065_v43, %v2064_v11  ;;  %v2082_v12 = vrot.slane %v2081_v21, 1  ;;  %v2333_v26 = vsel %vm1990_vm2, %v2330_v13, %v2332_v39  ;;  %v2308_v16 = vadd.f32 %v2307_v46, %v2299_v59 }
 0x1db   :  { %v2335_v28 = vsel %vm1990_vm2, %v2332_v39, %v2334_v57  ;;  %v2343_v51 = vadd.f32 %v2333_v26, %v2331_v36  ;;  %v2287_v43 = vmul.f32 %v3939_v37, %v4194_v45 }
 0x1dc   :  { %v4200_v17 = vadd.f32 %v2066_v8, %v4087_v0  ;;  %v2083_v35 = vadd.f32 %v2082_v12, %v2081_v21  ;;  %v1568_v24 = vpop.f32.mrb[120].mxu0 }
 0x1dd   :  { %v1661_v11 = vpop.f32.mrb[120].mxu1  ;;  %v3145_v18 = vpop.f32.mrb[121].mxu0  ;;  %v2344_v15 = vadd.f32 %v2343_v51, %v2335_v28  ;;  %v2300_v50 = vrot.slane %v2287_v43, 4  ;;  %v2323_v0 = vmul.f32 %v2287_v43, %v4194_v45 }
 0x1de   :  { %v4205_v20 = vadd.f32 %v2083_v35, %v4092_v19  ;;  %v4207_v47 = vadd.f32 %v1661_v11, %v1568_v24  ;;  %v3167_v13 = vpop.f32.mrb[121].mxu1  ;;  %v1571_v42 = vpop.f32.mrb[122].mxu0 }
 0x1df   :  { %v1664_v21 = vpop.f32.mrb[122].mxu1  ;;  %v3146_v2 = vpop.f32.mrb[123].mxu0  ;;  %v2301_v39 = vsel %vm1990_vm2, %v2298_v22, %v2300_v50  ;;  %v2336_v59 = vrot.slane %v2323_v0, 4  ;;  %v2310_v19 = vsel %vm1990_vm2, %v2300_v50, 0.0 }
 0x1e0   :  { %v4210_v54 = vadd.f32 %v1664_v21, %v1571_v42  ;;  %v3168_v29 = vpop.f32.mrb[123].mxu1  ;;  %v2309_v8 = vadd.f32 %v2308_v16, %v2301_v39 }
 0x1e1   :  { %v2337_v12 = vsel %vm1990_vm2, %v2334_v57, %v2336_v59  ;;  %v2346_v28 = vsel %vm1990_vm2, %v2336_v59, 0.0 }
 0x1e2   :  { %v2311_v46 = vadd.f32 %v2310_v19, %v2309_v8  ;;  %v2345_v36 = vadd.f32 %v2344_v15, %v2337_v12 }
 0x1e4   :  { %v1576_v26 = vpop.f32.mrb[124].mxu0  ;;  %v2312_v24 = vrot.slane %v2311_v46, 4  ;;  %v2347_v43 = vadd.f32 %v2346_v28, %v2345_v36 }
 0x1e5   :  { %v1669_v35 = vpop.f32.mrb[124].mxu1  ;;  %v3149_v51 = vpop.f32.mrb[125].mxu0 }
 0x1e6   :  { %v4216_v11 = vadd.f32 %v1669_v35, %v1576_v26  ;;  %v3171_v18 = vpop.f32.mrb[125].mxu1  ;;  %v1579_v13 = vpop.f32.mrb[126].mxu0  ;;  %v2313_v16 = vadd.f32 %v2312_v24, %v2311_v46  ;;  %v2348_v0 = vrot.slane %v2347_v43, 4 }
 0x1e7   :  { %v1672_v22 = vpop.f32.mrb[126].mxu1  ;;  %v3150_v42 = vpop.f32.mrb[127].mxu0 }
 0x1e8   :  { %v4218_v50 = vadd.f32 %v1672_v22, %v1579_v13  ;;  %v3172_v57 = vpop.f32.mrb[127].mxu1  ;;  %v2314_v21 = vrot.slane %v2313_v16, 2  ;;  %v2349_v15 = vadd.f32 %v2348_v0, %v2347_v43 }
 0x1ea   :  { %v2315_v2 = vadd.f32 %v2314_v21, %v2313_v16  ;;  %v2350_v29 = vrot.slane %v2349_v15, 2 }
 0x1ec   :  { %v1584_v39 = vpop.f32.mrb[128].mxu0  ;;  %v2316_v19 = vrot.slane %v2315_v2, 1  ;;  %v2351_v12 = vadd.f32 %v2350_v29, %v2349_v15 }
 0x1ed   :  { %v1677_v59 = vpop.f32.mrb[128].mxu1  ;;  %v3153_v8 = vpop.f32.mrb[129].mxu0 }
 0x1ee   :  { %v4220_v36 = vadd.f32 %v1677_v59, %v1584_v39  ;;  %v3175_v26 = vpop.f32.mrb[129].mxu1  ;;  %v1587_v28 = vpop.f32.mrb[130].mxu0  ;;  %v2317_v46 = vadd.f32 %v2316_v19, %v2315_v2  ;;  %v2352_v24 = vrot.slane %v2351_v12, 1 }
 0x1ef   :  { %v1680_v35 = vpop.f32.mrb[130].mxu1  ;;  %v3154_v51 = vpop.f32.mrb[131].mxu0 }
 0x1f0   :  { %v4222_v18 = vadd.f32 %v1680_v35, %v1587_v28  ;;  %v3176_v13 = vpop.f32.mrb[131].mxu1  ;;  %v4225_v43 = vadd.f32 %v2317_v46, %v4113_v9  ;;  %v2353_v22 = vadd.f32 %v2352_v24, %v2351_v12 }
 0x1f2   :  { %v4228_v42 = vadd.f32 %v2353_v22, %v4115_v55 }
 0x1f4   :  { %v1592_v16 = vpop.f32.mrb[132].mxu0 }
 0x1f5   :  { %v1685_v0 = vpop.f32.mrb[132].mxu1  ;;  %v3157_v57 = vpop.f32.mrb[133].mxu0 }
 0x1f6   :  { %v4230_v21 = vadd.f32 %v1685_v0, %v1592_v16  ;;  %v3179_v15 = vpop.f32.mrb[133].mxu1  ;;  %v1595_v29 = vpop.f32.mrb[134].mxu0 }
 0x1f7   :  { %v1688_v39 = vpop.f32.mrb[134].mxu1  ;;  %v3158_v2 = vpop.f32.mrb[135].mxu0 }
 0x1f8   :  { %v4232_v59 = vadd.f32 %v1688_v39, %v1595_v29  ;;  %v3180_v8 = vpop.f32.mrb[135].mxu1 }
 0x1fc   :  { %v1600_v19 = vpop.f32.mrb[136].mxu0 }
 0x1fd   :  { %v1693_v26 = vpop.f32.mrb[136].mxu1  ;;  %v3161_v9 = vpop.f32.mrb[137].mxu0 }
 0x1fe   :  { %v4234_v28 = vadd.f32 %v1693_v26, %v1600_v19  ;;  %v3183_v12 = vpop.f32.mrb[137].mxu1  ;;  %v1603_v55 = vpop.f32.mrb[138].mxu0 }
 0x1ff   :  { %v1696_v35 = vpop.f32.mrb[138].mxu1  ;;  %v3162_v51 = vpop.f32.mrb[139].mxu0 }
 0x200   :  { %v3184_v46 = vpop.f32.mrb[139].mxu1 }
 0x204   :  { %v1774_v24 = vpop.f32.mrb[140].mxu0 }
 0x205   :  { %v1812_v13 = vadd.f32 %v1774_v24, %v4207_v47  ;;  %v1896_v22 = vpop.f32.mrb[140].mxu1  ;;  %v3189_v16 = vpop.f32.mrb[141].mxu0 }
 0x206   :  { %v3211_v0 = vpop.f32.mrb[141].mxu1  ;;  %v1777_v57 = vpop.f32.mrb[142].mxu0 }
 0x207   :  { %v1934_v15 = vadd.f32 %v1896_v22, %v1812_v13  ;;  %v1813_v29 = vadd.f32 %v1777_v57, %v4210_v54  ;;  %v1899_v39 = vpop.f32.mrb[142].mxu1  ;;  %v3190_v2 = vpop.f32.mrb[143].mxu0 }
 0x208   :  { %v3212_v8 = vpop.f32.mrb[143].mxu1 }
 0x209   :  { %v4239_v19 = vadd.f32 %v4142_v4, %v1934_v15  ;;  %v1935_v26 = vadd.f32 %v1899_v39, %v1813_v29 }
 0x20b   :  { %v2085_v9 = vmul.f32 %v3790_v7, %v4239_v19  ;;  %v4244_v12 = vadd.f32 %v4142_v4, %v1935_v26 }
 0x20c   :  { %v1782_v47 = vpop.f32.mrb[144].mxu0 }
 0x20d   :  { %v2086_v55 = vmul.f32 %v3804_v25, %v4244_v12  ;;  %v1814_v35 = vadd.f32 %v1782_v47, %v4216_v11  ;;  %v1904_v54 = vpop.f32.mrb[144].mxu1  ;;  %v3193_v51 = vpop.f32.mrb[145].mxu0  ;;  %v2102_v46 = vmul.f32 %v2085_v9, %v4239_v19 }
 0x20e   :  { %v3215_v24 = vpop.f32.mrb[145].mxu1  ;;  %v1785_v13 = vpop.f32.mrb[146].mxu0 }
 0x20f   :  { %v2090_v22 = vadd.f32 %v2086_v55, %v2085_v9  ;;  %v2103_v16 = vmul.f32 %v2086_v55, %v4244_v12  ;;  %v1936_v0 = vadd.f32 %v1904_v54, %v1814_v35  ;;  %v1815_v7 = vadd.f32 %v1785_v13, %v4218_v50  ;;  %v1907_v57 = vpop.f32.mrb[146].mxu1  ;;  %v3194_v15 = vpop.f32.mrb[147].mxu0 }
 0x210   :  { %v3216_v29 = vpop.f32.mrb[147].mxu1 }
 0x211   :  { %v2107_v39 = vadd.f32 %v2103_v16, %v2102_v46  ;;  %v4253_v25 = vadd.f32 %v4142_v4, %v1936_v0  ;;  %v1937_v11 = vadd.f32 %v1907_v57, %v1815_v7 }
 0x213   :  { %v2087_v2 = vmul.f32 %v3819_v33, %v4253_v25  ;;  %v4258_v8 = vadd.f32 %v4142_v4, %v1937_v11 }
 0x214   :  { %v1790_v26 = vpop.f32.mrb[148].mxu0 }
 0x215   :  { %v2091_v9 = vadd.f32 %v2090_v22, %v2087_v2  ;;  %v2104_v47 = vmul.f32 %v2087_v2, %v4253_v25  ;;  %v2088_v50 = vmul.f32 %v3837_v56, %v4258_v8  ;;  %v1816_v55 = vadd.f32 %v1790_v26, %v4220_v36  ;;  %v1912_v35 = vpop.f32.mrb[148].mxu1  ;;  %v3197_v54 = vpop.f32.mrb[149].mxu0 }
 0x216   :  { %v3219_v51 = vpop.f32.mrb[149].mxu1  ;;  %v1793_v46 = vpop.f32.mrb[150].mxu0 }
 0x217   :  { %v2108_v24 = vadd.f32 %v2107_v39, %v2104_v47  ;;  %v2092_v13 = vadd.f32 %v2091_v9, %v2088_v50  ;;  %v2105_v33 = vmul.f32 %v2088_v50, %v4258_v8  ;;  %v1938_v16 = vadd.f32 %v1912_v35, %v1816_v55  ;;  %v1915_v0 = vpop.f32.mrb[150].mxu1  ;;  %v3198_v7 = vpop.f32.mrb[151].mxu0 }
 0x218   :  { %v1817_v22 = vadd.f32 %v1793_v46, %v4222_v18  ;;  %v3220_v57 = vpop.f32.mrb[151].mxu1 }
 0x219   :  { %v2109_v15 = vadd.f32 %v2108_v24, %v2105_v33  ;;  %v4267_v29 = vadd.f32 %v4142_v4, %v1938_v16 }
 0x21a   :  { %v1939_v56 = vadd.f32 %v1915_v0, %v1817_v22 }
 0x21b   :  { %v2089_v36 = vmul.f32 %v3916_v60, %v4267_v29  ;;  %v2355_v39 = vmul.f32 %v3854_v6, %v4267_v29 }
 0x21c   :  { %v4274_v11 = vadd.f32 %v4142_v4, %v1939_v56  ;;  %v1798_v2 = vpop.f32.mrb[152].mxu0 }
 0x21d   :  { %v2093_v26 = vsel %vm1990_vm2, %v2089_v36, 0.0  ;;  %v2106_v18 = vmul.f32 %v2089_v36, %v4267_v29  ;;  %v2391_v9 = vmul.f32 %v2355_v39, %v4267_v29  ;;  %v1920_v47 = vpop.f32.mrb[152].mxu1  ;;  %v3201_v50 = vpop.f32.mrb[153].mxu0  ;;  %v1818_v60 = vadd.f32 %v1798_v2, %v4230_v21 }
 0x21e   :  { %v2094_v55 = vadd.f32 %v2093_v26, %v2092_v13  ;;  %v2356_v35 = vmul.f32 %v3883_v27, %v4274_v11  ;;  %v3223_v54 = vpop.f32.mrb[153].mxu1  ;;  %v1801_v6 = vpop.f32.mrb[154].mxu0  ;;  %v2365_v46 = vrot.slane %v2355_v39, 4 }
 0x21f   :  { %v2110_v51 = vsel %vm1990_vm2, %v2106_v18, 0.0  ;;  %v1819_v24 = vadd.f32 %v1801_v6, %v4232_v59  ;;  %v1923_v33 = vpop.f32.mrb[154].mxu1  ;;  %v3202_v16 = vpop.f32.mrb[155].mxu0  ;;  %v2401_v56 = vrot.slane %v2391_v9, 4  ;;  %v1940_v36 = vadd.f32 %v1920_v47, %v1818_v60 }
 0x220   :  { %v2095_v0 = vrot.slane %v2094_v55, 4  ;;  %v2111_v7 = vadd.f32 %v2110_v51, %v2109_v15  ;;  %v2366_v22 = vrot.slane %v2356_v35, 4  ;;  %v2392_v57 = vmul.f32 %v2356_v35, %v4274_v11  ;;  %v3224_v13 = vpop.f32.mrb[155].mxu1 }
 0x221   :  { %v1941_v27 = vadd.f32 %v1923_v33, %v1819_v24  ;;  %v4287_v39 = vadd.f32 %v4142_v4, %v1940_v36 }
 0x222   :  { %v2096_v26 = vadd.f32 %v2095_v0, %v2094_v55  ;;  %v2112_v21 = vrot.slane %v2111_v7, 4  ;;  %v2367_v2 = vsel %vm1990_vm2, %v2365_v46, %v2366_v22  ;;  %v2402_v50 = vrot.slane %v2392_v57, 4 }
 0x223   :  { %v4290_v59 = vadd.f32 %v4142_v4, %v1941_v27  ;;  %v2357_v9 = vmul.f32 %v3909_v58, %v4287_v39 }
 0x224   :  { %v2097_v18 = vrot.slane %v2096_v26, 2  ;;  %v2113_v15 = vadd.f32 %v2112_v21, %v2111_v7  ;;  %v2403_v54 = vsel %vm1990_vm2, %v2401_v56, %v2402_v50  ;;  %v1806_v35 = vpop.f32.mrb[156].mxu0 }
 0x225   :  { %v2358_v47 = vmul.f32 %v3905_v38, %v4290_v59  ;;  %v1820_v55 = vadd.f32 %v1806_v35, %v4234_v28  ;;  %v1928_v60 = vpop.f32.mrb[156].mxu1  ;;  %v3205_v6 = vpop.f32.mrb[157].mxu0  ;;  %v2368_v16 = vrot.slane %v2357_v9, 4  ;;  %v2393_v0 = vmul.f32 %v2357_v9, %v4287_v39 }
 0x226   :  { %v2098_v51 = vadd.f32 %v2097_v18, %v2096_v26  ;;  %v2114_v46 = vrot.slane %v2113_v15, 2  ;;  %v3227_v24 = vpop.f32.mrb[157].mxu1  ;;  %v1809_v33 = vpop.f32.mrb[158].mxu0 }
 0x227   :  { %v2370_v7 = vrot.slane %v2358_v47, 4  ;;  %v2394_v57 = vmul.f32 %v2358_v47, %v4290_v59  ;;  %v1931_v13 = vpop.f32.mrb[158].mxu1  ;;  %v3206_v56 = vpop.f32.mrb[159].mxu0  ;;  %v1942_v27 = vadd.f32 %v1928_v60, %v1820_v55  ;;  %v2369_v28 = vsel %vm1990_vm2, %v2366_v22, %v2368_v16 }
 0x228   :  { %v2099_v58 = vrot.slane %v2098_v51, 1  ;;  %v2115_v36 = vadd.f32 %v2114_v46, %v2113_v15  ;;  %v3228_v38 = vpop.f32.mrb[159].mxu1  ;;  %v2404_v21 = vrot.slane %v2393_v0, 4  ;;  %v2379_v24 = vadd.f32 %v2369_v28, %v2367_v2 }
 0x229   :  { %v2371_v26 = vsel %vm1990_vm2, %v2368_v16, %v2370_v7  ;;  %v2406_v18 = vrot.slane %v2394_v57, 4  ;;  %v4303_v9 = vadd.f32 %v4142_v4, %v1942_v27 }
 0x22a   :  { %v2100_v35 = vadd.f32 %v2099_v58, %v2098_v51  ;;  %v2116_v6 = vrot.slane %v2115_v36, 1  ;;  %v2405_v47 = vsel %vm1990_vm2, %v2402_v50, %v2404_v21  ;;  %v2380_v46 = vadd.f32 %v2379_v24, %v2371_v26 }
 0x22b   :  { %v2407_v33 = vsel %vm1990_vm2, %v2404_v21, %v2406_v18  ;;  %v2415_v60 = vadd.f32 %v2405_v47, %v2403_v54  ;;  %v2359_v22 = vmul.f32 %v3939_v37, %v4303_v9 }
 0x22c   :  { %v2101_v15 = vadd.f32 %v2100_v35, %v4200_v17  ;;  %v2117_v55 = vadd.f32 %v2116_v6, %v2115_v36 }
 0x22d   :  { %v2416_v2 = vadd.f32 %v2415_v60, %v2407_v33  ;;  %v2372_v0 = vrot.slane %v2359_v22, 4  ;;  %v2395_v13 = vmul.f32 %v2359_v22, %v4303_v9 }
 0x22e   :  { %v2118_v16 = vadd.f32 %v2117_v55, %v4205_v20  ;;  %v4311_v51 = vmul.f32 0.015625, %v2101_v15 }
 0x22f   :  { %v2408_v38 = vrot.slane %v2395_v13, 4  ;;  %v2382_v28 = vsel %vm1990_vm2, %v2372_v0, 0.0 }
 0x230   :  { %v2120_v4 = vmul.f32 0.015625, %v2118_v16  ;;  %v2121_v50 = vmul.f32 %v4311_v51, %v4311_v51  ;;  %v2433_v57 = vsub.f32 %v3800_v23, %v4311_v51  ;;  %v2434_v17 = vsub.f32 %v3811_v61, %v4311_v51 }
 0x231   :  { %v2435_v54 = vsub.f32 %v3832_v52, %v4311_v51  ;;  %v2436_v37 = vsub.f32 %v3842_v14, %v4311_v51  ;;  %v2454_v20 = vsub.f32 %v4016_v1, %v4311_v51  ;;  %v2455_v58 = vsub.f32 %v4022_v30, %v4311_v51 }
 0x232   :  { %v2122_v56 = vsub.f32 %v2120_v4, %v2121_v50  ;;  %v2456_v23 = vsub.f32 %v4032_v40, %v4311_v51  ;;  %v2457_v61 = vsub.f32 %v4037_v5, %v4311_v51  ;;  %v2475_v52 = vsub.f32 %v4126_v10, %v4311_v51 }
 0x233   :  { %v2476_v14 = vsub.f32 %v4131_v53, %v4311_v51  ;;  %v2477_v1 = vsub.f32 %v4145_v41, %v4311_v51  ;;  %v2478_v27 = vsub.f32 %v4150_v34, %v4311_v51  ;;  %v2496_v30 = vsub.f32 %v4239_v19, %v4311_v51 }
 0x234   :  { %v2123_v36 = vadd.f32 1e-05, %v2122_v56  ;;  %v2497_v40 = vsub.f32 %v4244_v12, %v4311_v51  ;;  %v2498_v5 = vsub.f32 %v4253_v25, %v4311_v51  ;;  %v2499_v10 = vsub.f32 %v4258_v8, %v4311_v51 }
 0x235   :  { %v2500_v53 = vsub.f32 %v4267_v29, %v4311_v51  ;;  %v2373_v41 = vsel %vm1990_vm2, %v2370_v7, %v2372_v0  ;;  %v2409_v19 = vsel %vm1990_vm2, %v2406_v18, %v2408_v38  ;;  %v2418_v26 = vsel %vm1990_vm2, %v2408_v38, 0.0 }
 0x236   :  { %3251 = vrsqrt.f32 %v2123_v36  ;;  %v2381_v34 = vadd.f32 %v2380_v46, %v2373_v41  ;;  %v2417_v12 = vadd.f32 %v2416_v2, %v2409_v19  ;;  %v2437_v24 = vsub.f32 %v3890_v31, %v4311_v51 }
 0x237   :  { %v2458_v7 = vsub.f32 %v4046_v48, %v4311_v51  ;;  %v2479_v33 = vsub.f32 %v4159_v44, %v4311_v51 }
 0x238   :  { %v2383_v21 = vadd.f32 %v2382_v28, %v2381_v34  ;;  %v2419_v35 = vadd.f32 %v2418_v26, %v2417_v12 }
 0x23a   :  { %v2384_v25 = vrot.slane %v2383_v21, 4  ;;  %v2420_v8 = vrot.slane %v2419_v35, 4 }
 0x23c   :  { %v2385_v6 = vadd.f32 %v2384_v25, %v2383_v21  ;;  %v2421_v18 = vadd.f32 %v2420_v8, %v2419_v35 }
 0x23e   :  { %v2386_v15 = vrot.slane %v2385_v6, 2 }
 0x240   :  { %v3252_v47 = vpop.eup %3251 }
 0x241   :  { %v2438_v55 = vmul.f32 %v3252_v47, %v2433_v57  ;;  %v2439_v60 = vmul.f32 %v3252_v47, %v2434_v17  ;;  %v2440_v46 = vmul.f32 %v3252_v47, %v2435_v54  ;;  %v2441_v22 = vmul.f32 %v3252_v47, %v2436_v37 }
 0x242   :  { %v2459_v16 = vmul.f32 %v3252_v47, %v2454_v20  ;;  %v2460_v2 = vmul.f32 %v3252_v47, %v2455_v58  ;;  %v2461_v0 = vmul.f32 %v3252_v47, %v2456_v23  ;;  %v2462_v4 = vmul.f32 %v3252_v47, %v2457_v61 }
 0x243   :  { %v2480_v50 = vmul.f32 %v3252_v47, %v2475_v52  ;;  %v2481_v13 = vmul.f32 %v3252_v47, %v2476_v14  ;;  %v2482_v56 = vmul.f32 %v3252_v47, %v2477_v1  ;;  %v2483_v36 = vmul.f32 %v3252_v47, %v2478_v27 }
 0x244   :  { %v2501_v41 = vmul.f32 %v3252_v47, %v2496_v30  ;;  %v2502_v38 = vmul.f32 %v3252_v47, %v2497_v40  ;;  %v2503_v34 = vmul.f32 %v3252_v47, %v2498_v5  ;;  %v2504_v28 = vmul.f32 %v3252_v47, %v2499_v10 }
 0x245   :  { %v4360_v19 = vmul.f32 %v3252_v47, %v2500_v53  ;;  %v2517_v51 = vmax.f32 %v2438_v55, 0.0  ;;  %v2518_v21 = vmax.f32 %v2439_v60, 0.0  ;;  %v2519_v57 = vmax.f32 %v2440_v46, 0.0 }
 0x246   :  { %v2520_v17 = vmax.f32 %v2441_v22, 0.0  ;;  %v2535_v54 = vmax.f32 %v2459_v16, 0.0  ;;  %v2536_v37 = vmax.f32 %v2460_v2, 0.0  ;;  %v2537_v20 = vmax.f32 %v2461_v0, 0.0 }
 0x247   :  { %2526 = vst [vmem:[%s4502_s5] sm:$0xff] %v2517_v51  ;;  %2527 = vst [vmem:[%s4502_s5 + $0x8] sm:$0xff] %v2518_v21  ;;  %v2538_v58 = vmax.f32 %v2462_v4, 0.0  ;;  %v2554_v23 = vmax.f32 %v2480_v50, 0.0  ;;  %v2555_v61 = vmax.f32 %v2481_v13, 0.0  ;;  %v2556_v52 = vmax.f32 %v2482_v56, 0.0  ;;  %v4516_v4 = vld [vmem:[#allocation6_spill] sm:$0xff] }
 0x248   :  { %2528 = vst [vmem:[%s4502_s5 + $0x10] sm:$0xff] %v2519_v57  ;;  %2529 = vst [vmem:[%s4502_s5 + $0x18] sm:$0xff] %v2520_v17  ;;  %v2557_v14 = vmax.f32 %v2483_v36, 0.0  ;;  %v2573_v1 = vmax.f32 %v2501_v41, 0.0  ;;  %v2574_v27 = vmax.f32 %v2502_v38, 0.0  ;;  %v2575_v30 = vmax.f32 %v2503_v34, 0.0 }
 0x249   :  { %2754 = vst [vmem:[%s4502_s5 + $0x48] sm:$0xff] %v2535_v54  ;;  %2755 = vst [vmem:[%s4502_s5 + $0x50] sm:$0xff] %v2536_v37  ;;  %v2576_v40 = vmax.f32 %v2504_v28, 0.0  ;;  %v2387_v5 = vadd.f32 %v2386_v15, %v2385_v6  ;;  %v2422_v10 = vrot.slane %v2421_v18, 2  ;;  %v2442_v53 = vmul.f32 %v3252_v47, %v2437_v24  ;;  %v4518_v56 = vld [vmem:[#allocation8_spill] sm:$0xff]  ;;  %v4519_v36 = vld [vmem:[#allocation9_spill] sm:$0xff] }
 0x24a   :  { %2756 = vst [vmem:[%s4502_s5 + $0x58] sm:$0xff] %v2537_v20  ;;  %2757 = vst [vmem:[%s4502_s5 + $0x60] sm:$0xff] %v2538_v58  ;;  %v2463_v12 = vmul.f32 %v3252_v47, %v2458_v7  ;;  %v2484_v26 = vmul.f32 %v3252_v47, %v2479_v33  ;;  %v4520_v38 = vld [vmem:[#allocation10_spill] sm:$0xff] }
 0x24b   :  { %2763 = vst [vmem:[%s4502_s5 + $0x90] sm:$0xff] %v2554_v23  ;;  %2764 = vst [vmem:[%s4502_s5 + $0x98] sm:$0xff] %v2555_v61  ;;  %v2388_v25 = vrot.slane %v2387_v5, 1  ;;  %v2423_v35 = vadd.f32 %v2422_v10, %v2421_v18  ;;  %v4515_v18 = vld [vmem:[#allocation5_spill] sm:$0xff] }
 0x24c   :  { %2765 = vst [vmem:[%s4502_s5 + $0xa0] sm:$0xff] %v2556_v52  ;;  %2766 = vst [vmem:[%s4502_s5 + $0xa8] sm:$0xff] %v2557_v14 }
 0x24d   :  { %2772 = vst [vmem:[%s4502_s5 + $0xd8] sm:$0xff] %v2573_v1  ;;  %2773 = vst [vmem:[%s4502_s5 + $0xe0] sm:$0xff] %v2574_v27  ;;  %v2389_v6 = vadd.f32 %v2388_v25, %v2387_v5  ;;  %v2424_v8 = vrot.slane %v2423_v35, 1 }
 0x24e   :  { %2774 = vst [vmem:[%s4502_s5 + $0xe8] sm:$0xff] %v2575_v30  ;;  %2775 = vst [vmem:[%s4502_s5 + $0xf0] sm:$0xff] %v2576_v40 }
 0x24f   :  { %v2390_v24 = vadd.f32 %v2389_v6, %v4225_v43  ;;  %v2425_v15 = vadd.f32 %v2424_v8, %v2423_v35  ;;  %v4517_v43 = vld [vmem:[#allocation7_spill] sm:$0xff] }
 0x251   :  { %v2426_v55 = vadd.f32 %v2425_v15, %v4228_v42  ;;  %v2427_v60 = vmul.f32 0.015625, %v2390_v24 }
 0x253   :  { %v2428_v46 = vmul.f32 0.015625, %v2426_v55  ;;  %v2429_v22 = vmul.f32 %v2427_v60, %v2427_v60  ;;  %v2444_v16 = vsub.f32 %v3893_v32, %v2427_v60  ;;  %v2445_v47 = vsub.f32 %v3919_v62, %v2427_v60 }
 0x254   :  { %v2446_v7 = vsub.f32 %v3922_v63, %v2427_v60  ;;  %v2447_v33 = vsub.f32 %v3946_v49, %v2427_v60  ;;  %v2465_v0 = vsub.f32 %v4515_v18, %v2427_v60  ;;  %v2466_v50 = vsub.f32 %v4516_v4, %v2427_v60 }
 0x255   :  { %v2430_v2 = vsub.f32 %v2428_v46, %v2429_v22  ;;  %v2467_v13 = vsub.f32 %v4517_v43, %v2427_v60  ;;  %v2468_v42 = vsub.f32 %v4518_v56, %v2427_v60  ;;  %v2486_v41 = vsub.f32 %v4519_v36, %v2427_v60 }
 0x256   :  { %v2487_v34 = vsub.f32 %v4520_v38, %v2427_v60  ;;  %v2488_v62 = vsub.f32 %v4181_v3, %v2427_v60  ;;  %v2489_v63 = vsub.f32 %v4194_v45, %v2427_v60  ;;  %v2506_v49 = vsub.f32 %v4267_v29, %v2427_v60 }
 0x257   :  { %v2431_v32 = vadd.f32 1e-05, %v2430_v2  ;;  %v2507_v28 = vsub.f32 %v4274_v11, %v2427_v60  ;;  %v2508_v51 = vsub.f32 %v4287_v39, %v2427_v60  ;;  %v2509_v21 = vsub.f32 %v4290_v59, %v2427_v60 }
 0x258   :  { %v2510_v57 = vsub.f32 %v4303_v9, %v2427_v60  ;;  %v2443_v17 = vsub.f32 %v3890_v31, %v2427_v60  ;;  %v2464_v37 = vsub.f32 %v4046_v48, %v2427_v60  ;;  %v2485_v3 = vsub.f32 %v4159_v44, %v2427_v60 }
 0x259   :  { %3253 = vrsqrt.f32 %v2431_v32 }
 0x263   :  { %v3254_v54 = vpop.eup %3253 }
 0x264   :  { %v2448_v20 = vmul.f32 %v3254_v54, %v2443_v17  ;;  %v2449_v45 = vmul.f32 %v3254_v54, %v2444_v16  ;;  %v2450_v58 = vmul.f32 %v3254_v54, %v2445_v47  ;;  %v2451_v29 = vmul.f32 %v3254_v54, %v2446_v7 }
 0x265   :  { %v2452_v23 = vmul.f32 %v3254_v54, %v2447_v33  ;;  %v2469_v11 = vmul.f32 %v3254_v54, %v2464_v37  ;;  %v2470_v61 = vmul.f32 %v3254_v54, %v2465_v0  ;;  %v2471_v39 = vmul.f32 %v3254_v54, %v2466_v50 }
 0x266   :  { %v2453_v59 = vsel %vm1990_vm2, %v2442_v53, %v2448_v20  ;;  %v2472_v52 = vmul.f32 %v3254_v54, %v2467_v13  ;;  %v2473_v9 = vmul.f32 %v3254_v54, %v2468_v42  ;;  %v2490_v14 = vmul.f32 %v3254_v54, %v2485_v3 }
 0x267   :  { %v2474_v31 = vsel %vm1990_vm2, %v2463_v12, %v2469_v11  ;;  %v2491_v1 = vmul.f32 %v3254_v54, %v2486_v41  ;;  %v2492_v27 = vmul.f32 %v3254_v54, %v2487_v34  ;;  %v2493_v48 = vmul.f32 %v3254_v54, %v2488_v62 }
 0x268   :  { %v2494_v30 = vmul.f32 %v3254_v54, %v2489_v63  ;;  %v2495_v44 = vsel %vm1990_vm2, %v2484_v26, %v2490_v14  ;;  %v2511_v40 = vmul.f32 %v3254_v54, %v2506_v49  ;;  %v2512_v5 = vmul.f32 %v3254_v54, %v2507_v28 }
 0x269   :  { %v2513_v10 = vmul.f32 %v3254_v54, %v2508_v51  ;;  %v2514_v25 = vmul.f32 %v3254_v54, %v2509_v21  ;;  %v2515_v35 = vmul.f32 %v3254_v54, %v2510_v57  ;;  %v2521_v6 = vmax.f32 %v2453_v59, 0.0 }
 0x26a   :  { %v2516_v53 = vsel %vm1990_vm2, %v4360_v19, %v2511_v40  ;;  %v2522_v8 = vmax.f32 %v2449_v45, 0.0  ;;  %v2523_v24 = vmax.f32 %v2450_v58, 0.0  ;;  %v2524_v15 = vmax.f32 %v2451_v29, 0.0 }
 0x26b   :  { %v2525_v55 = vmax.f32 %v2452_v23, 0.0  ;;  %2530 = vst [vmem:[%s4502_s5 + $0x20] sm:$0xff] %v2521_v6  ;;  %v2539_v12 = vmax.f32 %v2474_v31, 0.0  ;;  %v2540_v60 = vmax.f32 %v2470_v61, 0.0  ;;  %v2541_v26 = vmax.f32 %v2471_v39, 0.0 }
 0x26c   :  { %2531 = vst [vmem:[%s4502_s5 + $0x28] sm:$0xff] %v2522_v8  ;;  %2532 = vst [vmem:[%s4502_s5 + $0x30] sm:$0xff] %v2523_v24  ;;  %v2542_v19 = vmax.f32 %v2472_v52, 0.0  ;;  %v2543_v46 = vmax.f32 %v2473_v9, 0.0  ;;  %v2558_v22 = vmax.f32 %v2495_v44, 0.0  ;;  %v2559_v16 = vmax.f32 %v2491_v1, 0.0 }
 0x26d   :  { %2533 = vst [vmem:[%s4502_s5 + $0x38] sm:$0xff] %v2524_v15  ;;  %2534 = vst [vmem:[%s4502_s5 + $0x40] sm:$0xff] %v2525_v55  ;;  %v2560_v47 = vmax.f32 %v2492_v27, 0.0  ;;  %v2561_v7 = vmax.f32 %v2493_v48, 0.0  ;;  %v2562_v33 = vmax.f32 %v2494_v30, 0.0  ;;  %v2577_v2 = vmax.f32 %v2516_v53, 0.0 }
 0x26e   :  { %2758 = vst [vmem:[%s4502_s5 + $0x68] sm:$0xff] %v2539_v12  ;;  %2759 = vst [vmem:[%s4502_s5 + $0x70] sm:$0xff] %v2540_v60  ;;  %v2578_v18 = vmax.f32 %v2512_v5, 0.0  ;;  %v2579_v0 = vmax.f32 %v2513_v10, 0.0  ;;  %v2580_v4 = vmax.f32 %v2514_v25, 0.0  ;;  %v2581_v50 = vmax.f32 %v2515_v35, 0.0 }
 0x26f   :  { %2760 = vst [vmem:[%s4502_s5 + $0x78] sm:$0xff] %v2541_v26  ;;  %2761 = vst [vmem:[%s4502_s5 + $0x80] sm:$0xff] %v2542_v19 }
 0x270   :  { %2762 = vst [vmem:[%s4502_s5 + $0x88] sm:$0xff] %v2543_v46  ;;  %2767 = vst [vmem:[%s4502_s5 + $0xb0] sm:$0xff] %v2558_v22 }
 0x271   :  { %2768 = vst [vmem:[%s4502_s5 + $0xb8] sm:$0xff] %v2559_v16  ;;  %2769 = vst [vmem:[%s4502_s5 + $0xc0] sm:$0xff] %v2560_v47 }
 0x272   :  { %2770 = vst [vmem:[%s4502_s5 + $0xc8] sm:$0xff] %v2561_v7  ;;  %2771 = vst [vmem:[%s4502_s5 + $0xd0] sm:$0xff] %v2562_v33 }
 0x273   :  { %2776 = vst [vmem:[%s4502_s5 + $0xf8] sm:$0xff] %v2577_v2  ;;  %2777 = vst [vmem:[%s4502_s5 + $0x100] sm:$0xff] %v2578_v18 }
 0x274   :  { %2778 = vst [vmem:[%s4502_s5 + $0x108] sm:$0xff] %v2579_v0  ;;  %2779 = vst [vmem:[%s4502_s5 + $0x110] sm:$0xff] %v2580_v4 }
 0x275   :  { %2780 = vst [vmem:[%s4502_s5 + $0x118] sm:$0xff] %v2581_v50 }

// kernel: good_network_forward.7
= control target key start
LH: loop header
LB: loop body
LE: loop exit
PB: predicated region body
PF: predicated region fallthrough
CT: control target
= control target key end

     0   :  { %s2479_s0 = inlined_call_operand.vmem [shape: s32[4,4], index: 0, kind: input, shape index: {}]   ;;  %s2480_s1 = inlined_call_operand.vmem [shape: f32[224,32], index: 1, kind: input, shape index: {}]   ;;  %s2481_s2 = inlined_call_operand.vmem [shape: bf16[4,4,32,128], index: 2, kind: input, shape index: {}]   ;;  %s2482_s3 = inlined_call_operand.vmem [shape: f32[1,128], index: 3, kind: input, shape index: {}]   ;;  %s2483_s4 = inlined_call_operand.vmem [shape: f32[100,1], index: 4, kind: input, shape index: {}]   ;;  %s2484_s5 = inlined_call_operand.vmem [shape: f32[4,200,128], index: 5, kind: output, shape index: {}]  }
   0x1   :  { %s10_s20 = sshll.u32 %s2479_s0, 4  ;;  %s11_s20 = int_to_ptr.vmem [resolvable:$true] %s10_s20 }
   0x2   :  { %s1968_s21 = scalar_lea.vmem %s11_s20, 64  ;;  %p1973_p1 = scmp.lt.s32.totalorder %s11_s20, %s11_s20 }
   0x3   :  { %p1969_p0 = scmp.ne.s32.totalorder %s11_s20, %s1968_s21  ;;  %p1974_p2 = scmp.lt.s32.totalorder %s1968_s21, %s1968_s21 }
   0x5   :  { %p1975_p3 = por %p1974_p2, %p1973_p1 }
   0x7   :  { %p1976_p4 = pnand %p1975_p3, %p1969_p0 }
   0x9   :  { %1979 = shalt.err (!%p1976_p4)  }
   0xa   :  { %s1990_s22 = smov [#allocation3]  }
   0xb   :  { %13 = dma.vmem_to_smem %s11_s20, 64, %s1990_s22, [#allocation2] }
   0xc   :  { %1984 = dma.done.wait [#allocation2], 64 }
   0xd   :  { %1985 = vsyncadd [#allocation2], 4294967232 }
   0xe   :  { %15 = sfence }
   0xf   :  { %s2026_s4 = smov 0  }
  0x10 LB: > { %s1454_s0 = sadd.s32 4294967295, %s1988_s4   ;;  %p1458_p5 = scmp.ge.s32.totalorder %s1988_s4, 1  ;;  %s1988_s4 = sphi %s2026_s4, %s21_s4  }
  0x11   : > { %p169_p6 = scmp.lt.s32.totalorder %s1988_s4, 5 }
  0x13   : > { %p170_p7 = pnand %p1458_p5, %p169_p6 }
  0x14   : > { %p195_p8 = scmp.lt.s32.totalorder (!%p170_p7), %s1454_s0, 3  ;;  %s2034_s23 = sshll.u32 (!%p170_p7), %s1454_s0, 7  ;;  %v1991_v0 = vmov (!%p170_p7), 0.0   ;;  %vm1992_vm0 = vmmov (!%p170_p7), 0   ;;  %vm309_vm1 = vcmask (!%p170_p7), 261120  }
  0x15   : > { %173 = sbr.rel (%p170_p7) target bundleno = 484 (0x1e4), region = 36  ;;  %1624 = vmatprep.subr.bf16.mxu0 (!%p170_p7), %v1991_v0  ;;  %1680 = vmatprep.subr.bf16.mxu1 (!%p170_p7), %v1991_v0  ;;  %s251_s24 = sadd.s32 (!%p170_p7), 1, %s2034_s23 }
  0x16   : > { %1628 = vmatprep.mubr.msk.bf16.mxu0 (!%p170_p7), %vm1992_vm0, %v1991_v0  ;;  %1684 = vmatprep.mubr.msk.bf16.mxu1 (!%p170_p7), %vm1992_vm0, %v1991_v0  ;;  %s252_s25 = sld [smem:[#allocation3 + %s251_s24]] (!%p170_p7)  ;;  %s672_s12 = sadd.s32 (!%p170_p7), 2, %s2034_s23 }
  0x17   : > { %s207_s30 = sld [smem:[#allocation3 + %s2034_s23]] (!%p170_p7)  ;;  %s930_s13 = sadd.s32 (!%p170_p7), 3, %s2034_s23 }
  0x18   : > { %s673_s14 = sld [smem:[#allocation3 + %s672_s12]] (!%p170_p7) }
  0x19   : > { %s931_s15 = sld [smem:[#allocation3 + %s930_s13]] (!%p170_p7) }
  0x1c   : > { %s2486_s0 = smov (!%p195_p8, %s1454_s0), 3  ;;  %s2060_s8 = scalar_lea.vmem %s2480_s1, %s252_s25 }
  0x1d   : > { %s1563_s26 = sshll.u32 %s2486_s0, 6  ;;  %v254_v5 = vld [vmem:[%s2060_s8] sm:$0xff]  ;;  %v255_v6 = vld [vmem:[%s2060_s8 + $0x8] sm:$0xff]  ;;  %s2069_s11 = scalar_lea.vmem %s2480_s1, %s207_s30  ;;  %v256_v13 = vld [vmem:[%s2060_s8 + $0x10] sm:$0xff] }
  0x1e   : > { %s2049_s29 = scalar_lea.vmem %s2481_s2, %s1563_s26  ;;  %v279_v7 = vpack.c.bf16 %v255_v6, %v254_v5  ;;  %v209_v9 = vld [vmem:[%s2069_s11] sm:$0xff]  ;;  %v210_v10 = vld [vmem:[%s2069_s11 + $0x8] sm:$0xff]  ;;  %v257_v14 = vld [vmem:[%s2060_s8 + $0x18] sm:$0xff]  ;;  %s2203_s18 = scalar_lea.vmem %s2480_s1, %s673_s14 }
  0x1f   : > { %v1860_v1 = vld [vmem:[%s2049_s29 + $0x10] sm:$0xff]   ;;  %v1861_v2 = vld [vmem:[%s2049_s29] sm:$0xff]   ;;  %v1862_v3 = vld [vmem:[%s2049_s29 + $0x18] sm:$0xff]   ;;  %v234_v12 = vpack.c.bf16 %v210_v10, %v209_v9  ;;  %v280_v17 = vpack.c.bf16 %v257_v14, %v256_v13  ;;  %s2209_s21 = scalar_lea.vmem %s2480_s1, %s931_s15  ;;  %s1848_s24 = smul.u32 200, %s2486_s0 }
  0x20   : > { %1625 = vmatpush3.bf16.msra.mxu0 %v1860_v1  ;;  %1681 = vmatpush3.bf16.msra.mxu1 %v1861_v2  ;;  %v1863_v4 = vld [vmem:[%s2049_s29 + $0x8] sm:$0xff]   ;;  %v1864_v8 = vld [vmem:[%s2049_s29 + $0x20] sm:$0xff]   ;;  %v1865_v11 = vld [vmem:[%s2049_s29 + $0x30] sm:$0xff]  }
  0x21   : > { %1626 = vmatprep.subr.bf16.mxu0 %v1991_v0  ;;  %1682 = vmatprep.subr.bf16.mxu1 %v1991_v0  ;;  %v211_v15 = vld [vmem:[%s2069_s11 + $0x10] sm:$0xff]  ;;  %v212_v16 = vld [vmem:[%s2069_s11 + $0x18] sm:$0xff]  ;;  %v1866_v19 = vld [vmem:[%s2049_s29 + $0x28] sm:$0xff]   ;;  %s2414_s0 = scalar_lea.vmem %s2484_s5, %s1848_s24 }
  0x22   : > { %v235_v18 = vpack.c.bf16 %v212_v16, %v211_v15  ;;  %v1867_v20 = vld [vmem:[%s2049_s29 + $0x38] sm:$0xff]   ;;  %v258_v21 = vld [vmem:[%s2060_s8 + $0x20] sm:$0xff]  ;;  %v259_v22 = vld [vmem:[%s2060_s8 + $0x28] sm:$0xff] }
  0x23   : > { %v213_v23 = vld [vmem:[%s2069_s11 + $0x20] sm:$0xff]  ;;  %v214_v24 = vld [vmem:[%s2069_s11 + $0x28] sm:$0xff]  ;;  %v281_v25 = vpack.c.bf16 %v259_v22, %v258_v21  ;;  %v260_v27 = vld [vmem:[%s2060_s8 + $0x30] sm:$0xff] }
  0x24   : > { %1627 = vmatpush3.bf16.msra.mxu0 %v1862_v3  ;;  %1683 = vmatpush3.bf16.msra.mxu1 %v1863_v4  ;;  %v236_v26 = vpack.c.bf16 %v214_v24, %v213_v23  ;;  %v261_v28 = vld [vmem:[%s2060_s8 + $0x38] sm:$0xff]  ;;  %v215_v29 = vld [vmem:[%s2069_s11 + $0x30] sm:$0xff]  ;;  %v262_v33 = vld [vmem:[%s2060_s8 + $0x40] sm:$0xff] }
  0x25   : > { %1736 = vmatprep.subr.bf16.mxu0 %v1991_v0  ;;  %1792 = vmatprep.subr.bf16.mxu1 %v1991_v0  ;;  %v216_v30 = vld [vmem:[%s2069_s11 + $0x38] sm:$0xff]  ;;  %v282_v31 = vpack.c.bf16 %v261_v28, %v260_v27  ;;  %v263_v34 = vld [vmem:[%s2060_s8 + $0x48] sm:$0xff]  ;;  %v217_v35 = vld [vmem:[%s2069_s11 + $0x40] sm:$0xff] }
  0x26   : > { %v237_v32 = vpack.c.bf16 %v216_v30, %v215_v29  ;;  %v218_v36 = vld [vmem:[%s2069_s11 + $0x48] sm:$0xff]  ;;  %v283_v37 = vpack.c.bf16 %v263_v34, %v262_v33  ;;  %v264_v39 = vld [vmem:[%s2060_s8 + $0x50] sm:$0xff]  ;;  %v265_v40 = vld [vmem:[%s2060_s8 + $0x58] sm:$0xff] }
  0x27   : > { %1629 = vmatmul.mubr.msk.bf16.vlgmr.msra.gmra.mrb[0].mxu0 %vm309_vm1, %v279_v7  ;;  %1685 = vmatmul.mubr.msk.bf16.vlgmr.msra.gmra.mrb[0].mxu1 %vm309_vm1, %v234_v12  ;;  %v238_v38 = vpack.c.bf16 %v218_v36, %v217_v35  ;;  %v219_v41 = vld [vmem:[%s2069_s11 + $0x50] sm:$0xff]  ;;  %v220_v42 = vld [vmem:[%s2069_s11 + $0x58] sm:$0xff]  ;;  %v284_v43 = vpack.c.bf16 %v265_v40, %v264_v39  ;;  %v266_v45 = vld [vmem:[%s2060_s8 + $0x60] sm:$0xff] }
  0x28   : > { %1737 = vmatpush3.bf16.msra.mxu0 %v1864_v8  ;;  %1632 = vmatprep.mubr.msk.bf16.mxu0 %vm1992_vm0, %v1991_v0  ;;  %v239_v44 = vpack.c.bf16 %v220_v42, %v219_v41  ;;  %v267_v46 = vld [vmem:[%s2060_s8 + $0x68] sm:$0xff]  ;;  %v221_v47 = vld [vmem:[%s2069_s11 + $0x60] sm:$0xff]  ;;  %v268_v51 = vld [vmem:[%s2060_s8 + $0x70] sm:$0xff] }
  0x29   : > { %1738 = vmatprep.subr.bf16.mxu0 %v1991_v0  ;;  %1793 = vmatpush3.bf16.msra.mxu1 %v1865_v11  ;;  %v222_v48 = vld [vmem:[%s2069_s11 + $0x68] sm:$0xff]  ;;  %v285_v49 = vpack.c.bf16 %v267_v46, %v266_v45  ;;  %v269_v52 = vld [vmem:[%s2060_s8 + $0x78] sm:$0xff]  ;;  %v223_v53 = vld [vmem:[%s2069_s11 + $0x70] sm:$0xff] }
  0x2a   : > { %1688 = vmatprep.mubr.msk.bf16.mxu1 %vm1992_vm0, %v1991_v0  ;;  %1794 = vmatprep.subr.bf16.mxu1 %v1991_v0  ;;  %v240_v50 = vpack.c.bf16 %v222_v48, %v221_v47  ;;  %v224_v54 = vld [vmem:[%s2069_s11 + $0x78] sm:$0xff]  ;;  %v286_v55 = vpack.c.bf16 %v269_v52, %v268_v51  ;;  %v270_v57 = vld [vmem:[%s2060_s8 + $0x80] sm:$0xff]  ;;  %v271_v58 = vld [vmem:[%s2060_s8 + $0x88] sm:$0xff] }
  0x2b   : > { %v241_v56 = vpack.c.bf16 %v224_v54, %v223_v53  ;;  %v225_v59 = vld [vmem:[%s2069_s11 + $0x80] sm:$0xff]  ;;  %v226_v60 = vld [vmem:[%s2069_s11 + $0x88] sm:$0xff]  ;;  %v287_v61 = vpack.c.bf16 %v271_v58, %v270_v57  ;;  %v272_v63 = vld [vmem:[%s2060_s8 + $0x90] sm:$0xff] }
  0x2c   : > { %1739 = vmatpush3.bf16.msra.mxu0 %v1866_v19  ;;  %v242_v62 = vpack.c.bf16 %v226_v60, %v225_v59  ;;  %v273_v1 = vld [vmem:[%s2060_s8 + $0x98] sm:$0xff]  ;;  %v227_v2 = vld [vmem:[%s2069_s11 + $0x90] sm:$0xff]  ;;  %v274_v6 = vld [vmem:[%s2060_s8 + $0xa0] sm:$0xff] }
  0x2d   : > { %1795 = vmatpush3.bf16.msra.mxu1 %v1867_v20  ;;  %v228_v3 = vld [vmem:[%s2069_s11 + $0x98] sm:$0xff]  ;;  %v288_v4 = vpack.c.bf16 %v273_v1, %v272_v63  ;;  %v275_v7 = vld [vmem:[%s2060_s8 + $0xa8] sm:$0xff]  ;;  %v229_v8 = vld [vmem:[%s2069_s11 + $0xa0] sm:$0xff] }
  0x2e   : > { %v243_v5 = vpack.c.bf16 %v228_v3, %v227_v2  ;;  %v230_v9 = vld [vmem:[%s2069_s11 + $0xa8] sm:$0xff]  ;;  %v289_v10 = vpack.c.bf16 %v275_v7, %v274_v6  ;;  %v276_v12 = vld [vmem:[%s2060_s8 + $0xb0] sm:$0xff]  ;;  %v277_v13 = vld [vmem:[%s2060_s8 + $0xb8] sm:$0xff] }
  0x2f   : > { %1633 = vmatmul.mubr.msk.bf16.gmra.mrb[4].mxu0 %vm309_vm1, %v280_v17  ;;  %1689 = vmatmul.mubr.msk.bf16.gmra.mrb[4].mxu1 %vm309_vm1, %v235_v18  ;;  %v244_v11 = vpack.c.bf16 %v230_v9, %v229_v8  ;;  %v231_v14 = vld [vmem:[%s2069_s11 + $0xb0] sm:$0xff]  ;;  %v232_v15 = vld [vmem:[%s2069_s11 + $0xb8] sm:$0xff]  ;;  %v290_v16 = vpack.c.bf16 %v277_v13, %v276_v12  ;;  %v278_v18 = vld [vmem:[%s2060_s8 + $0xc0] sm:$0xff] }
  0x30   : > { %1636 = vmatprep.mubr.msk.bf16.mxu0 %vm1992_vm0, %v1991_v0  ;;  %1692 = vmatprep.mubr.msk.bf16.mxu1 %vm1992_vm0, %v1991_v0  ;;  %v245_v17 = vpack.c.bf16 %v232_v15, %v231_v14  ;;  %v233_v19 = vld [vmem:[%s2069_s11 + $0xc0] sm:$0xff]  ;;  %v291_v20 = vpack.c.bf16 %v278_v18, %v278_v18  ;;  %v676_v23 = vld [vmem:[%s2203_s18 + $0x8] sm:$0xff]  ;;  %v677_v28 = vld [vmem:[%s2203_s18 + $0x10] sm:$0xff] }
  0x31   : > { %v246_v21 = vpack.c.bf16 %v233_v19, %v233_v19  ;;  %v675_v22 = vld [vmem:[%s2203_s18] sm:$0xff]  ;;  %v678_v29 = vld [vmem:[%s2203_s18 + $0x18] sm:$0xff]  ;;  %v935_v30 = vld [vmem:[%s2209_s21 + $0x10] sm:$0xff] }
  0x32   : > { %v933_v24 = vld [vmem:[%s2209_s21] sm:$0xff]  ;;  %v680_v35 = vld [vmem:[%s2203_s18 + $0x28] sm:$0xff]  ;;  %v681_v40 = vld [vmem:[%s2203_s18 + $0x30] sm:$0xff] }
  0x33   : > { %v679_v34 = vld [vmem:[%s2203_s18 + $0x20] sm:$0xff]  ;;  %v682_v41 = vld [vmem:[%s2203_s18 + $0x38] sm:$0xff]  ;;  %v939_v42 = vld [vmem:[%s2209_s21 + $0x30] sm:$0xff] }
  0x34   : > { %v937_v36 = vld [vmem:[%s2209_s21 + $0x20] sm:$0xff]  ;;  %v684_v47 = vld [vmem:[%s2203_s18 + $0x48] sm:$0xff]  ;;  %v685_v52 = vld [vmem:[%s2203_s18 + $0x50] sm:$0xff] }
  0x35   : > { %v683_v46 = vld [vmem:[%s2203_s18 + $0x40] sm:$0xff]  ;;  %v686_v53 = vld [vmem:[%s2203_s18 + $0x58] sm:$0xff]  ;;  %v943_v54 = vld [vmem:[%s2209_s21 + $0x50] sm:$0xff] }
  0x36   : > { %v941_v48 = vld [vmem:[%s2209_s21 + $0x40] sm:$0xff]  ;;  %v688_v59 = vld [vmem:[%s2203_s18 + $0x68] sm:$0xff]  ;;  %v689_v1 = vld [vmem:[%s2203_s18 + $0x70] sm:$0xff] }
  0x37   : > { %1637 = vmatmul.mubr.msk.bf16.gmra.mrb[8].mxu0 %vm309_vm1, %v281_v25  ;;  %1693 = vmatmul.mubr.msk.bf16.gmra.mrb[8].mxu1 %vm309_vm1, %v236_v26  ;;  %v934_v25 = vld [vmem:[%s2209_s21 + $0x8] sm:$0xff]  ;;  %v700_v26 = vpack.c.bf16 %v676_v23, %v675_v22  ;;  %v687_v58 = vld [vmem:[%s2203_s18 + $0x60] sm:$0xff]  ;;  %v690_v2 = vld [vmem:[%s2203_s18 + $0x78] sm:$0xff] }
  0x38   : > { %1640 = vmatprep.mubr.msk.bf16.mxu0 %vm1992_vm0, %v1991_v0  ;;  %1696 = vmatprep.mubr.msk.bf16.mxu1 %vm1992_vm0, %v1991_v0  ;;  %v958_v27 = vpack.c.bf16 %v934_v25, %v933_v24  ;;  %v945_v60 = vld [vmem:[%s2209_s21 + $0x60] sm:$0xff]  ;;  %v947_v3 = vld [vmem:[%s2209_s21 + $0x70] sm:$0xff]  ;;  %v692_v8 = vld [vmem:[%s2203_s18 + $0x88] sm:$0xff] }
  0x39   : > { %v691_v7 = vld [vmem:[%s2203_s18 + $0x80] sm:$0xff]  ;;  %v693_v13 = vld [vmem:[%s2203_s18 + $0x90] sm:$0xff]  ;;  %v694_v14 = vld [vmem:[%s2203_s18 + $0x98] sm:$0xff] }
  0x3a   : > { %v949_v9 = vld [vmem:[%s2209_s21 + $0x80] sm:$0xff]  ;;  %v951_v15 = vld [vmem:[%s2209_s21 + $0x90] sm:$0xff]  ;;  %v954_v22 = vld [vmem:[%s2209_s21 + $0xa8] sm:$0xff] }
  0x3b   : > { %v695_v19 = vld [vmem:[%s2203_s18 + $0xa0] sm:$0xff]  ;;  %v697_v25 = vld [vmem:[%s2203_s18 + $0xb0] sm:$0xff] }
  0x3f   : > { %1641 = vmatmul.mubr.msk.bf16.gmra.mrb[12].mxu0 %vm309_vm1, %v282_v31  ;;  %1697 = vmatmul.mubr.msk.bf16.gmra.mrb[12].mxu1 %vm309_vm1, %v237_v32  ;;  %v936_v31 = vld [vmem:[%s2209_s21 + $0x18] sm:$0xff]  ;;  %v701_v32 = vpack.c.bf16 %v678_v29, %v677_v28 }
  0x40   : > { %1644 = vmatprep.mubr.msk.bf16.mxu0 %vm1992_vm0, %v1991_v0  ;;  %1700 = vmatprep.mubr.msk.bf16.mxu1 %vm1992_vm0, %v1991_v0  ;;  %v959_v33 = vpack.c.bf16 %v936_v31, %v935_v30  ;;  %v956_v28 = vld [vmem:[%s2209_s21 + $0xb8] sm:$0xff]  ;;  %v699_v31 = vld [vmem:[%s2203_s18 + $0xc0] sm:$0xff] }
  0x47   : > { %1645 = vmatmul.mubr.msk.bf16.gmra.mrb[16].mxu0 %vm309_vm1, %v283_v37  ;;  %1701 = vmatmul.mubr.msk.bf16.gmra.mrb[16].mxu1 %vm309_vm1, %v238_v38  ;;  %v938_v37 = vld [vmem:[%s2209_s21 + $0x28] sm:$0xff]  ;;  %v702_v38 = vpack.c.bf16 %v680_v35, %v679_v34 }
  0x48   : > { %1648 = vmatprep.mubr.msk.bf16.mxu0 %vm1992_vm0, %v1991_v0  ;;  %1704 = vmatprep.mubr.msk.bf16.mxu1 %vm1992_vm0, %v1991_v0  ;;  %v960_v39 = vpack.c.bf16 %v938_v37, %v937_v36 }
  0x4f   : > { %1649 = vmatmul.mubr.msk.bf16.gmra.mrb[20].mxu0 %vm309_vm1, %v284_v43  ;;  %1705 = vmatmul.mubr.msk.bf16.gmra.mrb[20].mxu1 %vm309_vm1, %v239_v44  ;;  %v940_v43 = vld [vmem:[%s2209_s21 + $0x38] sm:$0xff]  ;;  %v703_v44 = vpack.c.bf16 %v682_v41, %v681_v40 }
  0x50   : > { %1652 = vmatprep.mubr.msk.bf16.mxu0 %vm1992_vm0, %v1991_v0  ;;  %1708 = vmatprep.mubr.msk.bf16.mxu1 %vm1992_vm0, %v1991_v0  ;;  %v961_v45 = vpack.c.bf16 %v940_v43, %v939_v42 }
  0x57   : > { %1653 = vmatmul.mubr.msk.bf16.gmra.mrb[24].mxu0 %vm309_vm1, %v285_v49  ;;  %1709 = vmatmul.mubr.msk.bf16.gmra.mrb[24].mxu1 %vm309_vm1, %v240_v50  ;;  %v942_v49 = vld [vmem:[%s2209_s21 + $0x48] sm:$0xff]  ;;  %v704_v50 = vpack.c.bf16 %v684_v47, %v683_v46 }
  0x58   : > { %1656 = vmatprep.mubr.msk.bf16.mxu0 %vm1992_vm0, %v1991_v0  ;;  %1712 = vmatprep.mubr.msk.bf16.mxu1 %vm1992_vm0, %v1991_v0  ;;  %v962_v51 = vpack.c.bf16 %v942_v49, %v941_v48 }
  0x5f   : > { %1657 = vmatmul.mubr.msk.bf16.gmra.mrb[28].mxu0 %vm309_vm1, %v286_v55  ;;  %1713 = vmatmul.mubr.msk.bf16.gmra.mrb[28].mxu1 %vm309_vm1, %v241_v56  ;;  %v944_v55 = vld [vmem:[%s2209_s21 + $0x58] sm:$0xff]  ;;  %v705_v56 = vpack.c.bf16 %v686_v53, %v685_v52 }
  0x60   : > { %1660 = vmatprep.mubr.msk.bf16.mxu0 %vm1992_vm0, %v1991_v0  ;;  %1716 = vmatprep.mubr.msk.bf16.mxu1 %vm1992_vm0, %v1991_v0  ;;  %v963_v57 = vpack.c.bf16 %v944_v55, %v943_v54 }
  0x67   : > { %1661 = vmatmul.mubr.msk.bf16.gmra.mrb[32].mxu0 %vm309_vm1, %v287_v61  ;;  %1717 = vmatmul.mubr.msk.bf16.gmra.mrb[32].mxu1 %vm309_vm1, %v242_v62  ;;  %v946_v61 = vld [vmem:[%s2209_s21 + $0x68] sm:$0xff]  ;;  %v706_v62 = vpack.c.bf16 %v688_v59, %v687_v58 }
  0x68   : > { %1664 = vmatprep.mubr.msk.bf16.mxu0 %vm1992_vm0, %v1991_v0  ;;  %1720 = vmatprep.mubr.msk.bf16.mxu1 %vm1992_vm0, %v1991_v0  ;;  %v964_v63 = vpack.c.bf16 %v946_v61, %v945_v60 }
  0x6f   : > { %1665 = vmatmul.mubr.msk.bf16.gmra.mrb[36].mxu0 %vm309_vm1, %v288_v4  ;;  %1721 = vmatmul.mubr.msk.bf16.gmra.mrb[36].mxu1 %vm309_vm1, %v243_v5  ;;  %v948_v4 = vld [vmem:[%s2209_s21 + $0x78] sm:$0xff]  ;;  %v707_v5 = vpack.c.bf16 %v690_v2, %v689_v1 }
  0x70   : > { %1668 = vmatprep.mubr.msk.bf16.mxu0 %vm1992_vm0, %v1991_v0  ;;  %1724 = vmatprep.mubr.msk.bf16.mxu1 %vm1992_vm0, %v1991_v0  ;;  %v965_v6 = vpack.c.bf16 %v948_v4, %v947_v3 }
  0x77   : > { %1669 = vmatmul.mubr.msk.bf16.gmra.mrb[40].mxu0 %vm309_vm1, %v289_v10  ;;  %1725 = vmatmul.mubr.msk.bf16.gmra.mrb[40].mxu1 %vm309_vm1, %v244_v11  ;;  %v950_v10 = vld [vmem:[%s2209_s21 + $0x88] sm:$0xff]  ;;  %v708_v11 = vpack.c.bf16 %v692_v8, %v691_v7 }
  0x78   : > { %1672 = vmatprep.mubr.msk.bf16.mxu0 %vm1992_vm0, %v1991_v0  ;;  %1728 = vmatprep.mubr.msk.bf16.mxu1 %vm1992_vm0, %v1991_v0  ;;  %v966_v12 = vpack.c.bf16 %v950_v10, %v949_v9 }
  0x7f   : > { %1673 = vmatmul.mubr.msk.bf16.gmra.mrb[44].mxu0 %vm309_vm1, %v290_v16  ;;  %1729 = vmatmul.mubr.msk.bf16.gmra.mrb[44].mxu1 %vm309_vm1, %v245_v17  ;;  %v952_v16 = vld [vmem:[%s2209_s21 + $0x98] sm:$0xff]  ;;  %v709_v17 = vpack.c.bf16 %v694_v14, %v693_v13 }
  0x80   : > { %1676 = vmatprep.mubr.msk.bf16.mxu0 %vm1992_vm0, %v1991_v0  ;;  %1732 = vmatprep.mubr.msk.bf16.mxu1 %vm1992_vm0, %v1991_v0  ;;  %v967_v18 = vpack.c.bf16 %v952_v16, %v951_v15 }
  0x87   : > { %1677 = vmatmul.mubr.msk.bf16.gmra.mrb[48].mxu0 %vm309_vm1, %v291_v20  ;;  %1733 = vmatmul.mubr.msk.bf16.gmra.mrb[48].mxu1 %vm309_vm1, %v246_v21  ;;  %v696_v20 = vld [vmem:[%s2203_s18 + $0xa8] sm:$0xff]  ;;  %v953_v21 = vld [vmem:[%s2209_s21 + $0xa0] sm:$0xff] }
  0x88   : > { %1740 = vmatprep.mubr.msk.bf16.mxu0 %vm1992_vm0, %v1991_v0  ;;  %1796 = vmatprep.mubr.msk.bf16.mxu1 %vm1992_vm0, %v1991_v0  ;;  %v710_v23 = vpack.c.bf16 %v696_v20, %v695_v19  ;;  %v968_v24 = vpack.c.bf16 %v954_v22, %v953_v21 }
  0x8f   : > { %1741 = vmatmul.mubr.msk.bf16.vlgmr.msra.gmra.mrb[52].mxu0 %vm309_vm1, %v700_v26  ;;  %1797 = vmatmul.mubr.msk.bf16.vlgmr.msra.gmra.mrb[52].mxu1 %vm309_vm1, %v958_v27  ;;  %v698_v26 = vld [vmem:[%s2203_s18 + $0xb8] sm:$0xff]  ;;  %v955_v27 = vld [vmem:[%s2209_s21 + $0xb0] sm:$0xff] }
  0x90   : > { %1744 = vmatprep.mubr.msk.bf16.mxu0 %vm1992_vm0, %v1991_v0  ;;  %1800 = vmatprep.mubr.msk.bf16.mxu1 %vm1992_vm0, %v1991_v0  ;;  %v711_v29 = vpack.c.bf16 %v698_v26, %v697_v25  ;;  %v969_v30 = vpack.c.bf16 %v956_v28, %v955_v27 }
  0x97   : > { %1745 = vmatmul.mubr.msk.bf16.gmra.mrb[56].mxu0 %vm309_vm1, %v701_v32  ;;  %1801 = vmatmul.mubr.msk.bf16.gmra.mrb[56].mxu1 %vm309_vm1, %v959_v33  ;;  %v957_v32 = vld [vmem:[%s2209_s21 + $0xc0] sm:$0xff]  ;;  %v712_v33 = vpack.c.bf16 %v699_v31, %v699_v31 }
  0x98   : > { %1748 = vmatprep.mubr.msk.bf16.mxu0 %vm1992_vm0, %v1991_v0  ;;  %1804 = vmatprep.mubr.msk.bf16.mxu1 %vm1992_vm0, %v1991_v0  ;;  %v970_v34 = vpack.c.bf16 %v957_v32, %v957_v32 }
  0x9f   : > { %1749 = vmatmul.mubr.msk.bf16.gmra.mrb[60].mxu0 %vm309_vm1, %v702_v38  ;;  %1805 = vmatmul.mubr.msk.bf16.gmra.mrb[60].mxu1 %vm309_vm1, %v960_v39 }
  0xa0   : > { %1752 = vmatprep.mubr.msk.bf16.mxu0 %vm1992_vm0, %v1991_v0  ;;  %1808 = vmatprep.mubr.msk.bf16.mxu1 %vm1992_vm0, %v1991_v0 }
  0xa7   : > { %1753 = vmatmul.mubr.msk.bf16.gmra.mrb[64].mxu0 %vm309_vm1, %v703_v44  ;;  %1809 = vmatmul.mubr.msk.bf16.gmra.mrb[64].mxu1 %vm309_vm1, %v961_v45 }
  0xa8   : > { %1756 = vmatprep.mubr.msk.bf16.mxu0 %vm1992_vm0, %v1991_v0  ;;  %1812 = vmatprep.mubr.msk.bf16.mxu1 %vm1992_vm0, %v1991_v0 }
  0xaf   : > { %1757 = vmatmul.mubr.msk.bf16.gmra.mrb[68].mxu0 %vm309_vm1, %v704_v50  ;;  %1813 = vmatmul.mubr.msk.bf16.gmra.mrb[68].mxu1 %vm309_vm1, %v962_v51 }
  0xb0   : > { %1760 = vmatprep.mubr.msk.bf16.mxu0 %vm1992_vm0, %v1991_v0  ;;  %1816 = vmatprep.mubr.msk.bf16.mxu1 %vm1992_vm0, %v1991_v0 }
  0xb7   : > { %1761 = vmatmul.mubr.msk.bf16.gmra.mrb[72].mxu0 %vm309_vm1, %v705_v56  ;;  %1817 = vmatmul.mubr.msk.bf16.gmra.mrb[72].mxu1 %vm309_vm1, %v963_v57 }
  0xb8   : > { %1764 = vmatprep.mubr.msk.bf16.mxu0 %vm1992_vm0, %v1991_v0  ;;  %1820 = vmatprep.mubr.msk.bf16.mxu1 %vm1992_vm0, %v1991_v0 }
  0xbf   : > { %1765 = vmatmul.mubr.msk.bf16.gmra.mrb[76].mxu0 %vm309_vm1, %v706_v62  ;;  %1821 = vmatmul.mubr.msk.bf16.gmra.mrb[76].mxu1 %vm309_vm1, %v964_v63 }
  0xc0   : > { %1768 = vmatprep.mubr.msk.bf16.mxu0 %vm1992_vm0, %v1991_v0  ;;  %1824 = vmatprep.mubr.msk.bf16.mxu1 %vm1992_vm0, %v1991_v0 }
  0xc7   : > { %1769 = vmatmul.mubr.msk.bf16.gmra.mrb[80].mxu0 %vm309_vm1, %v707_v5  ;;  %1825 = vmatmul.mubr.msk.bf16.gmra.mrb[80].mxu1 %vm309_vm1, %v965_v6 }
  0xc8   : > { %1772 = vmatprep.mubr.msk.bf16.mxu0 %vm1992_vm0, %v1991_v0  ;;  %1828 = vmatprep.mubr.msk.bf16.mxu1 %vm1992_vm0, %v1991_v0 }
  0xcf   : > { %1773 = vmatmul.mubr.msk.bf16.gmra.mrb[84].mxu0 %vm309_vm1, %v708_v11  ;;  %1829 = vmatmul.mubr.msk.bf16.gmra.mrb[84].mxu1 %vm309_vm1, %v966_v12 }
  0xd0   : > { %1776 = vmatprep.mubr.msk.bf16.mxu0 %vm1992_vm0, %v1991_v0  ;;  %1832 = vmatprep.mubr.msk.bf16.mxu1 %vm1992_vm0, %v1991_v0 }
  0xd7   : > { %1777 = vmatmul.mubr.msk.bf16.gmra.mrb[88].mxu0 %vm309_vm1, %v709_v17  ;;  %1833 = vmatmul.mubr.msk.bf16.gmra.mrb[88].mxu1 %vm309_vm1, %v967_v18 }
  0xd8   : > { %1780 = vmatprep.mubr.msk.bf16.mxu0 %vm1992_vm0, %v1991_v0  ;;  %1836 = vmatprep.mubr.msk.bf16.mxu1 %vm1992_vm0, %v1991_v0 }
  0xdf   : > { %1781 = vmatmul.mubr.msk.bf16.gmra.mrb[92].mxu0 %vm309_vm1, %v710_v23  ;;  %1837 = vmatmul.mubr.msk.bf16.gmra.mrb[92].mxu1 %vm309_vm1, %v968_v24 }
  0xe0   : > { %1784 = vmatprep.mubr.msk.bf16.mxu0 %vm1992_vm0, %v1991_v0  ;;  %1840 = vmatprep.mubr.msk.bf16.mxu1 %vm1992_vm0, %v1991_v0 }
  0xe7   : > { %1785 = vmatmul.mubr.msk.bf16.gmra.mrb[96].mxu0 %vm309_vm1, %v711_v29  ;;  %1841 = vmatmul.mubr.msk.bf16.gmra.mrb[96].mxu1 %vm309_vm1, %v969_v30 }
  0xe8   : > { %1788 = vmatprep.mubr.msk.bf16.mxu0 %vm1992_vm0, %v1991_v0  ;;  %1844 = vmatprep.mubr.msk.bf16.mxu1 %vm1992_vm0, %v1991_v0 }
  0xef   : > { %1789 = vmatmul.mubr.msk.bf16.gmra.mrb[100].mxu0 %vm309_vm1, %v712_v33  ;;  %1845 = vmatmul.mubr.msk.bf16.gmra.mrb[100].mxu1 %vm309_vm1, %v970_v34 }
  0xfa   : > { %v383_v35 = vpop.f32.mrb[0].mxu0  ;;  %v570_v37 = vpop.f32.mrb[0].mxu1 }
  0xfb   : > { %v1630_v36 = vpop.f32.mrb[1].mxu0  ;;  %v2340_v39 = vadd.f32 %v570_v37, %v383_v35  ;;  %v1686_v40 = vpop.f32.mrb[1].mxu1 }
  0xfc   : > { %v386_v38 = vpop.f32.mrb[2].mxu0  ;;  %v573_v42 = vpop.f32.mrb[2].mxu1 }
  0xfd   : > { %v1631_v41 = vpop.f32.mrb[3].mxu0  ;;  %v2342_v43 = vadd.f32 %v573_v42, %v386_v38  ;;  %v1687_v44 = vpop.f32.mrb[3].mxu1 }
 0x102   : > { %v391_v0 = vpop.f32.mrb[4].mxu0  ;;  %v578_v46 = vpop.f32.mrb[4].mxu1 }
 0x103   : > { %v1634_v45 = vpop.f32.mrb[5].mxu0  ;;  %v2344_v48 = vadd.f32 %v578_v46, %v391_v0  ;;  %v1690_v49 = vpop.f32.mrb[5].mxu1 }
 0x104   : > { %v394_v47 = vpop.f32.mrb[6].mxu0  ;;  %v581_v51 = vpop.f32.mrb[6].mxu1 }
 0x105   : > { %v1635_v50 = vpop.f32.mrb[7].mxu0  ;;  %v2346_v52 = vadd.f32 %v581_v51, %v394_v47  ;;  %v1691_v53 = vpop.f32.mrb[7].mxu1 }
 0x10a   : > { %v399_v54 = vpop.f32.mrb[8].mxu0  ;;  %v586_v56 = vpop.f32.mrb[8].mxu1 }
 0x10b   : > { %v1638_v55 = vpop.f32.mrb[9].mxu0  ;;  %v2348_v58 = vadd.f32 %v586_v56, %v399_v54  ;;  %v1694_v59 = vpop.f32.mrb[9].mxu1 }
 0x10c   : > { %v402_v57 = vpop.f32.mrb[10].mxu0  ;;  %v589_v61 = vpop.f32.mrb[10].mxu1 }
 0x10d   : > { %v1639_v60 = vpop.f32.mrb[11].mxu0  ;;  %v2350_v62 = vadd.f32 %v589_v61, %v402_v57  ;;  %v1695_v63 = vpop.f32.mrb[11].mxu1 }
 0x112   : > { %v407_v1 = vpop.f32.mrb[12].mxu0  ;;  %v594_v3 = vpop.f32.mrb[12].mxu1 }
 0x113   : > { %v1642_v2 = vpop.f32.mrb[13].mxu0  ;;  %v2352_v5 = vadd.f32 %v594_v3, %v407_v1  ;;  %v1698_v6 = vpop.f32.mrb[13].mxu1 }
 0x114   : > { %v410_v4 = vpop.f32.mrb[14].mxu0  ;;  %v597_v8 = vpop.f32.mrb[14].mxu1 }
 0x115   : > { %v1643_v7 = vpop.f32.mrb[15].mxu0  ;;  %v2354_v9 = vadd.f32 %v597_v8, %v410_v4  ;;  %v1699_v10 = vpop.f32.mrb[15].mxu1 }
 0x11a   : > { %v415_v11 = vpop.f32.mrb[16].mxu0  ;;  %v602_v13 = vpop.f32.mrb[16].mxu1 }
 0x11b   : > { %v1646_v12 = vpop.f32.mrb[17].mxu0  ;;  %v2356_v15 = vadd.f32 %v602_v13, %v415_v11  ;;  %v1702_v16 = vpop.f32.mrb[17].mxu1 }
 0x11c   : > { %v418_v14 = vpop.f32.mrb[18].mxu0  ;;  %v605_v18 = vpop.f32.mrb[18].mxu1 }
 0x11d   : > { %v1647_v17 = vpop.f32.mrb[19].mxu0  ;;  %v2358_v19 = vadd.f32 %v605_v18, %v418_v14  ;;  %v1703_v20 = vpop.f32.mrb[19].mxu1 }
 0x122   : > { %v423_v21 = vpop.f32.mrb[20].mxu0  ;;  %v610_v23 = vpop.f32.mrb[20].mxu1 }
 0x123   : > { %v1650_v22 = vpop.f32.mrb[21].mxu0  ;;  %v2360_v25 = vadd.f32 %v610_v23, %v423_v21  ;;  %v1706_v26 = vpop.f32.mrb[21].mxu1 }
 0x124   : > { %v426_v24 = vpop.f32.mrb[22].mxu0  ;;  %v613_v28 = vpop.f32.mrb[22].mxu1 }
 0x125   : > { %v1651_v27 = vpop.f32.mrb[23].mxu0  ;;  %v2362_v29 = vadd.f32 %v613_v28, %v426_v24  ;;  %v1707_v30 = vpop.f32.mrb[23].mxu1 }
 0x12a   : > { %v431_v31 = vpop.f32.mrb[24].mxu0  ;;  %v618_v33 = vpop.f32.mrb[24].mxu1 }
 0x12b   : > { %v1654_v32 = vpop.f32.mrb[25].mxu0  ;;  %v2364_v35 = vadd.f32 %v618_v33, %v431_v31  ;;  %v1710_v36 = vpop.f32.mrb[25].mxu1 }
 0x12c   : > { %v434_v34 = vpop.f32.mrb[26].mxu0  ;;  %v621_v38 = vpop.f32.mrb[26].mxu1 }
 0x12d   : > { %v1655_v37 = vpop.f32.mrb[27].mxu0  ;;  %v2366_v40 = vadd.f32 %v621_v38, %v434_v34  ;;  %v1711_v41 = vpop.f32.mrb[27].mxu1 }
 0x132   : > { %v439_v42 = vpop.f32.mrb[28].mxu0  ;;  %v626_v0 = vpop.f32.mrb[28].mxu1 }
 0x133   : > { %v1658_v44 = vpop.f32.mrb[29].mxu0  ;;  %v2368_v46 = vadd.f32 %v626_v0, %v439_v42  ;;  %v1714_v47 = vpop.f32.mrb[29].mxu1 }
 0x134   : > { %v442_v45 = vpop.f32.mrb[30].mxu0  ;;  %v629_v50 = vpop.f32.mrb[30].mxu1 }
 0x135   : > { %v1659_v49 = vpop.f32.mrb[31].mxu0  ;;  %v2370_v51 = vadd.f32 %v629_v50, %v442_v45  ;;  %v1715_v53 = vpop.f32.mrb[31].mxu1 }
 0x13a   : > { %v447_v54 = vpop.f32.mrb[32].mxu0  ;;  %v634_v56 = vpop.f32.mrb[32].mxu1 }
 0x13b   : > { %v1662_v55 = vpop.f32.mrb[33].mxu0  ;;  %v2372_v59 = vadd.f32 %v634_v56, %v447_v54  ;;  %v1718_v60 = vpop.f32.mrb[33].mxu1 }
 0x13c   : > { %v450_v57 = vpop.f32.mrb[34].mxu0  ;;  %v637_v63 = vpop.f32.mrb[34].mxu1 }
 0x13d   : > { %v1663_v61 = vpop.f32.mrb[35].mxu0  ;;  %v2374_v1 = vadd.f32 %v637_v63, %v450_v57  ;;  %v1719_v2 = vpop.f32.mrb[35].mxu1 }
 0x13e   : > { %v2394_v61 = vld [vmem:[%s2482_s3] ss:$0 sm:$0xff] }
 0x142   : > { %v455_v3 = vpop.f32.mrb[36].mxu0  ;;  %v642_v6 = vpop.f32.mrb[36].mxu1 }
 0x143   : > { %v1666_v4 = vpop.f32.mrb[37].mxu0  ;;  %v2376_v8 = vadd.f32 %v642_v6, %v455_v3  ;;  %v1722_v10 = vpop.f32.mrb[37].mxu1 }
 0x144   : > { %v458_v7 = vpop.f32.mrb[38].mxu0  ;;  %v645_v12 = vpop.f32.mrb[38].mxu1 }
 0x145   : > { %v1667_v11 = vpop.f32.mrb[39].mxu0  ;;  %v2378_v13 = vadd.f32 %v645_v12, %v458_v7  ;;  %v1723_v14 = vpop.f32.mrb[39].mxu1 }
 0x14a   : > { %v463_v16 = vpop.f32.mrb[40].mxu0  ;;  %v650_v18 = vpop.f32.mrb[40].mxu1 }
 0x14b   : > { %v1670_v17 = vpop.f32.mrb[41].mxu0  ;;  %v2380_v21 = vadd.f32 %v650_v18, %v463_v16  ;;  %v1726_v22 = vpop.f32.mrb[41].mxu1 }
 0x14c   : > { %v466_v20 = vpop.f32.mrb[42].mxu0  ;;  %v653_v24 = vpop.f32.mrb[42].mxu1 }
 0x14d   : > { %v1671_v23 = vpop.f32.mrb[43].mxu0  ;;  %v2382_v26 = vadd.f32 %v653_v24, %v466_v20  ;;  %v1727_v27 = vpop.f32.mrb[43].mxu1 }
 0x152   : > { %v471_v28 = vpop.f32.mrb[44].mxu0  ;;  %v658_v31 = vpop.f32.mrb[44].mxu1 }
 0x153   : > { %v1674_v30 = vpop.f32.mrb[45].mxu0  ;;  %v2384_v33 = vadd.f32 %v658_v31, %v471_v28  ;;  %v1730_v34 = vpop.f32.mrb[45].mxu1 }
 0x154   : > { %v474_v32 = vpop.f32.mrb[46].mxu0  ;;  %v661_v37 = vpop.f32.mrb[46].mxu1 }
 0x155   : > { %v1675_v36 = vpop.f32.mrb[47].mxu0  ;;  %v2386_v38 = vadd.f32 %v661_v37, %v474_v32  ;;  %v1731_v41 = vpop.f32.mrb[47].mxu1 }
 0x15a   : > { %v479_v42 = vpop.f32.mrb[48].mxu0  ;;  %v666_v0 = vpop.f32.mrb[48].mxu1 }
 0x15b   : > { %v1678_v44 = vpop.f32.mrb[49].mxu0  ;;  %v2388_v47 = vadd.f32 %v666_v0, %v479_v42  ;;  %v1734_v49 = vpop.f32.mrb[49].mxu1 }
 0x15c   : > { %v482_v45 = vpop.f32.mrb[50].mxu0  ;;  %v669_v53 = vpop.f32.mrb[50].mxu1 }
 0x15d   : > { %v1679_v50 = vpop.f32.mrb[51].mxu0  ;;  %v1735_v54 = vpop.f32.mrb[51].mxu1 }
 0x162   : > { %v803_v55 = vpop.f32.mrb[52].mxu0  ;;  %v1061_v60 = vpop.f32.mrb[52].mxu1 }
 0x163   : > { %v905_v56 = vadd.f32 %v803_v55, %v2340_v39  ;;  %v1742_v57 = vpop.f32.mrb[53].mxu0  ;;  %v1798_v3 = vpop.f32.mrb[53].mxu1 }
 0x164   : > { %v806_v63 = vpop.f32.mrb[54].mxu0  ;;  %v1064_v7 = vpop.f32.mrb[54].mxu1 }
 0x165   : > { %v1163_v2 = vadd.f32 %v1061_v60, %v905_v56  ;;  %v906_v4 = vadd.f32 %v806_v63, %v2342_v43  ;;  %v1743_v6 = vpop.f32.mrb[55].mxu0  ;;  %v1799_v12 = vpop.f32.mrb[55].mxu1 }
 0x167   : > { %v1195_v10 = vadd.f32 %v2394_v61, %v1163_v2  ;;  %v1164_v11 = vadd.f32 %v1064_v7, %v906_v4 }
 0x169   : > { %v1536_v14 = vmul.f32 -1.442695, %v1195_v10  ;;  %v1196_v39 = vadd.f32 %v2394_v61, %v1164_v11 }
 0x16a   : > { %v811_v16 = vpop.f32.mrb[56].mxu0  ;;  %v1069_v22 = vpop.f32.mrb[56].mxu1 }
 0x16b   : > { %1868 = vpow2.f32 %v1536_v14  ;;  %v1537_v17 = vmul.f32 -1.442695, %v1196_v39  ;;  %v907_v18 = vadd.f32 %v811_v16, %v2344_v48  ;;  %v1746_v20 = vpop.f32.mrb[57].mxu0  ;;  %v1802_v43 = vpop.f32.mrb[57].mxu1 }
 0x16c   : > { %v814_v23 = vpop.f32.mrb[58].mxu0  ;;  %v1072_v30 = vpop.f32.mrb[58].mxu1 }
 0x16d   : > { %1870 = vpow2.f32 %v1537_v17  ;;  %v1165_v24 = vadd.f32 %v1069_v22, %v907_v18  ;;  %v908_v27 = vadd.f32 %v814_v23, %v2346_v52  ;;  %v1747_v28 = vpop.f32.mrb[59].mxu0  ;;  %v1803_v34 = vpop.f32.mrb[59].mxu1 }
 0x16f   : > { %v1197_v31 = vadd.f32 %v2394_v61, %v1165_v24  ;;  %v1166_v32 = vadd.f32 %v1072_v30, %v908_v27 }
 0x171   : > { %v1538_v36 = vmul.f32 -1.442695, %v1197_v31  ;;  %v1198_v37 = vadd.f32 %v2394_v61, %v1166_v32 }
 0x172   : > { %v819_v41 = vpop.f32.mrb[60].mxu0  ;;  %v1077_v0 = vpop.f32.mrb[60].mxu1 }
 0x173   : > { %1872 = vpow2.f32 %v1538_v36  ;;  %v1539_v48 = vmul.f32 -1.442695, %v1198_v37  ;;  %v909_v42 = vadd.f32 %v819_v41, %v2348_v58  ;;  %v1750_v44 = vpop.f32.mrb[61].mxu0  ;;  %v1806_v50 = vpop.f32.mrb[61].mxu1 }
 0x174   : > { %v822_v45 = vpop.f32.mrb[62].mxu0  ;;  %v1080_v56 = vpop.f32.mrb[62].mxu1 }
 0x175   : > { %v1869_v49 = vpop.eup %1868  ;;  %1874 = vpow2.f32 %v1539_v48  ;;  %v1167_v52 = vadd.f32 %v1077_v0, %v909_v42  ;;  %v910_v53 = vadd.f32 %v822_v45, %v2350_v62  ;;  %v1751_v54 = vpop.f32.mrb[63].mxu0 }
 0x176   : > { %v1295_v55 = vadd.f32 1.0, %v1869_v49  ;;  %v1807_v2 = vpop.f32.mrb[63].mxu1 }
 0x177   : > { %v1871_v57 = vpop.eup %1870  ;;  %v1199_v60 = vadd.f32 %v2394_v61, %v1167_v52  ;;  %v1168_v63 = vadd.f32 %v1080_v56, %v910_v53 }
 0x178   : > { %1876 = vrcp.f32 %v1295_v55  ;;  %v1296_v58 = vadd.f32 1.0, %v1871_v57 }
 0x179   : > { %v1540_v3 = vmul.f32 -1.442695, %v1199_v60  ;;  %v1200_v4 = vadd.f32 %v2394_v61, %v1168_v63 }
 0x17a   : > { %1878 = vrcp.f32 %v1296_v58  ;;  %v827_v6 = vpop.f32.mrb[64].mxu0  ;;  %v1085_v11 = vpop.f32.mrb[64].mxu1 }
 0x17b   : > { %1880 = vpow2.f32 %v1540_v3  ;;  %v1541_v7 = vmul.f32 -1.442695, %v1200_v4  ;;  %v911_v62 = vadd.f32 %v827_v6, %v2352_v5  ;;  %v1754_v10 = vpop.f32.mrb[65].mxu0  ;;  %v1810_v16 = vpop.f32.mrb[65].mxu1 }
 0x17c   : > { %v830_v12 = vpop.f32.mrb[66].mxu0  ;;  %v1088_v22 = vpop.f32.mrb[66].mxu1 }
 0x17d   : > { %v1873_v14 = vpop.eup %1872  ;;  %1882 = vpow2.f32 %v1541_v7  ;;  %v1169_v39 = vadd.f32 %v1085_v11, %v911_v62  ;;  %v912_v17 = vadd.f32 %v830_v12, %v2354_v9  ;;  %v1755_v18 = vpop.f32.mrb[67].mxu0 }
 0x17e   : > { %v1297_v20 = vadd.f32 1.0, %v1873_v14  ;;  %v1811_v27 = vpop.f32.mrb[67].mxu1 }
 0x17f   : > { %v1875_v23 = vpop.eup %1874  ;;  %v1201_v24 = vadd.f32 %v2394_v61, %v1169_v39  ;;  %v1170_v43 = vadd.f32 %v1088_v22, %v912_v17 }
 0x180   : > { %1884 = vrcp.f32 %v1297_v20  ;;  %v1298_v5 = vadd.f32 1.0, %v1875_v23 }
 0x181   : > { %v1542_v28 = vmul.f32 -1.442695, %v1201_v24  ;;  %v1202_v9 = vadd.f32 %v2394_v61, %v1170_v43 }
 0x182   : > { %v1877_v30 = vpop.eup %1876  ;;  %1886 = vrcp.f32 %v1298_v5  ;;  %v835_v31 = vpop.f32.mrb[68].mxu0 }
 0x183   : > { %1370 = vst [vmem:[%s2414_s0] sm:$0xff] %v1877_v30  ;;  %1888 = vpow2.f32 %v1542_v28  ;;  %v1543_v32 = vmul.f32 -1.442695, %v1202_v9  ;;  %v913_v34 = vadd.f32 %v835_v31, %v2356_v15  ;;  %v1758_v36 = vpop.f32.mrb[69].mxu0  ;;  %v1093_v41 = vpop.f32.mrb[68].mxu1 }
 0x184   : > { %v1879_v37 = vpop.eup %1878  ;;  %v838_v48 = vpop.f32.mrb[70].mxu0 }
 0x185   : > { %v1881_v42 = vpop.eup %1880  ;;  %1371 = vst [vmem:[%s2414_s0 + $0x8] sm:$0xff] %v1879_v37  ;;  %1890 = vpow2.f32 %v1543_v32  ;;  %v1171_v44 = vadd.f32 %v1093_v41, %v913_v34  ;;  %v1814_v0 = vpop.f32.mrb[69].mxu1  ;;  %v914_v45 = vadd.f32 %v838_v48, %v2358_v19 }
 0x186   : > { %v1759_v49 = vpop.f32.mrb[71].mxu0  ;;  %v1299_v52 = vadd.f32 1.0, %v1881_v42  ;;  %v1096_v50 = vpop.f32.mrb[70].mxu1 }
 0x187   : > { %v1883_v53 = vpop.eup %1882  ;;  %v1203_v54 = vadd.f32 %v2394_v61, %v1171_v44  ;;  %v1172_v55 = vadd.f32 %v1096_v50, %v914_v45  ;;  %v1815_v15 = vpop.f32.mrb[71].mxu1 }
 0x188   : > { %1892 = vrcp.f32 %v1299_v52  ;;  %v1300_v56 = vadd.f32 1.0, %v1883_v53 }
 0x189   : > { %v1544_v57 = vmul.f32 -1.442695, %v1203_v54  ;;  %v1204_v60 = vadd.f32 %v2394_v61, %v1172_v55 }
 0x18a   : > { %v1885_v63 = vpop.eup %1884  ;;  %1894 = vrcp.f32 %v1300_v56  ;;  %v843_v2 = vpop.f32.mrb[72].mxu0 }
 0x18b   : > { %1372 = vst [vmem:[%s2414_s0 + $0x10] sm:$0xff] %v1885_v63  ;;  %1896 = vpow2.f32 %v1544_v57  ;;  %v1545_v19 = vmul.f32 -1.442695, %v1204_v60  ;;  %v915_v58 = vadd.f32 %v843_v2, %v2360_v25  ;;  %v1762_v3 = vpop.f32.mrb[73].mxu0  ;;  %v1101_v6 = vpop.f32.mrb[72].mxu1 }
 0x18c   : > { %v1887_v4 = vpop.eup %1886  ;;  %v846_v7 = vpop.f32.mrb[74].mxu0 }
 0x18d   : > { %v1889_v62 = vpop.eup %1888  ;;  %1373 = vst [vmem:[%s2414_s0 + $0x18] sm:$0xff] %v1887_v4  ;;  %1898 = vpow2.f32 %v1545_v19  ;;  %v1173_v10 = vadd.f32 %v1101_v6, %v915_v58  ;;  %v1818_v11 = vpop.f32.mrb[73].mxu1  ;;  %v916_v12 = vadd.f32 %v846_v7, %v2362_v29 }
 0x18e   : > { %v1763_v14 = vpop.f32.mrb[75].mxu0  ;;  %v1301_v39 = vadd.f32 1.0, %v1889_v62  ;;  %v1104_v16 = vpop.f32.mrb[74].mxu1 }
 0x18f   : > { %v1891_v17 = vpop.eup %1890  ;;  %v1205_v18 = vadd.f32 %v2394_v61, %v1173_v10  ;;  %v1174_v20 = vadd.f32 %v1104_v16, %v916_v12  ;;  %v1819_v25 = vpop.f32.mrb[75].mxu1 }
 0x190   : > { %1900 = vrcp.f32 %v1301_v39  ;;  %v1302_v22 = vadd.f32 1.0, %v1891_v17 }
 0x191   : > { %v1546_v23 = vmul.f32 -1.442695, %v1205_v18  ;;  %v1206_v24 = vadd.f32 %v2394_v61, %v1174_v20 }
 0x192   : > { %v1893_v43 = vpop.eup %1892  ;;  %1902 = vrcp.f32 %v1302_v22  ;;  %v851_v27 = vpop.f32.mrb[76].mxu0 }
 0x193   : > { %1374 = vst [vmem:[%s2414_s0 + $0x20] sm:$0xff] %v1893_v43  ;;  %1904 = vpow2.f32 %v1546_v23  ;;  %v1547_v29 = vmul.f32 -1.442695, %v1206_v24  ;;  %v917_v5 = vadd.f32 %v851_v27, %v2364_v35  ;;  %v1766_v28 = vpop.f32.mrb[77].mxu0  ;;  %v1109_v30 = vpop.f32.mrb[76].mxu1 }
 0x194   : > { %v1895_v9 = vpop.eup %1894  ;;  %v854_v31 = vpop.f32.mrb[78].mxu0 }
 0x195   : > { %v1897_v32 = vpop.eup %1896  ;;  %1375 = vst [vmem:[%s2414_s0 + $0x28] sm:$0xff] %v1895_v9  ;;  %1906 = vpow2.f32 %v1547_v29  ;;  %v1175_v34 = vadd.f32 %v1109_v30, %v917_v5  ;;  %v1822_v36 = vpop.f32.mrb[77].mxu1  ;;  %v918_v37 = vadd.f32 %v854_v31, %v2366_v40 }
 0x196   : > { %v1767_v41 = vpop.f32.mrb[79].mxu0  ;;  %v1303_v48 = vadd.f32 1.0, %v1897_v32  ;;  %v1112_v42 = vpop.f32.mrb[78].mxu1 }
 0x197   : > { %v1899_v44 = vpop.eup %1898  ;;  %v1207_v0 = vadd.f32 %v2394_v61, %v1175_v34  ;;  %v1176_v45 = vadd.f32 %v1112_v42, %v918_v37  ;;  %v1823_v35 = vpop.f32.mrb[79].mxu1 }
 0x198   : > { %1908 = vrcp.f32 %v1303_v48  ;;  %v1304_v49 = vadd.f32 1.0, %v1899_v44 }
 0x199   : > { %v1548_v52 = vmul.f32 -1.442695, %v1207_v0  ;;  %v1208_v50 = vadd.f32 %v2394_v61, %v1176_v45 }
 0x19a   : > { %v1901_v53 = vpop.eup %1900  ;;  %1910 = vrcp.f32 %v1304_v49  ;;  %v859_v54 = vpop.f32.mrb[80].mxu0 }
 0x19b   : > { %1376 = vst [vmem:[%s2414_s0 + $0x30] sm:$0xff] %v1901_v53  ;;  %1912 = vpow2.f32 %v1548_v52  ;;  %v1549_v40 = vmul.f32 -1.442695, %v1208_v50  ;;  %v919_v55 = vadd.f32 %v859_v54, %v2368_v46  ;;  %v1770_v15 = vpop.f32.mrb[81].mxu0  ;;  %v1117_v57 = vpop.f32.mrb[80].mxu1 }
 0x19c   : > { %v1903_v56 = vpop.eup %1902  ;;  %v862_v60 = vpop.f32.mrb[82].mxu0 }
 0x19d   : > { %v1905_v63 = vpop.eup %1904  ;;  %1377 = vst [vmem:[%s2414_s0 + $0x38] sm:$0xff] %v1903_v56  ;;  %1914 = vpow2.f32 %v1549_v40  ;;  %v1177_v2 = vadd.f32 %v1117_v57, %v919_v55  ;;  %v1826_v19 = vpop.f32.mrb[81].mxu1  ;;  %v920_v58 = vadd.f32 %v862_v60, %v2370_v51 }
 0x19e   : > { %v1771_v3 = vpop.f32.mrb[83].mxu0  ;;  %v1305_v4 = vadd.f32 1.0, %v1905_v63  ;;  %v1120_v6 = vpop.f32.mrb[82].mxu1 }
 0x19f   : > { %v1907_v7 = vpop.eup %1906  ;;  %v1209_v62 = vadd.f32 %v2394_v61, %v1177_v2  ;;  %v1178_v10 = vadd.f32 %v1120_v6, %v920_v58  ;;  %v1827_v46 = vpop.f32.mrb[83].mxu1 }
 0x1a0   : > { %1916 = vrcp.f32 %v1305_v4  ;;  %v1306_v11 = vadd.f32 1.0, %v1907_v7 }
 0x1a1   : > { %v1550_v12 = vmul.f32 -1.442695, %v1209_v62  ;;  %v1210_v14 = vadd.f32 %v2394_v61, %v1178_v10 }
 0x1a2   : > { %v1909_v39 = vpop.eup %1908  ;;  %1918 = vrcp.f32 %v1306_v11  ;;  %v867_v16 = vpop.f32.mrb[84].mxu0 }
 0x1a3   : > { %1378 = vst [vmem:[%s2414_s0 + $0x40] sm:$0xff] %v1909_v39  ;;  %1920 = vpow2.f32 %v1550_v12  ;;  %v1551_v51 = vmul.f32 -1.442695, %v1210_v14  ;;  %v921_v17 = vadd.f32 %v867_v16, %v2372_v59  ;;  %v1774_v18 = vpop.f32.mrb[85].mxu0  ;;  %v1125_v25 = vpop.f32.mrb[84].mxu1 }
 0x1a4   : > { %v1911_v20 = vpop.eup %1910  ;;  %v870_v22 = vpop.f32.mrb[86].mxu0 }
 0x1a5   : > { %v1913_v23 = vpop.eup %1912  ;;  %1379 = vst [vmem:[%s2414_s0 + $0x48] sm:$0xff] %v1911_v20  ;;  %1922 = vpow2.f32 %v1551_v51  ;;  %v1179_v24 = vadd.f32 %v1125_v25, %v921_v17  ;;  %v1830_v43 = vpop.f32.mrb[85].mxu1  ;;  %v922_v27 = vadd.f32 %v870_v22, %v2374_v1 }
 0x1a6   : > { %v1775_v29 = vpop.f32.mrb[87].mxu0  ;;  %v1307_v5 = vadd.f32 1.0, %v1913_v23  ;;  %v1128_v28 = vpop.f32.mrb[86].mxu1 }
 0x1a7   : > { %v1915_v9 = vpop.eup %1914  ;;  %v1211_v30 = vadd.f32 %v2394_v61, %v1179_v24  ;;  %v1180_v31 = vadd.f32 %v1128_v28, %v922_v27  ;;  %v1831_v59 = vpop.f32.mrb[87].mxu1 }
 0x1a8   : > { %1924 = vrcp.f32 %v1307_v5  ;;  %v1308_v32 = vadd.f32 1.0, %v1915_v9 }
 0x1a9   : > { %v1552_v34 = vmul.f32 -1.442695, %v1211_v30  ;;  %v1212_v36 = vadd.f32 %v2394_v61, %v1180_v31 }
 0x1aa   : > { %v1917_v37 = vpop.eup %1916  ;;  %1926 = vrcp.f32 %v1308_v32  ;;  %v875_v41 = vpop.f32.mrb[88].mxu0 }
 0x1ab   : > { %1380 = vst [vmem:[%s2414_s0 + $0x50] sm:$0xff] %v1917_v37  ;;  %1928 = vpow2.f32 %v1552_v34  ;;  %v1553_v1 = vmul.f32 -1.442695, %v1212_v36  ;;  %v923_v48 = vadd.f32 %v875_v41, %v2376_v8  ;;  %v1778_v42 = vpop.f32.mrb[89].mxu0  ;;  %v1133_v0 = vpop.f32.mrb[88].mxu1 }
 0x1ac   : > { %v1919_v44 = vpop.eup %1918  ;;  %v878_v45 = vpop.f32.mrb[90].mxu0 }
 0x1ad   : > { %v1921_v35 = vpop.eup %1920  ;;  %1381 = vst [vmem:[%s2414_s0 + $0x58] sm:$0xff] %v1919_v44  ;;  %1930 = vpow2.f32 %v1553_v1  ;;  %v1181_v49 = vadd.f32 %v1133_v0, %v923_v48  ;;  %v1834_v52 = vpop.f32.mrb[89].mxu1  ;;  %v924_v50 = vadd.f32 %v878_v45, %v2378_v13 }
 0x1ae   : > { %v1779_v53 = vpop.f32.mrb[91].mxu0  ;;  %v1309_v54 = vadd.f32 1.0, %v1921_v35  ;;  %v1136_v40 = vpop.f32.mrb[90].mxu1 }
 0x1af   : > { %v1923_v55 = vpop.eup %1922  ;;  %v1213_v15 = vadd.f32 %v2394_v61, %v1181_v49  ;;  %v1182_v56 = vadd.f32 %v1136_v40, %v924_v50  ;;  %v1835_v8 = vpop.f32.mrb[91].mxu1 }
 0x1b0   : > { %1932 = vrcp.f32 %v1309_v54  ;;  %v1310_v57 = vadd.f32 1.0, %v1923_v55 }
 0x1b1   : > { %v1554_v60 = vmul.f32 -1.442695, %v1213_v15  ;;  %v1214_v63 = vadd.f32 %v2394_v61, %v1182_v56 }
 0x1b2   : > { %v1925_v2 = vpop.eup %1924  ;;  %1934 = vrcp.f32 %v1310_v57  ;;  %v883_v19 = vpop.f32.mrb[92].mxu0 }
 0x1b3   : > { %1382 = vst [vmem:[%s2414_s0 + $0x60] sm:$0xff] %v1925_v2  ;;  %1936 = vpow2.f32 %v1554_v60  ;;  %v1555_v13 = vmul.f32 -1.442695, %v1214_v63  ;;  %v925_v58 = vadd.f32 %v883_v19, %v2380_v21  ;;  %v1782_v3 = vpop.f32.mrb[93].mxu0  ;;  %v1141_v6 = vpop.f32.mrb[92].mxu1 }
 0x1b4   : > { %v1927_v4 = vpop.eup %1926  ;;  %v886_v7 = vpop.f32.mrb[94].mxu0 }
 0x1b5   : > { %v1929_v62 = vpop.eup %1928  ;;  %1383 = vst [vmem:[%s2414_s0 + $0x68] sm:$0xff] %v1927_v4  ;;  %1938 = vpow2.f32 %v1555_v13  ;;  %v1183_v10 = vadd.f32 %v1141_v6, %v925_v58  ;;  %v1838_v46 = vpop.f32.mrb[93].mxu1  ;;  %v926_v11 = vadd.f32 %v886_v7, %v2382_v26 }
 0x1b6   : > { %v1783_v12 = vpop.f32.mrb[95].mxu0  ;;  %v1311_v14 = vadd.f32 1.0, %v1929_v62  ;;  %v1144_v39 = vpop.f32.mrb[94].mxu1 }
 0x1b7   : > { %v1931_v16 = vpop.eup %1930  ;;  %v1215_v51 = vadd.f32 %v2394_v61, %v1183_v10  ;;  %v1184_v17 = vadd.f32 %v1144_v39, %v926_v11  ;;  %v1839_v21 = vpop.f32.mrb[95].mxu1 }
 0x1b8   : > { %1940 = vrcp.f32 %v1311_v14  ;;  %v1312_v18 = vadd.f32 1.0, %v1931_v16 }
 0x1b9   : > { %v1556_v20 = vmul.f32 -1.442695, %v1215_v51  ;;  %v1216_v25 = vadd.f32 %v2394_v61, %v1184_v17 }
 0x1ba   : > { %v1933_v22 = vpop.eup %1932  ;;  %1942 = vrcp.f32 %v1312_v18  ;;  %v891_v23 = vpop.f32.mrb[96].mxu0 }
 0x1bb   : > { %1384 = vst [vmem:[%s2414_s0 + $0x70] sm:$0xff] %v1933_v22  ;;  %1944 = vpow2.f32 %v1556_v20  ;;  %v1557_v26 = vmul.f32 -1.442695, %v1216_v25  ;;  %v927_v24 = vadd.f32 %v891_v23, %v2384_v33  ;;  %v1786_v43 = vpop.f32.mrb[97].mxu0  ;;  %v1149_v29 = vpop.f32.mrb[96].mxu1 }
 0x1bc   : > { %v1935_v27 = vpop.eup %1934  ;;  %v894_v5 = vpop.f32.mrb[98].mxu0 }
 0x1bd   : > { %v1937_v28 = vpop.eup %1936  ;;  %1385 = vst [vmem:[%s2414_s0 + $0x78] sm:$0xff] %v1935_v27  ;;  %1946 = vpow2.f32 %v1557_v26  ;;  %v1185_v9 = vadd.f32 %v1149_v29, %v927_v24  ;;  %v1842_v30 = vpop.f32.mrb[97].mxu1  ;;  %v928_v31 = vadd.f32 %v894_v5, %v2386_v38 }
 0x1be   : > { %v1787_v59 = vpop.f32.mrb[99].mxu0  ;;  %v1313_v32 = vadd.f32 1.0, %v1937_v28  ;;  %v1152_v34 = vpop.f32.mrb[98].mxu1 }
 0x1bf   : > { %v1939_v36 = vpop.eup %1938  ;;  %v1217_v37 = vadd.f32 %v2394_v61, %v1185_v9  ;;  %v1186_v41 = vadd.f32 %v1152_v34, %v928_v31  ;;  %v1843_v33 = vpop.f32.mrb[99].mxu1 }
 0x1c0   : > { %1948 = vrcp.f32 %v1313_v32  ;;  %v1314_v1 = vadd.f32 1.0, %v1939_v36 }
 0x1c1   : > { %v1558_v48 = vmul.f32 -1.442695, %v1217_v37  ;;  %v1218_v42 = vadd.f32 %v2394_v61, %v1186_v41 }
 0x1c2   : > { %v1941_v44 = vpop.eup %1940  ;;  %1950 = vrcp.f32 %v1314_v1  ;;  %v899_v0 = vpop.f32.mrb[100].mxu0 }
 0x1c3   : > { %1386 = vst [vmem:[%s2414_s0 + $0x80] sm:$0xff] %v1941_v44  ;;  %1952 = vpow2.f32 %v1558_v48  ;;  %v1559_v38 = vmul.f32 -1.442695, %v1218_v42  ;;  %v929_v45 = vadd.f32 %v899_v0, %v2388_v47  ;;  %v1790_v35 = vpop.f32.mrb[101].mxu0  ;;  %v1157_v52 = vpop.f32.mrb[100].mxu1 }
 0x1c4   : > { %v1943_v49 = vpop.eup %1942  ;;  %v902_v50 = vpop.f32.mrb[102].mxu0 }
 0x1c5   : > { %v1945_v53 = vpop.eup %1944  ;;  %1387 = vst [vmem:[%s2414_s0 + $0x88] sm:$0xff] %v1943_v49  ;;  %1954 = vpow2.f32 %v1559_v38  ;;  %v1187_v54 = vadd.f32 %v1157_v52, %v929_v45  ;;  %v1846_v40 = vpop.f32.mrb[101].mxu1 }
 0x1c6   : > { %v1791_v55 = vpop.f32.mrb[103].mxu0  ;;  %v1315_v15 = vadd.f32 1.0, %v1945_v53  ;;  %v1160_v56 = vpop.f32.mrb[102].mxu1 }
 0x1c7   : > { %v1947_v8 = vpop.eup %1946  ;;  %v1219_v57 = vadd.f32 %v2394_v61, %v1187_v54  ;;  %v1847_v60 = vpop.f32.mrb[103].mxu1 }
 0x1c8   : > { %1956 = vrcp.f32 %v1315_v15  ;;  %v1316_v47 = vadd.f32 1.0, %v1947_v8 }
 0x1c9   : > { %v1560_v63 = vmul.f32 -1.442695, %v1219_v57 }
 0x1ca   : > { %v1949_v2 = vpop.eup %1948  ;;  %1958 = vrcp.f32 %v1316_v47 }
 0x1cb   : > { %1388 = vst [vmem:[%s2414_s0 + $0x90] sm:$0xff] %v1949_v2  ;;  %1960 = vpow2.f32 %v1560_v63 }
 0x1cc   : > { %v1951_v19 = vpop.eup %1950 }
 0x1cd   : > { %v1953_v13 = vpop.eup %1952  ;;  %1389 = vst [vmem:[%s2414_s0 + $0x98] sm:$0xff] %v1951_v19 }
 0x1ce   : > { %v1317_v58 = vadd.f32 1.0, %v1953_v13 }
 0x1cf   : > { %v1955_v3 = vpop.eup %1954 }
 0x1d0   : > { %1962 = vrcp.f32 %v1317_v58  ;;  %v1318_v61 = vadd.f32 1.0, %v1955_v3 }
 0x1d2   : > { %v1957_v4 = vpop.eup %1956  ;;  %1964 = vrcp.f32 %v1318_v61 }
 0x1d3   : > { %1390 = vst [vmem:[%s2414_s0 + $0xa0] sm:$0xff] %v1957_v4 }
 0x1d4   : > { %v1959_v6 = vpop.eup %1958 }
 0x1d5   : > { %v1961_v7 = vpop.eup %1960  ;;  %1391 = vst [vmem:[%s2414_s0 + $0xa8] sm:$0xff] %v1959_v6 }
 0x1d6   : > { %v1319_v62 = vadd.f32 1.0, %v1961_v7 }
 0x1d8   : > { %1966 = vrcp.f32 %v1319_v62 }
 0x1da   : > { %v1963_v10 = vpop.eup %1962 }
 0x1db   : > { %1392 = vst [vmem:[%s2414_s0 + $0xb0] sm:$0xff] %v1963_v10 }
 0x1dc   : > { %v1965_v46 = vpop.eup %1964 }
 0x1dd   : > { %1393 = vst [vmem:[%s2414_s0 + $0xb8] sm:$0xff] %v1965_v46 }
 0x1e2   : > { %v1967_v11 = vpop.eup %1966 }
 0x1e3   : > { %1394 = vst [vmem:[%s2414_s0 + $0xc0] sm:$0xff] %v1967_v11 }
 0x1e4 PF: > { %s21_s4 = sadd.s32 1, %s1988_s4  }
 0x1e5   : > { %p18_p9 = scmp.ge.s32.totalorder %s21_s4, 6  }
 0x1e7   :  { %20 = sbr.rel (!%p18_p9) target bundleno = 16 (0x10), region = 73 }

</bundles_post_ra>
